<compile_context>
chip_gen: v5e
topology: v5e:2x2
jax: 0.10.0
libtpu: 0.0.40
codegen_flags: <defaults>
</compile_context>

<pallas_src>
import functools

import jax
import jax.numpy as jnp
from jax.experimental import pallas as pl
from jax.experimental.pallas import tpu as pltpu

_EPS = 1e-5
_DIMS = [(1280, 512), (512, 256), (256, 128)]  # layers with BatchNorm; conv4 last


# --------------------------------- kernel -----------------------------------

def _head_kernel(x_ref,
                 w1_ref, b1_ref,
                 w2_ref, b2_ref,
                 w3_ref, b3_ref,
                 w4_ref, b4_ref,
                 o_ref):
    """One (1280, tn) tile of points through conv/bn/relu stack + log_softmax.

    Weights are (C_out, C_in) bf16 with BN scale folded in; biases are
    (C_out, 1) f32 with BN shift folded in.  conv4 is padded to KP=8 rows with
    pad bias -1e30 so the softmax reductions are sublane-aligned.
    """
    # Fast path: x already bf16 in HBM (no-op cast); f32 inputs still work.
    xb = x_ref[...].astype(jnp.bfloat16)                        # (1280, tn)

    # conv1 (+ folded bn1) + relu
    h = jnp.dot(w1_ref[...], xb,
                preferred_element_type=jnp.float32) + b1_ref[...]
    h = jnp.maximum(h, 0.0)                                     # (512, tn) f32

    # conv2 (+ folded bn2) + relu
    h = jnp.dot(w2_ref[...], h.astype(jnp.bfloat16),
                preferred_element_type=jnp.float32) + b2_ref[...]
    h = jnp.maximum(h, 0.0)                                     # (256, tn)

    # conv3 (+ folded bn3) + relu
    h = jnp.dot(w3_ref[...], h.astype(jnp.bfloat16),
                preferred_element_type=jnp.float32) + b3_ref[...]
    h = jnp.maximum(h, 0.0)                                     # (128, tn)

    # conv4 (padded to KP output rows; pad bias = -1e30)
    logits = jnp.dot(w4_ref[...], h.astype(jnp.bfloat16),
                     preferred_element_type=jnp.float32) + b4_ref[...]  # (KP, tn)

    # log_softmax over class axis (sublanes); pad rows vanish via exp(-1e30)=0.
    m = jnp.max(logits, axis=0, keepdims=True)
    z = logits - m
    lse = jnp.log(jnp.sum(jnp.exp(z), axis=0, keepdims=True))
    o_ref[...] = z - lse                                        # (KP, tn), lane-dense


# --------------------------------- wrapper -----------------------------------

def _physical_vmem_bytes():
    try:
        return int(pltpu.get_tpu_info().vmem_capacity_bytes)
    except Exception:
        return 64 * 1024 * 1024  # conservative (v7x per-TensorCore)


def _choose_tile(n, vmem_bytes):
    """Pick a lane-dense point tile; pad N when no candidate divides it."""
    big_vmem = vmem_bytes >= 96 * 1024 * 1024          # v5e / v6e (128 MiB)
    candidates = (2048, 1024, 512) if big_vmem else (1024, 512)
    for c in candidates:
        if n % c == 0:
            return c, n
    if n < 512:
        # Tiny inputs: full extent (allowed by the (8,128) rule). Correctness
        # path only -- not representative of the performance configuration.
        return n, n
    tn = 512
    n_pad = ((n + tn - 1) // tn) * tn
    return tn, n_pad


def global_tirnn_forward(x_ncw, fused_params, *, k):
    """x_ncw: (B, 1280, N) bf16 (preferred) or f32.  Returns (B, N, k) f32."""
    B, C_in, N = x_ncw.shape
    assert C_in == 1280

    (w1, b1, w2, b2, w3, b3, w4, b4) = fused_params
    KP = w4.shape[0]                                   # padded class rows (8)
    assert k <= KP

    vmem_phys = _physical_vmem_bytes()
    tn, n_pad = _choose_tile(N, vmem_phys)
    if n_pad != N:
        x_ncw = jnp.pad(x_ncw, ((0, 0), (0, 0), (0, n_pad - N)))

    grid = (B, n_pad // tn)
    # Note: both TensorCores on v7x are fed when B * (n_pad // tn) >= 2.

    # Constant operands: single-buffered (index map never changes -> one DMA,
    # no wasted second VMEM buffer).
    def const(shape):
        return pl.BlockSpec(shape, lambda b, j: (0, 0),
                            pipeline_mode=pl.Buffered(1))

    flops = 2 * B * n_pad * (1280 * 512 + 512 * 256 + 256 * 128 + 128 * KP)
    bytes_accessed = (
        x_ncw.size * x_ncw.dtype.itemsize
        + sum(p.size * p.dtype.itemsize for p in fused_params)
        + B * KP * n_pad * 4)
    cost = pl.CostEstimate(flops=flops,
                           transcendentals=B * n_pad * (KP + 1),
                           bytes_accessed=bytes_accessed)

    # 96 MiB on 128-MiB-VMEM chips (v5e/v6e), 40 MiB on 64-MiB v7x / fallback.
    vmem_limit = (96 * 1024 * 1024 if vmem_phys >= 96 * 1024 * 1024
                  else 40 * 1024 * 1024)

    out_kn = pl.pallas_call(
        _head_kernel,
        out_shape=jax.ShapeDtypeStruct((B, KP, n_pad), jnp.float32),
        grid_spec=pltpu.PrefetchScalarGridSpec(
            num_scalar_prefetch=0,
            grid=grid,
            in_specs=[
                pl.BlockSpec((None, 1280, tn), lambda b, j: (b, 0, j)),  # x tile
                const((512, 1280)), const((512, 1)),
                const((256, 512)), const((256, 1)),
                const((128, 256)), const((128, 1)),
                const((KP, 128)), const((KP, 1)),
            ],
            out_specs=pl.BlockSpec((None, KP, tn), lambda b, j: (b, 0, j)),
        ),
        compiler_params=pltpu.CompilerParams(
            dimension_semantics=("parallel", "parallel"),
            vmem_limit_bytes=vmem_limit,
        ),
        cost_estimate=cost,
    )(x_ncw, w1, b1, w2, b2, w3, b3, w4, b4)

    # Tiny epilogue: drop padded class rows / padded points, NCW -> NWC.
    return jnp.transpose(out_kn, (0, 2, 1))[:, :N, :k]


# ----------------------------- parameter helpers -----------------------------

def make_raw_params(key, k):
    """Deterministic synthetic parameters mirroring the module's __init__ shapes.

    Conv weights stored as (C_out, C_in) (Conv1d weight with kernel dim squeezed).
    """
    layers = []
    keys = jax.random.split(key, 32)
    ki = 0
    for (cin, cout) in _DIMS:
        w = jax.random.normal(keys[ki], (cout, cin), jnp.float32) * 0.02; ki += 1
        b = jax.random.normal(keys[ki], (cout,), jnp.float32) * 0.01; ki += 1
        gamma = 1.0 + 0.1 * jax.random.normal(keys[ki], (cout,), jnp.float32); ki += 1
        beta = 0.1 * jax.random.normal(keys[ki], (cout,), jnp.float32); ki += 1
        mean = 0.05 * jax.random.normal(keys[ki], (cout,), jnp.float32); ki += 1
        var = 1.0 + 0.1 * jnp.abs(jax.random.normal(keys[ki], (cout,), jnp.float32)); ki += 1
        layers.append((w, b, gamma, beta, mean, var))
    # conv4: 128 -> k, no BN
    w4 = jax.random.normal(keys[ki], (k, 128), jnp.float32) * 0.02; ki += 1
    b4 = jax.random.normal(keys[ki], (k,), jnp.float32) * 0.01; ki += 1
    layers.append((w4, b4))
    return layers


def fuse_params(raw_layers):
    """Fold conv bias + eval-mode BN into bf16 weights / f32 (C_out,1) biases."""
    fused = []
    for i, layer in enumerate(raw_layers):
        if i < 3:
            w, b, gamma, beta, mean, var = layer
            s = gamma / jnp.sqrt(var + _EPS)            # (C_out,)
            t = beta - mean * s
            wf = (w * s[:, None]).astype(jnp.bfloat16)  # (C_out, C_in) bf16
            bf = ((b * s + t)[:, None]).astype(jnp.float32)
        else:
            w, b = layer
            kk = w.shape[0]
            kp = max(8, ((kk + 7) // 8) * 8)
            wf = jnp.zeros((kp, w.shape[1]), jnp.float32).at[:kk].set(w)
            wf = wf.astype(jnp.bfloat16)
            bf = jnp.full((kp, 1), -1e30, jnp.float32).at[:kk, 0].set(b)
        fused.extend([wf, bf])
    return tuple(fused)


def _reference(x_ncw, raw_layers, k):
    """Pure-JAX f32 reference matching the PyTorch forward (eval-mode BN)."""
    h = x_ncw                                           # (B, C, N) f32
    for i, layer in enumerate(raw_layers):
        if i < 3:
            w, b, gamma, beta, mean, var = layer
            h = jnp.einsum('oc,bcn->bon', w, h) + b[None, :, None]
            s = gamma / jnp.sqrt(var + _EPS)
            t = beta - mean * s
            h = h * s[None, :, None] + t[None, :, None]
            h = jnp.maximum(h, 0.0)
        else:
            w, b = layer
            h = jnp.einsum('oc,bcn->bon', w, h) + b[None, :, None]
    logits = jnp.transpose(h, (0, 2, 1))                # (B, N, k)
    return jax.nn.log_softmax(logits, axis=-1)


# ----------------------------------- main ------------------------------------

if __name__ == "__main__":
    k = 6
    B, C_in, N = 2, 1280, 16   # small shapes consistent with the module's forward

    key = jax.random.PRNGKey(0)
    kx, kp = jax.random.split(key)

    # Fast path: upstream producer emits x as bf16 in HBM (no standalone
    # f32->bf16 cast op added in the wrapper).
    x_bf16 = jax.random.normal(kx, (B, C_in, N), jnp.float32).astype(jnp.bfloat16)
    x_f32 = x_bf16.astype(jnp.float32)      # same values, for the f32 path / ref

    raw = make_raw_params(kp, k)
    fused = fuse_params(raw)

    fwd = jax.jit(functools.partial(global_tirnn_forward, k=k))

    out = jax.block_until_ready(fwd(x_bf16, fused))
    ref = _reference(x_f32, raw, k)
    assert out.shape == (B, N, k)
    max_err = float(jnp.max(jnp.abs(out - ref)))
    # bf16 MXU matmuls + bf16 x -> looser tolerance than pure-f32
    assert jnp.allclose(out, ref, atol=2e-2, rtol=2e-2), f"max_err={max_err}"

    # f32-input fallback path (kernel casts to bf16 internally) still works.
    out_f32 = jax.block_until_ready(fwd(x_f32, fused))
    assert jnp.allclose(out_f32, ref, atol=2e-2, rtol=2e-2)

    print("KERNEL_OK")
</pallas_src>

<mosaic_0001>
module attributes {stable_mosaic.version = 11 : i64} {
  func.func @_head_kernel(%arg0: i32, %arg1: i32, %arg2: memref<1x1280x16xbf16, #tpu.memory_space<vmem>>, %arg3: memref<512x1280xbf16, #tpu.memory_space<vmem>>, %arg4: memref<512x1xf32, #tpu.memory_space<vmem>>, %arg5: memref<256x512xbf16, #tpu.memory_space<vmem>>, %arg6: memref<256x1xf32, #tpu.memory_space<vmem>>, %arg7: memref<128x256xbf16, #tpu.memory_space<vmem>>, %arg8: memref<128x1xf32, #tpu.memory_space<vmem>>, %arg9: memref<8x128xbf16, #tpu.memory_space<vmem>>, %arg10: memref<8x1xf32, #tpu.memory_space<vmem>>, %arg11: memref<1x8x16xf32, #tpu.memory_space<vmem>>) attributes {dimension_semantics = [#tpu.dimension_semantics<parallel>, #tpu.dimension_semantics<parallel>], iteration_bounds = array<i64: 2, 1>, scalar_prefetch = 0 : i64, scratch_operands = 0 : i64, tpu.core_type = #tpu.core_type<tc>, window_params = [{transform_indices = @transform_0, window_bounds = array<i64: 1, 1280, 16>}, {pipeline_mode = #tpu.pipeline_mode<synchronous>, transform_indices = @transform_1, window_bounds = array<i64: 512, 1280>}, {pipeline_mode = #tpu.pipeline_mode<synchronous>, transform_indices = @transform_2, window_bounds = array<i64: 512, 1>}, {pipeline_mode = #tpu.pipeline_mode<synchronous>, transform_indices = @transform_3, window_bounds = array<i64: 256, 512>}, {pipeline_mode = #tpu.pipeline_mode<synchronous>, transform_indices = @transform_4, window_bounds = array<i64: 256, 1>}, {pipeline_mode = #tpu.pipeline_mode<synchronous>, transform_indices = @transform_5, window_bounds = array<i64: 128, 256>}, {pipeline_mode = #tpu.pipeline_mode<synchronous>, transform_indices = @transform_6, window_bounds = array<i64: 128, 1>}, {pipeline_mode = #tpu.pipeline_mode<synchronous>, transform_indices = @transform_7, window_bounds = array<i64: 8, 128>}, {pipeline_mode = #tpu.pipeline_mode<synchronous>, transform_indices = @transform_8, window_bounds = array<i64: 8, 1>}, {transform_indices = @transform_9, window_bounds = array<i64: 1, 8, 16>}]} {
    %c0 = arith.constant 0 : index
    %c0_0 = arith.constant 0 : index
    %c0_1 = arith.constant 0 : index
    %0 = vector.load %arg2[%c0, %c0_0, %c0_1] : memref<1x1280x16xbf16, #tpu.memory_space<vmem>>, vector<1x1280x16xbf16>
    %1 = vector.shape_cast %0 : vector<1x1280x16xbf16> to vector<1280x16xbf16>
    %c0_2 = arith.constant 0 : index
    %c0_3 = arith.constant 0 : index
    %2 = vector.load %arg3[%c0_2, %c0_3] : memref<512x1280xbf16, #tpu.memory_space<vmem>>, vector<512x1280xbf16>
    %cst = arith.constant dense<0.000000e+00> : vector<512x16xf32>
    %3 = tpu.matmul %2, %1, %cst {dimension_numbers = #tpu.dot_dimension_numbers<[1], [0], [0], [1], [0, 0, 1, 1], [], []>} : vector<512x1280xbf16>, vector<1280x16xbf16>, vector<512x16xf32> -> vector<512x16xf32>
    %c0_4 = arith.constant 0 : index
    %c0_5 = arith.constant 0 : index
    %4 = vector.load %arg4[%c0_4, %c0_5] : memref<512x1xf32, #tpu.memory_space<vmem>>, vector<512x1xf32>
    %5 = vector.broadcast %4 : vector<512x1xf32> to vector<512x16xf32>
    %6 = arith.addf %3, %5 : vector<512x16xf32>
    %cst_6 = arith.constant 0.000000e+00 : f32
    %7 = vector.broadcast %cst_6 : f32 to vector<512x16xf32>
    %8 = arith.maximumf %6, %7 : vector<512x16xf32>
    %c0_7 = arith.constant 0 : index
    %c0_8 = arith.constant 0 : index
    %9 = vector.load %arg5[%c0_7, %c0_8] : memref<256x512xbf16, #tpu.memory_space<vmem>>, vector<256x512xbf16>
    %10 = arith.truncf %8 : vector<512x16xf32> to vector<512x16xbf16>
    %cst_9 = arith.constant dense<0.000000e+00> : vector<256x16xf32>
    %11 = tpu.matmul %9, %10, %cst_9 {dimension_numbers = #tpu.dot_dimension_numbers<[1], [0], [0], [1], [0, 0, 1, 1], [], []>} : vector<256x512xbf16>, vector<512x16xbf16>, vector<256x16xf32> -> vector<256x16xf32>
    %c0_10 = arith.constant 0 : index
    %c0_11 = arith.constant 0 : index
    %12 = vector.load %arg6[%c0_10, %c0_11] : memref<256x1xf32, #tpu.memory_space<vmem>>, vector<256x1xf32>
    %13 = vector.broadcast %12 : vector<256x1xf32> to vector<256x16xf32>
    %14 = arith.addf %11, %13 : vector<256x16xf32>
    %cst_12 = arith.constant 0.000000e+00 : f32
    %15 = vector.broadcast %cst_12 : f32 to vector<256x16xf32>
    %16 = arith.maximumf %14, %15 : vector<256x16xf32>
    %c0_13 = arith.constant 0 : index
    %c0_14 = arith.constant 0 : index
    %17 = vector.load %arg7[%c0_13, %c0_14] : memref<128x256xbf16, #tpu.memory_space<vmem>>, vector<128x256xbf16>
    %18 = arith.truncf %16 : vector<256x16xf32> to vector<256x16xbf16>
    %cst_15 = arith.constant dense<0.000000e+00> : vector<128x16xf32>
    %19 = tpu.matmul %17, %18, %cst_15 {dimension_numbers = #tpu.dot_dimension_numbers<[1], [0], [0], [1], [0, 0, 1, 1], [], []>} : vector<128x256xbf16>, vector<256x16xbf16>, vector<128x16xf32> -> vector<128x16xf32>
    %c0_16 = arith.constant 0 : index
    %c0_17 = arith.constant 0 : index
    %20 = vector.load %arg8[%c0_16, %c0_17] : memref<128x1xf32, #tpu.memory_space<vmem>>, vector<128x1xf32>
    %21 = vector.broadcast %20 : vector<128x1xf32> to vector<128x16xf32>
    %22 = arith.addf %19, %21 : vector<128x16xf32>
    %cst_18 = arith.constant 0.000000e+00 : f32
    %23 = vector.broadcast %cst_18 : f32 to vector<128x16xf32>
    %24 = arith.maximumf %22, %23 : vector<128x16xf32>
    %c0_19 = arith.constant 0 : index
    %c0_20 = arith.constant 0 : index
    %25 = vector.load %arg9[%c0_19, %c0_20] : memref<8x128xbf16, #tpu.memory_space<vmem>>, vector<8x128xbf16>
    %26 = arith.truncf %24 : vector<128x16xf32> to vector<128x16xbf16>
    %cst_21 = arith.constant dense<0.000000e+00> : vector<8x16xf32>
    %27 = tpu.matmul %25, %26, %cst_21 {dimension_numbers = #tpu.dot_dimension_numbers<[1], [0], [0], [1], [0, 0, 1, 1], [], []>} : vector<8x128xbf16>, vector<128x16xbf16>, vector<8x16xf32> -> vector<8x16xf32>
    %c0_22 = arith.constant 0 : index
    %c0_23 = arith.constant 0 : index
    %28 = vector.load %arg10[%c0_22, %c0_23] : memref<8x1xf32, #tpu.memory_space<vmem>>, vector<8x1xf32>
    %29 = vector.broadcast %28 : vector<8x1xf32> to vector<8x16xf32>
    %30 = arith.addf %27, %29 : vector<8x16xf32>
    %cst_24 = arith.constant dense<0xFF800000> : vector<16xf32>
    %31 = vector.multi_reduction <maximumf>, %30, %cst_24 [0] : vector<8x16xf32> to vector<16xf32>
    %32 = vector.shape_cast %31 : vector<16xf32> to vector<1x16xf32>
    %33 = vector.broadcast %32 : vector<1x16xf32> to vector<8x16xf32>
    %34 = arith.subf %30, %33 : vector<8x16xf32>
    %35 = math.exp %34 : vector<8x16xf32>
    %cst_25 = arith.constant dense<0.000000e+00> : vector<16xf32>
    %36 = vector.multi_reduction <add>, %35, %cst_25 [0] : vector<8x16xf32> to vector<16xf32>
    %37 = vector.shape_cast %36 : vector<16xf32> to vector<1x16xf32>
    %38 = math.log %37 : vector<1x16xf32>
    %39 = vector.broadcast %38 : vector<1x16xf32> to vector<8x16xf32>
    %40 = arith.subf %34, %39 : vector<8x16xf32>
    %c0_26 = arith.constant 0 : index
    %c0_27 = arith.constant 0 : index
    %c0_28 = arith.constant 0 : index
    %41 = vector.load %arg11[%c0_26, %c0_27, %c0_28] : memref<1x8x16xf32, #tpu.memory_space<vmem>>, vector<1x8x16xf32>
    %42 = vector.shape_cast %41 : vector<1x8x16xf32> to vector<8x16xf32>
    %43 = vector.shape_cast %40 : vector<8x16xf32> to vector<1x8x16xf32>
    tpu.vector_store %arg11[%c0_26, %c0_27, %c0_28], %43 {strides = array<i32>} : memref<1x8x16xf32, #tpu.memory_space<vmem>>, vector<1x8x16xf32>,
    return
  }
  func.func @transform_0(%arg0: i32, %arg1: i32) -> (i32, i32, i32) {
    %c0_i32 = arith.constant 0 : i32
    %c0_i32_0 = arith.constant 0 : i32
    return %arg0, %c0_i32, %arg1 : i32, i32, i32
  }
  func.func @transform_1(%arg0: i32, %arg1: i32) -> (i32, i32) {
    %c0_i32 = arith.constant 0 : i32
    %c0_i32_0 = arith.constant 0 : i32
    %c0_i32_1 = arith.constant 0 : i32
    return %c0_i32, %c0_i32_0 : i32, i32
  }
  func.func @transform_2(%arg0: i32, %arg1: i32) -> (i32, i32) {
    %c0_i32 = arith.constant 0 : i32
    %c0_i32_0 = arith.constant 0 : i32
    %c0_i32_1 = arith.constant 0 : i32
    return %c0_i32, %c0_i32_0 : i32, i32
  }
  func.func @transform_3(%arg0: i32, %arg1: i32) -> (i32, i32) {
    %c0_i32 = arith.constant 0 : i32
    %c0_i32_0 = arith.constant 0 : i32
    %c0_i32_1 = arith.constant 0 : i32
    return %c0_i32, %c0_i32_0 : i32, i32
  }
  func.func @transform_4(%arg0: i32, %arg1: i32) -> (i32, i32) {
    %c0_i32 = arith.constant 0 : i32
    %c0_i32_0 = arith.constant 0 : i32
    %c0_i32_1 = arith.constant 0 : i32
    return %c0_i32, %c0_i32_0 : i32, i32
  }
  func.func @transform_5(%arg0: i32, %arg1: i32) -> (i32, i32) {
    %c0_i32 = arith.constant 0 : i32
    %c0_i32_0 = arith.constant 0 : i32
    %c0_i32_1 = arith.constant 0 : i32
    return %c0_i32, %c0_i32_0 : i32, i32
  }
  func.func @transform_6(%arg0: i32, %arg1: i32) -> (i32, i32) {
    %c0_i32 = arith.constant 0 : i32
    %c0_i32_0 = arith.constant 0 : i32
    %c0_i32_1 = arith.constant 0 : i32
    return %c0_i32, %c0_i32_0 : i32, i32
  }
  func.func @transform_7(%arg0: i32, %arg1: i32) -> (i32, i32) {
    %c0_i32 = arith.constant 0 : i32
    %c0_i32_0 = arith.constant 0 : i32
    %c0_i32_1 = arith.constant 0 : i32
    return %c0_i32, %c0_i32_0 : i32, i32
  }
  func.func @transform_8(%arg0: i32, %arg1: i32) -> (i32, i32) {
    %c0_i32 = arith.constant 0 : i32
    %c0_i32_0 = arith.constant 0 : i32
    %c0_i32_1 = arith.constant 0 : i32
    return %c0_i32, %c0_i32_0 : i32, i32
  }
  func.func @transform_9(%arg0: i32, %arg1: i32) -> (i32, i32, i32) {
    %c0_i32 = arith.constant 0 : i32
    %c0_i32_0 = arith.constant 0 : i32
    return %arg0, %c0_i32, %arg1 : i32, i32, i32
  }
}

</mosaic_0001>

<bundles_post_ra>
// kernel: global_tirnn_forward.1
= control target key start
LH: loop header
LB: loop body
LE: loop exit
PB: predicated region body
PF: predicated region fallthrough
CT: control target
= control target key end

     0   :  { %14 = vsyncpa [#allocation3], 0  ;;  %s11589_s0 = inlined_call_operand.vmem [shape: bf16[2,1280,16], index: 0, kind: input, shape index: {}]   ;;  %s11590_s1 = inlined_call_operand.hbm [shape: bf16[512,1280], index: 1, kind: input, shape index: {}]   ;;  %s11591_s2 = inlined_call_operand.vmem [shape: f32[512,1], index: 2, kind: input, shape index: {}]   ;;  %s11592_s3 = inlined_call_operand.vmem [shape: bf16[256,512], index: 3, kind: input, shape index: {}]   ;;  %s11593_s4 = inlined_call_operand.vmem [shape: f32[256,1], index: 4, kind: input, shape index: {}]   ;;  %s11594_s5 = inlined_call_operand.hbm [shape: bf16[128,256], index: 5, kind: input, shape index: {}]   ;;  %s11595_s6 = inlined_call_operand.vmem [shape: f32[128,1], index: 6, kind: input, shape index: {}]   ;;  %s11596_s7 = inlined_call_operand.hbm [shape: bf16[8,128], index: 7, kind: input, shape index: {}]   ;;  %s11597_s8 = inlined_call_operand.vmem [shape: f32[8,1], index: 8, kind: input, shape index: {}]   ;;  %s11598_s9 = inlined_call_operand.vmem [shape: f32[2,8,16], index: 9, kind: output, shape index: {}]  }
   0x1   :  { %15 = vsyncpa [#allocation5], 0  ;;  %s9264_s30 = smov 0   ;;  %s9266_s10 = smov 0  }
   0x2   :  { %s9268_s11 = smov 0  }
   0x3 LB: > { %s296_s14 = sshll.u32 %s11594_s5, 4  ;;  %s6585_s15 = sadd.s32 4294967295, %s9204_s11   ;;  %s9204_s11 = sphi %s9268_s11, %s21_s11   ;;  %s9200_s10 = sphi %s9266_s10, %s11801_s10   ;;  %s9196_s30 = sphi %s9264_s30, %s11800_s30   ;;  %s297_s14 = int_to_ptr.hbm [resolvable:$true] %s296_s14 }
   0x4   : > { %p6587_p0 = scmp.ge.s32.totalorder %s9204_s11, 1  ;;  %p262_p1 = scmp.lt.s32.totalorder %s9204_s11, 3 }
   0x5   : > { %p9285_p2 = scmp.eq.s32.totalorder %s6585_s15, 0  ;;  %s9206_s18 = smov [#allocation4]  }
   0x6   : > { %p9289_p3 = pnand %p6587_p0, %p262_p1  ;;  %s298_s19 = sshll.u32 %s9206_s18, 4  ;;  %s299_s19 = int_to_ptr.vmem [resolvable:$true] %s298_s19 }
   0x7   : > { %s33_s21 = sadd.s32 1, %s9200_s10  ;;  %s9207_s22 = smov 128  }
   0x8   : > { %p9029_p4 = pneg %p9289_p3  ;;  %p35_p6 = scmp.ge.s32.totalorder %s33_s21, 2 }
   0x9   : > { %s9208_s23 = smov 8   ;;  %s273_s26 = sshll.u32 %s11590_s1, 4  ;;  %s274_s26 = int_to_ptr.hbm [resolvable:$true] %s273_s26 }
   0xa   : > { %p9297_p5 = pnand %p9285_p2, %p9029_p4  ;;  %s11803_s21 = smov (%p35_p6, %s33_s21), 0 }
   0xb   : > { %s9209_s27 = smov [#allocation2]   ;;  %s314_s13 = sshll.u32 %s11596_s7, 4  ;;  %s315_s13 = int_to_ptr.hbm [resolvable:$true] %s314_s13 }
   0xc   : > { %9035 = dma.hbm_to_vmem [thread:$0]  (!%p9297_p5), %s297_s14, 2048, %s299_s19, [#allocation5], %s9207_s22, %s9207_s22, %s9208_s23  }
   0xd   : > { %s275_s28 = sshll.u32 %s9209_s27, 4  ;;  %s9210_s15 = smov 640   ;;  %s276_s28 = int_to_ptr.vmem [resolvable:$true] %s275_s28 }
   0xe   : > { %s9211_s18 = smov 40   ;;  %s9212_s14 = smov [#allocation6]  }
   0xf   : > { %9032 = dma.hbm_to_vmem [thread:$0]  (!%p9297_p5), %s274_s26, 40960, %s276_s28, [#allocation3], %s9210_s15, %s9210_s15, %s9211_s18  }
  0x10   : > { %s316_s19 = sshll.u32 %s9212_s14, 4  ;;  %343 = sbr.rel (%p9289_p3) target bundleno = 2590 (0xa1e), region = 56  ;;  %s317_s19 = int_to_ptr.vmem [resolvable:$true] %s316_s19 }
  0x11   : > { %9038 = dma.hbm_to_vmem [thread:$0]  (!%p9297_p5), %s315_s13, 64, %s317_s19, [#allocation5]  }
  0x15   : > { %9187 = dma.done.wait (%p9285_p2), [#allocation3], 40960  }
  0x16   : > { %9189 = vsyncadd (%p9285_p2), [#allocation3], 4294926336 }
  0x17   : > { %9191 = dma.done.wait (%p9285_p2), [#allocation5], 2112  }
  0x18   : > { %9193 = vsyncadd (%p9285_p2), [#allocation5], 4294965184  ;;  %p395_p7 = scmp.lt.s32.totalorder %s9196_s30, 1  ;;  %v9213_v0 = vmov 0   ;;  %v920_v1 = vld [vmem:[%s11591_s2 + $0xf0] sm:$0xff]  ;;  %v902_v5 = vld [vmem:[%s11591_s2 + $0x60] sm:$0xff] }
  0x19   : > { %9078 = vset.pattern.permute.xlu1 %v9213_v0  ;;  %9077 = vset.pattern.permute.xlu0 %v9213_v0  ;;  %v904_v2 = vld [vmem:[%s11591_s2 + $0x70] sm:$0xff]  ;;  %v921_v8 = vld [vmem:[%s11591_s2 + $0xf8] sm:$0xff]  ;;  %v903_v12 = vld [vmem:[%s11591_s2 + $0x68] sm:$0xff]  ;;  %vm6454_vm0 = vcmask 130048  }
  0x1a   : > { %s11805_s30 = smov (!%p395_p7, %s9196_s30), 1  ;;  %9079 = vset.pattern.permute.xlu2 %v9213_v0  ;;  %1106 = vperm.xlu1 %9078, %v920_v1   ;;  %v905_v9 = vld [vmem:[%s11591_s2 + $0x78] sm:$0xff]  ;;  %v919_v15 = vld [vmem:[%s11591_s2 + $0xe8] sm:$0xff]  ;;  %v918_v16 = vld [vmem:[%s11591_s2 + $0xe0] sm:$0xff] }
  0x1b   : > { %s9016_s17 = smul.u32 640, %s11805_s30  ;;  %1026 = vperm.xlu0 %9077, %v904_v2   ;;  %1016 = vperm.xlu2 %9079, %v902_v5   ;;  %v900_v19 = vld [vmem:[%s11591_s2 + $0x50] sm:$0xff]  ;;  %v901_v23 = vld [vmem:[%s11591_s2 + $0x58] sm:$0xff]  ;;  %v6600_v29 = vld [vmem:[#allocation2] sm:$0xf] }
  0x1c   : > { %v916_v22 = vld [vmem:[%s11591_s2 + $0xd0] sm:$0xff]  ;;  %v917_v26 = vld [vmem:[%s11591_s2 + $0xd8] sm:$0xff]  ;;  %v8605_v30 = vld [vmem:[#allocation2 + $0x24] sm:$0xf0] }
  0x1d   : > { %s9334_s23 = scalar_lea.vmem %s11589_s0, %s9016_s17  ;;  %v8600_v31 = vld [vmem:[#allocation2 + $0x4] sm:$0xf]  ;;  %v6602_v32 = vld [vmem:[#allocation2 + $0x28] sm:$0xf0]  ;;  %v8890_v33 = vld [vmem:[#allocation2 + $0x914] sm:$0xf]  ;;  %v6601_v40 = vor.u32 %v8605_v30, %v6600_v29 }
  0x1e   : > { %v8527_v3 = vld [vmem:[%s9334_s23 + $0x38] sm:$0xff]  ;;  %v8526_v6 = vld [vmem:[%s9334_s23 + $0x30] sm:$0xff]  ;;  %v8525_v10 = vld [vmem:[%s9334_s23 + $0x28] sm:$0xff]  ;;  %v6605_v41 = vor.u32 %v8600_v31, %v6602_v32  ;;  %s6597_s17 = sshll.u32 %s11805_s30, 3 }
  0x1f   : > { %v8535_v4 = vld [vmem:[%s9334_s23 + $0x78] sm:$0xff]  ;;  %3354 = vmatpush.bf16.msra.mxu0 %v8527_v3  ;;  %v8534_v7 = vld [vmem:[%s9334_s23 + $0x70] sm:$0xff]  ;;  %9000 = vmatpush.bf16.msra.mxu3 %v8527_v3  ;;  %v8533_v11 = vld [vmem:[%s9334_s23 + $0x68] sm:$0xff] }
  0x20   : > { %3523 = vmatpush.bf16.msra.mxu1 %v8535_v4  ;;  %9008 = vmatpush.bf16.msra.mxu2 %v8535_v4  ;;  %v8524_v13 = vld [vmem:[%s9334_s23 + $0x20] sm:$0xff]  ;;  %v8523_v17 = vld [vmem:[%s9334_s23 + $0x18] sm:$0xff]  ;;  %v8522_v20 = vld [vmem:[%s9334_s23 + $0x10] sm:$0xff] }
  0x21   : > { %v8532_v14 = vld [vmem:[%s9334_s23 + $0x60] sm:$0xff]  ;;  %v8531_v18 = vld [vmem:[%s9334_s23 + $0x58] sm:$0xff]  ;;  %v8530_v21 = vld [vmem:[%s9334_s23 + $0x50] sm:$0xff] }
  0x22   : > { %1111 = vperm.xlu1 %9078, %v921_v8   ;;  %v8521_v24 = vld [vmem:[%s9334_s23 + $0x8] sm:$0xff]  ;;  %v8520_v27 = vld [vmem:[%s9334_s23] sm:$0xff]  ;;  %v7762_v34 = vld [vmem:[#allocation2 + $0x938] sm:$0xf0] }
  0x23   : > { %3355 = vmatpush.bf16.msra.mxu0 %v8526_v6  ;;  %9001 = vmatpush.bf16.msra.mxu3 %v8526_v6  ;;  %v8529_v25 = vld [vmem:[%s9334_s23 + $0x48] sm:$0xff]  ;;  %v8528_v28 = vld [vmem:[%s9334_s23 + $0x40] sm:$0xff]  ;;  %v7760_v35 = vld [vmem:[#allocation2 + $0x910] sm:$0xf]  ;;  %v7765_v42 = vor.u32 %v8890_v33, %v7762_v34 }
  0x24   : > { %3524 = vmatpush.bf16.msra.mxu1 %v8534_v7  ;;  %9009 = vmatpush.bf16.msra.mxu2 %v8534_v7  ;;  %v8895_v36 = vld [vmem:[#allocation2 + $0x934] sm:$0xf0]  ;;  %v899_v38 = vld [vmem:[%s11591_s2 + $0x48] sm:$0xff]  ;;  %v898_v39 = vld [vmem:[%s11591_s2 + $0x40] sm:$0xff] }
  0x25   : > { %1031 = vperm.xlu0 %9077, %v905_v9   ;;  %1021 = vperm.xlu2 %9079, %v903_v12   ;;  %v8543_v37 = vld [vmem:[%s9334_s23 + $0xb8] sm:$0xff]  ;;  %v7761_v43 = vor.u32 %v8895_v36, %v7760_v35  ;;  %v914_v45 = vld [vmem:[%s11591_s2 + $0xc0] sm:$0xff]  ;;  %v8542_v46 = vld [vmem:[%s9334_s23 + $0xb0] sm:$0xff] }
  0x26   : > { %v8551_v44 = vld [vmem:[%s9334_s23 + $0xf8] sm:$0xff]  ;;  %v8550_v47 = vld [vmem:[%s9334_s23 + $0xf0] sm:$0xff]  ;;  %v915_v48 = vld [vmem:[%s11591_s2 + $0xc8] sm:$0xff] }
  0x27   : > { %3356 = vmatpush.bf16.msra.mxu0 %v8525_v10  ;;  %9002 = vmatpush.bf16.msra.mxu3 %v8525_v10  ;;  %v896_v49 = vld [vmem:[%s11591_s2 + $0x30] sm:$0xff]  ;;  %v8541_v50 = vld [vmem:[%s9334_s23 + $0xa8] sm:$0xff]  ;;  %v897_v52 = vld [vmem:[%s11591_s2 + $0x38] sm:$0xff] }
  0x28   : > { %3525 = vmatpush.bf16.msra.mxu1 %v8533_v11  ;;  %9010 = vmatpush.bf16.msra.mxu2 %v8533_v11  ;;  %v8549_v51 = vld [vmem:[%s9334_s23 + $0xe8] sm:$0xff]  ;;  %v6640_v53 = vld [vmem:[#allocation2 + $0x50] sm:$0xf]  ;;  %v8615_v54 = vld [vmem:[#allocation2 + $0x74] sm:$0xf0] }
  0x29   : > { %v8610_v55 = vld [vmem:[#allocation2 + $0x54] sm:$0xf]  ;;  %v8540_v56 = vld [vmem:[%s9334_s23 + $0xa0] sm:$0xff]  ;;  %v6642_v57 = vld [vmem:[#allocation2 + $0x78] sm:$0xf0]  ;;  %v6641_v1 = vor.u32 %v8615_v54, %v6640_v53 }
  0x2a   : > { %1101 = vperm.xlu1 %9078, %v919_v15   ;;  %v8900_v58 = vld [vmem:[#allocation2 + $0x964] sm:$0xf]  ;;  %v7802_v59 = vld [vmem:[#allocation2 + $0x988] sm:$0xf0]  ;;  %v7800_v60 = vld [vmem:[#allocation2 + $0x960] sm:$0xf]  ;;  %v6645_v2 = vor.u32 %v8610_v55, %v6642_v57 }
  0x2b   : > { %3357 = vmatpush.bf16.msra.mxu0 %v8524_v13  ;;  %9003 = vmatpush.bf16.msra.mxu3 %v8524_v13  ;;  %v8905_v61 = vld [vmem:[#allocation2 + $0x984] sm:$0xf0]  ;;  %v8548_v62 = vld [vmem:[%s9334_s23 + $0xe0] sm:$0xff]  ;;  %v912_v63 = vld [vmem:[%s11591_s2 + $0xb0] sm:$0xff]  ;;  %v7805_v3 = vor.u32 %v8900_v58, %v7802_v59 }
  0x2c   : > { %3526 = vmatpush.bf16.msra.mxu1 %v8532_v14  ;;  %9011 = vmatpush.bf16.msra.mxu2 %v8532_v14  ;;  %v913_v0 = vld [vmem:[%s11591_s2 + $0xb8] sm:$0xff]  ;;  %v7801_v4 = vor.u32 %v8905_v61, %v7800_v60  ;;  %v894_v6 = vld [vmem:[%s11591_s2 + $0x20] sm:$0xff]  ;;  %v8538_v8 = vld [vmem:[%s9334_s23 + $0x90] sm:$0xff] }
  0x2d   : > { %1096 = vperm.xlu0 %9077, %v918_v16   ;;  %1006 = vperm.xlu2 %9079, %v900_v19   ;;  %v8539_v5 = vld [vmem:[%s9334_s23 + $0x98] sm:$0xff]  ;;  %v910_v9 = vld [vmem:[%s11591_s2 + $0xa0] sm:$0xff]  ;;  %v895_v10 = vld [vmem:[%s11591_s2 + $0x28] sm:$0xff] }
  0x2e   : > { %v8547_v7 = vld [vmem:[%s9334_s23 + $0xd8] sm:$0xff]  ;;  %v8546_v11 = vld [vmem:[%s9334_s23 + $0xd0] sm:$0xff]  ;;  %v8537_v12 = vld [vmem:[%s9334_s23 + $0x88] sm:$0xff] }
  0x2f   : > { %3358 = vmatpush.bf16.msra.mxu0 %v8523_v17  ;;  %9004 = vmatpush.bf16.msra.mxu3 %v8523_v17  ;;  %v911_v13 = vld [vmem:[%s11591_s2 + $0xa8] sm:$0xff]  ;;  %v6680_v14 = vld [vmem:[#allocation2 + $0xa0] sm:$0xf]  ;;  %v8620_v16 = vld [vmem:[#allocation2 + $0xa4] sm:$0xf] }
  0x30   : > { %3527 = vmatpush.bf16.msra.mxu1 %v8531_v18  ;;  %9012 = vmatpush.bf16.msra.mxu2 %v8531_v18  ;;  %v8625_v15 = vld [vmem:[#allocation2 + $0xc4] sm:$0xf0]  ;;  %v6682_v18 = vld [vmem:[#allocation2 + $0xc8] sm:$0xf0]  ;;  %v8910_v19 = vld [vmem:[#allocation2 + $0x9b4] sm:$0xf] }
  0x31   : > { %v8545_v17 = vld [vmem:[%s9334_s23 + $0xc8] sm:$0xff]  ;;  %v8544_v30 = vld [vmem:[%s9334_s23 + $0xc0] sm:$0xff]  ;;  %v908_v31 = vld [vmem:[%s11591_s2 + $0x90] sm:$0xff] }
  0x32   : > { %1086 = vperm.xlu1 %9078, %v916_v22   ;;  %v8915_v22 = vld [vmem:[#allocation2 + $0x9d4] sm:$0xf0]  ;;  %v890_v32 = vld [vmem:[%s11591_s2] sm:$0xff]  ;;  %v891_v33 = vld [vmem:[%s11591_s2 + $0x8] sm:$0xff] }
  0x33   : > { %3359 = vmatpush.bf16.msra.mxu0 %v8522_v20  ;;  %9005 = vmatpush.bf16.msra.mxu3 %v8522_v20  ;;  %v7842_v20 = vld [vmem:[#allocation2 + $0x9d8] sm:$0xf0]  ;;  %v6720_v34 = vld [vmem:[#allocation2 + $0xf0] sm:$0xf]  ;;  %v8635_v35 = vld [vmem:[#allocation2 + $0x114] sm:$0xf0] }
  0x34   : > { %3528 = vmatpush.bf16.msra.mxu1 %v8530_v21  ;;  %9013 = vmatpush.bf16.msra.mxu2 %v8530_v21  ;;  %v7840_v21 = vld [vmem:[#allocation2 + $0x9b0] sm:$0xf]  ;;  %v8630_v36 = vld [vmem:[#allocation2 + $0xf4] sm:$0xf]  ;;  %v8611_v53 = vld [vmem:[#allocation2 + $0x5c] sm:$0xf] }
  0x35   : > { %1011 = vperm.xlu0 %9077, %v901_v23   ;;  %1091 = vperm.xlu2 %9079, %v917_v26   ;;  %v8536_v23 = vld [vmem:[%s9334_s23 + $0x80] sm:$0xff]  ;;  %v6681_v26 = vor.u32 %v8625_v15, %v6680_v14  ;;  %v7841_v29 = vor.u32 %v8915_v22, %v7840_v21  ;;  %v6800_v60 = vld [vmem:[#allocation2 + $0x190] sm:$0xf]  ;;  %v8655_v61 = vld [vmem:[#allocation2 + $0x1b4] sm:$0xf0] }
  0x36   : > { %v6650_v54 = vld [vmem:[#allocation2 + $0x80] sm:$0xf0] }
  0x37   : > { %3360 = vmatpush.bf16.msra.mxu0 %v8521_v24  ;;  %9006 = vmatpush.bf16.msra.mxu3 %v8521_v24  ;;  %v893_v24 = vld [vmem:[%s11591_s2 + $0x18] sm:$0xff]  ;;  %v6653_v58 = vor.u32 %v8611_v53, %v6650_v54  ;;  %v6730_v21 = vld [vmem:[#allocation2 + $0x120] sm:$0xf0]  ;;  %v8685_v53 = vld [vmem:[#allocation2 + $0x2a4] sm:$0xf0] }
  0x38   : > { %3529 = vmatpush.bf16.msra.mxu1 %v8529_v25  ;;  %9014 = vmatpush.bf16.msra.mxu2 %v8529_v25  ;;  %v892_v25 = vld [vmem:[%s11591_s2 + $0x10] sm:$0xff] }
  0x3a   : > { %1001 = vperm.xlu1 %9078, %v899_v38   ;;  %v6608_v38 = vld [vmem:[#allocation2 + $0x8] sm:$0xf] }
  0x3b   : > { %3361 = vmatpush.bf16.msra.mxu0 %v8520_v27  ;;  %9007 = vmatpush.bf16.msra.mxu3 %v8520_v27  ;;  %v6685_v27 = vor.u32 %v8620_v16, %v6682_v18  ;;  %v8660_v16 = vld [vmem:[#allocation2 + $0x1e4] sm:$0xf]  ;;  %v6728_v18 = vld [vmem:[#allocation2 + $0xf8] sm:$0xf] }
  0x3c   : > { %3530 = vmatpush.bf16.msra.mxu1 %v8528_v28  ;;  %9015 = vmatpush.bf16.msra.mxu2 %v8528_v28  ;;  %v7845_v28 = vor.u32 %v8910_v19, %v7842_v20  ;;  %v8636_v19 = vld [vmem:[#allocation2 + $0x11c] sm:$0xf0]  ;;  %v8631_v20 = vld [vmem:[#allocation2 + $0xfc] sm:$0xf] }
  0x3d   : > { %996 = vperm.xlu0 %9077, %v898_v39   ;;  %1076 = vperm.xlu2 %9079, %v914_v45   ;;  %v8606_v39 = vld [vmem:[#allocation2 + $0x2c] sm:$0xf0] }
  0x3e   : > { %3362 = vmatmul.bf16.vlgmr.msra.gmra.mxu0 %v6601_v40  ;;  %3507 = vmatmul.bf16.vlgmr.msra.gmra.mxu3 %v7761_v43  ;;  %v8601_v40 = vld [vmem:[#allocation2 + $0xc] sm:$0xf] }
  0x3f   : > { %3531 = vmatmul.bf16.vlgmr.msra.gmra.mxu1 %v6605_v41  ;;  %3676 = vmatmul.bf16.vlgmr.msra.gmra.mxu2 %v7765_v42  ;;  %v6610_v41 = vld [vmem:[#allocation2 + $0x30] sm:$0xf0]  ;;  %v6721_v42 = vor.u32 %v8635_v35, %v6720_v34 }
  0x40   : > { %3692 = vmatpush.bf16.msrb.mxu2 %v8543_v37  ;;  %3861 = vmatpush.bf16.msrb.mxu3 %v8551_v44  ;;  %v6722_v37 = vld [vmem:[#allocation2 + $0x118] sm:$0xf0]  ;;  %v6609_v44 = vor.u32 %v8606_v39, %v6608_v38  ;;  %v6613_v45 = vor.u32 %v8601_v40, %v6610_v41  ;;  %v906_v38 = vld [vmem:[%s11591_s2 + $0x80] sm:$0xff]  ;;  %v8646_v39 = vld [vmem:[#allocation2 + $0x16c] sm:$0xf0] }
  0x41   : > { %v6725_v43 = vor.u32 %v8630_v36, %v6722_v37  ;;  %v6882_v36 = vld [vmem:[#allocation2 + $0x258] sm:$0xf0]  ;;  %v6768_v37 = vld [vmem:[#allocation2 + $0x148] sm:$0xf]  ;;  %v8641_v40 = vld [vmem:[#allocation2 + $0x14c] sm:$0xf] }
  0x42   : > { %986 = vperm.xlu1 %9078, %v896_v49   ;;  %v6762_v49 = vld [vmem:[#allocation2 + $0x168] sm:$0xf0]  ;;  %v6770_v41 = vld [vmem:[#allocation2 + $0x170] sm:$0xf0] }
  0x44   : > { %3693 = vmatpush.bf16.msrb.mxu2 %v8542_v46  ;;  %3862 = vmatpush.bf16.msrb.mxu3 %v8550_v47  ;;  %v6760_v46 = vld [vmem:[#allocation2 + $0x140] sm:$0xf]  ;;  %v8645_v47 = vld [vmem:[#allocation2 + $0x164] sm:$0xf0] }
  0x45   : > { %1081 = vperm.xlu0 %9077, %v915_v48   ;;  %991 = vperm.xlu2 %9079, %v897_v52   ;;  %v8640_v48 = vld [vmem:[#allocation2 + $0x144] sm:$0xf]  ;;  %v8616_v52 = vld [vmem:[#allocation2 + $0x7c] sm:$0xf0]  ;;  %v6761_v55 = vor.u32 %v8645_v47, %v6760_v46  ;;  %v6773_v46 = vor.u32 %v8641_v40, %v6770_v41 }
  0x48   : > { %3694 = vmatpush.bf16.msrb.mxu2 %v8541_v50  ;;  %3863 = vmatpush.bf16.msrb.mxu3 %v8549_v51  ;;  %v6648_v50 = vld [vmem:[#allocation2 + $0x58] sm:$0xf] }
  0x49   : > { %v6649_v57 = vor.u32 %v8616_v52, %v6648_v50  ;;  %v6920_v52 = vld [vmem:[#allocation2 + $0x280] sm:$0xf] }
  0x4a   : > { %1071 = vperm.xlu1 %9078, %v913_v0   ;;  %v6688_v0 = vld [vmem:[#allocation2 + $0xa8] sm:$0xf] }
  0x4c   : > { %3695 = vmatpush.bf16.msrb.mxu2 %v8540_v56  ;;  %3864 = vmatpush.bf16.msrb.mxu3 %v8548_v62  ;;  %v6765_v56 = vor.u32 %v8640_v48, %v6762_v49  ;;  %v8650_v62 = vld [vmem:[#allocation2 + $0x194] sm:$0xf]  ;;  %v907_v49 = vld [vmem:[%s11591_s2 + $0x88] sm:$0xff] }
  0x4d   : > { %1066 = vperm.xlu0 %9077, %v912_v63   ;;  %976 = vperm.xlu2 %9079, %v894_v6   ;;  %v6802_v63 = vld [vmem:[#allocation2 + $0x1b8] sm:$0xf0] }
  0x4e   : > { %3367 = vmatmul.bf16.gmra.mxu0 %v6641_v1  ;;  %3512 = vmatmul.bf16.gmra.mxu3 %v7801_v4  ;;  %v6690_v4 = vld [vmem:[#allocation2 + $0xd0] sm:$0xf0]  ;;  %v6805_v6 = vor.u32 %v8650_v62, %v6802_v63  ;;  %v6810_v62 = vld [vmem:[#allocation2 + $0x1c0] sm:$0xf0] }
  0x4f   : > { %3536 = vmatmul.bf16.gmra.mxu1 %v6645_v2  ;;  %3681 = vmatmul.bf16.gmra.mxu2 %v7805_v3  ;;  %v8626_v2 = vld [vmem:[#allocation2 + $0xcc] sm:$0xf0]  ;;  %v8621_v3 = vld [vmem:[#allocation2 + $0xac] sm:$0xf] }
  0x50   : > { %3696 = vmatpush.bf16.msrb.mxu2 %v8539_v5  ;;  %3865 = vmatpush.bf16.msrb.mxu3 %v8547_v7  ;;  %v6801_v5 = vor.u32 %v8655_v61, %v6800_v60  ;;  %v6689_v7 = vor.u32 %v8626_v2, %v6688_v0  ;;  %v8656_v60 = vld [vmem:[#allocation2 + $0x1bc] sm:$0xf0]  ;;  %v8651_v61 = vld [vmem:[#allocation2 + $0x19c] sm:$0xf]  ;;  %v6921_v0 = vor.u32 %v8685_v53, %v6920_v52 }
  0x52   : > { %1056 = vperm.xlu1 %9078, %v910_v9  }
  0x54   : > { %3697 = vmatpush.bf16.msrb.mxu2 %v8538_v8  ;;  %3866 = vmatpush.bf16.msrb.mxu3 %v8546_v11  ;;  %v6693_v8 = vor.u32 %v8621_v3, %v6690_v4 }
  0x55   : > { %981 = vperm.xlu0 %9077, %v895_v10   ;;  %1061 = vperm.xlu2 %9079, %v911_v13   ;;  %v8665_v13 = vld [vmem:[#allocation2 + $0x204] sm:$0xf0] }
  0x58   : > { %3698 = vmatpush.bf16.msrb.mxu2 %v8537_v12  ;;  %3867 = vmatpush.bf16.msrb.mxu3 %v8545_v17  ;;  %v6840_v12 = vld [vmem:[#allocation2 + $0x1e0] sm:$0xf]  ;;  %v6842_v17 = vld [vmem:[#allocation2 + $0x208] sm:$0xf0] }
  0x5a   : > { %971 = vperm.xlu1 %9078, %v893_v24   ;;  %v6845_v24 = vor.u32 %v8660_v16, %v6842_v17 }
  0x5c   : > { %3699 = vmatpush.bf16.msrb.mxu2 %v8536_v23  ;;  %3868 = vmatpush.bf16.msrb.mxu3 %v8544_v30  ;;  %v6841_v23 = vor.u32 %v8665_v13, %v6840_v12 }
  0x5d   : > { %966 = vperm.xlu0 %9077, %v892_v25   ;;  %1046 = vperm.xlu2 %9079, %v908_v31   ;;  %v6729_v25 = vor.u32 %v8636_v19, %v6728_v18  ;;  %v6880_v31 = vld [vmem:[#allocation2 + $0x230] sm:$0xf] }
  0x5e   : > { %3372 = vmatmul.bf16.gmra.mxu0 %v6681_v26  ;;  %3517 = vmatmul.bf16.gmra.mxu3 %v7841_v29  ;;  %v6733_v26 = vor.u32 %v8631_v20, %v6730_v21  ;;  %v909_v29 = vld [vmem:[%s11591_s2 + $0x98] sm:$0xff]  ;;  %v6960_v21 = vld [vmem:[#allocation2 + $0x2d0] sm:$0xf] }
  0x5f   : > { %3541 = vmatmul.bf16.gmra.mxu1 %v6685_v27  ;;  %3686 = vmatmul.bf16.gmra.mxu2 %v7845_v28 }
  0x62   : > { %956 = vperm.xlu1 %9078, %v890_v32   ;;  %v8675_v32 = vld [vmem:[#allocation2 + $0x254] sm:$0xf0] }
  0x65   : > { %961 = vperm.xlu2 %9079, %v891_v33   ;;  %1051 = vperm.xlu0 %9077, %v909_v29   ;;  %v8670_v33 = vld [vmem:[#allocation2 + $0x234] sm:$0xf]  ;;  %v6962_v29 = vld [vmem:[#allocation2 + $0x2f8] sm:$0xf0] }
  0x6a   : > { %1041 = vperm.xlu1 %9078, %v907_v49  }
  0x6d   : > { %1036 = vperm.xlu0 %9077, %v906_v38  }
  0x6e   : > { %3377 = vmatmul.bf16.gmra.mxu0 %v6721_v42  ;;  %3869 = vmatmul.bf16.vlgmr.msrb.gmra.mxu3 %v6613_v45  ;;  %v6769_v45 = vor.u32 %v8646_v39, %v6768_v37 }
  0x6f   : > { %3546 = vmatmul.bf16.gmra.mxu1 %v6725_v43  ;;  %3700 = vmatmul.bf16.vlgmr.msrb.gmra.mxu2 %v6609_v44  ;;  %v6881_v43 = vor.u32 %v8675_v32, %v6880_v31  ;;  %v6885_v44 = vor.u32 %v8670_v33, %v6882_v36  ;;  %v6848_v31 = vld [vmem:[#allocation2 + $0x1e8] sm:$0xf]  ;;  %v8666_v32 = vld [vmem:[#allocation2 + $0x20c] sm:$0xf0]  ;;  %v8661_v33 = vld [vmem:[#allocation2 + $0x1ec] sm:$0xf] }
  0x70   : > { %v6850_v36 = vld [vmem:[#allocation2 + $0x210] sm:$0xf0] }
  0x75   : > { %v9455_v51 = vpop.permute.xlu2 %1016 }
  0x7e   : > { %3382 = vmatmul.bf16.gmra.mxu0 %v6761_v55  ;;  %3874 = vmatmul.bf16.gmra.mxu3 %v6653_v58  ;;  %v6808_v58 = vld [vmem:[#allocation2 + $0x198] sm:$0xf] }
  0x7f   : > { %3551 = vmatmul.bf16.gmra.mxu1 %v6765_v56  ;;  %3705 = vmatmul.bf16.gmra.mxu2 %v6649_v57  ;;  %v9457_v59 = vpop.permute.xlu2 %1021  ;;  %v8680_v56 = vld [vmem:[#allocation2 + $0x284] sm:$0xf]  ;;  %v6922_v57 = vld [vmem:[#allocation2 + $0x2a8] sm:$0xf0] }
  0x80   : > { %v6925_v2 = vor.u32 %v8680_v56, %v6922_v57 }
  0x87   : > { %v9459_v1 = vpop.permute.xlu2 %1006 }
  0x8c   : > { %v9461_v9 = vpop.permute.xlu1 %1106 }
  0x8d   : > { %v9463_v10 = vpop.permute.xlu0 %1026 }
  0x8e   : > { %3387 = vmatmul.bf16.gmra.mxu0 %v6801_v5  ;;  %3879 = vmatmul.bf16.gmra.mxu3 %v6693_v8  ;;  %v6809_v5 = vor.u32 %v8656_v60, %v6808_v58 }
  0x8f   : > { %3556 = vmatmul.bf16.gmra.mxu1 %v6805_v6  ;;  %3710 = vmatmul.bf16.gmra.mxu2 %v6689_v7  ;;  %v9465_v11 = vpop.permute.xlu2 %1091  ;;  %v6813_v6 = vor.u32 %v8651_v61, %v6810_v62 }
  0x94   : > { %v9467_v14 = vpop.permute.xlu1 %1111 }
  0x97   : > { %v9469_v15 = vpop.permute.xlu0 %1031  ;;  %v9471_v22 = vpop.permute.xlu2 %1076 }
  0x9c   : > { %v9473_v27 = vpop.permute.xlu1 %1101 }
  0x9e   : > { %3392 = vmatmul.bf16.gmra.mxu0 %v6841_v23  ;;  %3884 = vmatmul.bf16.gmra.mxu3 %v6733_v26  ;;  %v8695_v23 = vld [vmem:[#allocation2 + $0x2f4] sm:$0xf0]  ;;  %v8690_v26 = vld [vmem:[#allocation2 + $0x2d4] sm:$0xf] }
  0x9f   : > { %3561 = vmatmul.bf16.gmra.mxu1 %v6845_v24  ;;  %3715 = vmatmul.bf16.gmra.mxu2 %v6729_v25  ;;  %v9475_v28 = vpop.permute.xlu0 %1096  ;;  %v9480_v30 = vpop.permute.xlu2 %991  ;;  %v6961_v38 = vor.u32 %v8695_v23, %v6960_v21  ;;  %v6965_v39 = vor.u32 %v8690_v26, %v6962_v29  ;;  %v8671_v21 = vld [vmem:[#allocation2 + $0x23c] sm:$0xf]  ;;  %v6890_v23 = vld [vmem:[#allocation2 + $0x260] sm:$0xf0] }
  0xa4   : > { %v9482_v34 = vpop.permute.xlu1 %1086 }
  0xa7   : > { %v9484_v35 = vpop.permute.xlu0 %1011  ;;  %v9489_v42 = vpop.permute.xlu2 %976 }
  0xac   : > { %v9491_v47 = vpop.permute.xlu1 %1001 }
  0xae   : > { %3397 = vmatmul.bf16.gmra.mxu0 %v6881_v43  ;;  %3889 = vmatmul.bf16.gmra.mxu3 %v6773_v46  ;;  %v6849_v43 = vor.u32 %v8666_v32, %v6848_v31 }
  0xaf   : > { %3566 = vmatmul.bf16.gmra.mxu1 %v6885_v44  ;;  %3720 = vmatmul.bf16.gmra.mxu2 %v6769_v45  ;;  %v9493_v48 = vpop.permute.xlu0 %996  ;;  %v9498_v50 = vpop.permute.xlu2 %1061  ;;  %v6853_v44 = vor.u32 %v8661_v33, %v6850_v36 }
  0xb4   : > { %v9502_v55 = vpop.permute.xlu1 %986 }
  0xb7   : > { %v9500_v54 = vpop.permute.xlu0 %1081  ;;  %v9504_v63 = vpop.permute.xlu2 %1046 }
  0xbb   : > { %v3363_v3 = vpop.f32.mrf.mxu0 }
  0xbc   : > { %v3532_v4 = vpop.f32.mrf.mxu1  ;;  %v9508_v8 = vpop.permute.xlu1 %1071 }
  0xbe   : > { %3402 = vmatmul.bf16.gmra.mxu0 %v6921_v0  ;;  %3894 = vmatmul.bf16.gmra.mxu3 %v6813_v6  ;;  %v7000_v0 = vld [vmem:[#allocation2 + $0x320] sm:$0xf]  ;;  %v8700_v6 = vld [vmem:[#allocation2 + $0x324] sm:$0xf] }
  0xbf   : > { %3571 = vmatmul.bf16.gmra.mxu1 %v6925_v2  ;;  %3725 = vmatmul.bf16.gmra.mxu2 %v6809_v5  ;;  %v9506_v7 = vpop.permute.xlu0 %1066  ;;  %v962_v13 = vpop.permute.xlu2 %961  ;;  %v8705_v2 = vld [vmem:[#allocation2 + $0x344] sm:$0xf0] }
  0xc0   : > { %v7001_v29 = vor.u32 %v8705_v2, %v7000_v0  ;;  %v952_v0 = vld [vmem:[%s11591_s2 + $0x1f0] sm:$0xff] }
  0xc1   : > { %v9512_v17 = vpop.f32.mrf.mxu3  ;;  %v8710_v2 = vld [vmem:[#allocation2 + $0x374] sm:$0xf]  ;;  %1266 = vperm.xlu1 %9078, %v952_v0   ;;  %v7080_v0 = vld [vmem:[#allocation2 + $0x3c0] sm:$0xf] }
  0xc2   : > { %v9510_v12 = vpop.f32.mrf.mxu2 }
  0xc3   : > { %v3365_v16 = vpop.f32.mrf.mxu0 }
  0xc4   : > { %v3366_v18 = vadd.f32 %v3365_v16, %v962_v13  ;;  %v3534_v19 = vpop.f32.mrf.mxu1  ;;  %v9516_v24 = vpop.permute.xlu1 %1056  ;;  %v7002_v13 = vld [vmem:[#allocation2 + $0x348] sm:$0xf0]  ;;  %v6888_v16 = vld [vmem:[#allocation2 + $0x238] sm:$0xf] }
  0xc5   : > { %v7005_v31 = vor.u32 %v8700_v6, %v7002_v13  ;;  %v6928_v6 = vld [vmem:[#allocation2 + $0x288] sm:$0xf]  ;;  %v8686_v13 = vld [vmem:[#allocation2 + $0x2ac] sm:$0xf0] }
  0xc6   : > { %v9514_v20 = vadd.f32 %v3534_v19, %v3366_v18  ;;  %v8676_v19 = vld [vmem:[#allocation2 + $0x25c] sm:$0xf0] }
  0xc7   : > { %v982_v25 = vpop.permute.xlu0 %981 }
  0xc9   : > { %v9520_v41 = vpop.f32.mrf.mxu3 }
  0xca   : > { %v9518_v37 = vpop.f32.mrf.mxu2 }
  0xcb   : > { %v3368_v40 = vpop.f32.mrf.mxu0 }
  0xcc   : > { %v3537_v45 = vpop.f32.mrf.mxu1  ;;  %v972_v46 = vpop.permute.xlu1 %971 }
  0xce   : > { %3407 = vmatmul.bf16.gmra.mxu0 %v6961_v38  ;;  %3899 = vmatmul.bf16.gmra.mxu3 %v6853_v44  ;;  %v6889_v38 = vor.u32 %v8676_v19, %v6888_v16  ;;  %v8681_v16 = vld [vmem:[#allocation2 + $0x28c] sm:$0xf] }
  0xcf   : > { %3576 = vmatmul.bf16.gmra.mxu1 %v6965_v39  ;;  %3730 = vmatmul.bf16.gmra.mxu2 %v6849_v43  ;;  %v967_v49 = vpop.permute.xlu0 %966  ;;  %v6893_v39 = vor.u32 %v8671_v21, %v6890_v23 }
  0xd0   : > { %v3369_v52 = vadd.f32 %v3368_v40, %v967_v49 }
  0xd1   : > { %v9526_v58 = vpop.f32.mrf.mxu3 }
  0xd2   : > { %v9522_v53 = vpop.f32.mrf.mxu2  ;;  %v9524_v56 = vadd.f32 %v3537_v45, %v3369_v52  ;;  %11603 = vst [vmem:[#allocation10_spill] sm:$0xff] %v9526_v58 }
  0xd3   : > { %11602 = vst [vmem:[#allocation9_spill] sm:$0xff] %v9522_v53  ;;  %v3370_v57 = vpop.f32.mrf.mxu0 }
  0xd4   : > { %v3371_v60 = vadd.f32 %v3370_v57, %v972_v46  ;;  %v3539_v61 = vpop.f32.mrf.mxu1  ;;  %v957_v5 = vpop.permute.xlu1 %956 }
  0xd5   : > { %v3364_v18 = vadd.f32 %v3363_v3, %v957_v5  ;;  %v937_v3 = vld [vmem:[%s11591_s2 + $0x178] sm:$0xff] }
  0xd6   : > { %v9528_v62 = vadd.f32 %v3539_v61, %v3371_v60  ;;  %1191 = vperm.xlu0 %9077, %v937_v3   ;;  %v8715_v60 = vld [vmem:[#allocation2 + $0x394] sm:$0xf0]  ;;  %v934_v61 = vld [vmem:[%s11591_s2 + $0x160] sm:$0xff]  ;;  %v7042_v5 = vld [vmem:[#allocation2 + $0x398] sm:$0xf0] }
  0xd7   : > { %v3533_v32 = vadd.f32 %v3532_v4, %v3364_v18  ;;  %v7045_v21 = vor.u32 %v8710_v2, %v7042_v5  ;;  %v935_v3 = vld [vmem:[%s11591_s2 + $0x168] sm:$0xff] }
  0xd8   : > { %1181 = vperm.xlu1 %9078, %v935_v3   ;;  %v8725_v5 = vld [vmem:[#allocation2 + $0x3e4] sm:$0xf0] }
  0xd9   : > { %v9532_v36 = vpop.f32.mrf.mxu3 }
  0xda   : > { %v9530_v26 = vpop.f32.mrf.mxu2  ;;  %11605 = vst [vmem:[#allocation12_spill] sm:$0xff] %v9532_v36 }
  0xdb   : > { %11604 = vst [vmem:[#allocation11_spill] sm:$0xff] %v9530_v26  ;;  %v3373_v33 = vpop.f32.mrf.mxu0 }
  0xdc   : > { %v3374_v40 = vadd.f32 %v3373_v33, %v9489_v42  ;;  %v3542_v43 = vpop.f32.mrf.mxu1  ;;  %v7040_v42 = vld [vmem:[#allocation2 + $0x370] sm:$0xf] }
  0xdd   : > { %v7041_v19 = vor.u32 %v8715_v60, %v7040_v42 }
  0xde   : > { %v9535_v44 = vadd.f32 %v3542_v43, %v3374_v40  ;;  %3412 = vmatmul.bf16.gmra.mxu0 %v7001_v29  ;;  %3904 = vmatmul.bf16.gmra.mxu3 %v6893_v39  ;;  %v951_v43 = vld [vmem:[%s11591_s2 + $0x1e8] sm:$0xff] }
  0xdf   : > { %3581 = vmatmul.bf16.gmra.mxu1 %v7005_v31  ;;  %3735 = vmatmul.bf16.gmra.mxu2 %v6889_v38  ;;  %v6929_v31 = vor.u32 %v8686_v13, %v6928_v6  ;;  %v948_v6 = vld [vmem:[%s11591_s2 + $0x1d0] sm:$0xff] }
  0xe0   : > { %1176 = vperm.xlu0 %9077, %v934_v61   ;;  %v932_v13 = vld [vmem:[%s11591_s2 + $0x150] sm:$0xff] }
  0xe1   : > { %v9542_v46 = vpop.f32.mrf.mxu3  ;;  %1166 = vperm.xlu1 %9078, %v932_v13  }
  0xe2   : > { %v9540_v4 = vpop.f32.mrf.mxu2  ;;  %11607 = vst [vmem:[#allocation14_spill] sm:$0xff] %v9542_v46 }
  0xe3   : > { %11606 = vst [vmem:[#allocation13_spill] sm:$0xff] %v9540_v4  ;;  %v3375_v45 = vpop.f32.mrf.mxu0 }
  0xe4   : > { %v3376_v49 = vadd.f32 %v3375_v45, %v982_v25  ;;  %v3544_v52 = vpop.f32.mrf.mxu1  ;;  %v6930_v25 = vld [vmem:[#allocation2 + $0x2b0] sm:$0xf0] }
  0xe5   : > { %v6933_v33 = vor.u32 %v8681_v16, %v6930_v25  ;;  %v7082_v16 = vld [vmem:[#allocation2 + $0x3e8] sm:$0xf0]  ;;  %v6968_v25 = vld [vmem:[#allocation2 + $0x2d8] sm:$0xf] }
  0xe6   : > { %v9544_v57 = vadd.f32 %v3544_v52, %v3376_v49 }
  0xe8   : > { %1261 = vperm.xlu0 %9077, %v951_v43  }
  0xe9   : > { %v9554_v29 = vpop.f32.mrf.mxu3 }
  0xea   : > { %v9552_v18 = vpop.f32.mrf.mxu2  ;;  %11609 = vst [vmem:[#allocation16_spill] sm:$0xff] %v9554_v29 }
  0xeb   : > { %11608 = vst [vmem:[#allocation15_spill] sm:$0xff] %v9552_v18  ;;  %v3378_v23 = vpop.f32.mrf.mxu0 }
  0xec   : > { %v3379_v38 = vadd.f32 %v3378_v23, %v9502_v55  ;;  %v3547_v39 = vpop.f32.mrf.mxu1 }
  0xee   : > { %v9557_v40 = vadd.f32 %v3547_v39, %v3379_v38  ;;  %3417 = vmatmul.bf16.gmra.mxu0 %v7041_v19  ;;  %3909 = vmatmul.bf16.gmra.mxu3 %v6933_v33  ;;  %v8696_v19 = vld [vmem:[#allocation2 + $0x2fc] sm:$0xf0] }
  0xef   : > { %3586 = vmatmul.bf16.gmra.mxu1 %v7045_v21  ;;  %3740 = vmatmul.bf16.gmra.mxu2 %v6929_v31  ;;  %v6970_v21 = vld [vmem:[#allocation2 + $0x300] sm:$0xf0]  ;;  %v7081_v31 = vor.u32 %v8725_v5, %v7080_v0  ;;  %v6969_v3 = vor.u32 %v8696_v19, %v6968_v25  ;;  %v7120_v25 = vld [vmem:[#allocation2 + $0x410] sm:$0xf] }
  0xf0   : > { %1246 = vperm.xlu0 %9077, %v948_v6  }
  0xf1   : > { %v3870_v52 = vpop.f32.mrf.mxu3 }
  0xf2   : > { %v3701_v45 = vpop.f32.mrf.mxu2 }
  0xf3   : > { %v3702_v49 = vadd.f32 %v3701_v45, %v3533_v32  ;;  %v3380_v55 = vpop.f32.mrf.mxu0  ;;  %v8720_v32 = vld [vmem:[#allocation2 + $0x3c4] sm:$0xf] }
  0xf4   : > { %v3381_v42 = vadd.f32 %v3380_v55, %v9480_v30  ;;  %v3549_v60 = vpop.f32.mrf.mxu1  ;;  %v8691_v30 = vld [vmem:[#allocation2 + $0x2dc] sm:$0xf]  ;;  %v7085_v33 = vor.u32 %v8720_v32, %v7082_v16 }
  0xf5   : > { %v9566_v61 = vadd.f32 %v3870_v52, %v3702_v49  ;;  %v6973_v45 = vor.u32 %v8691_v30, %v6970_v21  ;;  %v8735_v30 = vld [vmem:[#allocation2 + $0x434] sm:$0xf0]  ;;  %v928_v21 = vld [vmem:[%s11591_s2 + $0x130] sm:$0xff] }
  0xf6   : > { %v9568_v2 = vadd.f32 %v3549_v60, %v3381_v42  ;;  %v931_v60 = vld [vmem:[%s11591_s2 + $0x148] sm:$0xff] }
  0xf8   : > { %1161 = vperm.xlu0 %9077, %v931_v60  }
  0xf9   : > { %v3872_v43 = vpop.f32.mrf.mxu3 }
  0xfa   : > { %v3703_v23 = vpop.f32.mrf.mxu2 }
  0xfb   : > { %v3704_v38 = vadd.f32 %v3703_v23, %v9514_v20  ;;  %v3383_v39 = vpop.f32.mrf.mxu0  ;;  %v949_v20 = vld [vmem:[%s11591_s2 + $0x1d8] sm:$0xff]  ;;  %v946_v23 = vld [vmem:[%s11591_s2 + $0x1c0] sm:$0xff] }
  0xfc   : > { %v3384_v49 = vadd.f32 %v3383_v39, %v9493_v48  ;;  %v3552_v55 = vpop.f32.mrf.mxu1  ;;  %1251 = vperm.xlu1 %9078, %v949_v20   ;;  %v7010_v39 = vld [vmem:[#allocation2 + $0x350] sm:$0xf0] }
  0xfd   : > { %v9578_v52 = vadd.f32 %v3872_v43, %v3704_v38  ;;  %v8706_v38 = vld [vmem:[#allocation2 + $0x34c] sm:$0xf0] }
  0xfe   : > { %v9580_v42 = vadd.f32 %v3552_v55, %v3384_v49  ;;  %3422 = vmatmul.bf16.gmra.mxu0 %v7081_v31  ;;  %3914 = vmatmul.bf16.gmra.mxu3 %v6973_v45  ;;  %v7122_v31 = vld [vmem:[#allocation2 + $0x438] sm:$0xf0] }
  0xff   : > { %3591 = vmatmul.bf16.gmra.mxu1 %v7085_v33  ;;  %3745 = vmatmul.bf16.gmra.mxu2 %v6969_v3  ;;  %v7008_v33 = vld [vmem:[#allocation2 + $0x328] sm:$0xf]  ;;  %v7121_v3 = vor.u32 %v8735_v30, %v7120_v25 }
 0x100   : > { %1146 = vperm.xlu0 %9077, %v928_v21   ;;  %v7009_v20 = vor.u32 %v8706_v38, %v7008_v33  ;;  %v7160_v38 = vld [vmem:[#allocation2 + $0x460] sm:$0xf] }
 0x101   : > { %v3875_v6 = vpop.f32.mrf.mxu3 }
 0x102   : > { %v3706_v48 = vpop.f32.mrf.mxu2 }
 0x103   : > { %v3707_v0 = vadd.f32 %v3706_v48, %v9524_v56  ;;  %v3385_v5 = vpop.f32.mrf.mxu0  ;;  %v8730_v56 = vld [vmem:[#allocation2 + $0x414] sm:$0xf] }
 0x104   : > { %v3386_v13 = vadd.f32 %v3385_v5, %v9491_v47  ;;  %v3554_v32 = vpop.f32.mrf.mxu1  ;;  %v8701_v47 = vld [vmem:[#allocation2 + $0x32c] sm:$0xf]  ;;  %1236 = vperm.xlu1 %9078, %v946_v23   ;;  %v7125_v45 = vor.u32 %v8730_v56, %v7122_v31 }
 0x105   : > { %v9590_v16 = vadd.f32 %v3875_v6, %v3707_v0  ;;  %v7013_v48 = vor.u32 %v8701_v47, %v7010_v39  ;;  %v8745_v47 = vld [vmem:[#allocation2 + $0x484] sm:$0xf0] }
 0x106   : > { %v9592_v19 = vadd.f32 %v3554_v32, %v3386_v13  ;;  %v945_v32 = vld [vmem:[%s11591_s2 + $0x1b8] sm:$0xff] }
 0x108   : > { %1231 = vperm.xlu0 %9077, %v945_v32  }
 0x109   : > { %v3877_v60 = vpop.f32.mrf.mxu3 }
 0x10a   : > { %v3708_v43 = vpop.f32.mrf.mxu2 }
 0x10b   : > { %v3709_v49 = vadd.f32 %v3708_v43, %v9528_v62  ;;  %v3388_v55 = vpop.f32.mrf.mxu0  ;;  %v936_v62 = vld [vmem:[%s11591_s2 + $0x170] sm:$0xff]  ;;  %v942_v43 = vld [vmem:[%s11591_s2 + $0x1a0] sm:$0xff] }
 0x10c   : > { %v3389_v0 = vadd.f32 %v3388_v55, %v9459_v1  ;;  %v3557_v5 = vpop.f32.mrf.mxu1  ;;  %v929_v1 = vld [vmem:[%s11591_s2 + $0x138] sm:$0xff]  ;;  %1186 = vperm.xlu2 %9079, %v936_v62   ;;  %v8716_v55 = vld [vmem:[#allocation2 + $0x39c] sm:$0xf0] }
 0x10d   : > { %v9602_v6 = vadd.f32 %v3877_v60, %v3709_v49  ;;  %1151 = vperm.xlu1 %9078, %v929_v1   ;;  %v7048_v49 = vld [vmem:[#allocation2 + $0x378] sm:$0xf]  ;;  %v8711_v60 = vld [vmem:[#allocation2 + $0x37c] sm:$0xf] }
 0x10e   : > { %v9604_v13 = vadd.f32 %v3557_v5, %v3389_v0  ;;  %3427 = vmatmul.bf16.gmra.mxu0 %v7121_v3  ;;  %3919 = vmatmul.bf16.gmra.mxu3 %v7013_v48  ;;  %v953_v3 = vld [vmem:[%s11591_s2 + $0x1f8] sm:$0xff]  ;;  %v7161_v0 = vor.u32 %v8745_v47, %v7160_v38 }
 0x10f   : > { %3596 = vmatmul.bf16.gmra.mxu1 %v7125_v45  ;;  %3750 = vmatmul.bf16.gmra.mxu2 %v7009_v20  ;;  %v7162_v45 = vld [vmem:[#allocation2 + $0x488] sm:$0xf0]  ;;  %v7050_v20 = vld [vmem:[#allocation2 + $0x3a0] sm:$0xf0]  ;;  %v925_v38 = vld [vmem:[%s11591_s2 + $0x118] sm:$0xff] }
 0x110   : > { %1216 = vperm.xlu0 %9077, %v942_v43  }
 0x111   : > { %v3880_v23 = vpop.f32.mrf.mxu3 }
 0x112   : > { %v3711_v25 = vpop.f32.mrf.mxu2 }
 0x113   : > { %v3712_v30 = vadd.f32 %v3711_v25, %v9535_v44  ;;  %v3390_v21 = vpop.f32.mrf.mxu0  ;;  %v926_v44 = vld [vmem:[%s11591_s2 + $0x120] sm:$0xff]  ;;  %v7049_v25 = vor.u32 %v8716_v55, %v7048_v49  ;;  %v7200_v55 = vld [vmem:[#allocation2 + $0x4b0] sm:$0xf] }
 0x114   : > { %v3391_v56 = vadd.f32 %v3390_v21, %v9484_v35  ;;  %v3559_v31 = vpop.f32.mrf.mxu1  ;;  %v8740_v35 = vld [vmem:[#allocation2 + $0x464] sm:$0xf]  ;;  %1271 = vperm.xlu2 %9079, %v953_v3  }
 0x115   : > { %v9617_v33 = vadd.f32 %v3880_v23, %v3712_v30  ;;  %1136 = vperm.xlu1 %9078, %v926_v44   ;;  %v7165_v5 = vor.u32 %v8740_v35, %v7162_v45  ;;  %v7053_v30 = vor.u32 %v8711_v60, %v7050_v20  ;;  %v8755_v60 = vld [vmem:[#allocation2 + $0x4d4] sm:$0xf0] }
 0x116   : > { %v9619_v39 = vadd.f32 %v3559_v31, %v3391_v56 }
 0x118   : > { %1131 = vperm.xlu0 %9077, %v925_v38  }
 0x119   : > { %v3882_v1 = vpop.f32.mrf.mxu3 }
 0x11a   : > { %v3713_v48 = vpop.f32.mrf.mxu2 }
 0x11b   : > { %v3714_v32 = vadd.f32 %v3713_v48, %v9544_v57  ;;  %v3393_v62 = vpop.f32.mrf.mxu0  ;;  %v950_v57 = vld [vmem:[%s11591_s2 + $0x1e0] sm:$0xff] }
 0x11c   : > { %v3394_v21 = vadd.f32 %v3393_v62, %v9455_v51  ;;  %v3562_v23 = vpop.f32.mrf.mxu1  ;;  %v943_v51 = vld [vmem:[%s11591_s2 + $0x1a8] sm:$0xff]  ;;  %1256 = vperm.xlu2 %9079, %v950_v57   ;;  %v922_v48 = vld [vmem:[%s11591_s2 + $0x100] sm:$0xff]  ;;  %v8726_v62 = vld [vmem:[#allocation2 + $0x3ec] sm:$0xf0] }
 0x11d   : > { %v9632_v56 = vadd.f32 %v3882_v1, %v3714_v32  ;;  %1221 = vperm.xlu1 %9078, %v943_v51   ;;  %v7088_v32 = vld [vmem:[#allocation2 + $0x3c8] sm:$0xf]  ;;  %v8721_v1 = vld [vmem:[#allocation2 + $0x3cc] sm:$0xf] }
 0x11e   : > { %v9634_v31 = vadd.f32 %v3562_v23, %v3394_v21  ;;  %3432 = vmatmul.bf16.gmra.mxu0 %v7161_v0  ;;  %3924 = vmatmul.bf16.gmra.mxu3 %v7053_v30  ;;  %v933_v0 = vld [vmem:[%s11591_s2 + $0x158] sm:$0xff]  ;;  %v7201_v21 = vor.u32 %v8755_v60, %v7200_v55  ;;  %v923_v55 = vld [vmem:[%s11591_s2 + $0x108] sm:$0xff] }
 0x11f   : > { %3601 = vmatmul.bf16.gmra.mxu1 %v7165_v5  ;;  %3755 = vmatmul.bf16.gmra.mxu2 %v7049_v25  ;;  %v7202_v5 = vld [vmem:[#allocation2 + $0x4d8] sm:$0xf0]  ;;  %v7090_v25 = vld [vmem:[#allocation2 + $0x3f0] sm:$0xf0] }
 0x120   : > { %1116 = vperm.xlu0 %9077, %v922_v48   ;;  %v9666_v48 = vpop.permute.xlu0 %1051 }
 0x121   : > { %v3885_v44 = vpop.f32.mrf.mxu3 }
 0x122   : > { %v3716_v47 = vpop.f32.mrf.mxu2 }
 0x123   : > { %v3717_v43 = vadd.f32 %v3716_v47, %v9557_v40  ;;  %v3395_v3 = vpop.f32.mrf.mxu0  ;;  %v940_v40 = vld [vmem:[%s11591_s2 + $0x190] sm:$0xff]  ;;  %v7089_v47 = vor.u32 %v8726_v62, %v7088_v32 }
 0x124   : > { %v3396_v35 = vadd.f32 %v3395_v3, %v9457_v59  ;;  %v3564_v45 = vpop.f32.mrf.mxu1  ;;  %v8750_v59 = vld [vmem:[#allocation2 + $0x4b4] sm:$0xf]  ;;  %1171 = vperm.xlu2 %9079, %v933_v0  }
 0x125   : > { %v9647_v49 = vadd.f32 %v3885_v44, %v3717_v43  ;;  %1206 = vperm.xlu1 %9078, %v940_v40   ;;  %v7205_v23 = vor.u32 %v8750_v59, %v7202_v5  ;;  %v7093_v43 = vor.u32 %v8721_v1, %v7090_v25  ;;  %v7240_v1 = vld [vmem:[#allocation2 + $0x500] sm:$0xf]  ;;  %v8765_v25 = vld [vmem:[#allocation2 + $0x524] sm:$0xf0] }
 0x126   : > { %v9649_v20 = vadd.f32 %v3564_v45, %v3396_v35 }
 0x129   : > { %v3887_v51 = vpop.f32.mrf.mxu3 }
 0x12a   : > { %v3718_v30 = vpop.f32.mrf.mxu2 }
 0x12b   : > { %v3719_v38 = vadd.f32 %v3718_v30, %v9568_v2  ;;  %v3398_v57 = vpop.f32.mrf.mxu0  ;;  %v930_v2 = vld [vmem:[%s11591_s2 + $0x140] sm:$0xff]  ;;  %v947_v30 = vld [vmem:[%s11591_s2 + $0x1c8] sm:$0xff] }
 0x12c   : > { %v3399_v3 = vadd.f32 %v3398_v57, %v9463_v10  ;;  %v3567_v44 = vpop.f32.mrf.mxu1  ;;  %1156 = vperm.xlu2 %9079, %v930_v2   ;;  %v8736_v57 = vld [vmem:[#allocation2 + $0x43c] sm:$0xf0] }
 0x12d   : > { %v9662_v35 = vadd.f32 %v3887_v51, %v3719_v38  ;;  %1121 = vperm.xlu1 %9078, %v923_v55   ;;  %v7128_v38 = vld [vmem:[#allocation2 + $0x418] sm:$0xf]  ;;  %v7130_v51 = vld [vmem:[#allocation2 + $0x440] sm:$0xf0] }
 0x12e   : > { %v9664_v45 = vadd.f32 %v3567_v44, %v3399_v3  ;;  %3437 = vmatmul.bf16.gmra.mxu0 %v7201_v21  ;;  %3929 = vmatmul.bf16.gmra.mxu3 %v7093_v43  ;;  %v8760_v21 = vld [vmem:[#allocation2 + $0x504] sm:$0xf]  ;;  %v7241_v43 = vor.u32 %v8765_v25, %v7240_v1  ;;  %v944_v1 = vld [vmem:[%s11591_s2 + $0x1b0] sm:$0xff] }
 0x12f   : > { %3606 = vmatmul.bf16.gmra.mxu1 %v7205_v23  ;;  %3760 = vmatmul.bf16.gmra.mxu2 %v7089_v47  ;;  %v7242_v23 = vld [vmem:[#allocation2 + $0x528] sm:$0xf0]  ;;  %v1037_v47 = vpop.permute.xlu0 %1036 }
 0x130   : > { %v7245_v3 = vor.u32 %v8760_v21, %v7242_v23 }
 0x131   : > { %v3890_v40 = vpop.f32.mrf.mxu3 }
 0x132   : > { %v3721_v10 = vpop.f32.mrf.mxu2 }
 0x133   : > { %v3722_v60 = vadd.f32 %v3721_v10, %v9580_v42  ;;  %v3400_v0 = vpop.f32.mrf.mxu0  ;;  %v8731_v42 = vld [vmem:[#allocation2 + $0x41c] sm:$0xf]  ;;  %v7129_v10 = vor.u32 %v8736_v57, %v7128_v38 }
 0x134   : > { %v3401_v59 = vadd.f32 %v3400_v0, %v9469_v15  ;;  %v3569_v5 = vpop.f32.mrf.mxu1  ;;  %1241 = vperm.xlu2 %9079, %v947_v30  }
 0x135   : > { %v9676_v32 = vadd.f32 %v3890_v40, %v3722_v60  ;;  %v7133_v60 = vor.u32 %v8731_v42, %v7130_v51 }
 0x136   : > { %v9678_v62 = vadd.f32 %v3569_v5, %v3401_v59 }
 0x137   : > { %11610 = vst [vmem:[#allocation17_spill] sm:$0xff] %v9676_v32  ;;  %v8567_v32 = vld [vmem:[%s9334_s23 + $0x178] sm:$0xff] }
 0x138   : > { %4199 = vmatpush.bf16.msrb.mxu1 %v8567_v32  ;;  %v8865_v32 = vld [vmem:[#allocation2 + $0x844] sm:$0xf0] }
 0x139   : > { %v3892_v55 = vpop.f32.mrf.mxu3 }
 0x13a   : > { %v3723_v15 = vpop.f32.mrf.mxu2 }
 0x13b   : > { %v3724_v44 = vadd.f32 %v3723_v15, %v9592_v19  ;;  %v3403_v2 = vpop.f32.mrf.mxu0  ;;  %v1042_v19 = vpop.permute.xlu1 %1041  ;;  %v8775_v15 = vld [vmem:[#allocation2 + $0x574] sm:$0xf0] }
 0x13c   : > { %v3404_v0 = vadd.f32 %v3403_v2, %v1037_v47  ;;  %v3572_v40 = vpop.f32.mrf.mxu1  ;;  %1226 = vperm.xlu2 %9079, %v944_v1   ;;  %v7280_v47 = vld [vmem:[#allocation2 + $0x550] sm:$0xf]  ;;  %v7168_v2 = vld [vmem:[#allocation2 + $0x468] sm:$0xf] }
 0x13d   : > { %v9684_v59 = vadd.f32 %v3892_v55, %v3724_v44  ;;  %v7282_v44 = vld [vmem:[#allocation2 + $0x578] sm:$0xf0]  ;;  %v8746_v55 = vld [vmem:[#allocation2 + $0x48c] sm:$0xf0] }
 0x13e   : > { %v9686_v5 = vadd.f32 %v3572_v40, %v3404_v0  ;;  %3442 = vmatmul.bf16.gmra.mxu0 %v7241_v43  ;;  %3934 = vmatmul.bf16.gmra.mxu3 %v7133_v60  ;;  %v927_v43 = vld [vmem:[%s11591_s2 + $0x128] sm:$0xff]  ;;  %v7281_v0 = vor.u32 %v8775_v15, %v7280_v47  ;;  %v924_v47 = vld [vmem:[%s11591_s2 + $0x110] sm:$0xff] }
 0x13f   : > { %11611 = vst [vmem:[#allocation18_spill] sm:$0xff] %v9684_v59  ;;  %3611 = vmatmul.bf16.gmra.mxu1 %v7245_v3  ;;  %3765 = vmatmul.bf16.gmra.mxu2 %v7129_v10  ;;  %v8770_v3 = vld [vmem:[#allocation2 + $0x554] sm:$0xf]  ;;  %v8741_v10 = vld [vmem:[#allocation2 + $0x46c] sm:$0xf] }
 0x140   : > { %v7285_v40 = vor.u32 %v8770_v3, %v7282_v44 }
 0x141   : > { %v3895_v23 = vpop.f32.mrf.mxu3 }
 0x142   : > { %v3726_v25 = vpop.f32.mrf.mxu2 }
 0x143   : > { %v3727_v30 = vadd.f32 %v3726_v25, %v9604_v13  ;;  %v3405_v21 = vpop.f32.mrf.mxu0  ;;  %v7170_v13 = vld [vmem:[#allocation2 + $0x490] sm:$0xf0] }
 0x144   : > { %v3406_v38 = vadd.f32 %v3405_v21, %v1042_v19  ;;  %v3574_v57 = vpop.f32.mrf.mxu1  ;;  %1141 = vperm.xlu2 %9079, %v927_v43   ;;  %v7173_v21 = vor.u32 %v8741_v10, %v7170_v13  ;;  %v7320_v10 = vld [vmem:[#allocation2 + $0x5a0] sm:$0xf]  ;;  %v8785_v13 = vld [vmem:[#allocation2 + $0x5c4] sm:$0xf0] }
 0x145   : > { %v9692_v42 = vadd.f32 %v3895_v23, %v3727_v30  ;;  %v7169_v30 = vor.u32 %v8746_v55, %v7168_v2 }
 0x146   : > { %v9694_v51 = vadd.f32 %v3574_v57, %v3406_v38 }
 0x147   : > { %11612 = vst [vmem:[#allocation19_spill] sm:$0xff] %v9692_v42 }
 0x149   : > { %v3897_v25 = vpop.f32.mrf.mxu3 }
 0x14a   : > { %v3728_v60 = vpop.f32.mrf.mxu2 }
 0x14b   : > { %v3729_v1 = vadd.f32 %v3728_v60, %v9619_v39  ;;  %v3408_v19 = vpop.f32.mrf.mxu0  ;;  %v8780_v60 = vld [vmem:[#allocation2 + $0x5a4] sm:$0xf] }
 0x14c   : > { %v3409_v23 = vadd.f32 %v3408_v19, %v9504_v63  ;;  %v3577_v38 = vpop.f32.mrf.mxu1  ;;  %1126 = vperm.xlu2 %9079, %v924_v47   ;;  %v8751_v19 = vld [vmem:[#allocation2 + $0x4bc] sm:$0xf] }
 0x14d   : > { %v9701_v57 = vadd.f32 %v3897_v25, %v3729_v1  ;;  %v8756_v1 = vld [vmem:[#allocation2 + $0x4dc] sm:$0xf0]  ;;  %v7210_v25 = vld [vmem:[#allocation2 + $0x4e0] sm:$0xf0] }
 0x14e   : > { %v9703_v18 = vadd.f32 %v3577_v38, %v3409_v23  ;;  %3447 = vmatmul.bf16.gmra.mxu0 %v7281_v0  ;;  %3939 = vmatmul.bf16.gmra.mxu3 %v7173_v21  ;;  %v7322_v0 = vld [vmem:[#allocation2 + $0x5c8] sm:$0xf0]  ;;  %v7321_v21 = vor.u32 %v8785_v13, %v7320_v10 }
 0x14f   : > { %11613 = vst [vmem:[#allocation20_spill] sm:$0xff] %v9701_v57  ;;  %3616 = vmatmul.bf16.gmra.mxu1 %v7285_v40  ;;  %3770 = vmatmul.bf16.gmra.mxu2 %v7169_v30  ;;  %v7208_v40 = vld [vmem:[#allocation2 + $0x4b8] sm:$0xf] }
 0x150   : > { %v7209_v47 = vor.u32 %v8756_v1, %v7208_v40 }
 0x151   : > { %v3900_v3 = vpop.f32.mrf.mxu3 }
 0x152   : > { %v3731_v39 = vpop.f32.mrf.mxu2 }
 0x153   : > { %v3732_v15 = vadd.f32 %v3731_v39, %v9634_v31  ;;  %v3410_v43 = vpop.f32.mrf.mxu0  ;;  %v7325_v31 = vor.u32 %v8780_v60, %v7322_v0  ;;  %v7213_v39 = vor.u32 %v8751_v19, %v7210_v25  ;;  %v7360_v19 = vld [vmem:[#allocation2 + $0x5f0] sm:$0xf]  ;;  %v8795_v25 = vld [vmem:[#allocation2 + $0x614] sm:$0xf0] }
 0x154   : > { %v3411_v63 = vadd.f32 %v3410_v43, %v9666_v48  ;;  %v3579_v44 = vpop.f32.mrf.mxu1 }
 0x155   : > { %v9710_v2 = vadd.f32 %v3900_v3, %v3732_v15 }
 0x156   : > { %v9712_v55 = vadd.f32 %v3579_v44, %v3411_v63  ;;  %v9720_v44 = vpop.permute.xlu0 %1191 }
 0x157   : > { %11614 = vst [vmem:[#allocation21_spill] sm:$0xff] %v9710_v2 }
 0x159   : > { %v3902_v48 = vpop.f32.mrf.mxu3 }
 0x15a   : > { %v3733_v30 = vpop.f32.mrf.mxu2 }
 0x15b   : > { %v3734_v23 = vadd.f32 %v3733_v30, %v9649_v20  ;;  %v3413_v38 = vpop.f32.mrf.mxu0  ;;  %v9728_v30 = vpop.permute.xlu1 %1266 }
 0x15c   : > { %v3414_v15 = vadd.f32 %v3413_v38, %v9516_v24  ;;  %v3582_v43 = vpop.f32.mrf.mxu1  ;;  %11617 = vst [vmem:[#allocation24_spill] sm:$0xff] %v9728_v30  ;;  %v8766_v38 = vld [vmem:[#allocation2 + $0x52c] sm:$0xf0] }
 0x15d   : > { %v9716_v3 = vadd.f32 %v3902_v48, %v3734_v23  ;;  %v7248_v23 = vld [vmem:[#allocation2 + $0x508] sm:$0xf]  ;;  %v8761_v48 = vld [vmem:[#allocation2 + $0x50c] sm:$0xf] }
 0x15e   : > { %v9718_v63 = vadd.f32 %v3582_v43, %v3414_v15  ;;  %3452 = vmatmul.bf16.gmra.mxu0 %v7321_v21  ;;  %3944 = vmatmul.bf16.gmra.mxu3 %v7213_v39  ;;  %v8790_v21 = vld [vmem:[#allocation2 + $0x5f4] sm:$0xf]  ;;  %v7361_v15 = vor.u32 %v8795_v25, %v7360_v19 }
 0x15f   : > { %11615 = vst [vmem:[#allocation22_spill] sm:$0xff] %v9716_v3  ;;  %3621 = vmatmul.bf16.gmra.mxu1 %v7325_v31  ;;  %3775 = vmatmul.bf16.gmra.mxu2 %v7209_v47  ;;  %v7362_v31 = vld [vmem:[#allocation2 + $0x618] sm:$0xf0]  ;;  %v7250_v47 = vld [vmem:[#allocation2 + $0x530] sm:$0xf0] }
 0x161   : > { %v3905_v60 = vpop.f32.mrf.mxu3 }
 0x162   : > { %v3736_v10 = vpop.f32.mrf.mxu2 }
 0x163   : > { %v3737_v20 = vadd.f32 %v3736_v10, %v9664_v45  ;;  %v3415_v13 = vpop.f32.mrf.mxu0  ;;  %v9730_v45 = vpop.permute.xlu0 %1176 }
 0x164   : > { %v3416_v0 = vadd.f32 %v3415_v13, %v9498_v50  ;;  %v3584_v40 = vpop.f32.mrf.mxu1  ;;  %v7365_v50 = vor.u32 %v8790_v21, %v7362_v31  ;;  %v7249_v13 = vor.u32 %v8766_v38, %v7248_v23  ;;  %v9738_v2 = vpop.permute.xlu1 %1181 }
 0x165   : > { %v9724_v24 = vadd.f32 %v3905_v60, %v3737_v20  ;;  %v7253_v60 = vor.u32 %v8761_v48, %v7250_v47  ;;  %v7400_v47 = vld [vmem:[#allocation2 + $0x640] sm:$0xf] }
 0x166   : > { %v9726_v1 = vadd.f32 %v3584_v40, %v3416_v0 }
 0x167   : > { %11616 = vst [vmem:[#allocation23_spill] sm:$0xff] %v9724_v24 }
 0x169   : > { %v3907_v20 = vpop.f32.mrf.mxu3 }
 0x16a   : > { %v3738_v39 = vpop.f32.mrf.mxu2 }
 0x16b   : > { %v3739_v43 = vadd.f32 %v3738_v39, %v9678_v62  ;;  %v3418_v10 = vpop.f32.mrf.mxu0  ;;  %v9740_v25 = vpop.permute.xlu0 %1261  ;;  %v8805_v39 = vld [vmem:[#allocation2 + $0x664] sm:$0xf0] }
 0x16c   : > { %v3419_v0 = vadd.f32 %v3418_v10, %v9506_v7  ;;  %v3587_v40 = vpop.f32.mrf.mxu1  ;;  %11619 = vst [vmem:[#allocation26_spill] sm:$0xff] %v9740_v25  ;;  %v8776_v10 = vld [vmem:[#allocation2 + $0x57c] sm:$0xf0] }
 0x16d   : > { %v9734_v24 = vadd.f32 %v3907_v20, %v3739_v43  ;;  %v7288_v43 = vld [vmem:[#allocation2 + $0x558] sm:$0xf]  ;;  %v8771_v20 = vld [vmem:[#allocation2 + $0x55c] sm:$0xf] }
 0x16e   : > { %v9736_v3 = vadd.f32 %v3587_v40, %v3419_v0  ;;  %3457 = vmatmul.bf16.gmra.mxu0 %v7361_v15  ;;  %3949 = vmatmul.bf16.gmra.mxu3 %v7253_v60  ;;  %v8800_v15 = vld [vmem:[#allocation2 + $0x644] sm:$0xf]  ;;  %v9748_v60 = vpop.permute.xlu2 %1186  ;;  %v7401_v0 = vor.u32 %v8805_v39, %v7400_v47 }
 0x16f   : > { %11618 = vst [vmem:[#allocation25_spill] sm:$0xff] %v9734_v24  ;;  %3626 = vmatmul.bf16.gmra.mxu1 %v7365_v50  ;;  %3780 = vmatmul.bf16.gmra.mxu2 %v7249_v13  ;;  %v7402_v50 = vld [vmem:[#allocation2 + $0x668] sm:$0xf0]  ;;  %v7290_v13 = vld [vmem:[#allocation2 + $0x580] sm:$0xf0] }
 0x170   : > { %v7405_v40 = vor.u32 %v8800_v15, %v7402_v50 }
 0x171   : > { %v3910_v31 = vpop.f32.mrf.mxu3 }
 0x172   : > { %v3741_v19 = vpop.f32.mrf.mxu2 }
 0x173   : > { %v3742_v62 = vadd.f32 %v3741_v19, %v9686_v5  ;;  %v3420_v21 = vpop.f32.mrf.mxu0  ;;  %v9750_v19 = vpop.permute.xlu1 %1166 }
 0x174   : > { %v3421_v7 = vadd.f32 %v3420_v21, %v9508_v8  ;;  %v3589_v23 = vpop.f32.mrf.mxu1  ;;  %v9754_v24 = vpop.permute.xlu0 %1246 }
 0x175   : > { %v9744_v38 = vadd.f32 %v3910_v31, %v3742_v62  ;;  %v7289_v31 = vor.u32 %v8776_v10, %v7288_v43 }
 0x176   : > { %v9746_v48 = vadd.f32 %v3589_v23, %v3421_v7  ;;  %v7293_v7 = vor.u32 %v8771_v20, %v7290_v13  ;;  %v9760_v39 = vpop.permute.xlu2 %1271  ;;  %v7440_v13 = vld [vmem:[#allocation2 + $0x690] sm:$0xf] }
 0x177   : > { %11620 = vst [vmem:[#allocation27_spill] sm:$0xff] %v9744_v38 }
 0x178   : > { %11622 = vst [vmem:[#allocation29_spill] sm:$0xff] %v9760_v39 }
 0x179   : > { %v3912_v21 = vpop.f32.mrf.mxu3 }
 0x17a   : > { %v3743_v5 = vpop.f32.mrf.mxu2 }
 0x17b   : > { %v3744_v8 = vadd.f32 %v3743_v5, %v9694_v51  ;;  %v3423_v62 = vpop.f32.mrf.mxu0  ;;  %v9764_v10 = vpop.permute.xlu1 %1251  ;;  %v8815_v5 = vld [vmem:[#allocation2 + $0x6b4] sm:$0xf0] }
 0x17c   : > { %v3424_v23 = vadd.f32 %v3423_v62, %v9471_v22  ;;  %v3592_v38 = vpop.f32.mrf.mxu1  ;;  %v7328_v62 = vld [vmem:[#allocation2 + $0x5a8] sm:$0xf] }
 0x17d   : > { %v9756_v29 = vadd.f32 %v3912_v21, %v3744_v8  ;;  %v7442_v8 = vld [vmem:[#allocation2 + $0x6b8] sm:$0xf0]  ;;  %v8786_v21 = vld [vmem:[#allocation2 + $0x5cc] sm:$0xf0] }
 0x17e   : > { %v9758_v57 = vadd.f32 %v3592_v38, %v3424_v23  ;;  %3462 = vmatmul.bf16.gmra.mxu0 %v7401_v0  ;;  %3954 = vmatmul.bf16.gmra.mxu3 %v7293_v7  ;;  %v9770_v0 = vpop.permute.xlu0 %1161  ;;  %v7441_v23 = vor.u32 %v8815_v5, %v7440_v13 }
 0x17f   : > { %11621 = vst [vmem:[#allocation28_spill] sm:$0xff] %v9756_v29  ;;  %3631 = vmatmul.bf16.gmra.mxu1 %v7405_v40  ;;  %3785 = vmatmul.bf16.gmra.mxu2 %v7289_v31  ;;  %v8810_v40 = vld [vmem:[#allocation2 + $0x694] sm:$0xf]  ;;  %v9774_v29 = vpop.permute.xlu2 %1256 }
 0x180   : > { %v7330_v31 = vld [vmem:[#allocation2 + $0x5d0] sm:$0xf0]  ;;  %11624 = vst [vmem:[#allocation31_spill] sm:$0xff] %v9774_v29  ;;  %v8559_v29 = vld [vmem:[%s9334_s23 + $0x138] sm:$0xff] }
 0x181   : > { %v3915_v50 = vpop.f32.mrf.mxu3  ;;  %4030 = vmatpush.bf16.msrb.mxu0 %v8559_v29 }
 0x182   : > { %v3746_v47 = vpop.f32.mrf.mxu2 }
 0x183   : > { %v3747_v51 = vadd.f32 %v3746_v47, %v9703_v18  ;;  %v3425_v15 = vpop.f32.mrf.mxu0  ;;  %v8781_v18 = vld [vmem:[#allocation2 + $0x5ac] sm:$0xf]  ;;  %v9780_v46 = vpop.permute.xlu1 %1236 }
 0x184   : > { %v3426_v22 = vadd.f32 %v3425_v15, %v9500_v54  ;;  %v3594_v43 = vpop.f32.mrf.mxu1  ;;  %v7445_v54 = vor.u32 %v8810_v40, %v7442_v8 }
 0x185   : > { %v9766_v20 = vadd.f32 %v3915_v50, %v3747_v51  ;;  %v7329_v50 = vor.u32 %v8786_v21, %v7328_v62 }
 0x186   : > { %v9768_v38 = vadd.f32 %v3594_v43, %v3426_v22  ;;  %v7333_v22 = vor.u32 %v8781_v18, %v7330_v31  ;;  %v7480_v18 = vld [vmem:[#allocation2 + $0x6e0] sm:$0xf]  ;;  %v8825_v31 = vld [vmem:[#allocation2 + $0x704] sm:$0xf0] }
 0x187   : > { %11623 = vst [vmem:[#allocation30_spill] sm:$0xff] %v9766_v20 }
 0x189   : > { %v3917_v51 = vpop.f32.mrf.mxu3 }
 0x18a   : > { %v3748_v7 = vpop.f32.mrf.mxu2 }
 0x18b   : > { %v3749_v47 = vadd.f32 %v3748_v7, %v9712_v55  ;;  %v3428_v15 = vpop.f32.mrf.mxu0  ;;  %v9782_v55 = vpop.permute.xlu0 %1146 }
 0x18c   : > { %v3429_v43 = vadd.f32 %v3428_v15, %v9482_v34  ;;  %v3597_v20 = vpop.f32.mrf.mxu1  ;;  %v9790_v7 = vpop.permute.xlu2 %1171  ;;  %v8796_v15 = vld [vmem:[#allocation2 + $0x61c] sm:$0xf0] }
 0x18d   : > { %v9776_v39 = vadd.f32 %v3917_v51, %v3749_v47  ;;  %v7368_v47 = vld [vmem:[#allocation2 + $0x5f8] sm:$0xf]  ;;  %v8791_v51 = vld [vmem:[#allocation2 + $0x5fc] sm:$0xf] }
 0x18e   : > { %v9778_v4 = vadd.f32 %v3597_v20, %v3429_v43  ;;  %3467 = vmatmul.bf16.gmra.mxu0 %v7441_v23  ;;  %3959 = vmatmul.bf16.gmra.mxu3 %v7333_v22  ;;  %v8820_v23 = vld [vmem:[#allocation2 + $0x6e4] sm:$0xf]  ;;  %v7481_v43 = vor.u32 %v8825_v31, %v7480_v18 }
 0x18f   : > { %11625 = vst [vmem:[#allocation32_spill] sm:$0xff] %v9776_v39  ;;  %3636 = vmatmul.bf16.gmra.mxu1 %v7445_v54  ;;  %3790 = vmatmul.bf16.gmra.mxu2 %v7329_v50  ;;  %v7482_v54 = vld [vmem:[#allocation2 + $0x708] sm:$0xf0]  ;;  %v7370_v50 = vld [vmem:[#allocation2 + $0x620] sm:$0xf0] }
 0x191   : > { %v3920_v34 = vpop.f32.mrf.mxu3 }
 0x192   : > { %v3751_v13 = vpop.f32.mrf.mxu2 }
 0x193   : > { %v3752_v5 = vadd.f32 %v3751_v13, %v9718_v63  ;;  %v3430_v40 = vpop.f32.mrf.mxu0  ;;  %v9792_v63 = vpop.permute.xlu1 %1151 }
 0x194   : > { %v3431_v8 = vadd.f32 %v3430_v40, %v9465_v11  ;;  %v3599_v62 = vpop.f32.mrf.mxu1  ;;  %v7485_v11 = vor.u32 %v8820_v23, %v7482_v54  ;;  %v9794_v13 = vpop.permute.xlu0 %1231 }
 0x195   : > { %v9786_v21 = vadd.f32 %v3920_v34, %v3752_v5  ;;  %v9802_v18 = vpop.permute.xlu2 %1156 }
 0x196   : > { %v9788_v20 = vadd.f32 %v3599_v62, %v3431_v8  ;;  %v7369_v8 = vor.u32 %v8796_v15, %v7368_v47  ;;  %v7373_v62 = vor.u32 %v8791_v51, %v7370_v50  ;;  %v7520_v50 = vld [vmem:[#allocation2 + $0x730] sm:$0xf] }
 0x197   : > { %11626 = vst [vmem:[#allocation33_spill] sm:$0xff] %v9786_v21 }
 0x199   : > { %v3922_v34 = vpop.f32.mrf.mxu3 }
 0x19a   : > { %v3753_v22 = vpop.f32.mrf.mxu2 }
 0x19b   : > { %v3754_v5 = vadd.f32 %v3753_v22, %v9726_v1  ;;  %v3433_v40 = vpop.f32.mrf.mxu0  ;;  %v9804_v23 = vpop.permute.xlu1 %1136  ;;  %v8835_v22 = vld [vmem:[#allocation2 + $0x754] sm:$0xf0] }
 0x19c   : > { %v3434_v21 = vadd.f32 %v3433_v40, %v9475_v28  ;;  %v3602_v39 = vpop.f32.mrf.mxu1  ;;  %v8806_v40 = vld [vmem:[#allocation2 + $0x66c] sm:$0xf0] }
 0x19d   : > { %v9798_v30 = vadd.f32 %v3922_v34, %v3754_v5  ;;  %v7408_v5 = vld [vmem:[#allocation2 + $0x648] sm:$0xf]  ;;  %v8801_v34 = vld [vmem:[#allocation2 + $0x64c] sm:$0xf] }
 0x19e   : > { %v9800_v42 = vadd.f32 %v3602_v39, %v3434_v21  ;;  %3472 = vmatmul.bf16.gmra.mxu0 %v7481_v43  ;;  %3964 = vmatmul.bf16.gmra.mxu3 %v7373_v62  ;;  %v9810_v39 = vpop.permute.xlu0 %1216  ;;  %v8830_v43 = vld [vmem:[#allocation2 + $0x734] sm:$0xf]  ;;  %v7521_v62 = vor.u32 %v8835_v22, %v7520_v50 }
 0x19f   : > { %11627 = vst [vmem:[#allocation34_spill] sm:$0xff] %v9798_v30  ;;  %3641 = vmatmul.bf16.gmra.mxu1 %v7485_v11  ;;  %3795 = vmatmul.bf16.gmra.mxu2 %v7369_v8  ;;  %v7522_v11 = vld [vmem:[#allocation2 + $0x758] sm:$0xf0]  ;;  %v7410_v8 = vld [vmem:[#allocation2 + $0x670] sm:$0xf0]  ;;  %v9814_v30 = vpop.permute.xlu2 %1241 }
 0x1a1   : > { %v3925_v47 = vpop.f32.mrf.mxu3 }
 0x1a2   : > { %v3756_v31 = vpop.f32.mrf.mxu2 }
 0x1a3   : > { %v3757_v1 = vadd.f32 %v3756_v31, %v9736_v3  ;;  %v3435_v54 = vpop.f32.mrf.mxu0  ;;  %v7525_v31 = vor.u32 %v8830_v43, %v7522_v11  ;;  %v9820_v36 = vpop.permute.xlu1 %1221 }
 0x1a4   : > { %v3436_v28 = vadd.f32 %v3435_v54, %v9473_v27  ;;  %v3604_v15 = vpop.f32.mrf.mxu1 }
 0x1a5   : > { %v9808_v51 = vadd.f32 %v3925_v47, %v3757_v1  ;;  %v7409_v47 = vor.u32 %v8806_v40, %v7408_v5 }
 0x1a6   : > { %v9812_v21 = vadd.f32 %v3604_v15, %v3436_v28  ;;  %v7413_v28 = vor.u32 %v8801_v34, %v7410_v8  ;;  %v9824_v50 = vpop.permute.xlu0 %1131 }
 0x1a7   : > { %11628 = vst [vmem:[#allocation35_spill] sm:$0xff] %v9808_v51  ;;  %v9833_v34 = vpop.permute.xlu2 %1226 }
 0x1a9   : > { %v3927_v54 = vpop.f32.mrf.mxu3 }
 0x1aa   : > { %v3758_v3 = vpop.f32.mrf.mxu2 }
 0x1ab   : > { %v3759_v27 = vadd.f32 %v3758_v3, %v9746_v48  ;;  %v3438_v1 = vpop.f32.mrf.mxu0  ;;  %v939_v48 = vld [vmem:[%s11591_s2 + $0x188] sm:$0xff]  ;;  %v7560_v3 = vld [vmem:[#allocation2 + $0x780] sm:$0xf] }
 0x1ac   : > { %v3439_v15 = vadd.f32 %v3438_v1, %v9461_v9  ;;  %v3607_v51 = vpop.f32.mrf.mxu1  ;;  %1201 = vperm.xlu0 %9077, %v939_v48   ;;  %v7562_v1 = vld [vmem:[#allocation2 + $0x7a8] sm:$0xf0] }
 0x1ad   : > { %v9818_v26 = vadd.f32 %v3927_v54, %v3759_v27  ;;  %v9840_v27 = vpop.permute.xlu1 %1206  ;;  %v7448_v54 = vld [vmem:[#allocation2 + $0x698] sm:$0xf] }
 0x1ae   : > { %v9822_v25 = vadd.f32 %v3607_v51, %v3439_v15  ;;  %3477 = vmatmul.bf16.gmra.mxu0 %v7521_v62  ;;  %3969 = vmatmul.bf16.gmra.mxu3 %v7413_v28  ;;  %v8845_v62 = vld [vmem:[#allocation2 + $0x7a4] sm:$0xf0]  ;;  %v7450_v28 = vld [vmem:[#allocation2 + $0x6c0] sm:$0xf0]  ;;  %v1117_v15 = vpop.permute.xlu0 %1116 }
 0x1af   : > { %11629 = vst [vmem:[#allocation36_spill] sm:$0xff] %v9818_v26  ;;  %3646 = vmatmul.bf16.gmra.mxu1 %v7525_v31  ;;  %3800 = vmatmul.bf16.gmra.mxu2 %v7409_v47  ;;  %v941_v31 = vld [vmem:[%s11591_s2 + $0x198] sm:$0xff] }
 0x1b0   : > { %1211 = vperm.xlu2 %9079, %v941_v31   ;;  %v8811_v47 = vld [vmem:[#allocation2 + $0x69c] sm:$0xf]  ;;  %v9847_v31 = vpop.permute.xlu2 %1141 }
 0x1b1   : > { %v3930_v11 = vpop.f32.mrf.mxu3 }
 0x1b2   : > { %v3761_v22 = vpop.f32.mrf.mxu2 }
 0x1b3   : > { %v3762_v9 = vadd.f32 %v3761_v22, %v9758_v57  ;;  %v3440_v43 = vpop.f32.mrf.mxu0  ;;  %v8840_v57 = vld [vmem:[#allocation2 + $0x784] sm:$0xf]  ;;  %v7561_v22 = vor.u32 %v8845_v62, %v7560_v3 }
 0x1b4   : > { %v3441_v5 = vadd.f32 %v3440_v43, %v9467_v14  ;;  %v3609_v51 = vpop.f32.mrf.mxu1  ;;  %v8816_v14 = vld [vmem:[#allocation2 + $0x6bc] sm:$0xf0] }
 0x1b5   : > { %v9831_v40 = vadd.f32 %v3930_v11, %v3762_v9  ;;  %v7565_v9 = vor.u32 %v8840_v57, %v7562_v1  ;;  %v1122_v3 = vpop.permute.xlu1 %1121 }
 0x1b6   : > { %v9835_v8 = vadd.f32 %v3609_v51, %v3441_v5  ;;  %v7449_v51 = vor.u32 %v8816_v14, %v7448_v54 }
 0x1b7   : > { %11630 = vst [vmem:[#allocation37_spill] sm:$0xff] %v9831_v40  ;;  %v7453_v40 = vor.u32 %v8811_v47, %v7450_v28  ;;  %v8855_v28 = vld [vmem:[#allocation2 + $0x7f4] sm:$0xf0] }
 0x1b9   : > { %v3932_v5 = vpop.f32.mrf.mxu3 }
 0x1ba   : > { %v3763_v48 = vpop.f32.mrf.mxu2 }
 0x1bb   : > { %v3764_v43 = vadd.f32 %v3763_v48, %v9768_v38  ;;  %v3443_v11 = vpop.f32.mrf.mxu0  ;;  %v938_v38 = vld [vmem:[%s11591_s2 + $0x180] sm:$0xff]  ;;  %v7602_v48 = vld [vmem:[#allocation2 + $0x7f8] sm:$0xf0] }
 0x1bc   : > { %v3444_v26 = vadd.f32 %v3443_v11, %v1117_v15  ;;  %v3612_v59 = vpop.f32.mrf.mxu1  ;;  %1196 = vperm.xlu2 %9079, %v938_v38   ;;  %v8850_v15 = vld [vmem:[#allocation2 + $0x7d4] sm:$0xf] }
 0x1bd   : > { %v9843_v53 = vadd.f32 %v3932_v5, %v3764_v43  ;;  %v8821_v43 = vld [vmem:[#allocation2 + $0x6ec] sm:$0xf]  ;;  %v7490_v11 = vld [vmem:[#allocation2 + $0x710] sm:$0xf0]  ;;  %v1127_v5 = vpop.permute.xlu2 %1126  ;;  %v7605_v38 = vor.u32 %v8850_v15, %v7602_v48 }
 0x1be   : > { %v9845_v58 = vadd.f32 %v3612_v59, %v3444_v26  ;;  %3482 = vmatmul.bf16.gmra.mxu0 %v7561_v22  ;;  %3974 = vmatmul.bf16.gmra.mxu3 %v7453_v40  ;;  %v7600_v40 = vld [vmem:[#allocation2 + $0x7d0] sm:$0xf]  ;;  %v7488_v22 = vld [vmem:[#allocation2 + $0x6e8] sm:$0xf] }
 0x1bf   : > { %11631 = vst [vmem:[#allocation38_spill] sm:$0xff] %v9843_v53  ;;  %3651 = vmatmul.bf16.gmra.mxu1 %v7565_v9  ;;  %3805 = vmatmul.bf16.gmra.mxu2 %v7449_v51  ;;  %v8826_v9 = vld [vmem:[#allocation2 + $0x70c] sm:$0xf0]  ;;  %v7601_v51 = vor.u32 %v8855_v28, %v7600_v40 }
 0x1c0   : > { %v8558_v40 = vld [vmem:[%s9334_s23 + $0x130] sm:$0xff] }
 0x1c1   : > { %v3935_v54 = vpop.f32.mrf.mxu3  ;;  %v8566_v28 = vld [vmem:[%s9334_s23 + $0x170] sm:$0xff]  ;;  %4031 = vmatpush.bf16.msrb.mxu0 %v8558_v40 }
 0x1c2   : > { %v3766_v62 = vpop.f32.mrf.mxu2  ;;  %4200 = vmatpush.bf16.msrb.mxu1 %v8566_v28 }
 0x1c3   : > { %v3767_v57 = vadd.f32 %v3766_v62, %v9778_v4  ;;  %v3445_v1 = vpop.f32.mrf.mxu0 }
 0x1c4   : > { %v3446_v14 = vadd.f32 %v3445_v1, %v1122_v3  ;;  %v3614_v26 = vpop.f32.mrf.mxu1  ;;  %v7489_v1 = vor.u32 %v8826_v9, %v7488_v22 }
 0x1c5   : > { %v9853_v59 = vadd.f32 %v3935_v54, %v3767_v57  ;;  %v7493_v54 = vor.u32 %v8821_v43, %v7490_v11 }
 0x1c6   : > { %v9855_v47 = vadd.f32 %v3614_v26, %v3446_v14 }
 0x1c7   : > { %11632 = vst [vmem:[#allocation39_spill] sm:$0xff] %v9853_v59 }
 0x1c9   : > { %v3937_v57 = vpop.f32.mrf.mxu3 }
 0x1ca   : > { %v3768_v4 = vpop.f32.mrf.mxu2 }
 0x1cb   : > { %v3769_v3 = vadd.f32 %v3768_v4, %v9788_v20  ;;  %v3448_v62 = vpop.f32.mrf.mxu0  ;;  %v8557_v4 = vld [vmem:[%s9334_s23 + $0x128] sm:$0xff] }
 0x1cc   : > { %v3449_v14 = vadd.f32 %v3448_v62, %v1127_v5  ;;  %v3617_v26 = vpop.f32.mrf.mxu1  ;;  %v7640_v5 = vld [vmem:[#allocation2 + $0x820] sm:$0xf]  ;;  %4032 = vmatpush.bf16.msrb.mxu0 %v8557_v4 }
 0x1cd   : > { %v9858_v59 = vadd.f32 %v3937_v57, %v3769_v3  ;;  %v7642_v3 = vld [vmem:[#allocation2 + $0x848] sm:$0xf0]  ;;  %v8836_v62 = vld [vmem:[#allocation2 + $0x75c] sm:$0xf0]  ;;  %v8831_v57 = vld [vmem:[#allocation2 + $0x73c] sm:$0xf] }
 0x1ce   : > { %v9860_v53 = vadd.f32 %v3617_v26, %v3449_v14  ;;  %3487 = vmatmul.bf16.gmra.mxu0 %v7601_v51  ;;  %3979 = vmatmul.bf16.gmra.mxu3 %v7493_v54  ;;  %v8565_v51 = vld [vmem:[%s9334_s23 + $0x168] sm:$0xff]  ;;  %v7641_v54 = vor.u32 %v8865_v32, %v7640_v5  ;;  %v8556_v26 = vld [vmem:[%s9334_s23 + $0x120] sm:$0xff]  ;;  %v8555_v32 = vld [vmem:[%s9334_s23 + $0x118] sm:$0xff] }
 0x1cf   : > { %3656 = vmatmul.bf16.gmra.mxu1 %v7605_v38  ;;  %3810 = vmatmul.bf16.gmra.mxu2 %v7489_v1  ;;  %v8860_v38 = vld [vmem:[#allocation2 + $0x824] sm:$0xf] }
 0x1d0   : > { %v7530_v1 = vld [vmem:[#allocation2 + $0x760] sm:$0xf0]  ;;  %4201 = vmatpush.bf16.msrb.mxu1 %v8565_v51  ;;  %v7645_v14 = vor.u32 %v8860_v38, %v7642_v3  ;;  %4033 = vmatpush.bf16.msrb.mxu0 %v8556_v26  ;;  %v8563_v51 = vld [vmem:[%s9334_s23 + $0x158] sm:$0xff]  ;;  %v8562_v38 = vld [vmem:[%s9334_s23 + $0x150] sm:$0xff] }
 0x1d1   : > { %v3940_v22 = vpop.f32.mrf.mxu3  ;;  %v8875_v26 = vld [vmem:[#allocation2 + $0x894] sm:$0xf0] }
 0x1d2   : > { %v3771_v20 = vpop.f32.mrf.mxu2 }
 0x1d3   : > { %v3772_v15 = vadd.f32 %v3771_v20, %v9800_v42  ;;  %v3450_v48 = vpop.f32.mrf.mxu0  ;;  %v7528_v42 = vld [vmem:[#allocation2 + $0x738] sm:$0xf]  ;;  %v8564_v20 = vld [vmem:[%s9334_s23 + $0x160] sm:$0xff] }
 0x1d4   : > { %v3451_v9 = vadd.f32 %v3450_v48, %v9824_v50  ;;  %v3619_v43 = vpop.f32.mrf.mxu1  ;;  %v7529_v48 = vor.u32 %v8836_v62, %v7528_v42  ;;  %4202 = vmatpush.bf16.msrb.mxu1 %v8564_v20  ;;  %4034 = vmatpush.bf16.msrb.mxu0 %v8555_v32  ;;  %v8553_v20 = vld [vmem:[%s9334_s23 + $0x108] sm:$0xff] }
 0x1d5   : > { %v9868_v11 = vadd.f32 %v3940_v22, %v3772_v15  ;;  %v7533_v22 = vor.u32 %v8831_v57, %v7530_v1 }
 0x1d6   : > { %v9870_v29 = vadd.f32 %v3619_v43, %v3451_v9 }
 0x1d8   : > { %4203 = vmatpush.bf16.msrb.mxu1 %v8563_v51  ;;  %v8552_v51 = vld [vmem:[%s9334_s23 + $0x100] sm:$0xff] }
 0x1d9   : > { %v3942_v15 = vpop.f32.mrf.mxu3 }
 0x1da   : > { %v3773_v50 = vpop.f32.mrf.mxu2 }
 0x1db   : > { %v3774_v40 = vadd.f32 %v3773_v50, %v9812_v21  ;;  %v3453_v28 = vpop.f32.mrf.mxu0 }
 0x1dc   : > { %v3454_v9 = vadd.f32 %v3453_v28, %v9804_v23  ;;  %v3622_v43 = vpop.f32.mrf.mxu1  ;;  %v8554_v23 = vld [vmem:[%s9334_s23 + $0x110] sm:$0xff]  ;;  %4204 = vmatpush.bf16.msrb.mxu1 %v8562_v38 }
 0x1dd   : > { %v9878_v4 = vadd.f32 %v3942_v15, %v3774_v40  ;;  %4035 = vmatpush.bf16.msrb.mxu0 %v8554_v23  ;;  %v8561_v40 = vld [vmem:[%s9334_s23 + $0x148] sm:$0xff]  ;;  %v8870_v28 = vld [vmem:[#allocation2 + $0x874] sm:$0xf]  ;;  %v7682_v15 = vld [vmem:[#allocation2 + $0x898] sm:$0xf0] }
 0x1de   : > { %v9880_v5 = vadd.f32 %v3622_v43, %v3454_v9  ;;  %3492 = vmatmul.bf16.gmra.mxu0 %v7641_v54  ;;  %3984 = vmatmul.bf16.gmra.mxu3 %v7533_v22  ;;  %v7680_v54 = vld [vmem:[#allocation2 + $0x870] sm:$0xf]  ;;  %v8841_v22 = vld [vmem:[#allocation2 + $0x78c] sm:$0xf]  ;;  %v7570_v9 = vld [vmem:[#allocation2 + $0x7b0] sm:$0xf0]  ;;  %v7685_v32 = vor.u32 %v8870_v28, %v7682_v15 }
 0x1df   : > { %3661 = vmatmul.bf16.gmra.mxu1 %v7645_v14  ;;  %3815 = vmatmul.bf16.gmra.mxu2 %v7529_v48  ;;  %v8846_v48 = vld [vmem:[#allocation2 + $0x7ac] sm:$0xf0]  ;;  %v7681_v43 = vor.u32 %v8875_v26, %v7680_v54 }
 0x1e0   : > { %4205 = vmatpush.bf16.msrb.mxu1 %v8561_v40 }
 0x1e1   : > { %v3945_v62 = vpop.f32.mrf.mxu3  ;;  %4036 = vmatpush.bf16.msrb.mxu0 %v8553_v20 }
 0x1e2   : > { %v3776_v21 = vpop.f32.mrf.mxu2 }
 0x1e3   : > { %v3777_v3 = vadd.f32 %v3776_v21, %v9822_v25  ;;  %v3455_v42 = vpop.f32.mrf.mxu0  ;;  %v7568_v25 = vld [vmem:[#allocation2 + $0x788] sm:$0xf]  ;;  %v8560_v21 = vld [vmem:[%s9334_s23 + $0x140] sm:$0xff] }
 0x1e4   : > { %v3456_v57 = vadd.f32 %v3455_v42, %v9847_v31  ;;  %v3624_v1 = vpop.f32.mrf.mxu1  ;;  %v7569_v42 = vor.u32 %v8846_v48, %v7568_v25  ;;  %4206 = vmatpush.bf16.msrb.mxu1 %v8560_v21  ;;  %v7720_v48 = vld [vmem:[#allocation2 + $0x8c0] sm:$0xf]  ;;  %v7610_v21 = vld [vmem:[#allocation2 + $0x800] sm:$0xf0] }
 0x1e5   : > { %v9888_v50 = vadd.f32 %v3945_v62, %v3777_v3  ;;  %v7573_v62 = vor.u32 %v8841_v22, %v7570_v9  ;;  %4037 = vmatpush.bf16.msrb.mxu0 %v8552_v51  ;;  %v8885_v22 = vld [vmem:[#allocation2 + $0x8e4] sm:$0xf0]  ;;  %v8880_v9 = vld [vmem:[#allocation2 + $0x8c4] sm:$0xf]  ;;  %v8851_v51 = vld [vmem:[#allocation2 + $0x7dc] sm:$0xf] }
 0x1e6   : > { %v9890_v14 = vadd.f32 %v3624_v1, %v3456_v57 }
 0x1e7   : > { %11633 = vst [vmem:[#allocation40_spill] sm:$0xff] %v9888_v50 }
 0x1e9   : > { %v3947_v3 = vpop.f32.mrf.mxu3 }
 0x1ea   : > { %v3778_v31 = vpop.f32.mrf.mxu2 }
 0x1eb   : > { %v3779_v23 = vadd.f32 %v3778_v31, %v9835_v8  ;;  %v3458_v38 = vpop.f32.mrf.mxu0  ;;  %v7722_v31 = vld [vmem:[#allocation2 + $0x8e8] sm:$0xf0] }
 0x1ec   : > { %v3459_v57 = vadd.f32 %v3458_v38, %v9782_v55  ;;  %v3627_v1 = vpop.f32.mrf.mxu1  ;;  %v7721_v38 = vor.u32 %v8885_v22, %v7720_v48 }
 0x1ed   : > { %v9898_v50 = vadd.f32 %v3947_v3, %v3779_v23 }
 0x1ee   : > { %v9900_v20 = vadd.f32 %v3627_v1, %v3459_v57  ;;  %3497 = vmatmul.bf16.gmra.mxu0 %v7681_v43  ;;  %3989 = vmatmul.bf16.gmra.mxu3 %v7573_v62  ;;  %v7608_v43 = vld [vmem:[#allocation2 + $0x7d8] sm:$0xf]  ;;  %v7613_v57 = vor.u32 %v8851_v51, %v7610_v21  ;;  %v8602_v51 = vld [vmem:[#allocation2 + $0x14] sm:$0xf]  ;;  %v6618_v21 = vld [vmem:[#allocation2 + $0x38] sm:$0xf0] }
 0x1ef   : > { %3666 = vmatmul.bf16.gmra.mxu1 %v7685_v32  ;;  %3820 = vmatmul.bf16.gmra.mxu2 %v7569_v42  ;;  %v8856_v32 = vld [vmem:[#allocation2 + $0x7fc] sm:$0xf0] }
 0x1f0   : > { %v7609_v62 = vor.u32 %v8856_v32, %v7608_v43  ;;  %v6616_v43 = vld [vmem:[#allocation2 + $0x10] sm:$0xf]  ;;  %v8607_v32 = vld [vmem:[#allocation2 + $0x34] sm:$0xf0] }
 0x1f1   : > { %v3950_v40 = vpop.f32.mrf.mxu3 }
 0x1f2   : > { %v3781_v54 = vpop.f32.mrf.mxu2 }
 0x1f3   : > { %v3782_v8 = vadd.f32 %v3781_v54, %v9845_v58  ;;  %v3460_v26 = vpop.f32.mrf.mxu0  ;;  %v7725_v58 = vor.u32 %v8880_v9, %v7722_v31  ;;  %v7648_v31 = vld [vmem:[#allocation2 + $0x828] sm:$0xf] }
 0x1f4   : > { %v3461_v28 = vadd.f32 %v3460_v26, %v9792_v63  ;;  %v3629_v15 = vpop.f32.mrf.mxu1 }
 0x1f5   : > { %v9904_v55 = vadd.f32 %v3950_v40, %v3782_v8 }
 0x1f6   : > { %v9906_v25 = vadd.f32 %v3629_v15, %v3461_v28 }
 0x1f9   : > { %v3952_v63 = vpop.f32.mrf.mxu3 }
 0x1fa   : > { %v3783_v23 = vpop.f32.mrf.mxu2 }
 0x1fb   : > { %v3784_v3 = vadd.f32 %v3783_v23, %v9855_v47  ;;  %v3463_v42 = vpop.f32.mrf.mxu0  ;;  %v8866_v23 = vld [vmem:[#allocation2 + $0x84c] sm:$0xf0] }
 0x1fc   : > { %v3464_v1 = vadd.f32 %v3463_v42, %v9802_v18  ;;  %v3632_v54 = vpop.f32.mrf.mxu1  ;;  %v6617_v42 = vor.u32 %v8607_v32, %v6616_v43 }
 0x1fd   : > { %v9910_v8 = vadd.f32 %v3952_v63, %v3784_v3 }
 0x1fe   : > { %v9912_v26 = vadd.f32 %v3632_v54, %v3464_v1  ;;  %3502 = vmatmul.bf16.gmra.mxu0 %v7721_v38  ;;  %3994 = vmatmul.bf16.gmra.mxu3 %v7613_v57  ;;  %v8861_v38 = vld [vmem:[#allocation2 + $0x82c] sm:$0xf]  ;;  %v7649_v57 = vor.u32 %v8866_v23, %v7648_v31  ;;  %v8617_v23 = vld [vmem:[#allocation2 + $0x84] sm:$0xf0] }
 0x1ff   : > { %3671 = vmatmul.bf16.gmra.mxu1 %v7725_v58  ;;  %3825 = vmatmul.bf16.gmra.mxu2 %v7609_v62  ;;  %v7650_v58 = vld [vmem:[#allocation2 + $0x850] sm:$0xf0] }
 0x200   : > { %v7653_v1 = vor.u32 %v8861_v38, %v7650_v58  ;;  %v8612_v38 = vld [vmem:[#allocation2 + $0x64] sm:$0xf]  ;;  %v6658_v58 = vld [vmem:[#allocation2 + $0x88] sm:$0xf0] }
 0x201   : > { %v3955_v47 = vpop.f32.mrf.mxu3 }
 0x202   : > { %v3786_v40 = vpop.f32.mrf.mxu2 }
 0x203   : > { %v3787_v28 = vadd.f32 %v3786_v40, %v9860_v53  ;;  %v3465_v15 = vpop.f32.mrf.mxu0  ;;  %v6621_v53 = vor.u32 %v8602_v51, %v6618_v21  ;;  %v7688_v51 = vld [vmem:[#allocation2 + $0x878] sm:$0xf]  ;;  %v6656_v21 = vld [vmem:[#allocation2 + $0x60] sm:$0xf] }
 0x204   : > { %v3466_v48 = vadd.f32 %v3465_v15, %v9770_v0  ;;  %v3634_v22 = vpop.f32.mrf.mxu1 }
 0x205   : > { %v9916_v9 = vadd.f32 %v3955_v47, %v3787_v28 }
 0x206   : > { %v9918_v18 = vadd.f32 %v3634_v22, %v3466_v48 }
 0x209   : > { %v3957_v0 = vpop.f32.mrf.mxu3 }
 0x20a   : > { %v3788_v3 = vpop.f32.mrf.mxu2 }
 0x20b   : > { %v3789_v63 = vadd.f32 %v3788_v3, %v9870_v29  ;;  %v3468_v62 = vpop.f32.mrf.mxu0  ;;  %v8876_v3 = vld [vmem:[#allocation2 + $0x89c] sm:$0xf0] }
 0x20c   : > { %v3469_v54 = vadd.f32 %v3468_v62, %v9750_v19  ;;  %v3637_v40 = vpop.f32.mrf.mxu1  ;;  %v6657_v62 = vor.u32 %v8617_v23, %v6656_v21 }
 0x20d   : > { %v9922_v28 = vadd.f32 %v3957_v0, %v3789_v63 }
 0x20e   : > { %v9924_v15 = vadd.f32 %v3637_v40, %v3469_v54  ;;  %4038 = vmatmul.bf16.vlgmr.msrb.gmra.mxu0 %v6617_v42  ;;  %3999 = vmatmul.bf16.gmra.mxu3 %v7653_v1  ;;  %v8871_v42 = vld [vmem:[#allocation2 + $0x87c] sm:$0xf]  ;;  %v7689_v1 = vor.u32 %v8876_v3, %v7688_v51  ;;  %v8627_v3 = vld [vmem:[#allocation2 + $0xd4] sm:$0xf0] }
 0x20f   : > { %4207 = vmatmul.bf16.vlgmr.msrb.gmra.mxu1 %v6621_v53  ;;  %3830 = vmatmul.bf16.gmra.mxu2 %v7649_v57  ;;  %v7690_v53 = vld [vmem:[#allocation2 + $0x8a0] sm:$0xf0] }
 0x210   : > { %v7693_v54 = vor.u32 %v8871_v42, %v7690_v53  ;;  %v8622_v42 = vld [vmem:[#allocation2 + $0xb4] sm:$0xf]  ;;  %v6698_v53 = vld [vmem:[#allocation2 + $0xd8] sm:$0xf0] }
 0x211   : > { %v3960_v29 = vpop.f32.mrf.mxu3 }
 0x212   : > { %v3791_v47 = vpop.f32.mrf.mxu2 }
 0x213   : > { %v3792_v48 = vadd.f32 %v3791_v47, %v9880_v5  ;;  %v3470_v22 = vpop.f32.mrf.mxu0  ;;  %v6661_v5 = vor.u32 %v8612_v38, %v6658_v58  ;;  %v7728_v38 = vld [vmem:[#allocation2 + $0x8c8] sm:$0xf]  ;;  %v6696_v58 = vld [vmem:[#allocation2 + $0xb0] sm:$0xf] }
 0x214   : > { %v3471_v43 = vadd.f32 %v3470_v22, %v9790_v7  ;;  %v3639_v31 = vpop.f32.mrf.mxu1 }
 0x215   : > { %v9928_v32 = vadd.f32 %v3960_v29, %v3792_v48 }
 0x216   : > { %v9930_v19 = vadd.f32 %v3639_v31, %v3471_v43 }
 0x219   : > { %v3962_v7 = vpop.f32.mrf.mxu3 }
 0x21a   : > { %v3793_v63 = vpop.f32.mrf.mxu2 }
 0x21b   : > { %v3794_v0 = vadd.f32 %v3793_v63, %v9890_v14  ;;  %v3473_v57 = vpop.f32.mrf.mxu0  ;;  %v8886_v63 = vld [vmem:[#allocation2 + $0x8ec] sm:$0xf0] }
 0x21c   : > { %v3474_v40 = vadd.f32 %v3473_v57, %v9730_v45  ;;  %v3642_v47 = vpop.f32.mrf.mxu1  ;;  %v6701_v57 = vor.u32 %v8622_v42, %v6698_v53 }
 0x21d   : > { %v9934_v48 = vadd.f32 %v3962_v7, %v3794_v0 }
 0x21e   : > { %v9936_v22 = vadd.f32 %v3642_v47, %v3474_v40  ;;  %4043 = vmatmul.bf16.gmra.mxu0 %v6657_v62  ;;  %4004 = vmatmul.bf16.gmra.mxu3 %v7693_v54  ;;  %v8881_v62 = vld [vmem:[#allocation2 + $0x8cc] sm:$0xf]  ;;  %v7729_v54 = vor.u32 %v8886_v63, %v7728_v38  ;;  %v8574_v38 = vld [vmem:[%s9334_s23 + $0x1b0] sm:$0xff] }
 0x21f   : > { %4212 = vmatmul.bf16.gmra.mxu1 %v6661_v5  ;;  %3835 = vmatmul.bf16.gmra.mxu2 %v7689_v1  ;;  %v7730_v5 = vld [vmem:[#allocation2 + $0x8f0] sm:$0xf0] }
 0x220   : > { %v7733_v40 = vor.u32 %v8881_v62, %v7730_v5  ;;  %v8582_v63 = vld [vmem:[%s9334_s23 + $0x1f0] sm:$0xff] }
 0x221   : > { %v3965_v14 = vpop.f32.mrf.mxu3 }
 0x222   : > { %v3796_v29 = vpop.f32.mrf.mxu2 }
 0x223   : > { %v3797_v43 = vadd.f32 %v3796_v29, %v9900_v20  ;;  %v3475_v31 = vpop.f32.mrf.mxu0  ;;  %v6697_v20 = vor.u32 %v8627_v3, %v6696_v58 }
 0x224   : > { %v3476_v21 = vadd.f32 %v3475_v31, %v9738_v2  ;;  %v3644_v51 = vpop.f32.mrf.mxu1 }
 0x225   : > { %v9940_v23 = vadd.f32 %v3965_v14, %v3797_v43  ;;  %v8575_v14 = vld [vmem:[%s9334_s23 + $0x1b8] sm:$0xff] }
 0x226   : > { %v9942_v45 = vadd.f32 %v3644_v51, %v3476_v21  ;;  %4368 = vmatpush.bf16.msra.mxu2 %v8575_v14  ;;  %v8583_v21 = vld [vmem:[%s9334_s23 + $0x1f8] sm:$0xff] }
 0x227   : > { %4537 = vmatpush.bf16.msra.mxu3 %v8583_v21 }
 0x229   : > { %v3967_v1 = vpop.f32.mrf.mxu3 }
 0x22a   : > { %v3798_v0 = vpop.f32.mrf.mxu2  ;;  %4369 = vmatpush.bf16.msra.mxu2 %v8574_v38 }
 0x22b   : > { %v3799_v7 = vadd.f32 %v3798_v0, %v9906_v25  ;;  %v3478_v2 = vpop.f32.mrf.mxu0  ;;  %v9951_v25 = vpop.permute.xlu2 %1211  ;;  %v7768_v0 = vld [vmem:[#allocation2 + $0x918] sm:$0xf]  ;;  %4538 = vmatpush.bf16.msra.mxu3 %v8582_v63 }
 0x22c   : > { %v3479_v47 = vadd.f32 %v3478_v2, %v9748_v60  ;;  %v3647_v29 = vpop.f32.mrf.mxu1  ;;  %v8637_v2 = vld [vmem:[#allocation2 + $0x124] sm:$0xf0] }
 0x22d   : > { %v9946_v43 = vadd.f32 %v3967_v1, %v3799_v7  ;;  %v8573_v7 = vld [vmem:[%s9334_s23 + $0x1a8] sm:$0xff] }
 0x22e   : > { %v9948_v31 = vadd.f32 %v3647_v29, %v3479_v47  ;;  %4048 = vmatmul.bf16.gmra.mxu0 %v6697_v20  ;;  %4009 = vmatmul.bf16.gmra.mxu3 %v7733_v40  ;;  %v8896_v20 = vld [vmem:[#allocation2 + $0x93c] sm:$0xf0]  ;;  %v6738_v1 = vld [vmem:[#allocation2 + $0x128] sm:$0xf0]  ;;  %v7770_v40 = vld [vmem:[#allocation2 + $0x940] sm:$0xf0] }
 0x22f   : > { %11634 = vst [vmem:[#allocation41_spill] sm:$0xff] %v9946_v43  ;;  %4217 = vmatmul.bf16.gmra.mxu1 %v6701_v57  ;;  %3840 = vmatmul.bf16.gmra.mxu2 %v7729_v54  ;;  %v6736_v57 = vld [vmem:[#allocation2 + $0x100] sm:$0xf]  ;;  %v8891_v54 = vld [vmem:[#allocation2 + $0x91c] sm:$0xf] }
 0x230   : > { %4370 = vmatpush.bf16.msra.mxu2 %v8573_v7  ;;  %v6737_v14 = vor.u32 %v8637_v2, %v6736_v57  ;;  %v8580_v7 = vld [vmem:[%s9334_s23 + $0x1e0] sm:$0xff]  ;;  %v8571_v57 = vld [vmem:[%s9334_s23 + $0x198] sm:$0xff]  ;;  %v8570_v2 = vld [vmem:[%s9334_s23 + $0x190] sm:$0xff] }
 0x231   : > { %v3970_v3 = vpop.f32.mrf.mxu3 }
 0x232   : > { %v3801_v51 = vpop.f32.mrf.mxu2 }
 0x233   : > { %v3802_v60 = vadd.f32 %v3801_v51, %v9912_v26  ;;  %v3480_v58 = vpop.f32.mrf.mxu0  ;;  %v8632_v26 = vld [vmem:[#allocation2 + $0x104] sm:$0xf]  ;;  %v1197_v47 = vpop.permute.xlu2 %1196 }
 0x234   : > { %v3481_v42 = vadd.f32 %v3480_v58, %v9720_v44  ;;  %v3649_v53 = vpop.f32.mrf.mxu1  ;;  %v8581_v44 = vld [vmem:[%s9334_s23 + $0x1e8] sm:$0xff]  ;;  %v6741_v21 = vor.u32 %v8632_v26, %v6738_v1  ;;  %v8572_v51 = vld [vmem:[%s9334_s23 + $0x1a0] sm:$0xff] }
 0x235   : > { %v9958_v62 = vadd.f32 %v3970_v3, %v3802_v60  ;;  %4539 = vmatpush.bf16.msra.mxu3 %v8581_v44  ;;  %v7769_v3 = vor.u32 %v8896_v20, %v7768_v0  ;;  %4371 = vmatpush.bf16.msra.mxu2 %v8572_v51  ;;  %v1202_v0 = vpop.permute.xlu0 %1201  ;;  %v8906_v51 = vld [vmem:[#allocation2 + $0x98c] sm:$0xf0] }
 0x236   : > { %v9960_v5 = vadd.f32 %v3649_v53, %v3481_v42  ;;  %v7773_v42 = vor.u32 %v8891_v54, %v7770_v40 }
 0x237   : > { %11635 = vst [vmem:[#allocation42_spill] sm:$0xff] %v9958_v62 }
 0x239   : > { %v3972_v58 = vpop.f32.mrf.mxu3  ;;  %4540 = vmatpush.bf16.msra.mxu3 %v8580_v7  ;;  %4372 = vmatpush.bf16.msra.mxu2 %v8571_v57 }
 0x23a   : > { %v3803_v29 = vpop.f32.mrf.mxu2 }
 0x23b   : > { %v3804_v38 = vadd.f32 %v3803_v29, %v9918_v18  ;;  %v3483_v60 = vpop.f32.mrf.mxu0  ;;  %v8579_v18 = vld [vmem:[%s9334_s23 + $0x1d8] sm:$0xff] }
 0x23c   : > { %v3484_v53 = vadd.f32 %v3483_v60, %v1197_v47  ;;  %v3652_v63 = vpop.f32.mrf.mxu1  ;;  %v8578_v47 = vld [vmem:[%s9334_s23 + $0x1d0] sm:$0xff]  ;;  %v8569_v60 = vld [vmem:[%s9334_s23 + $0x188] sm:$0xff] }
 0x23d   : > { %v9967_v62 = vadd.f32 %v3972_v58, %v3804_v38  ;;  %4541 = vmatpush.bf16.msra.mxu3 %v8579_v18  ;;  %4373 = vmatpush.bf16.msra.mxu2 %v8570_v2  ;;  %v6776_v38 = vld [vmem:[#allocation2 + $0x150] sm:$0xf]  ;;  %v8647_v58 = vld [vmem:[#allocation2 + $0x174] sm:$0xf0] }
 0x23e   : > { %v9969_v43 = vadd.f32 %v3652_v63, %v3484_v53  ;;  %4053 = vmatmul.bf16.gmra.mxu0 %v6737_v14  ;;  %4014 = vmatmul.bf16.gmra.mxu3 %v7773_v42  ;;  %v8901_v42 = vld [vmem:[#allocation2 + $0x96c] sm:$0xf]  ;;  %v7810_v53 = vld [vmem:[#allocation2 + $0x990] sm:$0xf0]  ;;  %v6777_v57 = vor.u32 %v8647_v58, %v6776_v38 }
 0x23f   : > { %4222 = vmatmul.bf16.gmra.mxu1 %v6741_v21  ;;  %3845 = vmatmul.bf16.gmra.mxu2 %v7769_v3  ;;  %v7808_v21 = vld [vmem:[#allocation2 + $0x968] sm:$0xf]  ;;  %v8642_v3 = vld [vmem:[#allocation2 + $0x154] sm:$0xf] }
 0x240   : > { %v8577_v63 = vld [vmem:[%s9334_s23 + $0x1c8] sm:$0xff] }
 0x241   : > { %v3975_v54 = vpop.f32.mrf.mxu3  ;;  %4542 = vmatpush.bf16.msra.mxu3 %v8578_v47  ;;  %4374 = vmatpush.bf16.msra.mxu2 %v8569_v60 }
 0x242   : > { %v3806_v20 = vpop.f32.mrf.mxu2 }
 0x243   : > { %v3807_v26 = vadd.f32 %v3806_v20, %v9924_v15  ;;  %v3485_v1 = vpop.f32.mrf.mxu0  ;;  %v6778_v15 = vld [vmem:[#allocation2 + $0x178] sm:$0xf0] }
 0x244   : > { %v3486_v40 = vadd.f32 %v3485_v1, %v1202_v0  ;;  %v3654_v44 = vpop.f32.mrf.mxu1  ;;  %v6781_v18 = vor.u32 %v8642_v3, %v6778_v15  ;;  %v8568_v0 = vld [vmem:[%s9334_s23 + $0x180] sm:$0xff]  ;;  %v7809_v1 = vor.u32 %v8906_v51, %v7808_v21 }
 0x245   : > { %v9976_v29 = vadd.f32 %v3975_v54, %v3807_v26  ;;  %v7813_v54 = vor.u32 %v8901_v42, %v7810_v53  ;;  %4543 = vmatpush.bf16.msra.mxu3 %v8577_v63  ;;  %4375 = vmatpush.bf16.msra.mxu2 %v8568_v0  ;;  %v7848_v42 = vld [vmem:[#allocation2 + $0x9b8] sm:$0xf]  ;;  %v6816_v53 = vld [vmem:[#allocation2 + $0x1a0] sm:$0xf]  ;;  %v8657_v63 = vld [vmem:[#allocation2 + $0x1c4] sm:$0xf0] }
 0x246   : > { %v9978_v14 = vadd.f32 %v3654_v44, %v3486_v40  ;;  %v8911_v0 = vld [vmem:[#allocation2 + $0x9bc] sm:$0xf] }
 0x247   : > { %11636 = vst [vmem:[#allocation43_spill] sm:$0xff] %v9976_v29  ;;  %v8576_v29 = vld [vmem:[%s9334_s23 + $0x1c0] sm:$0xff] }
 0x249   : > { %v3977_v26 = vpop.f32.mrf.mxu3  ;;  %4544 = vmatpush.bf16.msra.mxu3 %v8576_v29  ;;  %v7850_v29 = vld [vmem:[#allocation2 + $0x9e0] sm:$0xf0] }
 0x24a   : > { %v3808_v7 = vpop.f32.mrf.mxu2 }
 0x24b   : > { %v3809_v20 = vadd.f32 %v3808_v7, %v9930_v19  ;;  %v3488_v2 = vpop.f32.mrf.mxu0  ;;  %v8652_v7 = vld [vmem:[#allocation2 + $0x1a4] sm:$0xf] }
 0x24c   : > { %v3489_v40 = vadd.f32 %v3488_v2, %v9840_v27  ;;  %v3657_v44 = vpop.f32.mrf.mxu1  ;;  %v6817_v2 = vor.u32 %v8657_v63, %v6816_v53 }
 0x24d   : > { %v9986_v47 = vadd.f32 %v3977_v26, %v3809_v20 }
 0x24e   : > { %v9988_v60 = vadd.f32 %v3657_v44, %v3489_v40  ;;  %4058 = vmatmul.bf16.gmra.mxu0 %v6777_v57  ;;  %4019 = vmatmul.bf16.gmra.mxu3 %v7813_v54  ;;  %v6818_v57 = vld [vmem:[#allocation2 + $0x1c8] sm:$0xf0]  ;;  %v7853_v40 = vor.u32 %v8911_v0, %v7850_v29  ;;  %v6858_v0 = vld [vmem:[#allocation2 + $0x218] sm:$0xf0]  ;;  %v6624_v29 = vld [vmem:[#allocation2 + $0x18] sm:$0xf] }
 0x24f   : > { %4227 = vmatmul.bf16.gmra.mxu1 %v6781_v18  ;;  %3850 = vmatmul.bf16.gmra.mxu2 %v7809_v1  ;;  %v8916_v18 = vld [vmem:[#allocation2 + $0x9dc] sm:$0xf0] }
 0x250   : > { %v7849_v54 = vor.u32 %v8916_v18, %v7848_v42  ;;  %v8662_v18 = vld [vmem:[#allocation2 + $0x1f4] sm:$0xf] }
 0x251   : > { %v3980_v51 = vpop.f32.mrf.mxu3 }
 0x252   : > { %v3811_v19 = vpop.f32.mrf.mxu2 }
 0x253   : > { %v3812_v38 = vadd.f32 %v3811_v19, %v9936_v22  ;;  %v3490_v21 = vpop.f32.mrf.mxu0  ;;  %v6821_v22 = vor.u32 %v8652_v7, %v6818_v57  ;;  %v6856_v7 = vld [vmem:[#allocation2 + $0x1f0] sm:$0xf]  ;;  %v8667_v57 = vld [vmem:[#allocation2 + $0x214] sm:$0xf0] }
 0x254   : > { %v3491_v27 = vadd.f32 %v3490_v21, %v9951_v25  ;;  %v3659_v58 = vpop.f32.mrf.mxu1 }
 0x255   : > { %v9992_v3 = vadd.f32 %v3980_v51, %v3812_v38 }
 0x256   : > { %v9994_v15 = vadd.f32 %v3659_v58, %v3491_v27 }
 0x259   : > { %v3982_v25 = vpop.f32.mrf.mxu3 }
 0x25a   : > { %v3813_v20 = vpop.f32.mrf.mxu2 }
 0x25b   : > { %v3814_v26 = vadd.f32 %v3813_v20, %v9942_v45  ;;  %v3493_v1 = vpop.f32.mrf.mxu0  ;;  %v8608_v20 = vld [vmem:[#allocation2 + $0x3c] sm:$0xf0] }
 0x25c   : > { %v3494_v44 = vadd.f32 %v3493_v1, %v9810_v39  ;;  %v3662_v19 = vpop.f32.mrf.mxu1  ;;  %v6857_v1 = vor.u32 %v8667_v57, %v6856_v7 }
 0x25d   : > { %v9998_v38 = vadd.f32 %v3982_v25, %v3814_v26 }
 0x25e   : > { %v10000_v21 = vadd.f32 %v3662_v19, %v3494_v44  ;;  %4063 = vmatmul.bf16.gmra.mxu0 %v6817_v2  ;;  %4024 = vmatmul.bf16.gmra.mxu3 %v7853_v40  ;;  %v8603_v2 = vld [vmem:[#allocation2 + $0x1c] sm:$0xf]  ;;  %v6625_v40 = vor.u32 %v8608_v20, %v6624_v29  ;;  %v8677_v29 = vld [vmem:[#allocation2 + $0x264] sm:$0xf0]  ;;  %v8672_v20 = vld [vmem:[#allocation2 + $0x244] sm:$0xf] }
 0x25f   : > { %4232 = vmatmul.bf16.gmra.mxu1 %v6821_v22  ;;  %3855 = vmatmul.bf16.gmra.mxu2 %v7849_v54  ;;  %v6626_v22 = vld [vmem:[#allocation2 + $0x40] sm:$0xf0] }
 0x260   : > { %v6629_v44 = vor.u32 %v8603_v2, %v6626_v22  ;;  %v6898_v2 = vld [vmem:[#allocation2 + $0x268] sm:$0xf0]  ;;  %v6664_v22 = vld [vmem:[#allocation2 + $0x68] sm:$0xf] }
 0x261   : > { %v3985_v45 = vpop.f32.mrf.mxu3 }
 0x262   : > { %v3816_v51 = vpop.f32.mrf.mxu2 }
 0x263   : > { %v3817_v27 = vadd.f32 %v3816_v51, %v9948_v31  ;;  %v3495_v58 = vpop.f32.mrf.mxu0  ;;  %v6861_v31 = vor.u32 %v8662_v18, %v6858_v0  ;;  %v6896_v0 = vld [vmem:[#allocation2 + $0x240] sm:$0xf] }
 0x264   : > { %v3496_v53 = vadd.f32 %v3495_v58, %v9820_v36  ;;  %v3664_v42 = vpop.f32.mrf.mxu1 }
 0x265   : > { %v10004_v63 = vadd.f32 %v3985_v45, %v3817_v27 }
 0x266   : > { %v10006_v39 = vadd.f32 %v3664_v42, %v3496_v53 }
 0x269   : > { %v3987_v36 = vpop.f32.mrf.mxu3 }
 0x26a   : > { %v3818_v26 = vpop.f32.mrf.mxu2 }
 0x26b   : > { %v3819_v25 = vadd.f32 %v3818_v26, %v9960_v5  ;;  %v3498_v54 = vpop.f32.mrf.mxu0  ;;  %v8618_v26 = vld [vmem:[#allocation2 + $0x8c] sm:$0xf0] }
 0x26c   : > { %v3499_v19 = vadd.f32 %v3498_v54, %v9833_v34  ;;  %v3667_v51 = vpop.f32.mrf.mxu1  ;;  %v6897_v54 = vor.u32 %v8677_v29, %v6896_v0 }
 0x26d   : > { %v10010_v27 = vadd.f32 %v3987_v36, %v3819_v25 }
 0x26e   : > { %v10012_v58 = vadd.f32 %v3667_v51, %v3499_v19  ;;  %4068 = vmatmul.bf16.gmra.mxu0 %v6857_v1  ;;  %4545 = vmatmul.bf16.vlgmr.msra.gmra.mxu3 %v6629_v44  ;;  %v8613_v1 = vld [vmem:[#allocation2 + $0x6c] sm:$0xf]  ;;  %v6665_v44 = vor.u32 %v8618_v26, %v6664_v22  ;;  %v8687_v22 = vld [vmem:[#allocation2 + $0x2b4] sm:$0xf0]  ;;  %v8682_v26 = vld [vmem:[#allocation2 + $0x294] sm:$0xf] }
 0x26f   : > { %4237 = vmatmul.bf16.gmra.mxu1 %v6861_v31  ;;  %4376 = vmatmul.bf16.vlgmr.msra.gmra.mxu2 %v6625_v40  ;;  %v6666_v31 = vld [vmem:[#allocation2 + $0x90] sm:$0xf0] }
 0x270   : > { %v6669_v19 = vor.u32 %v8613_v1, %v6666_v31  ;;  %v6938_v1 = vld [vmem:[#allocation2 + $0x2b8] sm:$0xf0]  ;;  %v6704_v31 = vld [vmem:[#allocation2 + $0xb8] sm:$0xf] }
 0x271   : > { %v3990_v5 = vpop.f32.mrf.mxu3 }
 0x272   : > { %v3821_v45 = vpop.f32.mrf.mxu2 }
 0x273   : > { %v3822_v53 = vadd.f32 %v3821_v45, %v9969_v43  ;;  %v3500_v42 = vpop.f32.mrf.mxu0  ;;  %v6901_v43 = vor.u32 %v8672_v20, %v6898_v2  ;;  %v6936_v2 = vld [vmem:[#allocation2 + $0x290] sm:$0xf] }
 0x274   : > { %v3501_v7 = vadd.f32 %v3500_v42, %v9794_v13  ;;  %v3669_v57 = vpop.f32.mrf.mxu1 }
 0x275   : > { %v10016_v18 = vadd.f32 %v3990_v5, %v3822_v53 }
 0x276   : > { %v10018_v34 = vadd.f32 %v3669_v57, %v3501_v7 }
 0x279   : > { %v3992_v13 = vpop.f32.mrf.mxu3 }
 0x27a   : > { %v3823_v25 = vpop.f32.mrf.mxu2 }
 0x27b   : > { %v3824_v36 = vadd.f32 %v3823_v25, %v9978_v14  ;;  %v3503_v40 = vpop.f32.mrf.mxu0  ;;  %v8628_v25 = vld [vmem:[#allocation2 + $0xdc] sm:$0xf0] }
 0x27c   : > { %v3504_v51 = vadd.f32 %v3503_v40, %v9780_v46  ;;  %v3672_v45 = vpop.f32.mrf.mxu1  ;;  %v6937_v40 = vor.u32 %v8687_v22, %v6936_v2 }
 0x27d   : > { %v10022_v53 = vadd.f32 %v3992_v13, %v3824_v36 }
 0x27e   : > { %v10024_v42 = vadd.f32 %v3672_v45, %v3504_v51  ;;  %4073 = vmatmul.bf16.gmra.mxu0 %v6897_v54  ;;  %4550 = vmatmul.bf16.gmra.mxu3 %v6669_v19  ;;  %v8623_v54 = vld [vmem:[#allocation2 + $0xbc] sm:$0xf]  ;;  %v6705_v19 = vor.u32 %v8628_v25, %v6704_v31  ;;  %v8697_v31 = vld [vmem:[#allocation2 + $0x304] sm:$0xf0]  ;;  %v8692_v25 = vld [vmem:[#allocation2 + $0x2e4] sm:$0xf] }
 0x27f   : > { %4242 = vmatmul.bf16.gmra.mxu1 %v6901_v43  ;;  %4381 = vmatmul.bf16.gmra.mxu2 %v6665_v44  ;;  %v6706_v43 = vld [vmem:[#allocation2 + $0xe0] sm:$0xf0] }
 0x280   : > { %v6709_v51 = vor.u32 %v8623_v54, %v6706_v43  ;;  %v6978_v54 = vld [vmem:[#allocation2 + $0x308] sm:$0xf0]  ;;  %v6744_v43 = vld [vmem:[#allocation2 + $0x108] sm:$0xf] }
 0x281   : > { %v3995_v14 = vpop.f32.mrf.mxu3 }
 0x282   : > { %v3826_v5 = vpop.f32.mrf.mxu2 }
 0x283   : > { %v3827_v7 = vadd.f32 %v3826_v5, %v9988_v60  ;;  %v3505_v57 = vpop.f32.mrf.mxu0  ;;  %v6941_v60 = vor.u32 %v8682_v26, %v6938_v1  ;;  %v6976_v1 = vld [vmem:[#allocation2 + $0x2e0] sm:$0xf] }
 0x284   : > { %v3506_v0 = vadd.f32 %v3505_v57, %v9814_v30  ;;  %v3674_v29 = vpop.f32.mrf.mxu1 }
 0x285   : > { %v10028_v20 = vadd.f32 %v3995_v14, %v3827_v7 }
 0x286   : > { %v10030_v46 = vadd.f32 %v3674_v29, %v3506_v0 }
 0x289   : > { %v3997_v44 = vpop.f32.mrf.mxu3 }
 0x28a   : > { %v3828_v36 = vpop.f32.mrf.mxu2 }
 0x28b   : > { %v3829_v13 = vadd.f32 %v3828_v36, %v9994_v15  ;;  %v4039_v30 = vpop.f32.mrf.mxu0  ;;  %v8638_v36 = vld [vmem:[#allocation2 + $0x12c] sm:$0xf0] }
 0x28c   : > { %v4040_v45 = vadd.f32 %v4039_v30, %v9566_v61  ;;  %v4208_v5 = vpop.f32.mrf.mxu1 }
 0x28d   : > { %v10034_v7 = vadd.f32 %v3997_v44, %v3829_v13  ;;  %v6977_v44 = vor.u32 %v8697_v31, %v6976_v1 }
 0x28e   : > { %v10036_v57 = vadd.f32 %v4208_v5, %v4040_v45  ;;  %4078 = vmatmul.bf16.gmra.mxu0 %v6937_v40  ;;  %4555 = vmatmul.bf16.gmra.mxu3 %v6709_v51  ;;  %v8633_v40 = vld [vmem:[#allocation2 + $0x10c] sm:$0xf]  ;;  %v6745_v51 = vor.u32 %v8638_v36, %v6744_v43  ;;  %v8707_v43 = vld [vmem:[#allocation2 + $0x354] sm:$0xf0]  ;;  %v8702_v36 = vld [vmem:[#allocation2 + $0x334] sm:$0xf] }
 0x28f   : > { %4247 = vmatmul.bf16.gmra.mxu1 %v6941_v60  ;;  %4386 = vmatmul.bf16.gmra.mxu2 %v6705_v19  ;;  %v6746_v60 = vld [vmem:[#allocation2 + $0x130] sm:$0xf0] }
 0x290   : > { %v6749_v45 = vor.u32 %v8633_v40, %v6746_v60  ;;  %v7018_v40 = vld [vmem:[#allocation2 + $0x358] sm:$0xf0]  ;;  %v6784_v60 = vld [vmem:[#allocation2 + $0x158] sm:$0xf] }
 0x291   : > { %v4000_v29 = vpop.f32.mrf.mxu3 }
 0x292   : > { %v3831_v14 = vpop.f32.mrf.mxu2 }
 0x293   : > { %v3832_v0 = vadd.f32 %v3831_v14, %v10000_v21  ;;  %v4041_v15 = vpop.f32.mrf.mxu0  ;;  %v6981_v21 = vor.u32 %v8692_v25, %v6978_v54  ;;  %v7016_v54 = vld [vmem:[#allocation2 + $0x330] sm:$0xf] }
 0x294   : > { %v4042_v2 = vadd.f32 %v4041_v15, %v9578_v52  ;;  %v4210_v22 = vpop.f32.mrf.mxu1 }
 0x295   : > { %v10040_v26 = vadd.f32 %v4000_v29, %v3832_v0 }
 0x296   : > { %v10042_v61 = vadd.f32 %v4210_v22, %v4042_v2 }
 0x299   : > { %v4002_v19 = vpop.f32.mrf.mxu3 }
 0x29a   : > { %v3833_v13 = vpop.f32.mrf.mxu2 }
 0x29b   : > { %v3834_v30 = vadd.f32 %v3833_v13, %v10006_v39  ;;  %v4044_v52 = vpop.f32.mrf.mxu0  ;;  %v8648_v13 = vld [vmem:[#allocation2 + $0x17c] sm:$0xf0] }
 0x29c   : > { %v4045_v5 = vadd.f32 %v4044_v52, %v9590_v16  ;;  %v4213_v14 = vpop.f32.mrf.mxu1 }
 0x29d   : > { %v10046_v0 = vadd.f32 %v4002_v19, %v3834_v30  ;;  %v7017_v19 = vor.u32 %v8707_v43, %v7016_v54 }
 0x29e   : > { %v10048_v29 = vadd.f32 %v4213_v14, %v4045_v5  ;;  %4083 = vmatmul.bf16.gmra.mxu0 %v6977_v44  ;;  %4560 = vmatmul.bf16.gmra.mxu3 %v6749_v45  ;;  %v8643_v44 = vld [vmem:[#allocation2 + $0x15c] sm:$0xf]  ;;  %v6785_v45 = vor.u32 %v8648_v13, %v6784_v60  ;;  %v8717_v60 = vld [vmem:[#allocation2 + $0x3a4] sm:$0xf0]  ;;  %v8712_v13 = vld [vmem:[#allocation2 + $0x384] sm:$0xf] }
 0x29f   : > { %4252 = vmatmul.bf16.gmra.mxu1 %v6981_v21  ;;  %4391 = vmatmul.bf16.gmra.mxu2 %v6745_v51  ;;  %v6786_v21 = vld [vmem:[#allocation2 + $0x180] sm:$0xf0] }
 0x2a0   : > { %v6789_v5 = vor.u32 %v8643_v44, %v6786_v21  ;;  %v7058_v44 = vld [vmem:[#allocation2 + $0x3a8] sm:$0xf0]  ;;  %v6824_v21 = vld [vmem:[#allocation2 + $0x1a8] sm:$0xf] }
 0x2a1   : > { %v4005_v22 = vpop.f32.mrf.mxu3 }
 0x2a2   : > { %v3836_v15 = vpop.f32.mrf.mxu2 }
 0x2a3   : > { %v3837_v2 = vadd.f32 %v3836_v15, %v10012_v58  ;;  %v4046_v39 = vpop.f32.mrf.mxu0  ;;  %v7021_v58 = vor.u32 %v8702_v36, %v7018_v40  ;;  %v7056_v40 = vld [vmem:[#allocation2 + $0x380] sm:$0xf] }
 0x2a4   : > { %v4047_v1 = vadd.f32 %v4046_v39, %v9602_v6  ;;  %v4215_v31 = vpop.f32.mrf.mxu1 }
 0x2a5   : > { %v10052_v25 = vadd.f32 %v4005_v22, %v3837_v2 }
 0x2a6   : > { %v10054_v16 = vadd.f32 %v4215_v31, %v4047_v1 }
 0x2a9   : > { %v4007_v51 = vpop.f32.mrf.mxu3 }
 0x2aa   : > { %v3838_v30 = vpop.f32.mrf.mxu2 }
 0x2ab   : > { %v3839_v52 = vadd.f32 %v3838_v30, %v10018_v34  ;;  %v4049_v6 = vpop.f32.mrf.mxu0  ;;  %v8658_v30 = vld [vmem:[#allocation2 + $0x1cc] sm:$0xf0] }
 0x2ac   : > { %v4050_v14 = vadd.f32 %v4049_v6, %v9617_v33  ;;  %v4218_v15 = vpop.f32.mrf.mxu1 }
 0x2ad   : > { %v10058_v2 = vadd.f32 %v4007_v51, %v3839_v52  ;;  %v7057_v51 = vor.u32 %v8717_v60, %v7056_v40 }
 0x2ae   : > { %v10060_v22 = vadd.f32 %v4218_v15, %v4050_v14  ;;  %4088 = vmatmul.bf16.gmra.mxu0 %v7017_v19  ;;  %4565 = vmatmul.bf16.gmra.mxu3 %v6789_v5  ;;  %v8653_v19 = vld [vmem:[#allocation2 + $0x1ac] sm:$0xf]  ;;  %v6825_v5 = vor.u32 %v8658_v30, %v6824_v21  ;;  %v7096_v21 = vld [vmem:[#allocation2 + $0x3d0] sm:$0xf]  ;;  %v8727_v30 = vld [vmem:[#allocation2 + $0x3f4] sm:$0xf0] }
 0x2af   : > { %4257 = vmatmul.bf16.gmra.mxu1 %v7021_v58  ;;  %4396 = vmatmul.bf16.gmra.mxu2 %v6785_v45  ;;  %v6826_v58 = vld [vmem:[#allocation2 + $0x1d0] sm:$0xf0] }
 0x2b0   : > { %v6829_v14 = vor.u32 %v8653_v19, %v6826_v58  ;;  %v8722_v19 = vld [vmem:[#allocation2 + $0x3d4] sm:$0xf]  ;;  %v7098_v58 = vld [vmem:[#allocation2 + $0x3f8] sm:$0xf0] }
 0x2b1   : > { %v4010_v31 = vpop.f32.mrf.mxu3 }
 0x2b2   : > { %v3841_v39 = vpop.f32.mrf.mxu2 }
 0x2b3   : > { %v3842_v1 = vadd.f32 %v3841_v39, %v10024_v42  ;;  %v4051_v34 = vpop.f32.mrf.mxu0  ;;  %v7061_v42 = vor.u32 %v8712_v13, %v7058_v44 }
 0x2b4   : > { %v4052_v54 = vadd.f32 %v4051_v34, %v9632_v56  ;;  %v4220_v43 = vpop.f32.mrf.mxu1 }
 0x2b5   : > { %v10064_v36 = vadd.f32 %v4010_v31, %v3842_v1  ;;  %v3509_v1 = vadd.f32 %v9512_v17, %v9754_v24  ;;  %v3511_v17 = vadd.f32 %v9520_v41, %v9764_v10 }
 0x2b6   : > { %v10066_v33 = vadd.f32 %v4220_v43, %v4052_v54 }
 0x2b9   : > { %v4012_v45 = vpop.f32.mrf.mxu3 }
 0x2ba   : > { %v3843_v52 = vpop.f32.mrf.mxu2 }
 0x2bb   : > { %v3844_v6 = vadd.f32 %v3843_v52, %v10030_v46  ;;  %v4054_v56 = vpop.f32.mrf.mxu0  ;;  %v3678_v46 = vadd.f32 %v9510_v12, %v3509_v1  ;;  %v6864_v52 = vld [vmem:[#allocation2 + $0x1f8] sm:$0xf]  ;;  %v8668_v12 = vld [vmem:[#allocation2 + $0x21c] sm:$0xf0] }
 0x2bc   : > { %v4055_v15 = vadd.f32 %v4054_v56, %v9647_v49  ;;  %v4223_v39 = vpop.f32.mrf.mxu1  ;;  %v7101_v56 = vor.u32 %v8722_v19, %v7098_v58  ;;  %v6865_v10 = vor.u32 %v8668_v12, %v6864_v52  ;;  %v11643_v58 = vld [vmem:[#allocation18_spill] sm:$0xff] }
 0x2bd   : > { %v10072_v31 = vadd.f32 %v4012_v45, %v3844_v6  ;;  %v3680_v6 = vadd.f32 %v9518_v37, %v3511_v17  ;;  %v11642_v37 = vld [vmem:[#allocation9_spill] sm:$0xff] }
 0x2be   : > { %v10074_v34 = vadd.f32 %v4223_v39, %v4055_v15  ;;  %4093 = vmatmul.bf16.gmra.mxu0 %v7057_v51  ;;  %4570 = vmatmul.bf16.gmra.mxu3 %v6829_v14  ;;  %v8663_v51 = vld [vmem:[#allocation2 + $0x1fc] sm:$0xf]  ;;  %v11638_v39 = vld [vmem:[#allocation17_spill] sm:$0xff] }
 0x2bf   : > { %4262 = vmatmul.bf16.gmra.mxu1 %v7061_v42  ;;  %4401 = vmatmul.bf16.gmra.mxu2 %v6825_v5  ;;  %v6866_v42 = vld [vmem:[#allocation2 + $0x220] sm:$0xf0] }
 0x2c0   : > { %v6869_v15 = vor.u32 %v8663_v51, %v6866_v42  ;;  %v11644_v51 = vld [vmem:[#allocation26_spill] sm:$0xff]  ;;  %v11645_v42 = vld [vmem:[#allocation12_spill] sm:$0xff] }
 0x2c1   : > { %v4015_v40 = vpop.f32.mrf.mxu3 }
 0x2c2   : > { %v3846_v54 = vpop.f32.mrf.mxu2 }
 0x2c3   : > { %v3847_v43 = vadd.f32 %v3846_v54, %v3678_v46  ;;  %v4056_v60 = vpop.f32.mrf.mxu0  ;;  %v11639_v54 = vld [vmem:[#allocation31_spill] sm:$0xff] }
 0x2c4   : > { %v4057_v49 = vadd.f32 %v4056_v60, %v9662_v35  ;;  %v4225_v13 = vpop.f32.mrf.mxu1  ;;  %v7097_v35 = vor.u32 %v8727_v30, %v7096_v21 }
 0x2c5   : > { %v10080_v24 = vadd.f32 %v4015_v40, %v3847_v43  ;;  %v11640_v43 = vld [vmem:[#allocation10_spill] sm:$0xff] }
 0x2c6   : > { %v10082_v44 = vadd.f32 %v4225_v13, %v4057_v49  ;;  %v3514_v40 = vadd.f32 %v11640_v43, %v11639_v54 }
 0x2c7   : > { %11637 = vst [vmem:[#allocation44_spill] sm:$0xff] %v10080_v24 }
 0x2c8   : > { %v3683_v13 = vadd.f32 %v11642_v37, %v3514_v40 }
 0x2c9   : > { %v4017_v14 = vpop.f32.mrf.mxu3 }
 0x2ca   : > { %v3848_v45 = vpop.f32.mrf.mxu2 }
 0x2cb   : > { %v3849_v5 = vadd.f32 %v3848_v45, %v3680_v6  ;;  %v4059_v41 = vpop.f32.mrf.mxu0  ;;  %v3516_v6 = vadd.f32 %v11645_v42, %v11644_v51  ;;  %v11649_v51 = vld [vmem:[#allocation24_spill] sm:$0xff]  ;;  %v11650_v42 = vld [vmem:[#allocation14_spill] sm:$0xff] }
 0x2cc   : > { %v4060_v1 = vadd.f32 %v4059_v41, %v11638_v39  ;;  %v4228_v46 = vpop.f32.mrf.mxu1  ;;  %v7138_v41 = vld [vmem:[#allocation2 + $0x448] sm:$0xf0] }
 0x2cd   : > { %v10088_v60 = vadd.f32 %v4017_v14, %v3849_v5  ;;  %v8732_v14 = vld [vmem:[#allocation2 + $0x424] sm:$0xf]  ;;  %v8673_v39 = vld [vmem:[#allocation2 + $0x24c] sm:$0xf] }
 0x2ce   : > { %v10090_v49 = vadd.f32 %v4228_v46, %v4060_v1  ;;  %4098 = vmatmul.bf16.gmra.mxu0 %v7097_v35  ;;  %4575 = vmatmul.bf16.gmra.mxu3 %v6869_v15  ;;  %v7136_v35 = vld [vmem:[#allocation2 + $0x420] sm:$0xf]  ;;  %v8678_v15 = vld [vmem:[#allocation2 + $0x26c] sm:$0xf0]  ;;  %v6906_v1 = vld [vmem:[#allocation2 + $0x270] sm:$0xf0]  ;;  %v7141_v37 = vor.u32 %v8732_v14, %v7138_v41 }
 0x2cf   : > { %11641 = vst [vmem:[#allocation17_spill] sm:$0xff] %v10088_v60  ;;  %4267 = vmatmul.bf16.gmra.mxu1 %v7101_v56  ;;  %4406 = vmatmul.bf16.gmra.mxu2 %v6865_v10  ;;  %v8737_v56 = vld [vmem:[#allocation2 + $0x444] sm:$0xf0]  ;;  %v11647_v46 = vld [vmem:[#allocation11_spill] sm:$0xff] }
 0x2d0   : > { %v6904_v10 = vld [vmem:[#allocation2 + $0x248] sm:$0xf]  ;;  %v3685_v54 = vadd.f32 %v11647_v46, %v3516_v6  ;;  %v7137_v40 = vor.u32 %v8737_v56, %v7136_v35 }
 0x2d1   : > { %v4020_v30 = vpop.f32.mrf.mxu3  ;;  %v11651_v6 = vld [vmem:[#allocation13_spill] sm:$0xff] }
 0x2d2   : > { %v3851_v17 = vpop.f32.mrf.mxu2  ;;  %v11653_v46 = vld [vmem:[#allocation29_spill] sm:$0xff] }
 0x2d3   : > { %v3852_v21 = vadd.f32 %v3851_v17, %v3683_v13  ;;  %v4061_v19 = vpop.f32.mrf.mxu0 }
 0x2d4   : > { %v4062_v52 = vadd.f32 %v4061_v19, %v11643_v58  ;;  %v4230_v12 = vpop.f32.mrf.mxu1  ;;  %v11648_v58 = vld [vmem:[#allocation19_spill] sm:$0xff] }
 0x2d5   : > { %v10096_v45 = vadd.f32 %v4020_v30, %v3852_v21  ;;  %v6905_v21 = vor.u32 %v8678_v15, %v6904_v10  ;;  %v6909_v30 = vor.u32 %v8673_v39, %v6906_v1  ;;  %v11652_v15 = vld [vmem:[#allocation20_spill] sm:$0xff] }
 0x2d6   : > { %v10098_v5 = vadd.f32 %v4230_v12, %v4062_v52 }
 0x2d7   : > { %11646 = vst [vmem:[#allocation31_spill] sm:$0xff] %v10096_v45  ;;  %v3519_v45 = vadd.f32 %v11650_v42, %v11649_v51 }
 0x2d9   : > { %v4022_v17 = vpop.f32.mrf.mxu3  ;;  %v3688_v35 = vadd.f32 %v11651_v6, %v3519_v45  ;;  %v8688_v45 = vld [vmem:[#allocation2 + $0x2bc] sm:$0xf0] }
 0x2da   : > { %v3853_v43 = vpop.f32.mrf.mxu2 }
 0x2db   : > { %v3854_v13 = vadd.f32 %v3853_v43, %v3685_v54  ;;  %v4064_v19 = vpop.f32.mrf.mxu0  ;;  %v11654_v54 = vld [vmem:[#allocation16_spill] sm:$0xff] }
 0x2dc   : > { %v4065_v52 = vadd.f32 %v4064_v19, %v11648_v58  ;;  %v4233_v12 = vpop.f32.mrf.mxu1  ;;  %v3521_v43 = vadd.f32 %v11654_v54, %v11653_v46  ;;  %v8742_v19 = vld [vmem:[#allocation2 + $0x474] sm:$0xf]  ;;  %v8683_v58 = vld [vmem:[#allocation2 + $0x29c] sm:$0xf] }
 0x2dd   : > { %v10104_v60 = vadd.f32 %v4022_v17, %v3854_v13 }
 0x2de   : > { %v10106_v24 = vadd.f32 %v4233_v12, %v4065_v52  ;;  %4103 = vmatmul.bf16.gmra.mxu0 %v7137_v40  ;;  %4580 = vmatmul.bf16.gmra.mxu3 %v6909_v30  ;;  %v7176_v40 = vld [vmem:[#allocation2 + $0x470] sm:$0xf]  ;;  %v6944_v30 = vld [vmem:[#allocation2 + $0x298] sm:$0xf]  ;;  %v6946_v52 = vld [vmem:[#allocation2 + $0x2c0] sm:$0xf0] }
 0x2df   : > { %4272 = vmatmul.bf16.gmra.mxu1 %v7141_v37  ;;  %4411 = vmatmul.bf16.gmra.mxu2 %v6905_v21  ;;  %v8747_v37 = vld [vmem:[#allocation2 + $0x494] sm:$0xf0]  ;;  %v7178_v21 = vld [vmem:[#allocation2 + $0x498] sm:$0xf0] }
 0x2e0   : > { %v11656_v12 = vld [vmem:[#allocation15_spill] sm:$0xff]  ;;  %v7177_v6 = vor.u32 %v8747_v37, %v7176_v40 }
 0x2e1   : > { %v4025_v41 = vpop.f32.mrf.mxu3  ;;  %v3690_v51 = vadd.f32 %v11656_v12, %v3521_v43 }
 0x2e2   : > { %v3856_v56 = vpop.f32.mrf.mxu2 }
 0x2e3   : > { %v3857_v14 = vadd.f32 %v3856_v56, %v3688_v35  ;;  %v4066_v10 = vpop.f32.mrf.mxu0  ;;  %v7181_v35 = vor.u32 %v8742_v19, %v7178_v21  ;;  %v11658_v21 = vld [vmem:[#allocation22_spill] sm:$0xff] }
 0x2e4   : > { %v4067_v39 = vadd.f32 %v4066_v10, %v11652_v15  ;;  %v4235_v1 = vpop.f32.mrf.mxu1 }
 0x2e5   : > { %v10112_v13 = vadd.f32 %v4025_v41, %v3857_v14  ;;  %v6945_v14 = vor.u32 %v8688_v45, %v6944_v30  ;;  %v6949_v41 = vor.u32 %v8683_v58, %v6946_v52  ;;  %v7216_v52 = vld [vmem:[#allocation2 + $0x4c0] sm:$0xf] }
 0x2e6   : > { %v10114_v17 = vadd.f32 %v4235_v1, %v4067_v39  ;;  %v11657_v39 = vld [vmem:[#allocation21_spill] sm:$0xff] }
 0x2e7   : > { %11655 = vst [vmem:[#allocation10_spill] sm:$0xff] %v10112_v13 }
 0x2e9   : > { %v4027_v10 = vpop.f32.mrf.mxu3 }
 0x2ea   : > { %v3858_v42 = vpop.f32.mrf.mxu2 }
 0x2eb   : > { %v3859_v56 = vadd.f32 %v3858_v42, %v3690_v51  ;;  %v4069_v15 = vpop.f32.mrf.mxu0  ;;  %v8757_v51 = vld [vmem:[#allocation2 + $0x4e4] sm:$0xf0]  ;;  %v8752_v42 = vld [vmem:[#allocation2 + $0x4c4] sm:$0xf] }
 0x2ec   : > { %v4070_v1 = vadd.f32 %v4069_v15, %v11657_v39  ;;  %v4238_v46 = vpop.f32.mrf.mxu1  ;;  %v6986_v15 = vld [vmem:[#allocation2 + $0x310] sm:$0xf0] }
 0x2ed   : > { %v10118_v54 = vadd.f32 %v4027_v10, %v3859_v56  ;;  %v7218_v56 = vld [vmem:[#allocation2 + $0x4e8] sm:$0xf0] }
 0x2ee   : > { %v10120_v13 = vadd.f32 %v4238_v46, %v4070_v1  ;;  %4108 = vmatmul.bf16.gmra.mxu0 %v7177_v6  ;;  %4585 = vmatmul.bf16.gmra.mxu3 %v6949_v41  ;;  %v6984_v6 = vld [vmem:[#allocation2 + $0x2e8] sm:$0xf]  ;;  %v8693_v10 = vld [vmem:[#allocation2 + $0x2ec] sm:$0xf]  ;;  %v7217_v41 = vor.u32 %v8757_v51, %v7216_v52 }
 0x2ef   : > { %4277 = vmatmul.bf16.gmra.mxu1 %v7181_v35  ;;  %4416 = vmatmul.bf16.gmra.mxu2 %v6945_v14  ;;  %v8698_v35 = vld [vmem:[#allocation2 + $0x30c] sm:$0xf0] }
 0x2f1   : > { %v4546_v19 = vpop.f32.mrf.mxu3 }
 0x2f2   : > { %v4377_v43 = vpop.f32.mrf.mxu2 }
 0x2f3   : > { %v4378_v40 = vadd.f32 %v4377_v43, %v10036_v57  ;;  %v4071_v37 = vpop.f32.mrf.mxu0  ;;  %v7221_v57 = vor.u32 %v8752_v42, %v7218_v56  ;;  %v6985_v43 = vor.u32 %v8698_v35, %v6984_v6  ;;  %v11662_v42 = vld [vmem:[#allocation25_spill] sm:$0xff] }
 0x2f4   : > { %v4072_v12 = vadd.f32 %v4071_v37, %v11658_v21  ;;  %v4240_v30 = vpop.f32.mrf.mxu1  ;;  %v11660_v37 = vld [vmem:[#allocation23_spill] sm:$0xff] }
 0x2f5   : > { %v10124_v45 = vadd.f32 %v4546_v19, %v4378_v40  ;;  %v6989_v40 = vor.u32 %v8693_v10, %v6986_v15  ;;  %v7256_v15 = vld [vmem:[#allocation2 + $0x510] sm:$0xf] }
 0x2f6   : > { %v10126_v58 = vadd.f32 %v4240_v30, %v4072_v12 }
 0x2f7   : > { %11659 = vst [vmem:[#allocation9_spill] sm:$0xff] %v10124_v45 }
 0x2f9   : > { %v4548_v46 = vpop.f32.mrf.mxu3 }
 0x2fa   : > { %v4379_v14 = vpop.f32.mrf.mxu2 }
 0x2fb   : > { %v4380_v39 = vadd.f32 %v4379_v14, %v10042_v61  ;;  %v4074_v1 = vpop.f32.mrf.mxu0  ;;  %v8767_v14 = vld [vmem:[#allocation2 + $0x534] sm:$0xf0] }
 0x2fc   : > { %v4075_v19 = vadd.f32 %v4074_v1, %v11660_v37  ;;  %v4243_v21 = vpop.f32.mrf.mxu1  ;;  %v7258_v1 = vld [vmem:[#allocation2 + $0x538] sm:$0xf0]  ;;  %v7257_v37 = vor.u32 %v8767_v14, %v7256_v15 }
 0x2fd   : > { %v10130_v12 = vadd.f32 %v4548_v46, %v4380_v39  ;;  %v8762_v39 = vld [vmem:[#allocation2 + $0x514] sm:$0xf]  ;;  %v8703_v46 = vld [vmem:[#allocation2 + $0x33c] sm:$0xf] }
 0x2fe   : > { %v10132_v30 = vadd.f32 %v4243_v21, %v4075_v19  ;;  %4113 = vmatmul.bf16.gmra.mxu0 %v7217_v41  ;;  %4590 = vmatmul.bf16.gmra.mxu3 %v6989_v40  ;;  %v7024_v41 = vld [vmem:[#allocation2 + $0x338] sm:$0xf] }
 0x2ff   : > { %11661 = vst [vmem:[#allocation18_spill] sm:$0xff] %v10130_v12  ;;  %4282 = vmatmul.bf16.gmra.mxu1 %v7221_v57  ;;  %4421 = vmatmul.bf16.gmra.mxu2 %v6985_v43  ;;  %v8708_v57 = vld [vmem:[#allocation2 + $0x35c] sm:$0xf0]  ;;  %v7026_v43 = vld [vmem:[#allocation2 + $0x360] sm:$0xf0] }
 0x301   : > { %v4551_v61 = vpop.f32.mrf.mxu3 }
 0x302   : > { %v4382_v45 = vpop.f32.mrf.mxu2 }
 0x303   : > { %v4383_v52 = vadd.f32 %v4382_v45, %v10048_v29  ;;  %v4076_v51 = vpop.f32.mrf.mxu0  ;;  %v7261_v29 = vor.u32 %v8762_v39, %v7258_v1  ;;  %v11666_v39 = vld [vmem:[#allocation28_spill] sm:$0xff] }
 0x304   : > { %v4077_v56 = vadd.f32 %v4076_v51, %v11662_v42  ;;  %v4245_v6 = vpop.f32.mrf.mxu1  ;;  %v7025_v51 = vor.u32 %v8708_v57, %v7024_v41 }
 0x305   : > { %v10136_v35 = vadd.f32 %v4551_v61, %v4383_v52  ;;  %v7029_v52 = vor.u32 %v8703_v46, %v7026_v43  ;;  %v11664_v61 = vld [vmem:[#allocation27_spill] sm:$0xff]  ;;  %v7296_v43 = vld [vmem:[#allocation2 + $0x560] sm:$0xf] }
 0x306   : > { %v10138_v10 = vadd.f32 %v4245_v6, %v4077_v56 }
 0x307   : > { %11663 = vst [vmem:[#allocation26_spill] sm:$0xff] %v10136_v35 }
 0x309   : > { %v4553_v21 = vpop.f32.mrf.mxu3 }
 0x30a   : > { %v4384_v40 = vpop.f32.mrf.mxu2 }
 0x30b   : > { %v4385_v45 = vadd.f32 %v4384_v40, %v10054_v16  ;;  %v4079_v19 = vpop.f32.mrf.mxu0  ;;  %v8777_v40 = vld [vmem:[#allocation2 + $0x584] sm:$0xf0] }
 0x30c   : > { %v4080_v42 = vadd.f32 %v4079_v19, %v11664_v61  ;;  %v4248_v56 = vpop.f32.mrf.mxu1  ;;  %v7298_v19 = vld [vmem:[#allocation2 + $0x588] sm:$0xf0]  ;;  %v7297_v61 = vor.u32 %v8777_v40, %v7296_v43 }
 0x30d   : > { %v10142_v6 = vadd.f32 %v4553_v21, %v4385_v45  ;;  %v8772_v45 = vld [vmem:[#allocation2 + $0x564] sm:$0xf]  ;;  %v8713_v21 = vld [vmem:[#allocation2 + $0x38c] sm:$0xf] }
 0x30e   : > { %v10144_v35 = vadd.f32 %v4248_v56, %v4080_v42  ;;  %4118 = vmatmul.bf16.gmra.mxu0 %v7257_v37  ;;  %4595 = vmatmul.bf16.gmra.mxu3 %v7029_v52  ;;  %v7064_v37 = vld [vmem:[#allocation2 + $0x388] sm:$0xf] }
 0x30f   : > { %11665 = vst [vmem:[#allocation12_spill] sm:$0xff] %v10142_v6  ;;  %4287 = vmatmul.bf16.gmra.mxu1 %v7261_v29  ;;  %4426 = vmatmul.bf16.gmra.mxu2 %v7025_v51  ;;  %v8718_v29 = vld [vmem:[#allocation2 + $0x3ac] sm:$0xf0]  ;;  %v7066_v51 = vld [vmem:[#allocation2 + $0x3b0] sm:$0xf0] }
 0x311   : > { %v4556_v16 = vpop.f32.mrf.mxu3 }
 0x312   : > { %v4387_v12 = vpop.f32.mrf.mxu2 }
 0x313   : > { %v4388_v15 = vadd.f32 %v4387_v12, %v10060_v22  ;;  %v4081_v14 = vpop.f32.mrf.mxu0  ;;  %v7301_v22 = vor.u32 %v8772_v45, %v7298_v19  ;;  %v11670_v45 = vld [vmem:[#allocation32_spill] sm:$0xff] }
 0x314   : > { %v4082_v1 = vadd.f32 %v4081_v14, %v11666_v39  ;;  %v4250_v41 = vpop.f32.mrf.mxu1  ;;  %v7065_v14 = vor.u32 %v8718_v29, %v7064_v37 }
 0x315   : > { %v10148_v57 = vadd.f32 %v4556_v16, %v4388_v15  ;;  %v7069_v15 = vor.u32 %v8713_v21, %v7066_v51  ;;  %v11668_v16 = vld [vmem:[#allocation30_spill] sm:$0xff] }
 0x316   : > { %v10150_v46 = vadd.f32 %v4250_v41, %v4082_v1  ;;  %v7336_v51 = vld [vmem:[#allocation2 + $0x5b0] sm:$0xf] }
 0x317   : > { %11667 = vst [vmem:[#allocation11_spill] sm:$0xff] %v10148_v57 }
 0x319   : > { %v4558_v56 = vpop.f32.mrf.mxu3 }
 0x31a   : > { %v4389_v52 = vpop.f32.mrf.mxu2 }
 0x31b   : > { %v4390_v12 = vadd.f32 %v4389_v52, %v10066_v33  ;;  %v4084_v42 = vpop.f32.mrf.mxu0  ;;  %v8787_v52 = vld [vmem:[#allocation2 + $0x5d4] sm:$0xf0] }
 0x31c   : > { %v4085_v39 = vadd.f32 %v4084_v42, %v11668_v16  ;;  %v4253_v1 = vpop.f32.mrf.mxu1  ;;  %v7338_v42 = vld [vmem:[#allocation2 + $0x5d8] sm:$0xf0]  ;;  %v7337_v16 = vor.u32 %v8787_v52, %v7336_v51 }
 0x31d   : > { %v10154_v41 = vadd.f32 %v4558_v56, %v4390_v12  ;;  %v8782_v12 = vld [vmem:[#allocation2 + $0x5b4] sm:$0xf]  ;;  %v8723_v56 = vld [vmem:[#allocation2 + $0x3dc] sm:$0xf] }
 0x31e   : > { %v10156_v57 = vadd.f32 %v4253_v1, %v4085_v39  ;;  %4123 = vmatmul.bf16.gmra.mxu0 %v7297_v61  ;;  %4600 = vmatmul.bf16.gmra.mxu3 %v7069_v15  ;;  %v7104_v61 = vld [vmem:[#allocation2 + $0x3d8] sm:$0xf] }
 0x31f   : > { %11669 = vst [vmem:[#allocation19_spill] sm:$0xff] %v10154_v41  ;;  %4292 = vmatmul.bf16.gmra.mxu1 %v7301_v22  ;;  %4431 = vmatmul.bf16.gmra.mxu2 %v7065_v14  ;;  %v8728_v22 = vld [vmem:[#allocation2 + $0x3fc] sm:$0xf0]  ;;  %v7106_v14 = vld [vmem:[#allocation2 + $0x400] sm:$0xf0] }
 0x321   : > { %v4561_v33 = vpop.f32.mrf.mxu3 }
 0x322   : > { %v4392_v6 = vpop.f32.mrf.mxu2 }
 0x323   : > { %v4393_v43 = vadd.f32 %v4392_v6, %v10074_v34  ;;  %v4086_v40 = vpop.f32.mrf.mxu0  ;;  %v7341_v34 = vor.u32 %v8782_v12, %v7338_v42  ;;  %v11674_v12 = vld [vmem:[#allocation34_spill] sm:$0xff] }
 0x324   : > { %v4087_v19 = vadd.f32 %v4086_v40, %v11670_v45  ;;  %v4255_v37 = vpop.f32.mrf.mxu1  ;;  %v7105_v40 = vor.u32 %v8728_v22, %v7104_v61 }
 0x325   : > { %v10160_v29 = vadd.f32 %v4561_v33, %v4393_v43  ;;  %v7109_v43 = vor.u32 %v8723_v56, %v7106_v14  ;;  %v11672_v33 = vld [vmem:[#allocation33_spill] sm:$0xff]  ;;  %v7376_v14 = vld [vmem:[#allocation2 + $0x600] sm:$0xf] }
 0x326   : > { %v10162_v21 = vadd.f32 %v4255_v37, %v4087_v19 }
 0x327   : > { %11671 = vst [vmem:[#allocation24_spill] sm:$0xff] %v10160_v29 }
 0x329   : > { %v4563_v1 = vpop.f32.mrf.mxu3 }
 0x32a   : > { %v4394_v15 = vpop.f32.mrf.mxu2 }
 0x32b   : > { %v4395_v6 = vadd.f32 %v4394_v15, %v10082_v44  ;;  %v4089_v39 = vpop.f32.mrf.mxu0  ;;  %v8797_v15 = vld [vmem:[#allocation2 + $0x624] sm:$0xf0] }
 0x32c   : > { %v4090_v45 = vadd.f32 %v4089_v39, %v11672_v33  ;;  %v4258_v19 = vpop.f32.mrf.mxu1  ;;  %v7378_v39 = vld [vmem:[#allocation2 + $0x628] sm:$0xf0]  ;;  %v7377_v33 = vor.u32 %v8797_v15, %v7376_v14 }
 0x32d   : > { %v10166_v37 = vadd.f32 %v4563_v1, %v4395_v6  ;;  %v8792_v6 = vld [vmem:[#allocation2 + $0x604] sm:$0xf]  ;;  %v8733_v1 = vld [vmem:[#allocation2 + $0x42c] sm:$0xf] }
 0x32e   : > { %v10168_v29 = vadd.f32 %v4258_v19, %v4090_v45  ;;  %4128 = vmatmul.bf16.gmra.mxu0 %v7337_v16  ;;  %4605 = vmatmul.bf16.gmra.mxu3 %v7109_v43  ;;  %v7144_v16 = vld [vmem:[#allocation2 + $0x428] sm:$0xf] }
 0x32f   : > { %11673 = vst [vmem:[#allocation14_spill] sm:$0xff] %v10166_v37  ;;  %4297 = vmatmul.bf16.gmra.mxu1 %v7341_v34  ;;  %4436 = vmatmul.bf16.gmra.mxu2 %v7105_v40  ;;  %v8738_v34 = vld [vmem:[#allocation2 + $0x44c] sm:$0xf0]  ;;  %v7146_v40 = vld [vmem:[#allocation2 + $0x450] sm:$0xf0] }
 0x331   : > { %v4566_v44 = vpop.f32.mrf.mxu3 }
 0x332   : > { %v4397_v41 = vpop.f32.mrf.mxu2 }
 0x333   : > { %v4398_v51 = vadd.f32 %v4397_v41, %v10090_v49  ;;  %v4091_v52 = vpop.f32.mrf.mxu0  ;;  %v7381_v49 = vor.u32 %v8792_v6, %v7378_v39  ;;  %v11678_v6 = vld [vmem:[#allocation36_spill] sm:$0xff] }
 0x334   : > { %v4092_v42 = vadd.f32 %v4091_v52, %v11674_v12  ;;  %v4260_v61 = vpop.f32.mrf.mxu1  ;;  %v7145_v52 = vor.u32 %v8738_v34, %v7144_v16 }
 0x335   : > { %v10172_v22 = vadd.f32 %v4566_v44, %v4398_v51  ;;  %v7149_v51 = vor.u32 %v8733_v1, %v7146_v40  ;;  %v11676_v44 = vld [vmem:[#allocation35_spill] sm:$0xff]  ;;  %v7416_v40 = vld [vmem:[#allocation2 + $0x650] sm:$0xf] }
 0x336   : > { %v10174_v56 = vadd.f32 %v4260_v61, %v4092_v42 }
 0x337   : > { %11675 = vst [vmem:[#allocation13_spill] sm:$0xff] %v10172_v22 }
 0x339   : > { %v4568_v19 = vpop.f32.mrf.mxu3 }
 0x33a   : > { %v4399_v43 = vpop.f32.mrf.mxu2 }
 0x33b   : > { %v4400_v41 = vadd.f32 %v4399_v43, %v10098_v5  ;;  %v4094_v45 = vpop.f32.mrf.mxu0  ;;  %v8807_v43 = vld [vmem:[#allocation2 + $0x674] sm:$0xf0] }
 0x33c   : > { %v4095_v12 = vadd.f32 %v4094_v45, %v11676_v44  ;;  %v4263_v42 = vpop.f32.mrf.mxu1  ;;  %v7418_v45 = vld [vmem:[#allocation2 + $0x678] sm:$0xf0]  ;;  %v7417_v44 = vor.u32 %v8807_v43, %v7416_v40 }
 0x33d   : > { %v10178_v61 = vadd.f32 %v4568_v19, %v4400_v41  ;;  %v8802_v41 = vld [vmem:[#allocation2 + $0x654] sm:$0xf]  ;;  %v8743_v19 = vld [vmem:[#allocation2 + $0x47c] sm:$0xf] }
 0x33e   : > { %v10180_v22 = vadd.f32 %v4263_v42, %v4095_v12  ;;  %4133 = vmatmul.bf16.gmra.mxu0 %v7377_v33  ;;  %4610 = vmatmul.bf16.gmra.mxu3 %v7149_v51  ;;  %v7184_v33 = vld [vmem:[#allocation2 + $0x478] sm:$0xf] }
 0x33f   : > { %11677 = vst [vmem:[#allocation20_spill] sm:$0xff] %v10178_v61  ;;  %4302 = vmatmul.bf16.gmra.mxu1 %v7381_v49  ;;  %4441 = vmatmul.bf16.gmra.mxu2 %v7145_v52  ;;  %v8748_v49 = vld [vmem:[#allocation2 + $0x49c] sm:$0xf0]  ;;  %v7186_v52 = vld [vmem:[#allocation2 + $0x4a0] sm:$0xf0] }
 0x341   : > { %v4571_v5 = vpop.f32.mrf.mxu3 }
 0x342   : > { %v4402_v37 = vpop.f32.mrf.mxu2 }
 0x343   : > { %v4403_v14 = vadd.f32 %v4402_v37, %v10106_v24  ;;  %v4096_v15 = vpop.f32.mrf.mxu0  ;;  %v7421_v24 = vor.u32 %v8802_v41, %v7418_v45  ;;  %v11682_v41 = vld [vmem:[#allocation38_spill] sm:$0xff] }
 0x344   : > { %v4097_v39 = vadd.f32 %v4096_v15, %v11678_v6  ;;  %v4265_v16 = vpop.f32.mrf.mxu1  ;;  %v7185_v15 = vor.u32 %v8748_v49, %v7184_v33 }
 0x345   : > { %v10184_v34 = vadd.f32 %v4571_v5, %v4403_v14  ;;  %v7189_v14 = vor.u32 %v8743_v19, %v7186_v52  ;;  %v11680_v5 = vld [vmem:[#allocation37_spill] sm:$0xff]  ;;  %v7456_v52 = vld [vmem:[#allocation2 + $0x6a0] sm:$0xf] }
 0x346   : > { %v10186_v1 = vadd.f32 %v4265_v16, %v4097_v39 }
 0x347   : > { %11679 = vst [vmem:[#allocation29_spill] sm:$0xff] %v10184_v34 }
 0x349   : > { %v4573_v42 = vpop.f32.mrf.mxu3 }
 0x34a   : > { %v4404_v51 = vpop.f32.mrf.mxu2 }
 0x34b   : > { %v4405_v37 = vadd.f32 %v4404_v51, %v10114_v17  ;;  %v4099_v12 = vpop.f32.mrf.mxu0  ;;  %v8817_v51 = vld [vmem:[#allocation2 + $0x6c4] sm:$0xf0] }
 0x34c   : > { %v4100_v6 = vadd.f32 %v4099_v12, %v11680_v5  ;;  %v4268_v39 = vpop.f32.mrf.mxu1  ;;  %v7458_v12 = vld [vmem:[#allocation2 + $0x6c8] sm:$0xf0]  ;;  %v7457_v5 = vor.u32 %v8817_v51, %v7456_v52 }
 0x34d   : > { %v10190_v16 = vadd.f32 %v4573_v42, %v4405_v37  ;;  %v8812_v37 = vld [vmem:[#allocation2 + $0x6a4] sm:$0xf]  ;;  %v8753_v42 = vld [vmem:[#allocation2 + $0x4cc] sm:$0xf] }
 0x34e   : > { %v10192_v34 = vadd.f32 %v4268_v39, %v4100_v6  ;;  %4138 = vmatmul.bf16.gmra.mxu0 %v7417_v44  ;;  %4615 = vmatmul.bf16.gmra.mxu3 %v7189_v14  ;;  %v7224_v44 = vld [vmem:[#allocation2 + $0x4c8] sm:$0xf] }
 0x34f   : > { %11681 = vst [vmem:[#allocation16_spill] sm:$0xff] %v10190_v16  ;;  %4307 = vmatmul.bf16.gmra.mxu1 %v7421_v24  ;;  %4446 = vmatmul.bf16.gmra.mxu2 %v7185_v15  ;;  %v8758_v24 = vld [vmem:[#allocation2 + $0x4ec] sm:$0xf0]  ;;  %v7226_v15 = vld [vmem:[#allocation2 + $0x4f0] sm:$0xf0] }
 0x351   : > { %v4576_v17 = vpop.f32.mrf.mxu3 }
 0x352   : > { %v4407_v61 = vpop.f32.mrf.mxu2 }
 0x353   : > { %v4408_v40 = vadd.f32 %v4407_v61, %v10120_v13  ;;  %v4101_v43 = vpop.f32.mrf.mxu0  ;;  %v7461_v13 = vor.u32 %v8812_v37, %v7458_v12 }
 0x354   : > { %v4102_v45 = vadd.f32 %v4101_v43, %v11682_v41  ;;  %v4270_v33 = vpop.f32.mrf.mxu1  ;;  %v7225_v43 = vor.u32 %v8758_v24, %v7224_v44 }
 0x355   : > { %v10196_v49 = vadd.f32 %v4576_v17, %v4408_v40  ;;  %v7229_v40 = vor.u32 %v8753_v42, %v7226_v15  ;;  %v11684_v17 = vld [vmem:[#allocation39_spill] sm:$0xff]  ;;  %v7496_v42 = vld [vmem:[#allocation2 + $0x6f0] sm:$0xf] }
 0x356   : > { %v10198_v19 = vadd.f32 %v4270_v33, %v4102_v45  ;;  %v8827_v15 = vld [vmem:[#allocation2 + $0x714] sm:$0xf0] }
 0x357   : > { %11683 = vst [vmem:[#allocation15_spill] sm:$0xff] %v10196_v49 }
 0x359   : > { %v4578_v39 = vpop.f32.mrf.mxu3 }
 0x35a   : > { %v4409_v14 = vpop.f32.mrf.mxu2 }
 0x35b   : > { %v4410_v61 = vadd.f32 %v4409_v14, %v10126_v58  ;;  %v4104_v6 = vpop.f32.mrf.mxu0  ;;  %v8822_v14 = vld [vmem:[#allocation2 + $0x6f4] sm:$0xf] }
 0x35c   : > { %v4105_v41 = vadd.f32 %v4104_v6, %v11684_v17  ;;  %v4273_v45 = vpop.f32.mrf.mxu1  ;;  %v8763_v6 = vld [vmem:[#allocation2 + $0x51c] sm:$0xf] }
 0x35d   : > { %v10202_v33 = vadd.f32 %v4578_v39, %v4410_v61  ;;  %v7498_v61 = vld [vmem:[#allocation2 + $0x718] sm:$0xf0]  ;;  %v7266_v39 = vld [vmem:[#allocation2 + $0x540] sm:$0xf0] }
 0x35e   : > { %v10204_v49 = vadd.f32 %v4273_v45, %v4105_v41  ;;  %4143 = vmatmul.bf16.gmra.mxu0 %v7457_v5  ;;  %4620 = vmatmul.bf16.gmra.mxu3 %v7229_v40  ;;  %v7264_v5 = vld [vmem:[#allocation2 + $0x518] sm:$0xf]  ;;  %v7497_v40 = vor.u32 %v8827_v15, %v7496_v42  ;;  %v7269_v45 = vor.u32 %v8763_v6, %v7266_v39  ;;  %v8837_v6 = vld [vmem:[#allocation2 + $0x764] sm:$0xf0]  ;;  %v8832_v39 = vld [vmem:[#allocation2 + $0x744] sm:$0xf] }
 0x35f   : > { %4312 = vmatmul.bf16.gmra.mxu1 %v7461_v13  ;;  %4451 = vmatmul.bf16.gmra.mxu2 %v7225_v43  ;;  %v8768_v13 = vld [vmem:[#allocation2 + $0x53c] sm:$0xf0] }
 0x360   : > { %v7265_v41 = vor.u32 %v8768_v13, %v7264_v5  ;;  %v7536_v13 = vld [vmem:[#allocation2 + $0x740] sm:$0xf] }
 0x361   : > { %v4581_v58 = vpop.f32.mrf.mxu3 }
 0x362   : > { %v4412_v16 = vpop.f32.mrf.mxu2 }
 0x363   : > { %v4413_v52 = vadd.f32 %v4412_v16, %v10132_v30  ;;  %v4106_v51 = vpop.f32.mrf.mxu0  ;;  %v7501_v30 = vor.u32 %v8822_v14, %v7498_v61 }
 0x364   : > { %v4107_v37 = vadd.f32 %v4106_v51, %v9858_v59  ;;  %v4275_v12 = vpop.f32.mrf.mxu1 }
 0x365   : > { %v10208_v44 = vadd.f32 %v4581_v58, %v4413_v52 }
 0x366   : > { %v10210_v24 = vadd.f32 %v4275_v12, %v4107_v37 }
 0x369   : > { %v4583_v59 = vpop.f32.mrf.mxu3 }
 0x36a   : > { %v4414_v43 = vpop.f32.mrf.mxu2 }
 0x36b   : > { %v4415_v16 = vadd.f32 %v4414_v43, %v10138_v10  ;;  %v4109_v17 = vpop.f32.mrf.mxu0  ;;  %v7538_v43 = vld [vmem:[#allocation2 + $0x768] sm:$0xf0] }
 0x36c   : > { %v4110_v52 = vadd.f32 %v4109_v17, %v9868_v11  ;;  %v4278_v51 = vpop.f32.mrf.mxu1  ;;  %v7306_v17 = vld [vmem:[#allocation2 + $0x590] sm:$0xf0] }
 0x36d   : > { %v10214_v58 = vadd.f32 %v4583_v59, %v4415_v16  ;;  %v8773_v16 = vld [vmem:[#allocation2 + $0x56c] sm:$0xf] }
 0x36e   : > { %v10216_v37 = vadd.f32 %v4278_v51, %v4110_v52  ;;  %4148 = vmatmul.bf16.gmra.mxu0 %v7497_v40  ;;  %4625 = vmatmul.bf16.gmra.mxu3 %v7269_v45  ;;  %v7304_v40 = vld [vmem:[#allocation2 + $0x568] sm:$0xf] }
 0x36f   : > { %4317 = vmatmul.bf16.gmra.mxu1 %v7501_v30  ;;  %4456 = vmatmul.bf16.gmra.mxu2 %v7265_v41  ;;  %v8778_v30 = vld [vmem:[#allocation2 + $0x58c] sm:$0xf0]  ;;  %v7537_v41 = vor.u32 %v8837_v6, %v7536_v13 }
 0x370   : > { %v7305_v51 = vor.u32 %v8778_v30, %v7304_v40 }
 0x371   : > { %v4586_v10 = vpop.f32.mrf.mxu3 }
 0x372   : > { %v4417_v12 = vpop.f32.mrf.mxu2 }
 0x373   : > { %v4418_v42 = vadd.f32 %v4417_v12, %v10144_v35  ;;  %v4111_v15 = vpop.f32.mrf.mxu0  ;;  %v7541_v35 = vor.u32 %v8832_v39, %v7538_v43  ;;  %v7309_v12 = vor.u32 %v8773_v16, %v7306_v17  ;;  %v7576_v16 = vld [vmem:[#allocation2 + $0x790] sm:$0xf]  ;;  %v8847_v17 = vld [vmem:[#allocation2 + $0x7b4] sm:$0xf0] }
 0x374   : > { %v4112_v14 = vadd.f32 %v4111_v15, %v9878_v4  ;;  %v4280_v61 = vpop.f32.mrf.mxu1 }
 0x375   : > { %v10220_v5 = vadd.f32 %v4586_v10, %v4418_v42  ;;  %v11686_v42 = vld [vmem:[#allocation40_spill] sm:$0xff] }
 0x376   : > { %v10222_v11 = vadd.f32 %v4280_v61, %v4112_v14 }
 0x377   : > { %11685 = vst [vmem:[#allocation21_spill] sm:$0xff] %v10220_v5 }
 0x379   : > { %v4588_v4 = vpop.f32.mrf.mxu3 }
 0x37a   : > { %v4419_v59 = vpop.f32.mrf.mxu2 }
 0x37b   : > { %v4420_v45 = vadd.f32 %v4419_v59, %v10150_v46  ;;  %v4114_v52 = vpop.f32.mrf.mxu0  ;;  %v8842_v59 = vld [vmem:[#allocation2 + $0x794] sm:$0xf] }
 0x37c   : > { %v4115_v15 = vadd.f32 %v4114_v52, %v11686_v42  ;;  %v4283_v10 = vpop.f32.mrf.mxu1  ;;  %v8783_v52 = vld [vmem:[#allocation2 + $0x5bc] sm:$0xf] }
 0x37d   : > { %v10226_v14 = vadd.f32 %v4588_v4, %v4420_v45  ;;  %v7578_v45 = vld [vmem:[#allocation2 + $0x7b8] sm:$0xf0]  ;;  %v7346_v4 = vld [vmem:[#allocation2 + $0x5e0] sm:$0xf0] }
 0x37e   : > { %v10228_v61 = vadd.f32 %v4283_v10, %v4115_v15  ;;  %4153 = vmatmul.bf16.gmra.mxu0 %v7537_v41  ;;  %4630 = vmatmul.bf16.gmra.mxu3 %v7309_v12  ;;  %v7344_v41 = vld [vmem:[#allocation2 + $0x5b8] sm:$0xf]  ;;  %v7577_v12 = vor.u32 %v8847_v17, %v7576_v16  ;;  %v7349_v10 = vor.u32 %v8783_v52, %v7346_v4  ;;  %v8857_v52 = vld [vmem:[#allocation2 + $0x804] sm:$0xf0]  ;;  %v8852_v4 = vld [vmem:[#allocation2 + $0x7e4] sm:$0xf] }
 0x37f   : > { %4322 = vmatmul.bf16.gmra.mxu1 %v7541_v35  ;;  %4461 = vmatmul.bf16.gmra.mxu2 %v7305_v51  ;;  %v8788_v35 = vld [vmem:[#allocation2 + $0x5dc] sm:$0xf0] }
 0x380   : > { %v7345_v15 = vor.u32 %v8788_v35, %v7344_v41  ;;  %v7616_v35 = vld [vmem:[#allocation2 + $0x7e0] sm:$0xf] }
 0x381   : > { %v4591_v46 = vpop.f32.mrf.mxu3 }
 0x382   : > { %v4422_v5 = vpop.f32.mrf.mxu2 }
 0x383   : > { %v4423_v13 = vadd.f32 %v4422_v5, %v10156_v57  ;;  %v4116_v6 = vpop.f32.mrf.mxu0  ;;  %v7581_v57 = vor.u32 %v8842_v59, %v7578_v45 }
 0x384   : > { %v4117_v39 = vadd.f32 %v4116_v6, %v9898_v50  ;;  %v4285_v43 = vpop.f32.mrf.mxu1 }
 0x385   : > { %v10232_v40 = vadd.f32 %v4591_v46, %v4423_v13 }
 0x386   : > { %v10234_v30 = vadd.f32 %v4285_v43, %v4117_v39 }
 0x389   : > { %v4593_v50 = vpop.f32.mrf.mxu3 }
 0x38a   : > { %v4424_v51 = vpop.f32.mrf.mxu2 }
 0x38b   : > { %v4425_v5 = vadd.f32 %v4424_v51, %v10162_v21  ;;  %v4119_v42 = vpop.f32.mrf.mxu0  ;;  %v7618_v51 = vld [vmem:[#allocation2 + $0x808] sm:$0xf0] }
 0x38c   : > { %v4120_v13 = vadd.f32 %v4119_v42, %v9904_v55  ;;  %v4288_v6 = vpop.f32.mrf.mxu1  ;;  %v7386_v42 = vld [vmem:[#allocation2 + $0x630] sm:$0xf0] }
 0x38d   : > { %v10238_v46 = vadd.f32 %v4593_v50, %v4425_v5  ;;  %v8793_v5 = vld [vmem:[#allocation2 + $0x60c] sm:$0xf] }
 0x38e   : > { %v10240_v39 = vadd.f32 %v4288_v6, %v4120_v13  ;;  %4158 = vmatmul.bf16.gmra.mxu0 %v7577_v12  ;;  %4635 = vmatmul.bf16.gmra.mxu3 %v7349_v10  ;;  %v7384_v12 = vld [vmem:[#allocation2 + $0x608] sm:$0xf] }
 0x38f   : > { %4327 = vmatmul.bf16.gmra.mxu1 %v7581_v57  ;;  %4466 = vmatmul.bf16.gmra.mxu2 %v7345_v15  ;;  %v8798_v57 = vld [vmem:[#allocation2 + $0x62c] sm:$0xf0]  ;;  %v7617_v15 = vor.u32 %v8857_v52, %v7616_v35 }
 0x390   : > { %v7385_v6 = vor.u32 %v8798_v57, %v7384_v12  ;;  %v7656_v57 = vld [vmem:[#allocation2 + $0x830] sm:$0xf] }
 0x391   : > { %v4596_v21 = vpop.f32.mrf.mxu3 }
 0x392   : > { %v4427_v43 = vpop.f32.mrf.mxu2 }
 0x393   : > { %v4428_v16 = vadd.f32 %v4427_v43, %v10168_v29  ;;  %v4121_v17 = vpop.f32.mrf.mxu0  ;;  %v7621_v29 = vor.u32 %v8852_v4, %v7618_v51  ;;  %v7389_v43 = vor.u32 %v8793_v5, %v7386_v42  ;;  %v8867_v5 = vld [vmem:[#allocation2 + $0x854] sm:$0xf0]  ;;  %v8862_v42 = vld [vmem:[#allocation2 + $0x834] sm:$0xf] }
 0x394   : > { %v4122_v59 = vadd.f32 %v4121_v17, %v9910_v8  ;;  %v4290_v45 = vpop.f32.mrf.mxu1 }
 0x395   : > { %v10244_v41 = vadd.f32 %v4596_v21, %v4428_v16 }
 0x396   : > { %v10246_v55 = vadd.f32 %v4290_v45, %v4122_v59 }
 0x399   : > { %v4598_v8 = vpop.f32.mrf.mxu3 }
 0x39a   : > { %v4429_v50 = vpop.f32.mrf.mxu2 }
 0x39b   : > { %v4430_v10 = vadd.f32 %v4429_v50, %v10174_v56  ;;  %v4124_v13 = vpop.f32.mrf.mxu0  ;;  %v7658_v50 = vld [vmem:[#allocation2 + $0x858] sm:$0xf0] }
 0x39c   : > { %v4125_v16 = vadd.f32 %v4124_v13, %v9916_v9  ;;  %v4293_v17 = vpop.f32.mrf.mxu1  ;;  %v7426_v13 = vld [vmem:[#allocation2 + $0x680] sm:$0xf0] }
 0x39d   : > { %v10250_v21 = vadd.f32 %v4598_v8, %v4430_v10  ;;  %v8803_v10 = vld [vmem:[#allocation2 + $0x65c] sm:$0xf] }
 0x39e   : > { %v10252_v59 = vadd.f32 %v4293_v17, %v4125_v16  ;;  %4163 = vmatmul.bf16.gmra.mxu0 %v7617_v15  ;;  %4640 = vmatmul.bf16.gmra.mxu3 %v7389_v43  ;;  %v7424_v15 = vld [vmem:[#allocation2 + $0x658] sm:$0xf] }
 0x39f   : > { %4332 = vmatmul.bf16.gmra.mxu1 %v7621_v29  ;;  %4471 = vmatmul.bf16.gmra.mxu2 %v7385_v6  ;;  %v8808_v29 = vld [vmem:[#allocation2 + $0x67c] sm:$0xf0]  ;;  %v7657_v6 = vor.u32 %v8867_v5, %v7656_v57 }
 0x3a0   : > { %v7425_v17 = vor.u32 %v8808_v29, %v7424_v15  ;;  %v7696_v29 = vld [vmem:[#allocation2 + $0x880] sm:$0xf] }
 0x3a1   : > { %v4601_v56 = vpop.f32.mrf.mxu3 }
 0x3a2   : > { %v4432_v45 = vpop.f32.mrf.mxu2 }
 0x3a3   : > { %v4433_v35 = vadd.f32 %v4432_v45, %v10180_v22  ;;  %v4126_v52 = vpop.f32.mrf.mxu0  ;;  %v7661_v22 = vor.u32 %v8862_v42, %v7658_v50  ;;  %v7429_v45 = vor.u32 %v8803_v10, %v7426_v13  ;;  %v8877_v10 = vld [vmem:[#allocation2 + $0x8a4] sm:$0xf0]  ;;  %v8872_v13 = vld [vmem:[#allocation2 + $0x884] sm:$0xf] }
 0x3a4   : > { %v4127_v4 = vadd.f32 %v4126_v52, %v9922_v28  ;;  %v4295_v51 = vpop.f32.mrf.mxu1 }
 0x3a5   : > { %v10256_v12 = vadd.f32 %v4601_v56, %v4433_v35 }
 0x3a6   : > { %v10258_v9 = vadd.f32 %v4295_v51, %v4127_v4 }
 0x3a9   : > { %v4603_v28 = vpop.f32.mrf.mxu3 }
 0x3aa   : > { %v4434_v8 = vpop.f32.mrf.mxu2 }
 0x3ab   : > { %v4435_v43 = vadd.f32 %v4434_v8, %v10186_v1  ;;  %v4129_v16 = vpop.f32.mrf.mxu0  ;;  %v7698_v8 = vld [vmem:[#allocation2 + $0x8a8] sm:$0xf0] }
 0x3ac   : > { %v4130_v35 = vadd.f32 %v4129_v16, %v9928_v32  ;;  %v4298_v52 = vpop.f32.mrf.mxu1  ;;  %v7466_v16 = vld [vmem:[#allocation2 + $0x6d0] sm:$0xf0] }
 0x3ad   : > { %v10262_v56 = vadd.f32 %v4603_v28, %v4435_v43  ;;  %v8813_v43 = vld [vmem:[#allocation2 + $0x6ac] sm:$0xf] }
 0x3ae   : > { %v10264_v4 = vadd.f32 %v4298_v52, %v4130_v35  ;;  %4168 = vmatmul.bf16.gmra.mxu0 %v7657_v6  ;;  %4645 = vmatmul.bf16.gmra.mxu3 %v7429_v45  ;;  %v7464_v6 = vld [vmem:[#allocation2 + $0x6a8] sm:$0xf] }
 0x3af   : > { %4337 = vmatmul.bf16.gmra.mxu1 %v7661_v22  ;;  %4476 = vmatmul.bf16.gmra.mxu2 %v7425_v17  ;;  %v8818_v22 = vld [vmem:[#allocation2 + $0x6cc] sm:$0xf0]  ;;  %v7697_v17 = vor.u32 %v8877_v10, %v7696_v29 }
 0x3b0   : > { %v7465_v52 = vor.u32 %v8818_v22, %v7464_v6 }
 0x3b1   : > { %v4606_v1 = vpop.f32.mrf.mxu3 }
 0x3b2   : > { %v4437_v51 = vpop.f32.mrf.mxu2 }
 0x3b3   : > { %v4438_v57 = vadd.f32 %v4437_v51, %v10192_v34  ;;  %v4131_v5 = vpop.f32.mrf.mxu0  ;;  %v7701_v34 = vor.u32 %v8872_v13, %v7698_v8  ;;  %v7469_v51 = vor.u32 %v8813_v43, %v7466_v16  ;;  %v11688_v13 = vld [vmem:[#allocation41_spill] sm:$0xff]  ;;  %v7736_v43 = vld [vmem:[#allocation2 + $0x8d0] sm:$0xf]  ;;  %v8887_v16 = vld [vmem:[#allocation2 + $0x8f4] sm:$0xf0] }
 0x3b4   : > { %v4132_v42 = vadd.f32 %v4131_v5, %v9934_v48  ;;  %v4300_v50 = vpop.f32.mrf.mxu1 }
 0x3b5   : > { %v10268_v15 = vadd.f32 %v4606_v1, %v4438_v57 }
 0x3b6   : > { %v10270_v32 = vadd.f32 %v4300_v50, %v4132_v42 }
 0x3b9   : > { %v4608_v48 = vpop.f32.mrf.mxu3 }
 0x3ba   : > { %v4439_v28 = vpop.f32.mrf.mxu2 }
 0x3bb   : > { %v4440_v45 = vadd.f32 %v4439_v28, %v10198_v19  ;;  %v4134_v35 = vpop.f32.mrf.mxu0  ;;  %v8882_v28 = vld [vmem:[#allocation2 + $0x8d4] sm:$0xf] }
 0x3bc   : > { %v4135_v57 = vadd.f32 %v4134_v35, %v9940_v23  ;;  %v4303_v5 = vpop.f32.mrf.mxu1  ;;  %v8823_v35 = vld [vmem:[#allocation2 + $0x6fc] sm:$0xf] }
 0x3bd   : > { %v10274_v1 = vadd.f32 %v4608_v48, %v4440_v45  ;;  %v7738_v45 = vld [vmem:[#allocation2 + $0x8f8] sm:$0xf0]  ;;  %v7506_v48 = vld [vmem:[#allocation2 + $0x720] sm:$0xf0] }
 0x3be   : > { %v10276_v42 = vadd.f32 %v4303_v5, %v4135_v57  ;;  %4173 = vmatmul.bf16.gmra.mxu0 %v7697_v17  ;;  %4650 = vmatmul.bf16.gmra.mxu3 %v7469_v51  ;;  %v7504_v17 = vld [vmem:[#allocation2 + $0x6f8] sm:$0xf]  ;;  %v7741_v51 = vor.u32 %v8882_v28, %v7738_v45  ;;  %v8598_v28 = vld [vmem:[%s9334_s23 + $0x270] sm:$0xff] }
 0x3bf   : > { %11687 = vst [vmem:[#allocation22_spill] sm:$0xff] %v10274_v1  ;;  %4342 = vmatmul.bf16.gmra.mxu1 %v7701_v34  ;;  %4481 = vmatmul.bf16.gmra.mxu2 %v7465_v52  ;;  %v8828_v34 = vld [vmem:[#allocation2 + $0x71c] sm:$0xf0]  ;;  %v7737_v52 = vor.u32 %v8887_v16, %v7736_v43  ;;  %v8591_v1 = vld [vmem:[%s9334_s23 + $0x238] sm:$0xff]  ;;  %v8590_v16 = vld [vmem:[%s9334_s23 + $0x230] sm:$0xff] }
 0x3c0   : > { %v8599_v43 = vld [vmem:[%s9334_s23 + $0x278] sm:$0xff]  ;;  %4706 = vmatpush.bf16.msra.mxu0 %v8591_v1 }
 0x3c1   : > { %v4611_v19 = vpop.f32.mrf.mxu3  ;;  %4875 = vmatpush.bf16.msra.mxu1 %v8599_v43 }
 0x3c2   : > { %v4442_v50 = vpop.f32.mrf.mxu2 }
 0x3c3   : > { %v4443_v29 = vadd.f32 %v4442_v50, %v10204_v49  ;;  %v4136_v10 = vpop.f32.mrf.mxu0 }
 0x3c4   : > { %v4137_v8 = vadd.f32 %v4136_v10, %v11688_v13  ;;  %v4305_v6 = vpop.f32.mrf.mxu1  ;;  %v7509_v10 = vor.u32 %v8823_v35, %v7506_v48  ;;  %4707 = vmatpush.bf16.msra.mxu0 %v8590_v16  ;;  %v8596_v16 = vld [vmem:[%s9334_s23 + $0x260] sm:$0xff] }
 0x3c5   : > { %v10280_v22 = vadd.f32 %v4611_v19, %v4443_v29  ;;  %v7505_v29 = vor.u32 %v8828_v34, %v7504_v17  ;;  %v11690_v19 = vld [vmem:[#allocation42_spill] sm:$0xff]  ;;  %4876 = vmatpush.bf16.msra.mxu1 %v8598_v28 }
 0x3c6   : > { %v10282_v23 = vadd.f32 %v4305_v6, %v4137_v8 }
 0x3c7   : > { %11689 = vst [vmem:[#allocation23_spill] sm:$0xff] %v10280_v22 }
 0x3c9   : > { %v4613_v50 = vpop.f32.mrf.mxu3 }
 0x3ca   : > { %v4444_v49 = vpop.f32.mrf.mxu2 }
 0x3cb   : > { %v4445_v57 = vadd.f32 %v4444_v49, %v10210_v24  ;;  %v4139_v5 = vpop.f32.mrf.mxu0 }
 0x3cc   : > { %v4140_v13 = vadd.f32 %v4139_v5, %v11690_v19  ;;  %v4308_v8 = vpop.f32.mrf.mxu1  ;;  %v8597_v5 = vld [vmem:[%s9334_s23 + $0x268] sm:$0xff] }
 0x3cd   : > { %v10286_v6 = vadd.f32 %v4613_v50, %v4445_v57  ;;  %v8589_v57 = vld [vmem:[%s9334_s23 + $0x228] sm:$0xff]  ;;  %v8892_v50 = vld [vmem:[#allocation2 + $0x924] sm:$0xf]  ;;  %4877 = vmatpush.bf16.msra.mxu1 %v8597_v5  ;;  %v8595_v5 = vld [vmem:[%s9334_s23 + $0x258] sm:$0xff] }
 0x3ce   : > { %v10288_v22 = vadd.f32 %v4308_v8, %v4140_v13  ;;  %4178 = vmatmul.bf16.gmra.mxu0 %v7737_v52  ;;  %4655 = vmatmul.bf16.gmra.mxu3 %v7509_v10  ;;  %v7776_v52 = vld [vmem:[#allocation2 + $0x920] sm:$0xf]  ;;  %v8838_v10 = vld [vmem:[#allocation2 + $0x76c] sm:$0xf0]  ;;  %v8833_v19 = vld [vmem:[#allocation2 + $0x74c] sm:$0xf] }
 0x3cf   : > { %4347 = vmatmul.bf16.gmra.mxu1 %v7741_v51  ;;  %4486 = vmatmul.bf16.gmra.mxu2 %v7505_v29  ;;  %v8897_v51 = vld [vmem:[#allocation2 + $0x944] sm:$0xf0]  ;;  %v7778_v29 = vld [vmem:[#allocation2 + $0x948] sm:$0xf0]  ;;  %v7546_v13 = vld [vmem:[#allocation2 + $0x770] sm:$0xf0] }
 0x3d0   : > { %4708 = vmatpush.bf16.msra.mxu0 %v8589_v57  ;;  %v7777_v8 = vor.u32 %v8897_v51, %v7776_v52  ;;  %v7781_v43 = vor.u32 %v8892_v50, %v7778_v29  ;;  %v8587_v51 = vld [vmem:[%s9334_s23 + $0x218] sm:$0xff]  ;;  %v8586_v50 = vld [vmem:[%s9334_s23 + $0x210] sm:$0xff] }
 0x3d1   : > { %v4616_v34 = vpop.f32.mrf.mxu3  ;;  %4878 = vmatpush.bf16.msra.mxu1 %v8596_v16  ;;  %v8594_v29 = vld [vmem:[%s9334_s23 + $0x250] sm:$0xff]  ;;  %v8593_v16 = vld [vmem:[%s9334_s23 + $0x248] sm:$0xff] }
 0x3d2   : > { %v4447_v24 = vpop.f32.mrf.mxu2 }
 0x3d3   : > { %v4448_v45 = vadd.f32 %v4447_v24, %v10216_v37  ;;  %v4141_v17 = vpop.f32.mrf.mxu0  ;;  %v7544_v37 = vld [vmem:[#allocation2 + $0x748] sm:$0xf]  ;;  %v8588_v24 = vld [vmem:[%s9334_s23 + $0x220] sm:$0xff] }
 0x3d4   : > { %v4142_v35 = vadd.f32 %v4141_v17, %v9967_v62  ;;  %v4310_v48 = vpop.f32.mrf.mxu1  ;;  %4709 = vmatpush.bf16.msra.mxu0 %v8588_v24  ;;  %v8585_v24 = vld [vmem:[%s9334_s23 + $0x208] sm:$0xff] }
 0x3d5   : > { %v10296_v49 = vadd.f32 %v4616_v34, %v4448_v45  ;;  %v7545_v34 = vor.u32 %v8838_v10, %v7544_v37  ;;  %4879 = vmatpush.bf16.msra.mxu1 %v8595_v5  ;;  %v8584_v5 = vld [vmem:[%s9334_s23 + $0x200] sm:$0xff] }
 0x3d6   : > { %v10298_v1 = vadd.f32 %v4310_v48, %v4142_v35  ;;  %v7549_v35 = vor.u32 %v8833_v19, %v7546_v13  ;;  %v11693_v48 = vld [vmem:[#allocation43_spill] sm:$0xff] }
 0x3d7   : > { %11691 = vst [vmem:[#allocation25_spill] sm:$0xff] %v10296_v49 }
 0x3d8   : > { %11692 = vst [vmem:[#allocation27_spill] sm:$0xff] %v10298_v1  ;;  %4710 = vmatpush.bf16.msra.mxu0 %v8587_v51 }
 0x3d9   : > { %v4618_v17 = vpop.f32.mrf.mxu3  ;;  %4880 = vmatpush.bf16.msra.mxu1 %v8594_v29 }
 0x3da   : > { %v4449_v62 = vpop.f32.mrf.mxu2 }
 0x3db   : > { %v4450_v28 = vadd.f32 %v4449_v62, %v10222_v11  ;;  %v4144_v45 = vpop.f32.mrf.mxu0  ;;  %v7816_v62 = vld [vmem:[#allocation2 + $0x970] sm:$0xf] }
 0x3dc   : > { %v4145_v1 = vadd.f32 %v4144_v45, %v11693_v48  ;;  %v4313_v49 = vpop.f32.mrf.mxu1  ;;  %4711 = vmatpush.bf16.msra.mxu0 %v8586_v50  ;;  %v7818_v45 = vld [vmem:[#allocation2 + $0x998] sm:$0xf0] }
 0x3dd   : > { %v10306_v57 = vadd.f32 %v4618_v17, %v4450_v28  ;;  %v8902_v28 = vld [vmem:[#allocation2 + $0x974] sm:$0xf]  ;;  %v8848_v17 = vld [vmem:[#allocation2 + $0x7bc] sm:$0xf0]  ;;  %4881 = vmatpush.bf16.msra.mxu1 %v8593_v16 }
 0x3de   : > { %v10308_v52 = vadd.f32 %v4313_v49, %v4145_v1  ;;  %4183 = vmatmul.bf16.gmra.mxu0 %v7777_v8  ;;  %4660 = vmatmul.bf16.gmra.mxu3 %v7549_v35  ;;  %v7586_v35 = vld [vmem:[#allocation2 + $0x7c0] sm:$0xf0]  ;;  %v7821_v51 = vor.u32 %v8902_v28, %v7818_v45 }
 0x3df   : > { %4352 = vmatmul.bf16.gmra.mxu1 %v7781_v43  ;;  %4491 = vmatmul.bf16.gmra.mxu2 %v7545_v34  ;;  %v8907_v43 = vld [vmem:[#allocation2 + $0x994] sm:$0xf0]  ;;  %v8843_v34 = vld [vmem:[#allocation2 + $0x79c] sm:$0xf] }
 0x3e0   : > { %4712 = vmatpush.bf16.msra.mxu0 %v8585_v24  ;;  %v7817_v48 = vor.u32 %v8907_v43, %v7816_v62 }
 0x3e1   : > { %v4621_v19 = vpop.f32.mrf.mxu3 }
 0x3e2   : > { %v4452_v11 = vpop.f32.mrf.mxu2 }
 0x3e3   : > { %v4453_v37 = vadd.f32 %v4452_v11, %v10228_v61  ;;  %v4146_v10 = vpop.f32.mrf.mxu0  ;;  %v7584_v61 = vld [vmem:[#allocation2 + $0x798] sm:$0xf]  ;;  %v8592_v11 = vld [vmem:[%s9334_s23 + $0x240] sm:$0xff]  ;;  %s409_s23 = scalar_lea.vmem %s11598_s9, %s6597_s17 }
 0x3e4   : > { %v4147_v49 = vadd.f32 %v4146_v10, %v9986_v47  ;;  %v4315_v1 = vpop.f32.mrf.mxu1  ;;  %v7585_v10 = vor.u32 %v8848_v17, %v7584_v61  ;;  %4713 = vmatpush.bf16.msra.mxu0 %v8584_v5  ;;  %4882 = vmatpush.bf16.msra.mxu1 %v8592_v11  ;;  %v7856_v17 = vld [vmem:[#allocation2 + $0x9c0] sm:$0xf]  ;;  %v8853_v5 = vld [vmem:[#allocation2 + $0x7ec] sm:$0xf]  ;;  %v7626_v11 = vld [vmem:[#allocation2 + $0x810] sm:$0xf0] }
 0x3e5   : > { %v10316_v13 = vadd.f32 %v4621_v19, %v4453_v37  ;;  %v7589_v19 = vor.u32 %v8843_v34, %v7586_v35  ;;  %v8917_v34 = vld [vmem:[#allocation2 + $0x9e4] sm:$0xf0]  ;;  %v8912_v35 = vld [vmem:[#allocation2 + $0x9c4] sm:$0xf] }
 0x3e6   : > { %v10318_v8 = vadd.f32 %v4315_v1, %v4147_v49 }
 0x3e8   : > { %11694 = vst [vmem:[#allocation28_spill] sm:$0xff] %v10318_v8 }
 0x3e9   : > { %v4623_v37 = vpop.f32.mrf.mxu3 }
 0x3ea   : > { %v4454_v47 = vpop.f32.mrf.mxu2 }
 0x3eb   : > { %v4455_v50 = vadd.f32 %v4454_v47, %v10234_v30  ;;  %v4149_v29 = vpop.f32.mrf.mxu0  ;;  %v7858_v47 = vld [vmem:[#allocation2 + $0x9e8] sm:$0xf0] }
 0x3ec   : > { %v4150_v49 = vadd.f32 %v4149_v29, %v9992_v3  ;;  %v4318_v1 = vpop.f32.mrf.mxu1  ;;  %v7857_v29 = vor.u32 %v8917_v34, %v7856_v17 }
 0x3ed   : > { %v10326_v8 = vadd.f32 %v4623_v37, %v4455_v50 }
 0x3ee   : > { %v10328_v24 = vadd.f32 %v4318_v1, %v4150_v49  ;;  %4188 = vmatmul.bf16.gmra.mxu0 %v7817_v48  ;;  %4665 = vmatmul.bf16.gmra.mxu3 %v7589_v19  ;;  %v7624_v48 = vld [vmem:[#allocation2 + $0x7e8] sm:$0xf]  ;;  %v7629_v49 = vor.u32 %v8853_v5, %v7626_v11  ;;  %v8604_v5 = vld [vmem:[#allocation2 + $0x24] sm:$0xf]  ;;  %v6634_v11 = vld [vmem:[#allocation2 + $0x48] sm:$0xf0] }
 0x3ef   : > { %4357 = vmatmul.bf16.gmra.mxu1 %v7821_v51  ;;  %4496 = vmatmul.bf16.gmra.mxu2 %v7585_v10  ;;  %v8858_v51 = vld [vmem:[#allocation2 + $0x80c] sm:$0xf0] }
 0x3f0   : > { %v7625_v19 = vor.u32 %v8858_v51, %v7624_v48  ;;  %v6632_v48 = vld [vmem:[#allocation2 + $0x20] sm:$0xf]  ;;  %v8609_v51 = vld [vmem:[#allocation2 + $0x44] sm:$0xf0] }
 0x3f1   : > { %v4626_v16 = vpop.f32.mrf.mxu3 }
 0x3f2   : > { %v4457_v62 = vpop.f32.mrf.mxu2 }
 0x3f3   : > { %v4458_v30 = vadd.f32 %v4457_v62, %v10240_v39  ;;  %v4151_v43 = vpop.f32.mrf.mxu0  ;;  %v7861_v39 = vor.u32 %v8912_v35, %v7858_v47  ;;  %v7664_v47 = vld [vmem:[#allocation2 + $0x838] sm:$0xf] }
 0x3f4   : > { %v4152_v28 = vadd.f32 %v4151_v43, %v9998_v38  ;;  %v4320_v45 = vpop.f32.mrf.mxu1 }
 0x3f5   : > { %v10332_v3 = vadd.f32 %v4626_v16, %v4458_v30 }
 0x3f6   : > { %v10334_v61 = vadd.f32 %v4320_v45, %v4152_v28 }
 0x3f9   : > { %v4628_v38 = vpop.f32.mrf.mxu3 }
 0x3fa   : > { %v4459_v50 = vpop.f32.mrf.mxu2 }
 0x3fb   : > { %v4460_v37 = vadd.f32 %v4459_v50, %v10246_v55  ;;  %v4154_v10 = vpop.f32.mrf.mxu0  ;;  %v8868_v50 = vld [vmem:[#allocation2 + $0x85c] sm:$0xf0] }
 0x3fc   : > { %v4155_v1 = vadd.f32 %v4154_v10, %v10004_v63  ;;  %v4323_v62 = vpop.f32.mrf.mxu1  ;;  %v6633_v10 = vor.u32 %v8609_v51, %v6632_v48 }
 0x3fd   : > { %v10338_v30 = vadd.f32 %v4628_v38, %v4460_v37 }
 0x3fe   : > { %v10340_v43 = vadd.f32 %v4323_v62, %v4155_v1  ;;  %4193 = vmatmul.bf16.gmra.mxu0 %v7857_v29  ;;  %4670 = vmatmul.bf16.gmra.mxu3 %v7629_v49  ;;  %v8863_v29 = vld [vmem:[#allocation2 + $0x83c] sm:$0xf]  ;;  %v7665_v49 = vor.u32 %v8868_v50, %v7664_v47  ;;  %v8619_v50 = vld [vmem:[#allocation2 + $0x94] sm:$0xf0] }
 0x3ff   : > { %4362 = vmatmul.bf16.gmra.mxu1 %v7861_v39  ;;  %4501 = vmatmul.bf16.gmra.mxu2 %v7625_v19  ;;  %v7666_v39 = vld [vmem:[#allocation2 + $0x860] sm:$0xf0] }
 0x400   : > { %v7669_v1 = vor.u32 %v8863_v29, %v7666_v39  ;;  %v8614_v29 = vld [vmem:[#allocation2 + $0x74] sm:$0xf]  ;;  %v6674_v39 = vld [vmem:[#allocation2 + $0x98] sm:$0xf0] }
 0x401   : > { %v4631_v55 = vpop.f32.mrf.mxu3 }
 0x402   : > { %v4462_v16 = vpop.f32.mrf.mxu2 }
 0x403   : > { %v4463_v28 = vadd.f32 %v4462_v16, %v10252_v59  ;;  %v4156_v45 = vpop.f32.mrf.mxu0  ;;  %v6637_v59 = vor.u32 %v8604_v5, %v6634_v11  ;;  %v7704_v5 = vld [vmem:[#allocation2 + $0x888] sm:$0xf]  ;;  %v6672_v11 = vld [vmem:[#allocation2 + $0x70] sm:$0xf] }
 0x404   : > { %v4157_v17 = vadd.f32 %v4156_v45, %v10010_v27  ;;  %v4325_v34 = vpop.f32.mrf.mxu1 }
 0x405   : > { %v10344_v35 = vadd.f32 %v4631_v55, %v4463_v28 }
 0x406   : > { %v10346_v63 = vadd.f32 %v4325_v34, %v4157_v17 }
 0x409   : > { %v4633_v27 = vpop.f32.mrf.mxu3 }
 0x40a   : > { %v4464_v37 = vpop.f32.mrf.mxu2 }
 0x40b   : > { %v4465_v38 = vadd.f32 %v4464_v37, %v10258_v9  ;;  %v4159_v19 = vpop.f32.mrf.mxu0  ;;  %v8878_v37 = vld [vmem:[#allocation2 + $0x8ac] sm:$0xf0] }
 0x40c   : > { %v4160_v62 = vadd.f32 %v4159_v19, %v10016_v18  ;;  %v4328_v16 = vpop.f32.mrf.mxu1  ;;  %v6673_v19 = vor.u32 %v8619_v50, %v6672_v11 }
 0x40d   : > { %v10350_v28 = vadd.f32 %v4633_v27, %v4465_v38 }
 0x40e   : > { %v10352_v45 = vadd.f32 %v4328_v16, %v4160_v62  ;;  %4714 = vmatmul.bf16.vlgmr.msra.gmra.mxu0 %v6633_v10  ;;  %4675 = vmatmul.bf16.gmra.mxu3 %v7669_v1  ;;  %v8873_v10 = vld [vmem:[#allocation2 + $0x88c] sm:$0xf]  ;;  %v7705_v1 = vor.u32 %v8878_v37, %v7704_v5  ;;  %v8629_v37 = vld [vmem:[#allocation2 + $0xe4] sm:$0xf0] }
 0x40f   : > { %4883 = vmatmul.bf16.vlgmr.msra.gmra.mxu1 %v6637_v59  ;;  %4506 = vmatmul.bf16.gmra.mxu2 %v7665_v49  ;;  %v7706_v59 = vld [vmem:[#allocation2 + $0x8b0] sm:$0xf0] }
 0x410   : > { %v7709_v62 = vor.u32 %v8873_v10, %v7706_v59  ;;  %v8624_v10 = vld [vmem:[#allocation2 + $0xc4] sm:$0xf]  ;;  %v6714_v59 = vld [vmem:[#allocation2 + $0xe8] sm:$0xf0] }
 0x411   : > { %v4636_v9 = vpop.f32.mrf.mxu3 }
 0x412   : > { %v4467_v55 = vpop.f32.mrf.mxu2 }
 0x413   : > { %v4468_v17 = vadd.f32 %v4467_v55, %v10264_v4  ;;  %v4161_v34 = vpop.f32.mrf.mxu0  ;;  %v6677_v4 = vor.u32 %v8614_v29, %v6674_v39  ;;  %v7744_v29 = vld [vmem:[#allocation2 + $0x8d8] sm:$0xf]  ;;  %v6712_v39 = vld [vmem:[#allocation2 + $0xc0] sm:$0xf] }
 0x414   : > { %v4162_v48 = vadd.f32 %v4161_v34, %v10022_v53  ;;  %v4330_v47 = vpop.f32.mrf.mxu1 }
 0x415   : > { %v10356_v51 = vadd.f32 %v4636_v9, %v4468_v17 }
 0x416   : > { %v10358_v18 = vadd.f32 %v4330_v47, %v4162_v48 }
 0x418   : > { %11695 = vst [vmem:[#allocation30_spill] sm:$0xff] %v10358_v18 }
 0x419   : > { %v4638_v53 = vpop.f32.mrf.mxu3 }
 0x41a   : > { %v4469_v38 = vpop.f32.mrf.mxu2 }
 0x41b   : > { %v4470_v27 = vadd.f32 %v4469_v38, %v10270_v32  ;;  %v4164_v49 = vpop.f32.mrf.mxu0  ;;  %v8888_v38 = vld [vmem:[#allocation2 + $0x8fc] sm:$0xf0] }
 0x41c   : > { %v4165_v16 = vadd.f32 %v4164_v49, %v10028_v20  ;;  %v4333_v55 = vpop.f32.mrf.mxu1  ;;  %v6713_v49 = vor.u32 %v8629_v37, %v6712_v39 }
 0x41d   : > { %v10362_v17 = vadd.f32 %v4638_v53, %v4470_v27 }
 0x41e   : > { %v10364_v34 = vadd.f32 %v4333_v55, %v4165_v16  ;;  %4719 = vmatmul.bf16.gmra.mxu0 %v6673_v19  ;;  %4680 = vmatmul.bf16.gmra.mxu3 %v7709_v62  ;;  %v8883_v19 = vld [vmem:[#allocation2 + $0x8dc] sm:$0xf]  ;;  %v7745_v62 = vor.u32 %v8888_v38, %v7744_v29 }
 0x41f   : > { %4888 = vmatmul.bf16.gmra.mxu1 %v6677_v4  ;;  %4511 = vmatmul.bf16.gmra.mxu2 %v7705_v1  ;;  %v7746_v4 = vld [vmem:[#allocation2 + $0x900] sm:$0xf0] }
 0x420   : > { %v7749_v16 = vor.u32 %v8883_v19, %v7746_v4  ;;  %v7784_v19 = vld [vmem:[#allocation2 + $0x928] sm:$0xf]  ;;  %v6752_v4 = vld [vmem:[#allocation2 + $0x110] sm:$0xf] }
 0x421   : > { %v4641_v32 = vpop.f32.mrf.mxu3 }
 0x422   : > { %v4472_v9 = vpop.f32.mrf.mxu2 }
 0x423   : > { %v4473_v48 = vadd.f32 %v4472_v9, %v10276_v42  ;;  %v4166_v47 = vpop.f32.mrf.mxu0  ;;  %v6717_v42 = vor.u32 %v8624_v10, %v6714_v59  ;;  %v5234_v10 = vld [vmem:[%s11593_s4 + $0xf0] sm:$0xff]  ;;  %v5235_v59 = vld [vmem:[%s11593_s4 + $0xf8] sm:$0xff] }
 0x424   : > { %v4167_v11 = vadd.f32 %v4166_v47, %v10034_v7  ;;  %v4335_v5 = vpop.f32.mrf.mxu1  ;;  %v5218_v47 = vld [vmem:[%s11593_s4 + $0x70] sm:$0xff]  ;;  %5388 = vperm.xlu0 %9077, %v5234_v10  }
 0x425   : > { %v10368_v50 = vadd.f32 %v4641_v32, %v4473_v48  ;;  %5308 = vperm.xlu1 %9078, %v5218_v47  }
 0x426   : > { %v10370_v20 = vadd.f32 %v4335_v5, %v4167_v11 }
 0x428   : > { %11696 = vst [vmem:[#allocation32_spill] sm:$0xff] %v10370_v20  ;;  %v11714_v20 = vld [vmem:[#allocation9_spill] sm:$0xff] }
 0x429   : > { %v4643_v7 = vpop.f32.mrf.mxu3 }
 0x42a   : > { %v4474_v27 = vpop.f32.mrf.mxu2 }
 0x42b   : > { %v4475_v53 = vadd.f32 %v4474_v27, %v10282_v23  ;;  %v4169_v1 = vpop.f32.mrf.mxu0  ;;  %v8634_v27 = vld [vmem:[#allocation2 + $0x114] sm:$0xf] }
 0x42c   : > { %v4170_v55 = vadd.f32 %v4169_v1, %v10040_v26  ;;  %v4338_v9 = vpop.f32.mrf.mxu1 }
 0x42d   : > { %v10374_v48 = vadd.f32 %v4643_v7, %v4475_v53  ;;  %v7786_v53 = vld [vmem:[#allocation2 + $0x950] sm:$0xf0]  ;;  %5393 = vperm.xlu1 %9078, %v5235_v59  }
 0x42e   : > { %v10379_v32 = vadd.f32 %v4338_v9, %v4170_v55  ;;  %4724 = vmatmul.bf16.gmra.mxu0 %v6713_v49  ;;  %4685 = vmatmul.bf16.gmra.mxu3 %v7749_v16  ;;  %v6754_v49 = vld [vmem:[#allocation2 + $0x138] sm:$0xf0] }
 0x42f   : > { %4893 = vmatmul.bf16.gmra.mxu1 %v6717_v42  ;;  %4516 = vmatmul.bf16.gmra.mxu2 %v7745_v62  ;;  %v8893_v42 = vld [vmem:[#allocation2 + $0x92c] sm:$0xf]  ;;  %v6757_v62 = vor.u32 %v8634_v27, %v6754_v49  ;;  %v5214_v27 = vld [vmem:[%s11593_s4 + $0x50] sm:$0xff]  ;;  %v5215_v49 = vld [vmem:[%s11593_s4 + $0x58] sm:$0xff] }
 0x430   : > { %v7789_v47 = vor.u32 %v8893_v42, %v7786_v53  ;;  %v7824_v42 = vld [vmem:[#allocation2 + $0x978] sm:$0xf]  ;;  %v6792_v53 = vld [vmem:[#allocation2 + $0x160] sm:$0xf] }
 0x431   : > { %v4646_v29 = vpop.f32.mrf.mxu3 }
 0x432   : > { %v4477_v23 = vpop.f32.mrf.mxu2 }
 0x433   : > { %v4478_v11 = vadd.f32 %v4477_v23, %v10288_v22  ;;  %v4171_v5 = vpop.f32.mrf.mxu0  ;;  %v8639_v22 = vld [vmem:[#allocation2 + $0x134] sm:$0xf0] }
 0x434   : > { %v4172_v26 = vadd.f32 %v4171_v5, %v10046_v0  ;;  %v4340_v39 = vpop.f32.mrf.mxu1  ;;  %v8898_v0 = vld [vmem:[#allocation2 + $0x94c] sm:$0xf0]  ;;  %v6753_v7 = vor.u32 %v8639_v22, %v6752_v4  ;;  %v5217_v5 = vld [vmem:[%s11593_s4 + $0x68] sm:$0xff] }
 0x435   : > { %v10383_v37 = vadd.f32 %v4646_v29, %v4478_v11  ;;  %v7785_v9 = vor.u32 %v8898_v0, %v7784_v19  ;;  %v5232_v29 = vld [vmem:[%s11593_s4 + $0xe0] sm:$0xff]  ;;  %5303 = vperm.xlu0 %9077, %v5217_v5  }
 0x436   : > { %v10391_v38 = vadd.f32 %v4340_v39, %v4172_v26  ;;  %5378 = vperm.xlu1 %9078, %v5232_v29  }
 0x438   : > { %11697 = vst [vmem:[#allocation33_spill] sm:$0xff] %v10391_v38 }
 0x439   : > { %v10395_v55 = vpop.f32.mrf.mxu3 }
 0x43a   : > { %v10393_v1 = vpop.f32.mrf.mxu2 }
 0x43b   : > { %v4174_v16 = vpop.f32.mrf.mxu0 }
 0x43c   : > { %v4175_v23 = vadd.f32 %v4174_v16, %v10052_v25  ;;  %v4343_v11 = vpop.f32.mrf.mxu1  ;;  %v8908_v16 = vld [vmem:[#allocation2 + $0x99c] sm:$0xf0] }
 0x43d   : > { %5288 = vperm.xlu0 %9077, %v5214_v27  }
 0x43e   : > { %v10404_v26 = vadd.f32 %v4343_v11, %v4175_v23  ;;  %4729 = vmatmul.bf16.gmra.mxu0 %v6753_v7  ;;  %4690 = vmatmul.bf16.gmra.mxu3 %v7789_v47  ;;  %v8644_v7 = vld [vmem:[#allocation2 + $0x164] sm:$0xf] }
 0x43f   : > { %4898 = vmatmul.bf16.gmra.mxu1 %v6757_v62  ;;  %4521 = vmatmul.bf16.gmra.mxu2 %v7785_v9  ;;  %v6794_v62 = vld [vmem:[#allocation2 + $0x188] sm:$0xf0]  ;;  %v7826_v9 = vld [vmem:[#allocation2 + $0x9a0] sm:$0xf0] }
 0x440   : > { %5293 = vperm.xlu1 %9078, %v5215_v49   ;;  %v6797_v11 = vor.u32 %v8644_v7, %v6794_v62 }
 0x441   : > { %v4651_v59 = vpop.f32.mrf.mxu3 }
 0x442   : > { %v4482_v39 = vpop.f32.mrf.mxu2 }
 0x443   : > { %v4483_v25 = vadd.f32 %v4482_v39, %v10308_v52  ;;  %v4176_v10 = vpop.f32.mrf.mxu0  ;;  %v8649_v52 = vld [vmem:[#allocation2 + $0x184] sm:$0xf0]  ;;  %v7825_v39 = vor.u32 %v8908_v16, %v7824_v42 }
 0x444   : > { %v4177_v19 = vadd.f32 %v4176_v10, %v10058_v2  ;;  %v4345_v4 = vpop.f32.mrf.mxu1  ;;  %v8903_v2 = vld [vmem:[#allocation2 + $0x97c] sm:$0xf]  ;;  %v6793_v23 = vor.u32 %v8649_v52, %v6792_v53 }
 0x445   : > { %v10408_v22 = vadd.f32 %v4651_v59, %v4483_v25  ;;  %v7829_v25 = vor.u32 %v8903_v2, %v7826_v9  ;;  %v5219_v52 = vld [vmem:[%s11593_s4 + $0x78] sm:$0xff]  ;;  %v5228_v2 = vld [vmem:[%s11593_s4 + $0xc0] sm:$0xff] }
 0x446   : > { %v10416_v0 = vadd.f32 %v4345_v4, %v4177_v19  ;;  %v5231_v19 = vld [vmem:[%s11593_s4 + $0xd8] sm:$0xff]  ;;  %v5212_v4 = vld [vmem:[%s11593_s4 + $0x40] sm:$0xff]  ;;  %5313 = vperm.xlu2 %9079, %v5219_v52  }
 0x447   : > { %5373 = vperm.xlu0 %9077, %v5231_v19  }
 0x448   : > { %11698 = vst [vmem:[#allocation34_spill] sm:$0xff] %v10416_v0  ;;  %5278 = vperm.xlu1 %9078, %v5212_v4  }
 0x449   : > { %v10420_v29 = vpop.f32.mrf.mxu3 }
 0x44a   : > { %v10418_v47 = vpop.f32.mrf.mxu2 }
 0x44b   : > { %v4179_v5 = vpop.f32.mrf.mxu0 }
 0x44c   : > { %v4180_v10 = vadd.f32 %v4179_v5, %v10064_v36  ;;  %v4348_v59 = vpop.f32.mrf.mxu1  ;;  %v8659_v5 = vld [vmem:[#allocation2 + $0x1d4] sm:$0xf0] }
 0x44e   : > { %v10429_v27 = vadd.f32 %v4348_v59, %v4180_v10  ;;  %4734 = vmatmul.bf16.gmra.mxu0 %v6793_v23  ;;  %4695 = vmatmul.bf16.gmra.mxu3 %v7829_v25  ;;  %v7864_v23 = vld [vmem:[#allocation2 + $0x9c8] sm:$0xf]  ;;  %v6834_v25 = vld [vmem:[#allocation2 + $0x1d8] sm:$0xf0]  ;;  %v8913_v10 = vld [vmem:[#allocation2 + $0x9cc] sm:$0xf] }
 0x44f   : > { %4903 = vmatmul.bf16.gmra.mxu1 %v6797_v11  ;;  %4526 = vmatmul.bf16.gmra.mxu2 %v7825_v39  ;;  %v6832_v11 = vld [vmem:[#allocation2 + $0x1b0] sm:$0xf]  ;;  %v8654_v39 = vld [vmem:[#allocation2 + $0x1b4] sm:$0xf] }
 0x450   : > { %v7866_v59 = vld [vmem:[#allocation2 + $0x9f0] sm:$0xf0]  ;;  %5358 = vperm.xlu0 %9077, %v5228_v2   ;;  %v6833_v4 = vor.u32 %v8659_v5, %v6832_v11  ;;  %v5211_v2 = vld [vmem:[%s11593_s4 + $0x38] sm:$0xff] }
 0x451   : > { %v4656_v53 = vpop.f32.mrf.mxu3  ;;  %v7869_v52 = vor.u32 %v8913_v10, %v7866_v59  ;;  %v11701_v10 = vld [vmem:[#allocation17_spill] sm:$0xff] }
 0x452   : > { %v4487_v49 = vpop.f32.mrf.mxu2 }
 0x453   : > { %v4488_v36 = vadd.f32 %v4487_v49, %v10328_v24  ;;  %v4181_v42 = vpop.f32.mrf.mxu0  ;;  %v5229_v24 = vld [vmem:[%s11593_s4 + $0xc8] sm:$0xff]  ;;  %v6837_v49 = vor.u32 %v8654_v39, %v6834_v25 }
 0x454   : > { %v4182_v7 = vadd.f32 %v4181_v42, %v10072_v31  ;;  %v4350_v62 = vpop.f32.mrf.mxu1  ;;  %v8918_v31 = vld [vmem:[#allocation2 + $0x9ec] sm:$0xf0]  ;;  %5363 = vperm.xlu1 %9078, %v5229_v24  }
 0x455   : > { %v10436_v16 = vadd.f32 %v4656_v53, %v4488_v36  ;;  %v7865_v53 = vor.u32 %v8918_v31, %v7864_v23  ;;  %v5226_v24 = vld [vmem:[%s11593_s4 + $0xb0] sm:$0xff]  ;;  %v5233_v31 = vld [vmem:[%s11593_s4 + $0xe8] sm:$0xff] }
 0x456   : > { %v10444_v9 = vadd.f32 %v4350_v62, %v4182_v7  ;;  %v5216_v7 = vld [vmem:[%s11593_s4 + $0x60] sm:$0xff] }
 0x457   : > { %v11700_v62 = vld [vmem:[#allocation44_spill] sm:$0xff]  ;;  %5298 = vperm.xlu2 %9079, %v5216_v7   ;;  %v6874_v7 = vld [vmem:[#allocation2 + $0x228] sm:$0xf0] }
 0x458   : > { %11699 = vst [vmem:[#allocation35_spill] sm:$0xff] %v10444_v9  ;;  %5273 = vperm.xlu0 %9077, %v5211_v2  }
 0x459   : > { %v10448_v42 = vpop.f32.mrf.mxu3 }
 0x45a   : > { %v10446_v19 = vpop.f32.mrf.mxu2 }
 0x45b   : > { %v4184_v36 = vpop.f32.mrf.mxu0 }
 0x45c   : > { %v4185_v9 = vadd.f32 %v4184_v36, %v11700_v62  ;;  %v4353_v0 = vpop.f32.mrf.mxu1  ;;  %5348 = vperm.xlu1 %9078, %v5226_v24  }
 0x45e   : > { %v10460_v11 = vadd.f32 %v4353_v0, %v4185_v9  ;;  %4739 = vmatmul.bf16.gmra.mxu0 %v6833_v4  ;;  %4700 = vmatmul.bf16.gmra.mxu3 %v7869_v52  ;;  %v5208_v9 = vld [vmem:[%s11593_s4 + $0x20] sm:$0xff] }
 0x45f   : > { %4908 = vmatmul.bf16.gmra.mxu1 %v6837_v49  ;;  %4531 = vmatmul.bf16.gmra.mxu2 %v7865_v53  ;;  %v6872_v49 = vld [vmem:[#allocation2 + $0x200] sm:$0xf]  ;;  %v8669_v53 = vld [vmem:[#allocation2 + $0x224] sm:$0xf0]  ;;  %v8664_v52 = vld [vmem:[#allocation2 + $0x204] sm:$0xf] }
 0x460   : > { %5383 = vperm.xlu2 %9079, %v5233_v31   ;;  %5258 = vperm.xlu0 %9077, %v5208_v9   ;;  %v6873_v2 = vor.u32 %v8669_v53, %v6872_v49  ;;  %v6877_v24 = vor.u32 %v8664_v52, %v6874_v7  ;;  %v5213_v7 = vld [vmem:[%s11593_s4 + $0x48] sm:$0xff] }
 0x461   : > { %v4661_v25 = vpop.f32.mrf.mxu3 }
 0x462   : > { %v4492_v23 = vpop.f32.mrf.mxu2 }
 0x463   : > { %v4493_v5 = vadd.f32 %v4492_v23, %v10340_v43  ;;  %v4186_v39 = vpop.f32.mrf.mxu0  ;;  %v5209_v43 = vld [vmem:[%s11593_s4 + $0x28] sm:$0xff] }
 0x464   : > { %v4187_v59 = vadd.f32 %v4186_v39, %v11701_v10  ;;  %v4355_v36 = vpop.f32.mrf.mxu1  ;;  %5263 = vperm.xlu1 %9078, %v5209_v43   ;;  %v5230_v39 = vld [vmem:[%s11593_s4 + $0xd0] sm:$0xff] }
 0x465   : > { %v10467_v0 = vadd.f32 %v4661_v25, %v4493_v5  ;;  %v11704_v25 = vld [vmem:[#allocation31_spill] sm:$0xff] }
 0x466   : > { %v10475_v4 = vadd.f32 %v4355_v36, %v4187_v59  ;;  %v5225_v59 = vld [vmem:[%s11593_s4 + $0xa8] sm:$0xff]  ;;  %v5206_v36 = vld [vmem:[%s11593_s4 + $0x10] sm:$0xff] }
 0x468   : > { %11702 = vst [vmem:[#allocation36_spill] sm:$0xff] %v10475_v4  ;;  %5368 = vperm.xlu2 %9079, %v5230_v39   ;;  %5343 = vperm.xlu0 %9077, %v5225_v59   ;;  %v8674_v59 = vld [vmem:[#allocation2 + $0x254] sm:$0xf]  ;;  %v11709_v4 = vld [vmem:[#allocation10_spill] sm:$0xff] }
 0x469   : > { %v10479_v5 = vpop.f32.mrf.mxu3 }
 0x46a   : > { %v10477_v62 = vpop.f32.mrf.mxu2  ;;  %11703 = vst [vmem:[#allocation37_spill] sm:$0xff] %v10479_v5 }
 0x46b   : > { %v4189_v23 = vpop.f32.mrf.mxu0 }
 0x46c   : > { %v4190_v31 = vadd.f32 %v4189_v23, %v11704_v25  ;;  %v4358_v10 = vpop.f32.mrf.mxu1  ;;  %5248 = vperm.xlu1 %9078, %v5206_v36   ;;  %v6914_v36 = vld [vmem:[#allocation2 + $0x278] sm:$0xf0] }
 0x46e   : > { %v10491_v9 = vadd.f32 %v4358_v10, %v4190_v31  ;;  %4744 = vmatmul.bf16.gmra.mxu0 %v6873_v2  ;;  %v5222_v2 = vld [vmem:[%s11593_s4 + $0x90] sm:$0xff]  ;;  %v8679_v10 = vld [vmem:[#allocation2 + $0x274] sm:$0xf0] }
 0x46f   : > { %4913 = vmatmul.bf16.gmra.mxu1 %v6877_v24  ;;  %v6912_v31 = vld [vmem:[#allocation2 + $0x250] sm:$0xf] }
 0x470   : > { %5283 = vperm.xlu2 %9079, %v5213_v7   ;;  %5328 = vperm.xlu0 %9077, %v5222_v2   ;;  %v5210_v7 = vld [vmem:[%s11593_s4 + $0x30] sm:$0xff]  ;;  %v5205_v2 = vld [vmem:[%s11593_s4 + $0x8] sm:$0xff] }
 0x471   : > { %v4666_v52 = vpop.f32.mrf.mxu3 }
 0x472   : > { %v4497_v43 = vpop.f32.mrf.mxu2 }
 0x473   : > { %v4498_v49 = vadd.f32 %v4497_v43, %v10352_v45  ;;  %v4191_v53 = vpop.f32.mrf.mxu0  ;;  %v5223_v45 = vld [vmem:[%s11593_s4 + $0x98] sm:$0xff]  ;;  %v6913_v43 = vor.u32 %v8679_v10, %v6912_v31 }
 0x474   : > { %v4192_v23 = vadd.f32 %v4191_v53, %v10104_v60  ;;  %v4360_v39 = vpop.f32.mrf.mxu1  ;;  %5333 = vperm.xlu1 %9078, %v5223_v45   ;;  %v5220_v45 = vld [vmem:[%s11593_s4 + $0x80] sm:$0xff] }
 0x475   : > { %v10498_v25 = vadd.f32 %v4666_v52, %v4498_v49  ;;  %v6917_v49 = vor.u32 %v8674_v59, %v6914_v36 }
 0x476   : > { %v10506_v24 = vadd.f32 %v4360_v39, %v4192_v23 }
 0x477   : > { %11705 = vst [vmem:[#allocation38_spill] sm:$0xff] %v10498_v25 }
 0x478   : > { %11706 = vst [vmem:[#allocation39_spill] sm:$0xff] %v10506_v24  ;;  %5268 = vperm.xlu2 %9079, %v5210_v7   ;;  %5243 = vperm.xlu0 %9077, %v5205_v2   ;;  %v8684_v2 = vld [vmem:[#allocation2 + $0x2a4] sm:$0xf] }
 0x479   : > { %v10510_v52 = vpop.f32.mrf.mxu3 }
 0x47a   : > { %v10508_v60 = vpop.f32.mrf.mxu2  ;;  %11708 = vst [vmem:[#allocation41_spill] sm:$0xff] %v10510_v52 }
 0x47b   : > { %11707 = vst [vmem:[#allocation40_spill] sm:$0xff] %v10508_v60  ;;  %v4194_v53 = vpop.f32.mrf.mxu0 }
 0x47c   : > { %v4195_v23 = vadd.f32 %v4194_v53, %v11709_v4  ;;  %v4363_v39 = vpop.f32.mrf.mxu1  ;;  %5318 = vperm.xlu1 %9078, %v5220_v45   ;;  %v5227_v53 = vld [vmem:[%s11593_s4 + $0xb8] sm:$0xff]  ;;  %v6954_v45 = vld [vmem:[#allocation2 + $0x2c8] sm:$0xf0] }
 0x47e   : > { %v10522_v31 = vadd.f32 %v4363_v39, %v4195_v23  ;;  %4749 = vmatmul.bf16.gmra.mxu0 %v6913_v43  ;;  %v6150_v43 = vld [vmem:[%s11595_s6 + $0x70] sm:$0xff]  ;;  %v6952_v23 = vld [vmem:[#allocation2 + $0x2a0] sm:$0xf]  ;;  %v8689_v39 = vld [vmem:[#allocation2 + $0x2c4] sm:$0xf0] }
 0x47f   : > { %4918 = vmatmul.bf16.gmra.mxu1 %v6917_v49 }
 0x480   : > { %5353 = vperm.xlu2 %9079, %v5227_v53   ;;  %6224 = vperm.xlu0 %9077, %v6150_v43   ;;  %v5224_v53 = vld [vmem:[%s11593_s4 + $0xa0] sm:$0xff]  ;;  %v6149_v43 = vld [vmem:[%s11595_s6 + $0x68] sm:$0xff] }
 0x481   : > { %v4671_v36 = vpop.f32.mrf.mxu3 }
 0x482   : > { %v4502_v10 = vpop.f32.mrf.mxu2 }
 0x483   : > { %v4503_v59 = vadd.f32 %v4502_v10, %v10364_v34  ;;  %v4196_v4 = vpop.f32.mrf.mxu0  ;;  %v6151_v34 = vld [vmem:[%s11595_s6 + $0x78] sm:$0xff]  ;;  %v6953_v10 = vor.u32 %v8689_v39, %v6952_v23 }
 0x484   : > { %v4197_v7 = vadd.f32 %v4196_v4, %v10118_v54  ;;  %v4365_v24 = vpop.f32.mrf.mxu1  ;;  %6229 = vperm.xlu1 %9078, %v6151_v34   ;;  %v6146_v34 = vld [vmem:[%s11595_s6 + $0x50] sm:$0xff] }
 0x485   : > { %v10529_v38 = vadd.f32 %v4671_v36, %v4503_v59  ;;  %v6957_v59 = vor.u32 %v8684_v2, %v6954_v45 }
 0x486   : > { %v10537_v49 = vadd.f32 %v4365_v24, %v4197_v7 }
 0x487   : > { %11710 = vst [vmem:[#allocation42_spill] sm:$0xff] %v10529_v38 }
 0x488   : > { %11711 = vst [vmem:[#allocation43_spill] sm:$0xff] %v10537_v49  ;;  %5338 = vperm.xlu2 %9079, %v5224_v53   ;;  %6219 = vperm.xlu0 %9077, %v6149_v43   ;;  %v11715_v53 = vld [vmem:[#allocation18_spill] sm:$0xff]  ;;  %v8694_v43 = vld [vmem:[#allocation2 + $0x2f4] sm:$0xf] }
 0x489   : > { %v10541_v4 = vpop.f32.mrf.mxu3 }
 0x48a   : > { %v10539_v54 = vpop.f32.mrf.mxu2  ;;  %11713 = vst [vmem:[#allocation17_spill] sm:$0xff] %v10541_v4 }
 0x48b   : > { %11712 = vst [vmem:[#allocation44_spill] sm:$0xff] %v10539_v54  ;;  %v4715_v36 = vpop.f32.mrf.mxu0 }
 0x48c   : > { %v4716_v24 = vadd.f32 %v4715_v36, %v11714_v20  ;;  %v4884_v7 = vpop.f32.mrf.mxu1  ;;  %6204 = vperm.xlu1 %9078, %v6146_v34   ;;  %v5207_v36 = vld [vmem:[%s11593_s4 + $0x18] sm:$0xff] }
 0x48d   : > { %v6994_v34 = vld [vmem:[#allocation2 + $0x318] sm:$0xf0] }
 0x48e   : > { %v4885_v23 = vadd.f32 %v4884_v7, %v4716_v24  ;;  %4754 = vmatmul.bf16.gmra.mxu0 %v6953_v10  ;;  %v6144_v10 = vld [vmem:[%s11595_s6 + $0x40] sm:$0xff]  ;;  %v6992_v24 = vld [vmem:[#allocation2 + $0x2f0] sm:$0xf]  ;;  %v8699_v7 = vld [vmem:[#allocation2 + $0x314] sm:$0xf0] }
 0x48f   : > { %4923 = vmatmul.bf16.gmra.mxu1 %v6957_v59 }
 0x490   : > { %5253 = vperm.xlu2 %9079, %v5207_v36   ;;  %6194 = vperm.xlu0 %9077, %v6144_v10  }
 0x491   : > { %v4676_v45 = vpop.f32.mrf.mxu3 }
 0x492   : > { %v4507_v39 = vpop.f32.mrf.mxu2 }
 0x493   : > { %v4508_v2 = vadd.f32 %v4507_v39, %v10379_v32  ;;  %v4717_v20 = vpop.f32.mrf.mxu0  ;;  %v6145_v32 = vld [vmem:[%s11595_s6 + $0x48] sm:$0xff]  ;;  %v5044_v39 = vmax.f32 %v4885_v23, 0.0  ;;  %v6143_v23 = vld [vmem:[%s11595_s6 + $0x38] sm:$0xff] }
 0x494   : > { %v4718_v49 = vadd.f32 %v4717_v20, %v11715_v53  ;;  %v4886_v4 = vpop.f32.mrf.mxu1  ;;  %6199 = vperm.xlu1 %9078, %v6145_v32  }
 0x495   : > { %v10558_v54 = vadd.f32 %v4676_v45, %v4508_v2  ;;  %v6993_v2 = vor.u32 %v8699_v7, %v6992_v24  ;;  %v6997_v45 = vor.u32 %v8694_v43, %v6994_v34  ;;  %v5221_v7 = vld [vmem:[%s11593_s4 + $0x88] sm:$0xff]  ;;  %v11720_v43 = vld [vmem:[#allocation12_spill] sm:$0xff] }
 0x496   : > { %v4887_v59 = vadd.f32 %v4886_v4, %v4718_v49  ;;  %v5204_v49 = vld [vmem:[%s11593_s4] sm:$0xff]  ;;  %v11719_v4 = vld [vmem:[#allocation26_spill] sm:$0xff] }
 0x497   : > { %11716 = vst [vmem:[#allocation31_spill] sm:$0xff] %v10558_v54 }
 0x498   : > { %v5045_v38 = vmax.f32 %v4887_v59, 0.0  ;;  %5238 = vperm.xlu2 %9079, %v5204_v49   ;;  %6189 = vperm.xlu0 %9077, %v6143_v23   ;;  %v7034_v23 = vld [vmem:[#allocation2 + $0x368] sm:$0xf0] }
 0x499   : > { %v10570_v53 = vpop.f32.mrf.mxu3 }
 0x49a   : > { %v10566_v20 = vpop.f32.mrf.mxu2  ;;  %v10568_v36 = vpack.c.bf16 %v5045_v38, %v5044_v39  ;;  %11718 = vst [vmem:[#allocation9_spill] sm:$0xff] %v10570_v53  ;;  %v6140_v38 = vld [vmem:[%s11595_s6 + $0x20] sm:$0xff] }
 0x49b   : > { %11717 = vst [vmem:[#allocation10_spill] sm:$0xff] %v10566_v20  ;;  %v4720_v54 = vpop.f32.mrf.mxu0 }
 0x49c   : > { %v4721_v52 = vadd.f32 %v4720_v54, %v11719_v4  ;;  %v4889_v60 = vpop.f32.mrf.mxu1  ;;  %6174 = vperm.xlu1 %9078, %v6140_v38   ;;  %v8704_v4 = vld [vmem:[#allocation2 + $0x344] sm:$0xf] }
 0x49e   : > { %v4890_v10 = vadd.f32 %v4889_v60, %v4721_v52  ;;  %4759 = vmatmul.bf16.gmra.mxu0 %v6993_v2  ;;  %v6138_v60 = vld [vmem:[%s11595_s6 + $0x10] sm:$0xff]  ;;  %v7032_v2 = vld [vmem:[#allocation2 + $0x340] sm:$0xf] }
 0x49f   : > { %4928 = vmatmul.bf16.gmra.mxu1 %v6997_v45  ;;  %v8709_v45 = vld [vmem:[#allocation2 + $0x364] sm:$0xf0] }
 0x4a0   : > { %5323 = vperm.xlu2 %9079, %v5221_v7   ;;  %v5046_v38 = vmax.f32 %v4890_v10, 0.0  ;;  %6164 = vperm.xlu0 %9077, %v6138_v60   ;;  %v6137_v10 = vld [vmem:[%s11595_s6 + $0x8] sm:$0xff]  ;;  %v6435_v60 = vld [vmem:[%s11597_s8] sm:$0xff] }
 0x4a1   : > { %v4681_v24 = vpop.f32.mrf.mxu3 }
 0x4a2   : > { %v4512_v32 = vpop.f32.mrf.mxu2 }
 0x4a3   : > { %v4513_v59 = vadd.f32 %v4512_v32, %v10404_v26  ;;  %v4722_v54 = vpop.f32.mrf.mxu0  ;;  %v6139_v26 = vld [vmem:[%s11595_s6 + $0x18] sm:$0xff] }
 0x4a4   : > { %v4723_v34 = vadd.f32 %v4722_v54, %v11720_v43  ;;  %v4891_v39 = vpop.f32.mrf.mxu1  ;;  %6169 = vperm.xlu1 %9078, %v6139_v26  }
 0x4a5   : > { %v10587_v49 = vadd.f32 %v4681_v24, %v4513_v59  ;;  %v7033_v59 = vor.u32 %v8709_v45, %v7032_v2  ;;  %v7037_v24 = vor.u32 %v8704_v4, %v7034_v23  ;;  %v6147_v4 = vld [vmem:[%s11595_s6 + $0x58] sm:$0xff] }
 0x4a6   : > { %v4892_v52 = vadd.f32 %v4891_v39, %v4723_v34  ;;  %v6148_v34 = vld [vmem:[%s11595_s6 + $0x60] sm:$0xff]  ;;  %v11724_v39 = vld [vmem:[#allocation11_spill] sm:$0xff] }
 0x4a7   : > { %11721 = vst [vmem:[#allocation18_spill] sm:$0xff] %v10587_v49  ;;  %v11725_v23 = vld [vmem:[#allocation19_spill] sm:$0xff] }
 0x4a8   : > { %v5047_v32 = vmax.f32 %v4892_v52, 0.0  ;;  %6214 = vperm.xlu2 %9079, %v6148_v34   ;;  %6159 = vperm.xlu0 %9077, %v6137_v10  }
 0x4a9   : > { %v10599_v43 = vpop.f32.mrf.mxu3 }
 0x4aa   : > { %v10595_v54 = vpop.f32.mrf.mxu2  ;;  %v10597_v7 = vpack.c.bf16 %v5047_v32, %v5046_v38  ;;  %11723 = vst [vmem:[#allocation12_spill] sm:$0xff] %v10599_v43 }
 0x4ab   : > { %11722 = vst [vmem:[#allocation26_spill] sm:$0xff] %v10595_v54  ;;  %v4725_v49 = vpop.f32.mrf.mxu0 }
 0x4ac   : > { %v4726_v53 = vadd.f32 %v4725_v49, %v11724_v39  ;;  %v4894_v20 = vpop.f32.mrf.mxu1  ;;  %6438 = vperm.xlu1 %9078, %v6435_v60   ;;  %v7074_v39 = vld [vmem:[#allocation2 + $0x3b8] sm:$0xf0] }
 0x4ae   : > { %v4895_v26 = vadd.f32 %v4894_v20, %v4726_v53  ;;  %4764 = vmatmul.bf16.gmra.mxu0 %v7033_v59  ;;  %v7072_v53 = vld [vmem:[#allocation2 + $0x390] sm:$0xf]  ;;  %v8719_v59 = vld [vmem:[#allocation2 + $0x3b4] sm:$0xf0] }
 0x4af   : > { %4933 = vmatmul.bf16.gmra.mxu1 %v7037_v24  ;;  %v8714_v24 = vld [vmem:[#allocation2 + $0x394] sm:$0xf] }
 0x4b0   : > { %6209 = vperm.xlu2 %9079, %v6147_v4   ;;  %v5048_v10 = vmax.f32 %v4895_v26, 0.0  ;;  %v7077_v43 = vor.u32 %v8714_v24, %v7074_v39  ;;  %v11730_v24 = vld [vmem:[#allocation14_spill] sm:$0xff] }
 0x4b1   : > { %v4686_v45 = vpop.f32.mrf.mxu3 }
 0x4b2   : > { %v4517_v52 = vpop.f32.mrf.mxu2 }
 0x4b3   : > { %v4518_v2 = vadd.f32 %v4517_v52, %v10429_v27  ;;  %v4727_v49 = vpop.f32.mrf.mxu0  ;;  %v7073_v52 = vor.u32 %v8719_v59, %v7072_v53  ;;  %v6141_v59 = vld [vmem:[%s11595_s6 + $0x28] sm:$0xff] }
 0x4b4   : > { %v4728_v38 = vadd.f32 %v4727_v49, %v11725_v23  ;;  %v4896_v32 = vpop.f32.mrf.mxu1 }
 0x4b5   : > { %v10616_v34 = vadd.f32 %v4686_v45, %v4518_v2  ;;  %v6142_v2 = vld [vmem:[%s11595_s6 + $0x30] sm:$0xff]  ;;  %v11729_v45 = vld [vmem:[#allocation24_spill] sm:$0xff] }
 0x4b6   : > { %v4897_v20 = vadd.f32 %v4896_v32, %v4728_v38 }
 0x4b7   : > { %11726 = vst [vmem:[#allocation11_spill] sm:$0xff] %v10616_v34 }
 0x4b8   : > { %v5049_v60 = vmax.f32 %v4897_v20, 0.0  ;;  %6184 = vperm.xlu2 %9079, %v6142_v2   ;;  %v7112_v2 = vld [vmem:[#allocation2 + $0x3e0] sm:$0xf] }
 0x4b9   : > { %v10622_v18 = vpop.f32.mrf.mxu3 }
 0x4ba   : > { %v10618_v27 = vpop.f32.mrf.mxu2  ;;  %v10620_v54 = vpack.c.bf16 %v5049_v60, %v5048_v10  ;;  %11728 = vst [vmem:[#allocation45_spill] sm:$0xff] %v10622_v18 }
 0x4bb   : > { %11727 = vst [vmem:[#allocation19_spill] sm:$0xff] %v10618_v27  ;;  %v4730_v49 = vpop.f32.mrf.mxu0 }
 0x4bc   : > { %v4731_v4 = vadd.f32 %v4730_v49, %v11729_v45  ;;  %v4899_v23 = vpop.f32.mrf.mxu1  ;;  %v8729_v45 = vld [vmem:[#allocation2 + $0x404] sm:$0xf0] }
 0x4be   : > { %v4900_v38 = vadd.f32 %v4899_v23, %v4731_v4  ;;  %4769 = vmatmul.bf16.gmra.mxu0 %v7073_v52  ;;  %v8724_v52 = vld [vmem:[#allocation2 + $0x3e4] sm:$0xf] }
 0x4bf   : > { %4938 = vmatmul.bf16.gmra.mxu1 %v7077_v43  ;;  %v7114_v43 = vld [vmem:[#allocation2 + $0x408] sm:$0xf0] }
 0x4c0   : > { %6179 = vperm.xlu2 %9079, %v6141_v59   ;;  %v5050_v4 = vmax.f32 %v4900_v38, 0.0  ;;  %v7117_v18 = vor.u32 %v8724_v52, %v7114_v43 }
 0x4c1   : > { %v4691_v20 = vpop.f32.mrf.mxu3 }
 0x4c2   : > { %v4522_v26 = vpop.f32.mrf.mxu2 }
 0x4c3   : > { %v4523_v32 = vadd.f32 %v4522_v26, %v10460_v11  ;;  %v4732_v53 = vpop.f32.mrf.mxu0  ;;  %v7113_v26 = vor.u32 %v8729_v45, %v7112_v2  ;;  %v11735_v45 = vld [vmem:[#allocation20_spill] sm:$0xff] }
 0x4c4   : > { %v4733_v39 = vadd.f32 %v4732_v53, %v11730_v24  ;;  %v4901_v10 = vpop.f32.mrf.mxu1 }
 0x4c5   : > { %v10633_v60 = vadd.f32 %v4691_v20, %v4523_v32  ;;  %v6136_v32 = vld [vmem:[%s11595_s6] sm:$0xff] }
 0x4c6   : > { %v4902_v49 = vadd.f32 %v4901_v10, %v4733_v39  ;;  %v11734_v20 = vld [vmem:[#allocation13_spill] sm:$0xff] }
 0x4c7   : > { %11731 = vst [vmem:[#allocation24_spill] sm:$0xff] %v10633_v60  ;;  %v8739_v60 = vld [vmem:[#allocation2 + $0x454] sm:$0xf0] }
 0x4c8   : > { %v5051_v23 = vmax.f32 %v4902_v49, 0.0  ;;  %6154 = vperm.xlu2 %9079, %v6136_v32  }
 0x4c9   : > { %v10639_v34 = vpop.f32.mrf.mxu3 }
 0x4ca   : > { %v10635_v11 = vpop.f32.mrf.mxu2  ;;  %v10637_v27 = vpack.c.bf16 %v5051_v23, %v5050_v4  ;;  %11733 = vst [vmem:[#allocation46_spill] sm:$0xff] %v10639_v34  ;;  %v7152_v34 = vld [vmem:[#allocation2 + $0x430] sm:$0xf] }
 0x4cb   : > { %11732 = vst [vmem:[#allocation14_spill] sm:$0xff] %v10635_v11  ;;  %v4735_v53 = vpop.f32.mrf.mxu0  ;;  %v8734_v11 = vld [vmem:[#allocation2 + $0x434] sm:$0xf] }
 0x4cc   : > { %v4736_v59 = vadd.f32 %v4735_v53, %v11734_v20  ;;  %v4904_v24 = vpop.f32.mrf.mxu1  ;;  %v7154_v53 = vld [vmem:[#allocation2 + $0x458] sm:$0xf0] }
 0x4ce   : > { %v4905_v39 = vadd.f32 %v4904_v24, %v4736_v59  ;;  %4774 = vmatmul.bf16.gmra.mxu0 %v7113_v26  ;;  %v7157_v26 = vor.u32 %v8734_v11, %v7154_v53  ;;  %v7192_v53 = vld [vmem:[#allocation2 + $0x480] sm:$0xf] }
 0x4cf   : > { %4943 = vmatmul.bf16.gmra.mxu1 %v7117_v18  ;;  %v7153_v18 = vor.u32 %v8739_v60, %v7152_v34 }
 0x4d0   : > { %v5052_v20 = vmax.f32 %v4905_v39, 0.0 }
 0x4d1   : > { %v4696_v49 = vpop.f32.mrf.mxu3 }
 0x4d2   : > { %v4527_v38 = vpop.f32.mrf.mxu2 }
 0x4d3   : > { %v4528_v10 = vadd.f32 %v4527_v38, %v10491_v9  ;;  %v4737_v2 = vpop.f32.mrf.mxu0 }
 0x4d4   : > { %v4738_v52 = vadd.f32 %v4737_v2, %v11735_v45  ;;  %v4906_v43 = vpop.f32.mrf.mxu1 }
 0x4d5   : > { %v10647_v4 = vadd.f32 %v4696_v49, %v4528_v10  ;;  %v11739_v10 = vld [vmem:[#allocation29_spill] sm:$0xff] }
 0x4d6   : > { %v4907_v23 = vadd.f32 %v4906_v43, %v4738_v52 }
 0x4d7   : > { %11736 = vst [vmem:[#allocation13_spill] sm:$0xff] %v10647_v4  ;;  %v11740_v4 = vld [vmem:[#allocation16_spill] sm:$0xff] }
 0x4d8   : > { %v5053_v32 = vmax.f32 %v4907_v23, 0.0 }
 0x4d9   : > { %v10653_v9 = vpop.f32.mrf.mxu3 }
 0x4da   : > { %v10649_v59 = vpop.f32.mrf.mxu2  ;;  %v10651_v24 = vpack.c.bf16 %v5053_v32, %v5052_v20  ;;  %11738 = vst [vmem:[#allocation47_spill] sm:$0xff] %v10653_v9  ;;  %v8749_v20 = vld [vmem:[#allocation2 + $0x4a4] sm:$0xf0]  ;;  %v8744_v32 = vld [vmem:[#allocation2 + $0x484] sm:$0xf] }
 0x4db   : > { %11737 = vst [vmem:[#allocation20_spill] sm:$0xff] %v10649_v59  ;;  %v4740_v38 = vpop.f32.mrf.mxu0  ;;  %v7194_v9 = vld [vmem:[#allocation2 + $0x4a8] sm:$0xf0]  ;;  %v7193_v25 = vor.u32 %v8749_v20, %v7192_v53 }
 0x4dc   : > { %v4909_v2 = vpop.f32.mrf.mxu1  ;;  %v4741_v49 = vadd.f32 %v4740_v38, %v11739_v10  ;;  %v7197_v38 = vor.u32 %v8744_v32, %v7194_v9 }
 0x4de   : > { %4779 = vmatmul.bf16.gmra.mxu0 %v7153_v18  ;;  %v4910_v23 = vadd.f32 %v4909_v2, %v4741_v49  ;;  %v11742_v2 = vld [vmem:[#allocation15_spill] sm:$0xff] }
 0x4df   : > { %4948 = vmatmul.bf16.gmra.mxu1 %v7157_v26 }
 0x4e0   : > { %v5054_v18 = vmax.f32 %v4910_v23, 0.0  ;;  %v7234_v23 = vld [vmem:[#allocation2 + $0x4f8] sm:$0xf0] }
 0x4e1   : > { %v4701_v43 = vpop.f32.mrf.mxu3 }
 0x4e2   : > { %v4532_v45 = vpop.f32.mrf.mxu2 }
 0x4e3   : > { %v4533_v52 = vadd.f32 %v4532_v45, %v10522_v31  ;;  %v4742_v39 = vpop.f32.mrf.mxu0 }
 0x4e4   : > { %v4743_v59 = vadd.f32 %v4742_v39, %v11740_v4  ;;  %v4911_v34 = vpop.f32.mrf.mxu1  ;;  %v7232_v39 = vld [vmem:[#allocation2 + $0x4d0] sm:$0xf] }
 0x4e5   : > { %v10658_v60 = vadd.f32 %v4701_v43, %v4533_v52 }
 0x4e6   : > { %v4912_v11 = vadd.f32 %v4911_v34, %v4743_v59  ;;  %v8759_v34 = vld [vmem:[#allocation2 + $0x4f4] sm:$0xf0] }
 0x4e7   : > { %11741 = vst [vmem:[#allocation29_spill] sm:$0xff] %v10658_v60  ;;  %v8754_v60 = vld [vmem:[#allocation2 + $0x4d4] sm:$0xf]  ;;  %v7233_v9 = vor.u32 %v8759_v34, %v7232_v39 }
 0x4e8   : > { %v5055_v26 = vmax.f32 %v4912_v11, 0.0  ;;  %v7237_v20 = vor.u32 %v8754_v60, %v7234_v23 }
 0x4ea   : > { %v5177_v10 = vpack.c.bf16 %v5055_v26, %v5054_v18 }
 0x4eb   : > { %v4745_v5 = vpop.f32.mrf.mxu0 }
 0x4ec   : > { %v4914_v31 = vpop.f32.mrf.mxu1  ;;  %v4746_v49 = vadd.f32 %v4745_v5, %v11742_v2 }
 0x4ee   : > { %4784 = vmatmul.bf16.gmra.mxu0 %v7193_v25  ;;  %v4915_v45 = vadd.f32 %v4914_v31, %v4746_v49  ;;  %v7272_v49 = vld [vmem:[#allocation2 + $0x520] sm:$0xf] }
 0x4ef   : > { %4953 = vmatmul.bf16.gmra.mxu1 %v7197_v38 }
 0x4f0   : > { %v5056_v11 = vmax.f32 %v4915_v45, 0.0  ;;  %v7274_v45 = vld [vmem:[#allocation2 + $0x548] sm:$0xf0] }
 0x4f3   : > { %v4747_v4 = vpop.f32.mrf.mxu0 }
 0x4f4   : > { %v4748_v52 = vadd.f32 %v4747_v4, %v10202_v33  ;;  %v4916_v59 = vpop.f32.mrf.mxu1  ;;  %v8769_v4 = vld [vmem:[#allocation2 + $0x544] sm:$0xf0] }
 0x4f5   : > { %v7273_v39 = vor.u32 %v8769_v4, %v7272_v49 }
 0x4f6   : > { %v4917_v43 = vadd.f32 %v4916_v59, %v4748_v52  ;;  %v8764_v52 = vld [vmem:[#allocation2 + $0x524] sm:$0xf] }
 0x4f7   : > { %v7277_v34 = vor.u32 %v8764_v52, %v7274_v45 }
 0x4f8   : > { %v5057_v53 = vmax.f32 %v4917_v43, 0.0 }
 0x4fa   : > { %v5178_v32 = vpack.c.bf16 %v5057_v53, %v5056_v11  ;;  %v11743_v11 = vld [vmem:[#allocation21_spill] sm:$0xff] }
 0x4fb   : > { %v4750_v18 = vpop.f32.mrf.mxu0 }
 0x4fc   : > { %v4919_v25 = vpop.f32.mrf.mxu1  ;;  %v4751_v5 = vadd.f32 %v4750_v18, %v10208_v44 }
 0x4fe   : > { %4789 = vmatmul.bf16.gmra.mxu0 %v7233_v9  ;;  %v4920_v38 = vadd.f32 %v4919_v25, %v4751_v5  ;;  %v7312_v5 = vld [vmem:[#allocation2 + $0x570] sm:$0xf] }
 0x4ff   : > { %4958 = vmatmul.bf16.gmra.mxu1 %v7237_v20 }
 0x500   : > { %v5058_v59 = vmax.f32 %v4920_v38, 0.0  ;;  %v8774_v38 = vld [vmem:[#allocation2 + $0x574] sm:$0xf] }
 0x503   : > { %v4752_v26 = vpop.f32.mrf.mxu0 }
 0x504   : > { %v4753_v33 = vadd.f32 %v4752_v26, %v10214_v58  ;;  %v4921_v31 = vpop.f32.mrf.mxu1  ;;  %v8779_v26 = vld [vmem:[#allocation2 + $0x594] sm:$0xf0] }
 0x505   : > { %v7313_v49 = vor.u32 %v8779_v26, %v7312_v5 }
 0x506   : > { %v4922_v2 = vadd.f32 %v4921_v31, %v4753_v33  ;;  %v7314_v33 = vld [vmem:[#allocation2 + $0x598] sm:$0xf0] }
 0x507   : > { %v7317_v4 = vor.u32 %v8774_v38, %v7314_v33  ;;  %v8926_v33 = vld [vmem:[%s11592_s3 + $0x2c] sm:$0xf0] }
 0x508   : > { %v5059_v43 = vmax.f32 %v4922_v2, 0.0 }
 0x50a   : > { %v5179_v60 = vpack.c.bf16 %v5059_v43, %v5058_v59 }
 0x50b   : > { %v4755_v23 = vpop.f32.mrf.mxu0 }
 0x50c   : > { %v4756_v53 = vadd.f32 %v4755_v23, %v11743_v11  ;;  %v4924_v9 = vpop.f32.mrf.mxu1  ;;  %5716 = vmatpush.bf16.msrb.mxu2 %v5179_v60  ;;  %v8789_v23 = vld [vmem:[#allocation2 + $0x5e4] sm:$0xf0]  ;;  %v8784_v11 = vld [vmem:[#allocation2 + $0x5c4] sm:$0xf] }
 0x50e   : > { %v4925_v44 = vadd.f32 %v4924_v9, %v4756_v53  ;;  %4794 = vmatmul.bf16.gmra.mxu0 %v7273_v39  ;;  %v7352_v39 = vld [vmem:[#allocation2 + $0x5c0] sm:$0xf] }
 0x50f   : > { %4963 = vmatmul.bf16.gmra.mxu1 %v7277_v34 }
 0x510   : > { %5717 = vmatpush.bf16.msrb.mxu2 %v5178_v32  ;;  %v5060_v31 = vmax.f32 %v4925_v44, 0.0 }
 0x513   : > { %v4757_v58 = vpop.f32.mrf.mxu0 }
 0x514   : > { %v4758_v20 = vadd.f32 %v4757_v58, %v10226_v14  ;;  %v4926_v18 = vpop.f32.mrf.mxu1  ;;  %5718 = vmatpush.bf16.msrb.mxu2 %v5177_v10 }
 0x516   : > { %v4927_v25 = vadd.f32 %v4926_v18, %v4758_v20 }
 0x518   : > { %v5061_v2 = vmax.f32 %v4927_v25, 0.0  ;;  %5719 = vmatpush.bf16.msrb.mxu2 %v10651_v24  ;;  %v8200_v24 = vld [vmem:[%s11592_s3] sm:$0xf] }
 0x51a   : > { %v10667_v52 = vpack.c.bf16 %v5061_v2, %v5060_v31  ;;  %v7392_v2 = vld [vmem:[#allocation2 + $0x610] sm:$0xf] }
 0x51b   : > { %v4760_v45 = vpop.f32.mrf.mxu0 }
 0x51c   : > { %v4761_v32 = vadd.f32 %v4760_v45, %v10232_v40  ;;  %v4929_v59 = vpop.f32.mrf.mxu1  ;;  %5720 = vmatpush.bf16.msrb.mxu2 %v10637_v27  ;;  %v8922_v40 = vld [vmem:[%s11592_s3 + $0xc] sm:$0xf0]  ;;  %v7394_v45 = vld [vmem:[#allocation2 + $0x638] sm:$0xf0] }
 0x51d   : > { %v8201_v34 = vor.u32 %v8922_v40, %v8200_v24 }
 0x51e   : > { %v4930_v14 = vadd.f32 %v4929_v59, %v4761_v32  ;;  %4799 = vmatmul.bf16.gmra.mxu0 %v7313_v49 }
 0x51f   : > { %4968 = vmatmul.bf16.gmra.mxu1 %v7317_v4  ;;  %v8794_v4 = vld [vmem:[#allocation2 + $0x614] sm:$0xf] }
 0x520   : > { %5721 = vmatpush.bf16.msrb.mxu2 %v10620_v54  ;;  %v7354_v54 = vld [vmem:[#allocation2 + $0x5e8] sm:$0xf0]  ;;  %v5062_v53 = vmax.f32 %v4930_v14, 0.0 }
 0x523   : > { %v4762_v10 = vpop.f32.mrf.mxu0 }
 0x524   : > { %v4763_v43 = vadd.f32 %v4762_v10, %v10238_v46  ;;  %v4931_v60 = vpop.f32.mrf.mxu1  ;;  %5722 = vmatpush.bf16.msrb.mxu2 %v10597_v7  ;;  %v7353_v46 = vor.u32 %v8789_v23, %v7352_v39  ;;  %v7357_v7 = vor.u32 %v8784_v11, %v7354_v54  ;;  %v7397_v10 = vor.u32 %v8794_v4, %v7394_v45  ;;  %v8232_v23 = vld [vmem:[%s11592_s3 + $0x40] sm:$0xf]  ;;  %v8930_v11 = vld [vmem:[%s11592_s3 + $0x4c] sm:$0xf0] }
 0x525   : > { %v8934_v4 = vld [vmem:[%s11592_s3 + $0x6c] sm:$0xf0] }
 0x526   : > { %v4932_v27 = vadd.f32 %v4931_v60, %v4763_v43 }
 0x528   : > { %v5063_v9 = vmax.f32 %v4932_v27, 0.0  ;;  %5723 = vmatpush.bf16.msrb.mxu2 %v10568_v36  ;;  %v8216_v36 = vld [vmem:[%s11592_s3 + $0x20] sm:$0xf] }
 0x529   : > { %v8217_v49 = vor.u32 %v8926_v33, %v8216_v36 }
 0x52a   : > { %v10681_v44 = vpack.c.bf16 %v5063_v9, %v5062_v53  ;;  %v7432_v53 = vld [vmem:[#allocation2 + $0x660] sm:$0xf]  ;;  %v8233_v9 = vor.u32 %v8930_v11, %v8232_v23  ;;  %v11745_v23 = vld [vmem:[#allocation23_spill] sm:$0xff] }
 0x52b   : > { %v4765_v58 = vpop.f32.mrf.mxu0  ;;  %5724 = vmatmul.bf16.vlgmr.msrb.gmra.mxu2 %v8201_v34 }
 0x52c   : > { %v4766_v20 = vadd.f32 %v4765_v58, %v10244_v41  ;;  %v4934_v18 = vpop.f32.mrf.mxu1  ;;  %v8799_v41 = vld [vmem:[#allocation2 + $0x634] sm:$0xf0] }
 0x52d   : > { %v7393_v14 = vor.u32 %v8799_v41, %v7392_v2  ;;  %v8248_v41 = vld [vmem:[%s11592_s3 + $0x60] sm:$0xf] }
 0x52e   : > { %v4935_v25 = vadd.f32 %v4934_v18, %v4766_v20  ;;  %4804 = vmatmul.bf16.gmra.mxu0 %v7353_v46  ;;  %v8804_v46 = vld [vmem:[#allocation2 + $0x664] sm:$0xf] }
 0x52f   : > { %4973 = vmatmul.bf16.gmra.mxu1 %v7357_v7  ;;  %v7434_v7 = vld [vmem:[#allocation2 + $0x688] sm:$0xf0] }
 0x530   : > { %v5064_v32 = vmax.f32 %v4935_v25, 0.0  ;;  %v7437_v25 = vor.u32 %v8804_v46, %v7434_v7  ;;  %v8264_v46 = vld [vmem:[%s11592_s3 + $0x80] sm:$0xf]  ;;  %v8938_v7 = vld [vmem:[%s11592_s3 + $0x8c] sm:$0xf0] }
 0x533   : > { %v4767_v5 = vpop.f32.mrf.mxu0 }
 0x534   : > { %v4768_v26 = vadd.f32 %v4767_v5, %v10250_v21  ;;  %v4936_v38 = vpop.f32.mrf.mxu1 }
 0x536   : > { %v4937_v31 = vadd.f32 %v4936_v38, %v4768_v26 }
 0x538   : > { %v5065_v59 = vmax.f32 %v4937_v31, 0.0  ;;  %v11744_v31 = vld [vmem:[#allocation22_spill] sm:$0xff] }
 0x53a   : > { %v10691_v21 = vpack.c.bf16 %v5065_v59, %v5064_v32  ;;  %v7472_v32 = vld [vmem:[#allocation2 + $0x6b0] sm:$0xf]  ;;  %v8249_v59 = vor.u32 %v8934_v4, %v8248_v41  ;;  %v11746_v41 = vld [vmem:[#allocation25_spill] sm:$0xff] }
 0x53b   : > { %v4770_v43 = vpop.f32.mrf.mxu0  ;;  %5729 = vmatmul.bf16.gmra.mxu2 %v8217_v49 }
 0x53c   : > { %v4771_v60 = vadd.f32 %v4770_v43, %v10256_v12  ;;  %v4939_v24 = vpop.f32.mrf.mxu1  ;;  %v8809_v12 = vld [vmem:[#allocation2 + $0x684] sm:$0xf0] }
 0x53d   : > { %v7433_v18 = vor.u32 %v8809_v12, %v7432_v53 }
 0x53e   : > { %v4940_v40 = vadd.f32 %v4939_v24, %v4771_v60  ;;  %4809 = vmatmul.bf16.gmra.mxu0 %v7393_v14  ;;  %v8814_v14 = vld [vmem:[#allocation2 + $0x6b4] sm:$0xf] }
 0x53f   : > { %4978 = vmatmul.bf16.gmra.mxu1 %v7397_v10  ;;  %v7474_v10 = vld [vmem:[#allocation2 + $0x6d8] sm:$0xf0] }
 0x540   : > { %v5066_v58 = vmax.f32 %v4940_v40, 0.0  ;;  %v7477_v40 = vor.u32 %v8814_v14, %v7474_v10  ;;  %v8280_v14 = vld [vmem:[%s11592_s3 + $0xa0] sm:$0xf]  ;;  %v8942_v10 = vld [vmem:[%s11592_s3 + $0xac] sm:$0xf0] }
 0x543   : > { %v4772_v27 = vpop.f32.mrf.mxu0 }
 0x544   : > { %v4773_v39 = vadd.f32 %v4772_v27, %v10262_v56  ;;  %v4941_v34 = vpop.f32.mrf.mxu1 }
 0x546   : > { %v4942_v54 = vadd.f32 %v4941_v34, %v4773_v39 }
 0x548   : > { %v5067_v20 = vmax.f32 %v4942_v54, 0.0 }
 0x54a   : > { %v10701_v56 = vpack.c.bf16 %v5067_v20, %v5066_v58  ;;  %v7512_v20 = vld [vmem:[#allocation2 + $0x700] sm:$0xf] }
 0x54b   : > { %v4775_v5 = vpop.f32.mrf.mxu0  ;;  %5734 = vmatmul.bf16.gmra.mxu2 %v8233_v9 }
 0x54c   : > { %v4776_v26 = vadd.f32 %v4775_v5, %v10268_v15  ;;  %v4944_v38 = vpop.f32.mrf.mxu1  ;;  %v8819_v15 = vld [vmem:[#allocation2 + $0x6d4] sm:$0xf0]  ;;  %v8824_v5 = vld [vmem:[#allocation2 + $0x704] sm:$0xf] }
 0x54d   : > { %v7473_v24 = vor.u32 %v8819_v15, %v7472_v32 }
 0x54e   : > { %v4945_v36 = vadd.f32 %v4944_v38, %v4776_v26  ;;  %4814 = vmatmul.bf16.gmra.mxu0 %v7433_v18  ;;  %v8265_v18 = vor.u32 %v8938_v7, %v8264_v46  ;;  %v7514_v26 = vld [vmem:[#allocation2 + $0x728] sm:$0xf0] }
 0x54f   : > { %4983 = vmatmul.bf16.gmra.mxu1 %v7437_v25  ;;  %v8829_v25 = vld [vmem:[#allocation2 + $0x724] sm:$0xf0] }
 0x550   : > { %v5068_v43 = vmax.f32 %v4945_v36, 0.0 }
 0x553   : > { %v4777_v33 = vpop.f32.mrf.mxu0 }
 0x554   : > { %v4778_v2 = vadd.f32 %v4777_v33, %v11744_v31  ;;  %v4946_v49 = vpop.f32.mrf.mxu1  ;;  %v7513_v33 = vor.u32 %v8829_v25, %v7512_v20  ;;  %v7517_v31 = vor.u32 %v8824_v5, %v7514_v26  ;;  %v8296_v25 = vld [vmem:[%s11592_s3 + $0xc0] sm:$0xf]  ;;  %v8946_v5 = vld [vmem:[%s11592_s3 + $0xcc] sm:$0xf0] }
 0x556   : > { %v4947_v45 = vadd.f32 %v4946_v49, %v4778_v2 }
 0x558   : > { %v5069_v60 = vmax.f32 %v4947_v45, 0.0 }
 0x55a   : > { %v10711_v27 = vpack.c.bf16 %v5069_v60, %v5068_v43  ;;  %v7552_v60 = vld [vmem:[#allocation2 + $0x750] sm:$0xf] }
 0x55b   : > { %v4780_v39 = vpop.f32.mrf.mxu0  ;;  %5739 = vmatmul.bf16.gmra.mxu2 %v8249_v59 }
 0x55c   : > { %v4949_v34 = vpop.f32.mrf.mxu1  ;;  %v4781_v11 = vadd.f32 %v4780_v39, %v11745_v23  ;;  %v8834_v39 = vld [vmem:[#allocation2 + $0x754] sm:$0xf] }
 0x55e   : > { %4819 = vmatmul.bf16.gmra.mxu0 %v7473_v24  ;;  %v4950_v53 = vadd.f32 %v4949_v34, %v4781_v11  ;;  %v8281_v24 = vor.u32 %v8942_v10, %v8280_v14  ;;  %v7554_v34 = vld [vmem:[#allocation2 + $0x778] sm:$0xf0] }
 0x55f   : > { %4988 = vmatmul.bf16.gmra.mxu1 %v7477_v40  ;;  %v8839_v40 = vld [vmem:[#allocation2 + $0x774] sm:$0xf0] }
 0x560   : > { %v5070_v38 = vmax.f32 %v4950_v53, 0.0  ;;  %v7557_v53 = vor.u32 %v8834_v39, %v7554_v34  ;;  %v8859_v34 = vld [vmem:[#allocation2 + $0x814] sm:$0xf0] }
 0x563   : > { %v4782_v54 = vpop.f32.mrf.mxu0 }
 0x564   : > { %v4783_v9 = vadd.f32 %v4782_v54, %v10286_v6  ;;  %v4951_v12 = vpop.f32.mrf.mxu1  ;;  %v7553_v54 = vor.u32 %v8839_v40, %v7552_v60  ;;  %v8312_v60 = vld [vmem:[%s11592_s3 + $0xe0] sm:$0xf]  ;;  %v7632_v40 = vld [vmem:[#allocation2 + $0x7f0] sm:$0xf] }
 0x566   : > { %v4952_v58 = vadd.f32 %v4951_v12, %v4783_v9 }
 0x568   : > { %v5071_v36 = vmax.f32 %v4952_v58, 0.0 }
 0x56a   : > { %v5185_v6 = vpack.c.bf16 %v5071_v36, %v5070_v38  ;;  %v7592_v38 = vld [vmem:[#allocation2 + $0x7a0] sm:$0xf]  ;;  %v8297_v36 = vor.u32 %v8946_v5, %v8296_v25  ;;  %v10765_v25 = vpop.f32.mrf.mxu2 }
 0x56b   : > { %v4785_v2 = vpop.f32.mrf.mxu0  ;;  %5744 = vmatmul.bf16.gmra.mxu2 %v8265_v18 }
 0x56c   : > { %v4954_v49 = vpop.f32.mrf.mxu1  ;;  %v4786_v4 = vadd.f32 %v4785_v2, %v11746_v41  ;;  %v7594_v2 = vld [vmem:[#allocation2 + $0x7c8] sm:$0xf0] }
 0x56e   : > { %4824 = vmatmul.bf16.gmra.mxu0 %v7513_v33  ;;  %v4955_v32 = vadd.f32 %v4954_v49, %v4786_v4  ;;  %v8849_v33 = vld [vmem:[#allocation2 + $0x7c4] sm:$0xf0] }
 0x56f   : > { %4993 = vmatmul.bf16.gmra.mxu1 %v7517_v31  ;;  %v8844_v31 = vld [vmem:[#allocation2 + $0x7a4] sm:$0xf]  ;;  %v7593_v4 = vor.u32 %v8849_v33, %v7592_v38  ;;  %v7674_v33 = vld [vmem:[#allocation2 + $0x868] sm:$0xf0] }
 0x570   : > { %v5072_v23 = vmax.f32 %v4955_v32, 0.0 }
 0x573   : > { %v4787_v45 = vpop.f32.mrf.mxu0 }
 0x574   : > { %v4788_v59 = vadd.f32 %v4787_v45, %v10306_v57  ;;  %v4956_v15 = vpop.f32.mrf.mxu1 }
 0x576   : > { %v4957_v43 = vadd.f32 %v4956_v15, %v4788_v59 }
 0x578   : > { %v5073_v11 = vmax.f32 %v4957_v43, 0.0 }
 0x57a   : > { %v5186_v57 = vpack.c.bf16 %v5073_v11, %v5072_v23  ;;  %v8854_v23 = vld [vmem:[#allocation2 + $0x7f4] sm:$0xf]  ;;  %v7634_v11 = vld [vmem:[#allocation2 + $0x818] sm:$0xf0] }
 0x57b   : > { %v4790_v9 = vpop.f32.mrf.mxu0  ;;  %5749 = vmatmul.bf16.gmra.mxu2 %v8281_v24  ;;  %v8950_v24 = vld [vmem:[%s11592_s3 + $0xec] sm:$0xf0] }
 0x57c   : > { %v4959_v12 = vpop.f32.mrf.mxu1  ;;  %v4791_v46 = vadd.f32 %v4790_v9, %v10316_v13  ;;  %v8313_v39 = vor.u32 %v8950_v24, %v8312_v60  ;;  %v8218_v60 = vld [vmem:[%s11592_s3 + $0x30] sm:$0xf0] }
 0x57e   : > { %4829 = vmatmul.bf16.gmra.mxu0 %v7553_v54  ;;  %v4960_v58 = vadd.f32 %v4959_v12, %v4791_v46 }
 0x57f   : > { %4998 = vmatmul.bf16.gmra.mxu1 %v7557_v53 }
 0x580   : > { %v5074_v13 = vmax.f32 %v4960_v58, 0.0 }
 0x583   : > { %v4792_v7 = vpop.f32.mrf.mxu0 }
 0x584   : > { %v4793_v20 = vadd.f32 %v4792_v7, %v10326_v8  ;;  %v4961_v18 = vpop.f32.mrf.mxu1  ;;  %v7597_v8 = vor.u32 %v8844_v31, %v7594_v2 }
 0x586   : > { %v4962_v26 = vadd.f32 %v4961_v18, %v4793_v20 }
 0x588   : > { %v5075_v49 = vmax.f32 %v4962_v26, 0.0  ;;  %v7672_v26 = vld [vmem:[#allocation2 + $0x840] sm:$0xf] }
 0x58a   : > { %v5187_v41 = vpack.c.bf16 %v5075_v49, %v5074_v13 }
 0x58b   : > { %v4795_v45 = vpop.f32.mrf.mxu0  ;;  %5754 = vmatmul.bf16.gmra.mxu2 %v8297_v36  ;;  %v8869_v36 = vld [vmem:[#allocation2 + $0x864] sm:$0xf0] }
 0x58c   : > { %v4796_v32 = vadd.f32 %v4795_v45, %v10332_v3  ;;  %v4964_v59 = vpop.f32.mrf.mxu1  ;;  %5805 = vmatpush.bf16.msrb.mxu3 %v5187_v41  ;;  %v7673_v13 = vor.u32 %v8869_v36, %v7672_v26 }
 0x58e   : > { %v4965_v15 = vadd.f32 %v4964_v59, %v4796_v32  ;;  %4834 = vmatmul.bf16.gmra.mxu0 %v7593_v4 }
 0x58f   : > { %5003 = vmatmul.bf16.gmra.mxu1 %v7597_v8 }
 0x590   : > { %5806 = vmatpush.bf16.msrb.mxu3 %v5186_v57  ;;  %v5076_v54 = vmax.f32 %v4965_v15, 0.0 }
 0x593   : > { %v4797_v14 = vpop.f32.mrf.mxu0 }
 0x594   : > { %v4798_v10 = vadd.f32 %v4797_v14, %v10338_v30  ;;  %v4966_v43 = vpop.f32.mrf.mxu1  ;;  %5807 = vmatpush.bf16.msrb.mxu3 %v5185_v6  ;;  %v7633_v30 = vor.u32 %v8859_v34, %v7632_v40  ;;  %v7637_v6 = vor.u32 %v8854_v23, %v7634_v11  ;;  %v7712_v40 = vld [vmem:[#allocation2 + $0x890] sm:$0xf]  ;;  %v8874_v23 = vld [vmem:[#allocation2 + $0x894] sm:$0xf]  ;;  %v7714_v11 = vld [vmem:[#allocation2 + $0x8b8] sm:$0xf0] }
 0x596   : > { %v4967_v3 = vadd.f32 %v4966_v43, %v4798_v10  ;;  %v8958_v43 = vld [vmem:[%s11592_s3 + $0x12c] sm:$0xf0] }
 0x598   : > { %v5077_v53 = vmax.f32 %v4967_v3, 0.0  ;;  %5808 = vmatpush.bf16.msrb.mxu3 %v10711_v27  ;;  %v8328_v27 = vld [vmem:[%s11592_s3 + $0x100] sm:$0xf] }
 0x59a   : > { %v10746_v57 = vpack.c.bf16 %v5077_v53, %v5076_v54 }
 0x59b   : > { %v4800_v9 = vpop.f32.mrf.mxu0  ;;  %5759 = vmatmul.bf16.gmra.mxu2 %v8313_v39 }
 0x59c   : > { %v4801_v12 = vadd.f32 %v4800_v9, %v10344_v35  ;;  %v4969_v46 = vpop.f32.mrf.mxu1  ;;  %5809 = vmatpush.bf16.msrb.mxu3 %v10701_v56  ;;  %v8954_v35 = vld [vmem:[%s11592_s3 + $0x10c] sm:$0xf0]  ;;  %v8920_v56 = vld [vmem:[%s11592_s3 + $0x4] sm:$0xf] }
 0x59e   : > { %v4970_v7 = vadd.f32 %v4969_v46, %v4801_v12  ;;  %4839 = vmatmul.bf16.gmra.mxu0 %v7633_v30 }
 0x59f   : > { %5008 = vmatmul.bf16.gmra.mxu1 %v7637_v6  ;;  %v7717_v6 = vor.u32 %v8874_v23, %v7714_v11  ;;  %v7792_v11 = vld [vmem:[#allocation2 + $0x930] sm:$0xf] }
 0x5a0   : > { %5810 = vmatpush.bf16.msrb.mxu3 %v10691_v21  ;;  %v8202_v21 = vld [vmem:[%s11592_s3 + $0x10] sm:$0xf0]  ;;  %v5078_v31 = vmax.f32 %v4970_v7, 0.0 }
 0x5a1   : > { %v8205_v38 = vor.u32 %v8920_v56, %v8202_v21  ;;  %v8962_v21 = vld [vmem:[%s11592_s3 + $0x14c] sm:$0xf0] }
 0x5a3   : > { %v4802_v58 = vpop.f32.mrf.mxu0 }
 0x5a4   : > { %v4803_v20 = vadd.f32 %v4802_v58, %v10350_v28  ;;  %v4971_v18 = vpop.f32.mrf.mxu1  ;;  %5811 = vmatpush.bf16.msrb.mxu3 %v10681_v44  ;;  %v8329_v28 = vor.u32 %v8954_v35, %v8328_v27  ;;  %v8864_v44 = vld [vmem:[#allocation2 + $0x844] sm:$0xf] }
 0x5a5   : > { %v7677_v49 = vor.u32 %v8864_v44, %v7674_v33  ;;  %v8884_v33 = vld [vmem:[#allocation2 + $0x8e4] sm:$0xf] }
 0x5a6   : > { %v4972_v5 = vadd.f32 %v4971_v18, %v4803_v20  ;;  %v8360_v18 = vld [vmem:[%s11592_s3 + $0x140] sm:$0xf] }
 0x5a7   : > { %v8361_v36 = vor.u32 %v8962_v21, %v8360_v18 }
 0x5a8   : > { %v5079_v2 = vmax.f32 %v4972_v5, 0.0  ;;  %5812 = vmatpush.bf16.msrb.mxu3 %v10667_v52  ;;  %v8344_v52 = vld [vmem:[%s11592_s3 + $0x120] sm:$0xf]  ;;  %v8234_v5 = vld [vmem:[%s11592_s3 + $0x50] sm:$0xf0] }
 0x5a9   : > { %v8345_v39 = vor.u32 %v8958_v43, %v8344_v52  ;;  %v11747_v52 = vld [vmem:[#allocation27_spill] sm:$0xff] }
 0x5aa   : > { %v10768_v41 = vpack.c.bf16 %v5079_v2, %v5078_v31  ;;  %v7754_v31 = vld [vmem:[#allocation2 + $0x908] sm:$0xf0] }
 0x5ab   : > { %v4805_v4 = vpop.f32.mrf.mxu0  ;;  %5764 = vmatmul.bf16.gmra.mxu2 %v8329_v28  ;;  %5813 = vmatmul.bf16.vlgmr.msrb.gmra.mxu3 %v8205_v38  ;;  %v7752_v38 = vld [vmem:[#allocation2 + $0x8e0] sm:$0xf] }
 0x5ac   : > { %v4806_v8 = vadd.f32 %v4805_v4, %v10356_v51  ;;  %v4974_v45 = vpop.f32.mrf.mxu1  ;;  %v8924_v51 = vld [vmem:[%s11592_s3 + $0x24] sm:$0xf]  ;;  %v7757_v4 = vor.u32 %v8884_v33, %v7754_v31  ;;  %v8392_v33 = vld [vmem:[%s11592_s3 + $0x180] sm:$0xf] }
 0x5ad   : > { %v8221_v34 = vor.u32 %v8924_v51, %v8218_v60  ;;  %v10816_v60 = vpop.permute.xlu2 %5313 }
 0x5ae   : > { %v4975_v32 = vadd.f32 %v4974_v45, %v4806_v8  ;;  %4844 = vmatmul.bf16.gmra.mxu0 %v7673_v13  ;;  %v10771_v59 = vpop.f32.mrf.mxu2 }
 0x5af   : > { %5013 = vmatmul.bf16.gmra.mxu1 %v7677_v49 }
 0x5b0   : > { %v5080_v54 = vmax.f32 %v4975_v32, 0.0 }
 0x5b3   : > { %v4807_v15 = vpop.f32.mrf.mxu0 }
 0x5b4   : > { %v4808_v14 = vadd.f32 %v4807_v15, %v10362_v17  ;;  %v4976_v10 = vpop.f32.mrf.mxu1  ;;  %v8879_v17 = vld [vmem:[#allocation2 + $0x8b4] sm:$0xf0] }
 0x5b5   : > { %v7713_v30 = vor.u32 %v8879_v17, %v7712_v40  ;;  %v8376_v40 = vld [vmem:[%s11592_s3 + $0x160] sm:$0xf]  ;;  %v10836_v21 = vpop.permute.xlu2 %5298 }
 0x5b6   : > { %v4977_v24 = vadd.f32 %v4976_v10, %v4808_v14  ;;  %v10786_v3 = vpop.f32.mrf.mxu2  ;;  %v4480_v14 = vadd.f32 %v10393_v1, %v11747_v52  ;;  %v8966_v1 = vld [vmem:[%s11592_s3 + $0x16c] sm:$0xf0] }
 0x5b8   : > { %v5081_v53 = vmax.f32 %v4977_v24, 0.0  ;;  %v4649_v51 = vadd.f32 %v10395_v55, %v4480_v14  ;;  %v8250_v55 = vld [vmem:[%s11592_s3 + $0x70] sm:$0xf0] }
 0x5ba   : > { %v10788_v9 = vpack.c.bf16 %v5081_v53, %v5080_v54  ;;  %v8377_v54 = vor.u32 %v8966_v1, %v8376_v40 }
 0x5bb   : > { %v4810_v12 = vpop.f32.mrf.mxu0  ;;  %5769 = vmatmul.bf16.gmra.mxu2 %v8345_v39  ;;  %5818 = vmatmul.bf16.gmra.mxu3 %v8221_v34  ;;  %v8932_v34 = vld [vmem:[%s11592_s3 + $0x64] sm:$0xf] }
 0x5bc   : > { %v4811_v46 = vadd.f32 %v4810_v12, %v10368_v50  ;;  %v4979_v7 = vpop.f32.mrf.mxu1  ;;  %v8928_v50 = vld [vmem:[%s11592_s3 + $0x44] sm:$0xf]  ;;  %v8253_v53 = vor.u32 %v8932_v34, %v8250_v55  ;;  %v7794_v12 = vld [vmem:[#allocation2 + $0x958] sm:$0xf0] }
 0x5bd   : > { %v8237_v44 = vor.u32 %v8928_v50, %v8234_v5  ;;  %v11749_v5 = vld [vmem:[#allocation28_spill] sm:$0xff] }
 0x5be   : > { %v4980_v58 = vadd.f32 %v4979_v7, %v4811_v46  ;;  %4849 = vmatmul.bf16.gmra.mxu0 %v7713_v30  ;;  %v10791_v27 = vpop.f32.mrf.mxu2  ;;  %v8899_v30 = vld [vmem:[#allocation2 + $0x954] sm:$0xf0] }
 0x5bf   : > { %5018 = vmatmul.bf16.gmra.mxu1 %v7717_v6  ;;  %v8894_v6 = vld [vmem:[#allocation2 + $0x934] sm:$0xf] }
 0x5c0   : > { %v5082_v2 = vmax.f32 %v4980_v58, 0.0  ;;  %v10832_v58 = vpop.permute.xlu0 %5388  ;;  %v7797_v18 = vor.u32 %v8894_v6, %v7794_v12 }
 0x5c1   : > { %11748 = vst [vmem:[#allocation16_spill] sm:$0xff] %v10832_v58 }
 0x5c3   : > { %v4812_v20 = vpop.f32.mrf.mxu0 }
 0x5c4   : > { %v4813_v35 = vadd.f32 %v4812_v20, %v10374_v48  ;;  %v4981_v56 = vpop.f32.mrf.mxu1  ;;  %v8889_v48 = vld [vmem:[#allocation2 + $0x904] sm:$0xf0]  ;;  %v7793_v20 = vor.u32 %v8899_v30, %v7792_v11 }
 0x5c5   : > { %v7753_v49 = vor.u32 %v8889_v48, %v7752_v38 }
 0x5c6   : > { %v4982_v26 = vadd.f32 %v4981_v56, %v4813_v35  ;;  %v10806_v28 = vpop.f32.mrf.mxu2 }
 0x5c8   : > { %v5083_v13 = vmax.f32 %v4982_v26, 0.0  ;;  %v4485_v26 = vadd.f32 %v10418_v47, %v11749_v5  ;;  %v10847_v31 = vpop.permute.xlu0 %5303  ;;  %v8970_v47 = vld [vmem:[%s11592_s3 + $0x18c] sm:$0xf0] }
 0x5c9   : > { %v8393_v52 = vor.u32 %v8970_v47, %v8392_v33  ;;  %v8919_v33 = vld [vmem:[#allocation2 + $0x9f4] sm:$0xf0] }
 0x5ca   : > { %v10808_v8 = vpack.c.bf16 %v5083_v13, %v5082_v2 }
 0x5cb   : > { %v4815_v45 = vpop.f32.mrf.mxu0  ;;  %5774 = vmatmul.bf16.gmra.mxu2 %v8361_v36  ;;  %5823 = vmatmul.bf16.gmra.mxu3 %v8237_v44  ;;  %v4654_v44 = vadd.f32 %v10420_v29, %v4485_v26  ;;  %v8266_v29 = vld [vmem:[%s11592_s3 + $0x90] sm:$0xf0] }
 0x5cc   : > { %v4816_v32 = vadd.f32 %v4815_v45, %v10383_v37  ;;  %v4984_v15 = vpop.f32.mrf.mxu1 }
 0x5ce   : > { %v4985_v10 = vadd.f32 %v4984_v15, %v4816_v32  ;;  %4854 = vmatmul.bf16.gmra.mxu0 %v7753_v49  ;;  %v10813_v43 = vpop.f32.mrf.mxu2  ;;  %v7832_v15 = vld [vmem:[#allocation2 + $0x980] sm:$0xf] }
 0x5cf   : > { %5023 = vmatmul.bf16.gmra.mxu1 %v7757_v4  ;;  %v10858_v4 = vpop.permute.xlu2 %5383 }
 0x5d0   : > { %v5084_v46 = vmax.f32 %v4985_v10, 0.0  ;;  %11750 = vst [vmem:[#allocation15_spill] sm:$0xff] %v10858_v4  ;;  %v8909_v10 = vld [vmem:[#allocation2 + $0x9a4] sm:$0xf0] }
 0x5d3   : > { %v4817_v24 = vpop.f32.mrf.mxu0 }
 0x5d4   : > { %v4818_v39 = vadd.f32 %v4817_v24, %v4649_v51  ;;  %v4986_v37 = vpop.f32.mrf.mxu1  ;;  %v8904_v51 = vld [vmem:[#allocation2 + $0x984] sm:$0xf]  ;;  %v7834_v24 = vld [vmem:[#allocation2 + $0x9a8] sm:$0xf0] }
 0x5d5   : > { %v7837_v1 = vor.u32 %v8904_v51, %v7834_v24  ;;  %v4495_v51 = vadd.f32 %v10477_v62, %v10346_v63 }
 0x5d6   : > { %v4987_v17 = vadd.f32 %v4986_v37, %v4818_v39  ;;  %v10830_v23 = vpop.f32.mrf.mxu2  ;;  %v7833_v37 = vor.u32 %v8909_v10, %v7832_v15 }
 0x5d7   : > { %v10872_v6 = vpop.permute.xlu2 %5368 }
 0x5d8   : > { %v5085_v7 = vmax.f32 %v4987_v17, 0.0  ;;  %v10864_v17 = vpop.permute.xlu1 %5308  ;;  %11751 = vst [vmem:[#allocation21_spill] sm:$0xff] %v10872_v6 }
 0x5da   : > { %v10834_v35 = vpack.c.bf16 %v5085_v7, %v5084_v46 }
 0x5db   : > { %v4820_v56 = vpop.f32.mrf.mxu0  ;;  %5779 = vmatmul.bf16.gmra.mxu2 %v8377_v54  ;;  %5828 = vmatmul.bf16.gmra.mxu3 %v8253_v53  ;;  %v4490_v54 = vadd.f32 %v10446_v19, %v10334_v61  ;;  %v10868_v53 = vpop.permute.xlu0 %5288  ;;  %v8974_v19 = vld [vmem:[%s11592_s3 + $0x1ac] sm:$0xf0] }
 0x5dc   : > { %v4989_v50 = vpop.f32.mrf.mxu1  ;;  %v4821_v36 = vadd.f32 %v4820_v56, %v10408_v22  ;;  %v8936_v22 = vld [vmem:[%s11592_s3 + $0x84] sm:$0xf] }
 0x5dd   : > { %v8269_v14 = vor.u32 %v8936_v22, %v8266_v29  ;;  %v4659_v46 = vadd.f32 %v10448_v42, %v4490_v54  ;;  %v8424_v54 = vld [vmem:[%s11592_s3 + $0x1c0] sm:$0xf] }
 0x5de   : > { %4859 = vmatmul.bf16.gmra.mxu0 %v7793_v20  ;;  %v10840_v38 = vpop.f32.mrf.mxu2  ;;  %v4990_v2 = vadd.f32 %v4989_v50, %v4821_v36  ;;  %v8408_v20 = vld [vmem:[%s11592_s3 + $0x1a0] sm:$0xf]  ;;  %v8940_v50 = vld [vmem:[%s11592_s3 + $0xa4] sm:$0xf]  ;;  %v7872_v36 = vld [vmem:[#allocation2 + $0x9d0] sm:$0xf] }
 0x5df   : > { %5028 = vmatmul.bf16.gmra.mxu1 %v7797_v18  ;;  %v10894_v29 = vpop.permute.xlu2 %5283 }
 0x5e0   : > { %v5086_v40 = vmax.f32 %v4990_v2, 0.0  ;;  %v10888_v42 = vpop.permute.xlu1 %5393  ;;  %v8914_v2 = vld [vmem:[#allocation2 + $0x9d4] sm:$0xf] }
 0x5e1   : > { %11752 = vst [vmem:[#allocation22_spill] sm:$0xff] %v10888_v42 }
 0x5e3   : > { %v4822_v48 = vpop.f32.mrf.mxu0 }
 0x5e4   : > { %v4823_v13 = vadd.f32 %v4822_v48, %v4654_v44  ;;  %v4991_v49 = vpop.f32.mrf.mxu1  ;;  %v8409_v44 = vor.u32 %v8974_v19, %v8408_v20  ;;  %v8298_v20 = vld [vmem:[%s11592_s3 + $0xd0] sm:$0xf0] }
 0x5e6   : > { %v4992_v45 = vadd.f32 %v4991_v49, %v4823_v13  ;;  %v10860_v32 = vpop.f32.mrf.mxu2  ;;  %v7874_v13 = vld [vmem:[#allocation2 + $0x9f8] sm:$0xf0]  ;;  %v10892_v49 = vpop.permute.xlu0 %5373 }
 0x5e7   : > { %11753 = vst [vmem:[#allocation23_spill] sm:$0xff] %v10892_v49  ;;  %v7877_v15 = vor.u32 %v8914_v2, %v7874_v13 }
 0x5e8   : > { %v5087_v39 = vmax.f32 %v4992_v45, 0.0  ;;  %v7873_v45 = vor.u32 %v8919_v33, %v7872_v36  ;;  %v11757_v33 = vld [vmem:[#allocation38_spill] sm:$0xff] }
 0x5ea   : > { %v10862_v34 = vpack.c.bf16 %v5087_v39, %v5086_v40  ;;  %v10900_v40 = vpop.permute.xlu1 %5378 }
 0x5eb   : > { %v4825_v55 = vpop.f32.mrf.mxu0  ;;  %5784 = vmatmul.bf16.gmra.mxu2 %v8393_v52  ;;  %5833 = vmatmul.bf16.gmra.mxu3 %v8269_v14  ;;  %11754 = vst [vmem:[#allocation25_spill] sm:$0xff] %v10900_v40  ;;  %v11770_v40 = vld [vmem:[#allocation18_spill] sm:$0xff] }
 0x5ec   : > { %v4994_v11 = vpop.f32.mrf.mxu1  ;;  %v4826_v12 = vadd.f32 %v4825_v55, %v10436_v16  ;;  %v8282_v16 = vld [vmem:[%s11592_s3 + $0xb0] sm:$0xf0] }
 0x5ed   : > { %v8285_v48 = vor.u32 %v8940_v50, %v8282_v16 }
 0x5ee   : > { %4864 = vmatmul.bf16.gmra.mxu0 %v7833_v37  ;;  %v10870_v30 = vpop.f32.mrf.mxu2  ;;  %v4995_v18 = vadd.f32 %v4994_v11, %v4826_v12  ;;  %v11755_v37 = vld [vmem:[#allocation37_spill] sm:$0xff]  ;;  %v10904_v55 = vpop.permute.xlu0 %5358 }
 0x5ef   : > { %5033 = vmatmul.bf16.gmra.mxu1 %v7837_v1  ;;  %v4664_v1 = vadd.f32 %v11755_v37, %v4495_v51  ;;  %11756 = vst [vmem:[#allocation27_spill] sm:$0xff] %v10904_v55  ;;  %v10909_v12 = vpop.permute.xlu2 %5268  ;;  %v11760_v51 = vld [vmem:[#allocation41_spill] sm:$0xff] }
 0x5f0   : > { %v5088_v47 = vmax.f32 %v4995_v18, 0.0 }
 0x5f3   : > { %v4827_v7 = vpop.f32.mrf.mxu0 }
 0x5f4   : > { %v4828_v56 = vadd.f32 %v4827_v7, %v4659_v46  ;;  %v4996_v61 = vpop.f32.mrf.mxu1  ;;  %v8978_v7 = vld [vmem:[%s11592_s3 + $0x1cc] sm:$0xf0] }
 0x5f6   : > { %v4997_v5 = vadd.f32 %v4996_v61, %v4828_v56  ;;  %v10890_v26 = vpop.f32.mrf.mxu2  ;;  %v8425_v61 = vor.u32 %v8978_v7, %v8424_v54 }
 0x5f8   : > { %v5089_v22 = vmax.f32 %v4997_v5, 0.0  ;;  %v10922_v5 = vpop.permute.xlu1 %5293 }
 0x5fa   : > { %v5194_v52 = vpack.c.bf16 %v5089_v22, %v5088_v47  ;;  %v11758_v47 = vld [vmem:[#allocation30_spill] sm:$0xff]  ;;  %v11759_v22 = vld [vmem:[#allocation40_spill] sm:$0xff] }
 0x5fb   : > { %v4830_v14 = vpop.f32.mrf.mxu0  ;;  %5789 = vmatmul.bf16.gmra.mxu2 %v8409_v44  ;;  %5838 = vmatmul.bf16.gmra.mxu3 %v8285_v48  ;;  %v10924_v48 = vpop.permute.xlu0 %5273 }
 0x5fc   : > { %v4999_v10 = vpop.f32.mrf.mxu1  ;;  %v4831_v39 = vadd.f32 %v4830_v14, %v10467_v0  ;;  %v8944_v0 = vld [vmem:[%s11592_s3 + $0xc4] sm:$0xf] }
 0x5fd   : > { %v8301_v19 = vor.u32 %v8944_v0, %v8298_v20 }
 0x5fe   : > { %4869 = vmatmul.bf16.gmra.mxu0 %v7873_v45  ;;  %v10898_v24 = vpop.f32.mrf.mxu2  ;;  %v5000_v63 = vadd.f32 %v4999_v10, %v4831_v39  ;;  %v4500_v45 = vadd.f32 %v11759_v22, %v11758_v47  ;;  %v11763_v47 = vld [vmem:[#allocation44_spill] sm:$0xff] }
 0x5ff   : > { %5038 = vmatmul.bf16.gmra.mxu1 %v7877_v15  ;;  %v10929_v15 = vpop.permute.xlu2 %5353 }
 0x600   : > { %v5090_v50 = vmax.f32 %v5000_v63, 0.0  ;;  %v4669_v39 = vadd.f32 %v11760_v51, %v4500_v45 }
 0x603   : > { %v4832_v11 = vpop.f32.mrf.mxu0  ;;  %v10949_v7 = vpop.permute.xlu0 %5258 }
 0x604   : > { %v4833_v62 = vadd.f32 %v4832_v11, %v4664_v1  ;;  %v5001_v46 = vpop.f32.mrf.mxu1  ;;  %v8440_v1 = vld [vmem:[%s11592_s3 + $0x1e0] sm:$0xf]  ;;  %v10937_v11 = vpop.permute.xlu1 %5278 }
 0x605   : > { %v5746_v55 = vadd.f32 %v10870_v30, %v10937_v11  ;;  %v8410_v11 = vld [vmem:[%s11592_s3 + $0x1b0] sm:$0xf0] }
 0x606   : > { %v5002_v18 = vadd.f32 %v5001_v46, %v4833_v62  ;;  %v10920_v56 = vpop.f32.mrf.mxu2  ;;  %v8982_v62 = vld [vmem:[%s11592_s3 + $0x1ec] sm:$0xf0]  ;;  %v8314_v46 = vld [vmem:[%s11592_s3 + $0xf0] sm:$0xf0] }
 0x608   : > { %v5091_v16 = vmax.f32 %v5002_v18, 0.0  ;;  %v8441_v18 = vor.u32 %v8982_v62, %v8440_v1 }
 0x60a   : > { %v5195_v36 = vpack.c.bf16 %v5091_v16, %v5090_v50 }
 0x60b   : > { %v4835_v44 = vpop.f32.mrf.mxu0  ;;  %5794 = vmatmul.bf16.gmra.mxu2 %v8425_v61  ;;  %5843 = vmatmul.bf16.gmra.mxu3 %v8301_v19 }
 0x60c   : > { %v4836_v2 = vadd.f32 %v4835_v44, %v11757_v33  ;;  %v5004_v13 = vpop.f32.mrf.mxu1  ;;  %5894 = vmatpush.bf16.msra.mxu2 %v5195_v36  ;;  %v11761_v44 = vld [vmem:[#allocation42_spill] sm:$0xff]  ;;  %v10962_v45 = vpop.permute.xlu1 %5363 }
 0x60d   : > { %11764 = vst [vmem:[#allocation28_spill] sm:$0xff] %v10962_v45 }
 0x60e   : > { %v5005_v14 = vadd.f32 %v5004_v13, %v4836_v2  ;;  %v10931_v10 = vpop.f32.mrf.mxu2  ;;  %v11762_v13 = vld [vmem:[#allocation32_spill] sm:$0xff] }
 0x60f   : > { %v4505_v22 = vadd.f32 %v11763_v47, %v11762_v13 }
 0x610   : > { %5895 = vmatpush.bf16.msra.mxu2 %v5194_v52  ;;  %v8948_v52 = vld [vmem:[%s11592_s3 + $0xe4] sm:$0xf]  ;;  %v5092_v19 = vmax.f32 %v5005_v14, 0.0 }
 0x611   : > { %v8317_v61 = vor.u32 %v8948_v52, %v8314_v46  ;;  %v8330_v52 = vld [vmem:[%s11592_s3 + $0x110] sm:$0xf0]  ;;  %v8923_v46 = vld [vmem:[%s11592_s3 + $0x14] sm:$0xf0] }
 0x613   : > { %v4837_v37 = vpop.f32.mrf.mxu0 }
 0x614   : > { %v4838_v54 = vadd.f32 %v4837_v37, %v4669_v39  ;;  %v5006_v63 = vpop.f32.mrf.mxu1  ;;  %5896 = vmatpush.bf16.msra.mxu2 %v10862_v34  ;;  %v10953_v34 = vpop.permute.xlu2 %5338 }
 0x615   : > { %v10966_v39 = vpop.permute.xlu0 %5343 }
 0x616   : > { %v5007_v0 = vadd.f32 %v5006_v63, %v4838_v54  ;;  %v10951_v20 = vpop.f32.mrf.mxu2 }
 0x618   : > { %v5093_v50 = vmax.f32 %v5007_v0, 0.0  ;;  %5897 = vmatpush.bf16.msra.mxu2 %v10834_v35  ;;  %v11765_v35 = vld [vmem:[#allocation17_spill] sm:$0xff]  ;;  %v10985_v0 = vpop.f32.mrf.mxu3 }
 0x619   : > { %v4674_v37 = vadd.f32 %v11765_v35, %v4505_v22  ;;  %v11766_v22 = vld [vmem:[#allocation31_spill] sm:$0xff] }
 0x61a   : > { %v10956_v16 = vpack.c.bf16 %v5093_v50, %v5092_v19 }
 0x61b   : > { %v4840_v36 = vpop.f32.mrf.mxu0  ;;  %5799 = vmatmul.bf16.gmra.mxu2 %v8441_v18  ;;  %5848 = vmatmul.bf16.gmra.mxu3 %v8317_v61 }
 0x61c   : > { %v4841_v33 = vadd.f32 %v4840_v36, %v11761_v44  ;;  %v5009_v2 = vpop.f32.mrf.mxu1  ;;  %5898 = vmatpush.bf16.msra.mxu2 %v10808_v8  ;;  %v10970_v1 = vpop.permute.xlu2 %5253  ;;  %v8952_v8 = vld [vmem:[%s11592_s3 + $0x104] sm:$0xf] }
 0x61d   : > { %v8333_v19 = vor.u32 %v8952_v8, %v8330_v52  ;;  %v11767_v8 = vld [vmem:[#allocation33_spill] sm:$0xff] }
 0x61e   : > { %v5010_v51 = vadd.f32 %v5009_v2, %v4841_v33  ;;  %v10964_v14 = vpop.f32.mrf.mxu2  ;;  %v10992_v33 = vpop.permute.xlu0 %5328 }
 0x620   : > { %5899 = vmatpush.bf16.msra.mxu2 %v10788_v9  ;;  %v8208_v9 = vld [vmem:[%s11592_s3 + $0x8] sm:$0xf]  ;;  %v5094_v36 = vmax.f32 %v5010_v51, 0.0 }
 0x621   : > { %v8209_v50 = vor.u32 %v8923_v46, %v8208_v9  ;;  %v11769_v46 = vld [vmem:[#allocation9_spill] sm:$0xff] }
 0x623   : > { %v4842_v54 = vpop.f32.mrf.mxu0 }
 0x624   : > { %v4843_v63 = vadd.f32 %v4842_v54, %v4674_v37  ;;  %v5011_v62 = vpop.f32.mrf.mxu1  ;;  %5900 = vmatpush.bf16.msra.mxu2 %v10768_v41  ;;  %v10989_v41 = vpop.permute.xlu1 %5348 }
 0x625   : > { %v5239_v47 = vpop.permute.xlu2 %5238 }
 0x626   : > { %v5012_v18 = vadd.f32 %v5011_v62, %v4843_v63  ;;  %v10987_v61 = vpop.f32.mrf.mxu2  ;;  %v5726_v54 = vadd.f32 %v10771_v59, %v5239_v47  ;;  %v11768_v63 = vld [vmem:[#allocation10_spill] sm:$0xff]  ;;  %v8346_v47 = vld [vmem:[%s11592_s3 + $0x130] sm:$0xf0] }
 0x627   : > { %v4510_v62 = vadd.f32 %v11768_v63, %v11767_v8 }
 0x628   : > { %v5095_v44 = vmax.f32 %v5012_v18, 0.0  ;;  %5901 = vmatpush.bf16.msra.mxu2 %v10746_v57 }
 0x629   : > { %v4679_v18 = vadd.f32 %v11769_v46, %v4510_v62 }
 0x62a   : > { %v10994_v2 = vpack.c.bf16 %v5095_v44, %v5094_v36  ;;  %v5244_v44 = vpop.permute.xlu0 %5243 }
 0x62b   : > { %v4845_v13 = vpop.f32.mrf.mxu0  ;;  %5853 = vmatmul.bf16.gmra.mxu3 %v8333_v19  ;;  %5902 = vmatmul.bf16.vlgmr.msra.gmra.mxu2 %v8209_v50  ;;  %v8956_v50 = vld [vmem:[%s11592_s3 + $0x124] sm:$0xf] }
 0x62c   : > { %v4846_v35 = vadd.f32 %v4845_v13, %v11766_v22  ;;  %v5014_v37 = vpop.f32.mrf.mxu1  ;;  %v11005_v36 = vpop.permute.xlu1 %5263  ;;  %v8224_v22 = vld [vmem:[%s11592_s3 + $0x28] sm:$0xf] }
 0x62e   : > { %v5015_v51 = vadd.f32 %v5014_v37, %v4846_v35  ;;  %v11000_v52 = vpop.f32.mrf.mxu2  ;;  %v5814_v57 = vpop.f32.mrf.mxu3  ;;  %v8927_v35 = vld [vmem:[%s11592_s3 + $0x34] sm:$0xf0]  ;;  %v5728_v37 = vadd.f32 %v10786_v3, %v5244_v44  ;;  %v11771_v44 = vld [vmem:[#allocation34_spill] sm:$0xff] }
 0x62f   : > { %v11002_v9 = vadd.f32 %v5814_v57, %v5726_v54  ;;  %v8349_v57 = vor.u32 %v8956_v50, %v8346_v47  ;;  %v8225_v46 = vor.u32 %v8927_v35, %v8224_v22  ;;  %v11773_v47 = vld [vmem:[#allocation12_spill] sm:$0xff] }
 0x633   : > { %v4847_v19 = vpop.f32.mrf.mxu0 }
 0x634   : > { %v4848_v59 = vadd.f32 %v4847_v19, %v4679_v18  ;;  %v5016_v13 = vpop.f32.mrf.mxu1  ;;  %v5096_v18 = vmax.f32 %v5015_v51, 0.0  ;;  %v5249_v4 = vpop.permute.xlu1 %5248 }
 0x635   : > { %v5731_v3 = vadd.f32 %v10791_v27, %v5249_v4  ;;  %v8362_v27 = vld [vmem:[%s11592_s3 + $0x150] sm:$0xf0]  ;;  %v8240_v4 = vld [vmem:[%s11592_s3 + $0x48] sm:$0xf] }
 0x636   : > { %v5017_v54 = vadd.f32 %v5016_v13, %v4848_v59  ;;  %v11020_v8 = vpop.f32.mrf.mxu2  ;;  %v5816_v63 = vpop.f32.mrf.mxu3  ;;  %v11772_v59 = vld [vmem:[#allocation26_spill] sm:$0xff] }
 0x637   : > { %v11022_v62 = vadd.f32 %v5816_v63, %v5728_v37  ;;  %v4515_v13 = vadd.f32 %v11772_v59, %v11771_v44 }
 0x638   : > { %v5097_v19 = vmax.f32 %v5017_v54, 0.0  ;;  %v8960_v54 = vld [vmem:[%s11592_s3 + $0x144] sm:$0xf] }
 0x639   : > { %v4684_v22 = vadd.f32 %v11773_v47, %v4515_v13 }
 0x63a   : > { %v11024_v42 = vpack.c.bf16 %v5097_v19, %v5096_v18 }
 0x63b   : > { %v4850_v58 = vpop.f32.mrf.mxu0  ;;  %5858 = vmatmul.bf16.gmra.mxu3 %v8349_v57  ;;  %5907 = vmatmul.bf16.gmra.mxu2 %v8225_v46 }
 0x63c   : > { %v4851_v49 = vadd.f32 %v4850_v58, %v11770_v40  ;;  %v5019_v6 = vpop.f32.mrf.mxu1 }
 0x63e   : > { %v5020_v37 = vadd.f32 %v5019_v6, %v4851_v49  ;;  %v11030_v63 = vpop.f32.mrf.mxu2  ;;  %v5819_v50 = vpop.f32.mrf.mxu3  ;;  %v8931_v6 = vld [vmem:[%s11592_s3 + $0x54] sm:$0xf0]  ;;  %v5733_v49 = vadd.f32 %v10806_v28, %v10970_v1  ;;  %v5736_v28 = vadd.f32 %v10813_v43, %v10949_v7  ;;  %v8378_v43 = vld [vmem:[%s11592_s3 + $0x170] sm:$0xf0]  ;;  %v8256_v7 = vld [vmem:[%s11592_s3 + $0x68] sm:$0xf] }
 0x63f   : > { %v11032_v51 = vadd.f32 %v5819_v50, %v5731_v3  ;;  %v8365_v3 = vor.u32 %v8960_v54, %v8362_v27  ;;  %v8241_v44 = vor.u32 %v8931_v6, %v8240_v4  ;;  %v11775_v1 = vld [vmem:[#allocation35_spill] sm:$0xff]  ;;  %v11777_v27 = vld [vmem:[#allocation45_spill] sm:$0xff] }
 0x640   : > { %v5098_v59 = vmax.f32 %v5020_v37, 0.0 }
 0x643   : > { %v4852_v35 = vpop.f32.mrf.mxu0 }
 0x644   : > { %v4853_v58 = vadd.f32 %v4852_v35, %v4684_v22  ;;  %v5021_v40 = vpop.f32.mrf.mxu1  ;;  %v11774_v22 = vld [vmem:[#allocation11_spill] sm:$0xff] }
 0x646   : > { %v5022_v57 = vadd.f32 %v5021_v40, %v4853_v58  ;;  %v11049_v46 = vpop.f32.mrf.mxu2  ;;  %v5821_v18 = vpop.f32.mrf.mxu3  ;;  %v11776_v58 = vld [vmem:[#allocation19_spill] sm:$0xff] }
 0x647   : > { %v11051_v19 = vadd.f32 %v5821_v18, %v5733_v49  ;;  %v4520_v40 = vadd.f32 %v11776_v58, %v11775_v1 }
 0x648   : > { %v5099_v13 = vmax.f32 %v5022_v57, 0.0  ;;  %v8964_v57 = vld [vmem:[%s11592_s3 + $0x164] sm:$0xf] }
 0x649   : > { %v4689_v4 = vadd.f32 %v11777_v27, %v4520_v40 }
 0x64a   : > { %v11053_v50 = vpack.c.bf16 %v5099_v13, %v5098_v59  ;;  %v5738_v59 = vadd.f32 %v10830_v23, %v11005_v36  ;;  %v11778_v23 = vld [vmem:[#allocation36_spill] sm:$0xff]  ;;  %v11779_v36 = vld [vmem:[#allocation14_spill] sm:$0xff] }
 0x64b   : > { %v4855_v47 = vpop.f32.mrf.mxu0  ;;  %5863 = vmatmul.bf16.gmra.mxu3 %v8365_v3  ;;  %5912 = vmatmul.bf16.gmra.mxu2 %v8241_v44 }
 0x64c   : > { %v4856_v35 = vadd.f32 %v4855_v47, %v11774_v22  ;;  %v5024_v45 = vpop.f32.mrf.mxu1 }
 0x64e   : > { %v5025_v49 = vadd.f32 %v5024_v45, %v4856_v35  ;;  %v11060_v18 = vpop.f32.mrf.mxu2  ;;  %v5824_v54 = vpop.f32.mrf.mxu3  ;;  %v8935_v45 = vld [vmem:[%s11592_s3 + $0x74] sm:$0xf0] }
 0x64f   : > { %v11062_v37 = vadd.f32 %v5824_v54, %v5736_v28  ;;  %v8381_v28 = vor.u32 %v8964_v57, %v8378_v43  ;;  %v8257_v1 = vor.u32 %v8935_v45, %v8256_v7  ;;  %v11780_v57 = vld [vmem:[#allocation24_spill] sm:$0xff]  ;;  %v11781_v43 = vld [vmem:[#allocation46_spill] sm:$0xff] }
 0x650   : > { %v5100_v58 = vmax.f32 %v5025_v49, 0.0 }
 0x653   : > { %v4857_v6 = vpop.f32.mrf.mxu0 }
 0x654   : > { %v4858_v3 = vadd.f32 %v4857_v6, %v4689_v4  ;;  %v5026_v44 = vpop.f32.mrf.mxu1  ;;  %v5741_v6 = vadd.f32 %v10840_v38, %v10909_v12  ;;  %v8394_v12 = vld [vmem:[%s11592_s3 + $0x190] sm:$0xf0] }
 0x656   : > { %v5027_v13 = vadd.f32 %v5026_v44, %v4858_v3  ;;  %v11079_v47 = vpop.f32.mrf.mxu2  ;;  %v5826_v22 = vpop.f32.mrf.mxu3  ;;  %v4525_v3 = vadd.f32 %v11779_v36, %v11778_v23 }
 0x657   : > { %v11081_v35 = vadd.f32 %v5826_v22, %v5738_v59 }
 0x658   : > { %v5101_v40 = vmax.f32 %v5027_v13, 0.0  ;;  %v4694_v7 = vadd.f32 %v11781_v43, %v4525_v3  ;;  %v8968_v13 = vld [vmem:[%s11592_s3 + $0x184] sm:$0xf] }
 0x659   : > { %v8397_v3 = vor.u32 %v8968_v13, %v8394_v12  ;;  %v11786_v13 = vld [vmem:[#allocation13_spill] sm:$0xff]  ;;  %v11787_v12 = vld [vmem:[#allocation47_spill] sm:$0xff] }
 0x65a   : > { %v11083_v54 = vpack.c.bf16 %v5101_v40, %v5100_v58  ;;  %v8272_v58 = vld [vmem:[%s11592_s3 + $0x88] sm:$0xf]  ;;  %v8939_v40 = vld [vmem:[%s11592_s3 + $0x94] sm:$0xf0] }
 0x65b   : > { %v4860_v27 = vpop.f32.mrf.mxu0  ;;  %5868 = vmatmul.bf16.gmra.mxu3 %v8381_v28  ;;  %5917 = vmatmul.bf16.gmra.mxu2 %v8257_v1 }
 0x65c   : > { %v5029_v4 = vpop.f32.mrf.mxu1  ;;  %v4861_v49 = vadd.f32 %v4860_v27, %v11780_v57  ;;  %v5743_v27 = vadd.f32 %v10860_v32, %v10924_v48  ;;  %v11782_v32 = vld [vmem:[#allocation39_spill] sm:$0xff]  ;;  %v11783_v48 = vld [vmem:[#allocation20_spill] sm:$0xff] }
 0x65e   : > { %v11089_v44 = vpop.f32.mrf.mxu2  ;;  %v5829_v59 = vpop.f32.mrf.mxu3  ;;  %v5030_v28 = vadd.f32 %v5029_v4, %v4861_v49 }
 0x65f   : > { %v11091_v22 = vadd.f32 %v5829_v59, %v5741_v6  ;;  %v8273_v59 = vor.u32 %v8939_v40, %v8272_v58 }
 0x660   : > { %v5102_v57 = vmax.f32 %v5030_v28, 0.0 }
 0x663   : > { %v4862_v45 = vpop.f32.mrf.mxu0 }
 0x664   : > { %v4863_v1 = vadd.f32 %v4862_v45, %v4694_v7  ;;  %v5031_v38 = vpop.f32.mrf.mxu1 }
 0x666   : > { %v5032_v6 = vadd.f32 %v5031_v38, %v4863_v1  ;;  %v11109_v23 = vpop.f32.mrf.mxu2  ;;  %v5831_v4 = vpop.f32.mrf.mxu3  ;;  %v4530_v1 = vadd.f32 %v11783_v48, %v11782_v32 }
 0x667   : > { %v11111_v36 = vadd.f32 %v5831_v4, %v5743_v27 }
 0x668   : > { %v5103_v49 = vmax.f32 %v5032_v6, 0.0  ;;  %v4699_v58 = vadd.f32 %v11787_v12, %v4530_v1  ;;  %v8972_v6 = vld [vmem:[%s11592_s3 + $0x1a4] sm:$0xf] }
 0x669   : > { %v8413_v1 = vor.u32 %v8972_v6, %v8410_v11  ;;  %v11789_v6 = vld [vmem:[#allocation29_spill] sm:$0xff] }
 0x66a   : > { %v11113_v43 = vpack.c.bf16 %v5103_v49, %v5102_v57  ;;  %v8943_v57 = vld [vmem:[%s11592_s3 + $0xb4] sm:$0xf0]  ;;  %v5748_v49 = vadd.f32 %v10890_v26, %v10894_v29 }
 0x66b   : > { %v4865_v7 = vpop.f32.mrf.mxu0  ;;  %5873 = vmatmul.bf16.gmra.mxu3 %v8397_v3  ;;  %5922 = vmatmul.bf16.gmra.mxu2 %v8273_v59 }
 0x66c   : > { %v5034_v45 = vpop.f32.mrf.mxu1  ;;  %v4866_v28 = vadd.f32 %v4865_v7, %v11786_v13 }
 0x66e   : > { %v11119_v38 = vpop.f32.mrf.mxu2  ;;  %v5834_v27 = vpop.f32.mrf.mxu3  ;;  %v5035_v3 = vadd.f32 %v5034_v45, %v4866_v28 }
 0x66f   : > { %11784 = vst [vmem:[#allocation37_spill] sm:$0xff] %v11119_v38  ;;  %v11121_v4 = vadd.f32 %v5834_v27, %v5746_v55  ;;  %v8288_v55 = vld [vmem:[%s11592_s3 + $0xa8] sm:$0xf]  ;;  %v11788_v38 = vld [vmem:[#allocation43_spill] sm:$0xff] }
 0x670   : > { %v8289_v27 = vor.u32 %v8943_v57, %v8288_v55  ;;  %v5104_v13 = vmax.f32 %v5035_v3, 0.0  ;;  %v4535_v26 = vadd.f32 %v10765_v25, %v11788_v38  ;;  %v8976_v57 = vld [vmem:[%s11592_s3 + $0x1c4] sm:$0xf]  ;;  %v8426_v25 = vld [vmem:[%s11592_s3 + $0x1d0] sm:$0xf0] }
 0x671   : > { %11785 = vst [vmem:[#allocation38_spill] sm:$0xff] %v11121_v4  ;;  %v5751_v4 = vadd.f32 %v10898_v24, %v10868_v53  ;;  %v8304_v53 = vld [vmem:[%s11592_s3 + $0xc8] sm:$0xf]  ;;  %v8947_v24 = vld [vmem:[%s11592_s3 + $0xd4] sm:$0xf0] }
 0x672   : > { %v4704_v3 = vadd.f32 %v10985_v0, %v4535_v26  ;;  %v5753_v0 = vadd.f32 %v10920_v56, %v10922_v5 }
 0x673   : > { %v4867_v40 = vpop.f32.mrf.mxu0 }
 0x674   : > { %v4868_v59 = vadd.f32 %v4867_v40, %v4699_v58  ;;  %v5036_v30 = vpop.f32.mrf.mxu1 }
 0x676   : > { %v5037_v7 = vadd.f32 %v5036_v30, %v4868_v59  ;;  %v11139_v32 = vpop.f32.mrf.mxu2  ;;  %v5836_v45 = vpop.f32.mrf.mxu3 }
 0x677   : > { %v11141_v48 = vadd.f32 %v5836_v45, %v5748_v49 }
 0x678   : > { %v5105_v28 = vmax.f32 %v5037_v7, 0.0 }
 0x67a   : > { %v5202_v12 = vpack.c.bf16 %v5105_v28, %v5104_v13  ;;  %v8429_v13 = vor.u32 %v8976_v57, %v8426_v25  ;;  %v8305_v28 = vor.u32 %v8947_v24, %v8304_v53  ;;  %v5761_v25 = vadd.f32 %v10964_v14, %v10864_v17  ;;  %v8921_v17 = vld [vmem:[%s11592_s3 + $0xc] sm:$0xf]  ;;  %v8210_v14 = vld [vmem:[%s11592_s3 + $0x18] sm:$0xf0] }
 0x67b   : > { %v4870_v58 = vpop.f32.mrf.mxu0  ;;  %5878 = vmatmul.bf16.gmra.mxu3 %v8413_v1  ;;  %5927 = vmatmul.bf16.gmra.mxu2 %v8289_v27 }
 0x67c   : > { %v5039_v40 = vpop.f32.mrf.mxu1  ;;  %v4871_v11 = vadd.f32 %v4870_v58, %v11789_v6 }
 0x67e   : > { %v11147_v29 = vpop.f32.mrf.mxu2  ;;  %v5839_v59 = vpop.f32.mrf.mxu3  ;;  %v5040_v49 = vadd.f32 %v5039_v40, %v4871_v11  ;;  %v8980_v11 = vld [vmem:[%s11592_s3 + $0x1e4] sm:$0xf] }
 0x67f   : > { %v11149_v30 = vadd.f32 %v5839_v59, %v5751_v4  ;;  %v5756_v59 = vadd.f32 %v10931_v10, %v10836_v21  ;;  %v8320_v21 = vld [vmem:[%s11592_s3 + $0xe8] sm:$0xf]  ;;  %v8951_v10 = vld [vmem:[%s11592_s3 + $0xf4] sm:$0xf0] }
 0x680   : > { %v5106_v58 = vmax.f32 %v5040_v49, 0.0 }
 0x683   : > { %v4872_v55 = vpop.f32.mrf.mxu0 }
 0x684   : > { %v4873_v7 = vadd.f32 %v4872_v55, %v4704_v3  ;;  %v5041_v38 = vpop.f32.mrf.mxu1  ;;  %v8442_v3 = vld [vmem:[%s11592_s3 + $0x1f0] sm:$0xf0] }
 0x686   : > { %v5042_v4 = vadd.f32 %v5041_v38, %v4873_v7  ;;  %v11167_v45 = vpop.f32.mrf.mxu2  ;;  %v5841_v1 = vpop.f32.mrf.mxu3  ;;  %v8321_v7 = vor.u32 %v8951_v10, %v8320_v21 }
 0x687   : > { %v11169_v27 = vadd.f32 %v5841_v1, %v5753_v0  ;;  %v8336_v0 = vld [vmem:[%s11592_s3 + $0x108] sm:$0xf]  ;;  %v8213_v1 = vor.u32 %v8921_v17, %v8210_v14 }
 0x688   : > { %v5107_v40 = vmax.f32 %v5042_v4, 0.0 }
 0x68a   : > { %v5203_v26 = vpack.c.bf16 %v5107_v40, %v5106_v58 }
 0x68b   : > { %5883 = vmatmul.bf16.gmra.mxu3 %v8429_v13  ;;  %5932 = vmatmul.bf16.gmra.mxu2 %v8305_v28 }
 0x68c   : > { %5983 = vmatpush.bf16.msra.mxu3 %v5203_v26 }
 0x68e   : > { %v11173_v6 = vpop.f32.mrf.mxu2  ;;  %v5844_v56 = vpop.f32.mrf.mxu3 }
 0x68f   : > { %v11175_v5 = vadd.f32 %v5844_v56, %v5756_v59  ;;  %v5324_v59 = vpop.permute.xlu2 %5323  ;;  %v8226_v56 = vld [vmem:[%s11592_s3 + $0x38] sm:$0xf0] }
 0x690   : > { %5984 = vmatpush.bf16.msra.mxu3 %v5202_v12  ;;  %v5758_v12 = vadd.f32 %v10951_v20, %v10847_v31  ;;  %v5334_v20 = vpop.permute.xlu1 %5333 }
 0x694   : > { %5985 = vmatpush.bf16.msra.mxu3 %v11113_v43  ;;  %v8445_v43 = vor.u32 %v8980_v11, %v8442_v3 }
 0x696   : > { %v11192_v55 = vpop.f32.mrf.mxu2  ;;  %v5846_v57 = vpop.f32.mrf.mxu3 }
 0x697   : > { %v11194_v49 = vadd.f32 %v5846_v57, %v5758_v12 }
 0x698   : > { %5986 = vmatpush.bf16.msra.mxu3 %v11083_v54  ;;  %v5319_v13 = vpop.permute.xlu1 %5318 }
 0x699   : > { %v5766_v28 = vadd.f32 %v11000_v52, %v5319_v13  ;;  %v8925_v52 = vld [vmem:[%s11592_s3 + $0x2c] sm:$0xf] }
 0x69a   : > { %v8229_v57 = vor.u32 %v8925_v52, %v8226_v56 }
 0x69b   : > { %5888 = vmatmul.bf16.gmra.mxu3 %v8445_v43  ;;  %5937 = vmatmul.bf16.gmra.mxu2 %v8321_v7  ;;  %v5771_v43 = vadd.f32 %v11030_v63, %v10992_v33  ;;  %v8242_v33 = vld [vmem:[%s11592_s3 + $0x58] sm:$0xf0]  ;;  %v5773_v63 = vadd.f32 %v11049_v46, %v5334_v20  ;;  %v8384_v20 = vld [vmem:[%s11592_s3 + $0x168] sm:$0xf] }
 0x69c   : > { %5987 = vmatpush.bf16.msra.mxu3 %v11053_v50  ;;  %v8955_v50 = vld [vmem:[%s11592_s3 + $0x114] sm:$0xf0] }
 0x69e   : > { %v11200_v53 = vpop.f32.mrf.mxu2  ;;  %v5849_v24 = vpop.f32.mrf.mxu3 }
 0x69f   : > { %v11202_v31 = vadd.f32 %v5849_v24, %v5761_v25 }
 0x6a0   : > { %5988 = vmatpush.bf16.msra.mxu3 %v11024_v42  ;;  %v5763_v42 = vadd.f32 %v10987_v61, %v10816_v60  ;;  %v8352_v61 = vld [vmem:[%s11592_s3 + $0x128] sm:$0xf] }
 0x6a4   : > { %5989 = vmatpush.bf16.msra.mxu3 %v10994_v2  ;;  %v8337_v2 = vor.u32 %v8955_v50, %v8336_v0  ;;  %v8368_v0 = vld [vmem:[%s11592_s3 + $0x148] sm:$0xf]  ;;  %v8929_v50 = vld [vmem:[%s11592_s3 + $0x4c] sm:$0xf] }
 0x6a6   : > { %v11220_v54 = vpop.f32.mrf.mxu2  ;;  %v5851_v38 = vpop.f32.mrf.mxu3 }
 0x6a7   : > { %v11222_v4 = vadd.f32 %v5851_v38, %v5763_v42 }
 0x6a8   : > { %5990 = vmatpush.bf16.msra.mxu3 %v10956_v16  ;;  %v8959_v16 = vld [vmem:[%s11592_s3 + $0x134] sm:$0xf0] }
 0x6a9   : > { %v8353_v12 = vor.u32 %v8959_v16, %v8352_v61 }
 0x6ab   : > { %5942 = vmatmul.bf16.gmra.mxu2 %v8337_v2  ;;  %5991 = vmatmul.bf16.vlgmr.msra.gmra.mxu3 %v8213_v1  ;;  %v8245_v2 = vor.u32 %v8929_v50, %v8242_v33  ;;  %v5776_v1 = vadd.f32 %v11060_v18, %v10953_v34  ;;  %v8258_v34 = vld [vmem:[%s11592_s3 + $0x78] sm:$0xf0]  ;;  %v5778_v18 = vadd.f32 %v11079_v47, %v10966_v39  ;;  %v8400_v47 = vld [vmem:[%s11592_s3 + $0x188] sm:$0xf]  ;;  %v11790_v50 = vld [vmem:[#allocation27_spill] sm:$0xff] }
 0x6ac   : > { %v11791_v33 = vld [vmem:[#allocation37_spill] sm:$0xff] }
 0x6ae   : > { %v5854_v58 = vpop.f32.mrf.mxu3  ;;  %v5903_v40 = vpop.f32.mrf.mxu2 }
 0x6af   : > { %v11226_v26 = vadd.f32 %v5854_v58, %v5766_v28  ;;  %v11229_v60 = vadd.f32 %v5903_v40, %v11002_v9  ;;  %v5768_v9 = vadd.f32 %v11020_v8, %v5324_v59  ;;  %v8933_v40 = vld [vmem:[%s11592_s3 + $0x6c] sm:$0xf] }
 0x6b0   : > { %v8261_v56 = vor.u32 %v8933_v40, %v8258_v34 }
 0x6b6   : > { %v5856_v11 = vpop.f32.mrf.mxu3  ;;  %v5905_v3 = vpop.f32.mrf.mxu2 }
 0x6b7   : > { %v11244_v21 = vadd.f32 %v5856_v11, %v5768_v9  ;;  %v11247_v10 = vadd.f32 %v5905_v3, %v11022_v62  ;;  %v8963_v62 = vld [vmem:[%s11592_s3 + $0x154] sm:$0xf0]  ;;  %v5781_v9 = vadd.f32 %v11089_v44, %v10989_v41  ;;  %v8274_v41 = vld [vmem:[%s11592_s3 + $0x98] sm:$0xf0]  ;;  %v5783_v44 = vadd.f32 %v11109_v23, %v10929_v15  ;;  %v8416_v23 = vld [vmem:[%s11592_s3 + $0x1a8] sm:$0xf] }
 0x6b8   : > { %v8369_v38 = vor.u32 %v8963_v62, %v8368_v0 }
 0x6bb   : > { %5947 = vmatmul.bf16.gmra.mxu2 %v8353_v12  ;;  %5996 = vmatmul.bf16.gmra.mxu3 %v8229_v57  ;;  %v8937_v57 = vld [vmem:[%s11592_s3 + $0x8c] sm:$0xf] }
 0x6bc   : > { %v8277_v62 = vor.u32 %v8937_v57, %v8274_v41 }
 0x6be   : > { %v5859_v7 = vpop.f32.mrf.mxu3  ;;  %v5908_v25 = vpop.f32.mrf.mxu2 }
 0x6bf   : > { %v11251_v24 = vadd.f32 %v5859_v7, %v5771_v43  ;;  %v11254_v8 = vadd.f32 %v5908_v25, %v11032_v51 }
 0x6c6   : > { %v5861_v51 = vpop.f32.mrf.mxu3  ;;  %v5910_v17 = vpop.f32.mrf.mxu2 }
 0x6c7   : > { %v11269_v14 = vadd.f32 %v5861_v51, %v5773_v63  ;;  %v11272_v42 = vadd.f32 %v5910_v17, %v11051_v19  ;;  %v8967_v19 = vld [vmem:[%s11592_s3 + $0x174] sm:$0xf0]  ;;  %v5786_v63 = vadd.f32 %v11791_v33, %v11790_v50 }
 0x6c8   : > { %v8385_v52 = vor.u32 %v8967_v19, %v8384_v20 }
 0x6cb   : > { %5952 = vmatmul.bf16.gmra.mxu2 %v8369_v38  ;;  %6001 = vmatmul.bf16.gmra.mxu3 %v8245_v2  ;;  %v11792_v2 = vld [vmem:[#allocation38_spill] sm:$0xff] }
 0x6ce   : > { %v5864_v13 = vpop.f32.mrf.mxu3  ;;  %v5913_v28 = vpop.f32.mrf.mxu2 }
 0x6cf   : > { %v11276_v58 = vadd.f32 %v5864_v13, %v5776_v1  ;;  %v11279_v46 = vadd.f32 %v5913_v28, %v11062_v37  ;;  %v8941_v1 = vld [vmem:[%s11592_s3 + $0xac] sm:$0xf]  ;;  %v8290_v13 = vld [vmem:[%s11592_s3 + $0xb8] sm:$0xf0] }
 0x6d0   : > { %v11793_v28 = vld [vmem:[#allocation28_spill] sm:$0xff] }
 0x6d1   : > { %v5788_v20 = vadd.f32 %v11139_v32, %v11793_v28  ;;  %v8432_v32 = vld [vmem:[%s11592_s3 + $0x1c8] sm:$0xf] }
 0x6d6   : > { %v5866_v37 = vpop.f32.mrf.mxu3  ;;  %v5915_v61 = vpop.f32.mrf.mxu2 }
 0x6d7   : > { %v11295_v59 = vadd.f32 %v5866_v37, %v5778_v18  ;;  %v11298_v16 = vadd.f32 %v5915_v61, %v11081_v35  ;;  %v8971_v35 = vld [vmem:[%s11592_s3 + $0x194] sm:$0xf0]  ;;  %v8293_v37 = vor.u32 %v8941_v1, %v8290_v13  ;;  %v11794_v61 = vld [vmem:[#allocation21_spill] sm:$0xff] }
 0x6d8   : > { %v8401_v0 = vor.u32 %v8971_v35, %v8400_v47  ;;  %v8945_v47 = vld [vmem:[%s11592_s3 + $0xcc] sm:$0xf]  ;;  %v11795_v35 = vld [vmem:[#allocation23_spill] sm:$0xff] }
 0x6d9   : > { %v5793_v57 = vadd.f32 %v11167_v45, %v11795_v35  ;;  %v8448_v45 = vld [vmem:[%s11592_s3 + $0x1e8] sm:$0xf] }
 0x6db   : > { %5957 = vmatmul.bf16.gmra.mxu2 %v8385_v52  ;;  %6006 = vmatmul.bf16.gmra.mxu3 %v8261_v56  ;;  %v5791_v52 = vadd.f32 %v11147_v29, %v11794_v61  ;;  %v8306_v29 = vld [vmem:[%s11592_s3 + $0xd8] sm:$0xf0] }
 0x6de   : > { %v5869_v11 = vpop.f32.mrf.mxu3  ;;  %v5918_v3 = vpop.f32.mrf.mxu2 }
 0x6df   : > { %v11302_v12 = vadd.f32 %v5869_v11, %v5781_v9  ;;  %v11305_v39 = vadd.f32 %v5918_v3, %v11091_v22  ;;  %v8979_v3 = vld [vmem:[%s11592_s3 + $0x1d4] sm:$0xf0] }
 0x6e6   : > { %v5871_v22 = vpop.f32.mrf.mxu3  ;;  %v5920_v43 = vpop.f32.mrf.mxu2 }
 0x6e7   : > { %v11321_v7 = vadd.f32 %v5871_v22, %v5783_v44  ;;  %v11324_v25 = vadd.f32 %v5920_v43, %v11111_v36  ;;  %v8975_v36 = vld [vmem:[%s11592_s3 + $0x1b4] sm:$0xf0]  ;;  %v8433_v43 = vor.u32 %v8979_v3, %v8432_v32  ;;  %v8338_v32 = vld [vmem:[%s11592_s3 + $0x118] sm:$0xf0]  ;;  %v11799_v3 = vld [vmem:[#allocation22_spill] sm:$0xff] }
 0x6e8   : > { %v8417_v18 = vor.u32 %v8975_v36, %v8416_v23  ;;  %v11797_v23 = vld [vmem:[#allocation15_spill] sm:$0xff] }
 0x6e9   : > { %v5798_v36 = vadd.f32 %v11192_v55, %v11797_v23  ;;  %v8953_v55 = vld [vmem:[%s11592_s3 + $0x10c] sm:$0xf] }
 0x6eb   : > { %5962 = vmatmul.bf16.gmra.mxu2 %v8401_v0  ;;  %6011 = vmatmul.bf16.gmra.mxu3 %v8277_v62  ;;  %v8309_v0 = vor.u32 %v8945_v47, %v8306_v29  ;;  %v11796_v62 = vld [vmem:[#allocation25_spill] sm:$0xff]  ;;  %v5803_v47 = vadd.f32 %v11220_v54, %v11799_v3  ;;  %v8354_v54 = vld [vmem:[%s11592_s3 + $0x138] sm:$0xf0] }
 0x6ec   : > { %v5796_v50 = vadd.f32 %v11173_v6, %v11796_v62  ;;  %v8322_v6 = vld [vmem:[%s11592_s3 + $0xf8] sm:$0xf0] }
 0x6ee   : > { %v5874_v51 = vpop.f32.mrf.mxu3  ;;  %v5923_v17 = vpop.f32.mrf.mxu2 }
 0x6ef   : > { %v11328_v38 = vadd.f32 %v5874_v51, %v5786_v63  ;;  %v11331_v15 = vadd.f32 %v5923_v17, %v11792_v2  ;;  %v8983_v17 = vld [vmem:[%s11592_s3 + $0x1f4] sm:$0xf0]  ;;  %v8949_v2 = vld [vmem:[%s11592_s3 + $0xec] sm:$0xf] }
 0x6f6   : > { %v5876_v19 = vpop.f32.mrf.mxu3  ;;  %v11347_v40 = vpop.f32.mrf.mxu2 }
 0x6f7   : > { %v11349_v34 = vadd.f32 %v5876_v19, %v5788_v20  ;;  %v8449_v20 = vor.u32 %v8983_v17, %v8448_v45  ;;  %v8325_v19 = vor.u32 %v8949_v2, %v8322_v6 }
 0x6fb   : > { %5967 = vmatmul.bf16.gmra.mxu2 %v8417_v18  ;;  %6016 = vmatmul.bf16.gmra.mxu3 %v8293_v37  ;;  %v11798_v18 = vld [vmem:[#allocation16_spill] sm:$0xff] }
 0x6fc   : > { %v5801_v37 = vadd.f32 %v11200_v53, %v11798_v18 }
 0x6fe   : > { %v5879_v56 = vpop.f32.mrf.mxu3  ;;  %v11353_v9 = vpop.f32.mrf.mxu2 }
 0x6ff   : > { %v11355_v11 = vadd.f32 %v5879_v56, %v5791_v52 }
 0x706   : > { %v5881_v41 = vpop.f32.mrf.mxu3  ;;  %v11371_v44 = vpop.f32.mrf.mxu2 }
 0x707   : > { %v11373_v22 = vadd.f32 %v5881_v41, %v5793_v57  ;;  %v8341_v57 = vor.u32 %v8953_v55, %v8338_v32 }
 0x70b   : > { %5972 = vmatmul.bf16.gmra.mxu2 %v8433_v43  ;;  %6021 = vmatmul.bf16.gmra.mxu3 %v8309_v0 }
 0x70e   : > { %v5884_v33 = vpop.f32.mrf.mxu3  ;;  %v11377_v63 = vpop.f32.mrf.mxu2 }
 0x70f   : > { %v11379_v51 = vadd.f32 %v5884_v33, %v5796_v50  ;;  %v8957_v50 = vld [vmem:[%s11592_s3 + $0x12c] sm:$0xf] }
 0x710   : > { %v8357_v6 = vor.u32 %v8957_v50, %v8354_v54 }
 0x716   : > { %v5886_v1 = vpop.f32.mrf.mxu3  ;;  %v11395_v13 = vpop.f32.mrf.mxu2 }
 0x717   : > { %v11397_v28 = vadd.f32 %v5886_v1, %v5798_v36 }
 0x71b   : > { %5977 = vmatmul.bf16.gmra.mxu2 %v8449_v20  ;;  %6026 = vmatmul.bf16.gmra.mxu3 %v8325_v19 }
 0x71e   : > { %v5889_v61 = vpop.f32.mrf.mxu3  ;;  %v11401_v52 = vpop.f32.mrf.mxu2 }
 0x71f   : > { %v11403_v56 = vadd.f32 %v5889_v61, %v5801_v37 }
 0x726   : > { %v5891_v29 = vpop.f32.mrf.mxu3  ;;  %v11413_v35 = vpop.f32.mrf.mxu2 }
 0x727   : > { %v11415_v53 = vadd.f32 %v5891_v29, %v5803_v47 }
 0x72b   : > { %6031 = vmatmul.bf16.gmra.mxu3 %v8341_v57 }
 0x72e   : > { %v5943_v41 = vpop.f32.mrf.mxu2  ;;  %v5992_v43 = vpop.f32.mrf.mxu3 }
 0x72f   : > { %v11418_v0 = vadd.f32 %v5943_v41, %v11226_v26  ;;  %v5993_v62 = vadd.f32 %v5992_v43, %v11229_v60 }
 0x731   : > { %v6072_v26 = vmax.f32 %v5993_v62, 0.0 }
 0x736   : > { %v5945_v33 = vpop.f32.mrf.mxu2  ;;  %v5994_v45 = vpop.f32.mrf.mxu3 }
 0x737   : > { %v11428_v17 = vadd.f32 %v5945_v33, %v11244_v21  ;;  %v5995_v2 = vadd.f32 %v5994_v45, %v11247_v10  ;;  %v8961_v21 = vld [vmem:[%s11592_s3 + $0x14c] sm:$0xf]  ;;  %v8370_v10 = vld [vmem:[%s11592_s3 + $0x158] sm:$0xf0] }
 0x738   : > { %v8373_v32 = vor.u32 %v8961_v21, %v8370_v10 }
 0x739   : > { %v6073_v23 = vmax.f32 %v5995_v2, 0.0 }
 0x73b   : > { %6036 = vmatmul.bf16.gmra.mxu3 %v8357_v6  ;;  %v11431_v60 = vpack.c.bf16 %v6073_v23, %v6072_v26 }
 0x73e   : > { %v5948_v36 = vpop.f32.mrf.mxu2  ;;  %v5997_v1 = vpop.f32.mrf.mxu3 }
 0x73f   : > { %v11434_v20 = vadd.f32 %v5948_v36, %v11251_v24  ;;  %v5998_v19 = vadd.f32 %v5997_v1, %v11254_v8 }
 0x741   : > { %v6074_v24 = vmax.f32 %v5998_v19, 0.0 }
 0x746   : > { %v5950_v18 = vpop.f32.mrf.mxu2  ;;  %v5999_v37 = vpop.f32.mrf.mxu3 }
 0x747   : > { %v11444_v61 = vadd.f32 %v5950_v18, %v11269_v14  ;;  %v6000_v55 = vadd.f32 %v5999_v37, %v11272_v42  ;;  %v8965_v14 = vld [vmem:[%s11592_s3 + $0x16c] sm:$0xf]  ;;  %v8386_v42 = vld [vmem:[%s11592_s3 + $0x178] sm:$0xf0] }
 0x748   : > { %v8389_v33 = vor.u32 %v8965_v14, %v8386_v42 }
 0x749   : > { %v6075_v3 = vmax.f32 %v6000_v55, 0.0 }
 0x74b   : > { %6041 = vmatmul.bf16.gmra.mxu3 %v8373_v32  ;;  %v11447_v8 = vpack.c.bf16 %v6075_v3, %v6074_v24  ;;  %v8973_v3 = vld [vmem:[%s11592_s3 + $0x1ac] sm:$0xf] }
 0x74e   : > { %v5953_v47 = vpop.f32.mrf.mxu2  ;;  %v6002_v29 = vpop.f32.mrf.mxu3 }
 0x74f   : > { %v11450_v57 = vadd.f32 %v5953_v47, %v11276_v58  ;;  %v6003_v41 = vadd.f32 %v6002_v29, %v11279_v46 }
 0x751   : > { %v6076_v58 = vmax.f32 %v6003_v41, 0.0 }
 0x756   : > { %v5955_v43 = vpop.f32.mrf.mxu2  ;;  %v6004_v62 = vpop.f32.mrf.mxu3 }
 0x757   : > { %v11460_v50 = vadd.f32 %v5955_v43, %v11295_v59  ;;  %v6005_v54 = vadd.f32 %v6004_v62, %v11298_v16  ;;  %v8969_v59 = vld [vmem:[%s11592_s3 + $0x18c] sm:$0xf]  ;;  %v8402_v16 = vld [vmem:[%s11592_s3 + $0x198] sm:$0xf0] }
 0x758   : > { %v8405_v10 = vor.u32 %v8969_v59, %v8402_v16  ;;  %v8977_v62 = vld [vmem:[%s11592_s3 + $0x1cc] sm:$0xf] }
 0x759   : > { %v6077_v45 = vmax.f32 %v6005_v54, 0.0  ;;  %v8434_v54 = vld [vmem:[%s11592_s3 + $0x1d8] sm:$0xf0]  ;;  %v8981_v59 = vld [vmem:[%s11592_s3 + $0x1ec] sm:$0xf] }
 0x75b   : > { %6046 = vmatmul.bf16.gmra.mxu3 %v8389_v33  ;;  %v11463_v46 = vpack.c.bf16 %v6077_v45, %v6076_v58  ;;  %v8437_v45 = vor.u32 %v8977_v62, %v8434_v54 }
 0x75e   : > { %v5958_v2 = vpop.f32.mrf.mxu2  ;;  %v6007_v6 = vpop.f32.mrf.mxu3 }
 0x75f   : > { %v11466_v26 = vadd.f32 %v5958_v2, %v11302_v12  ;;  %v6008_v23 = vadd.f32 %v6007_v6, %v11305_v39 }
 0x761   : > { %v6078_v12 = vmax.f32 %v6008_v23, 0.0 }
 0x766   : > { %v5960_v36 = vpop.f32.mrf.mxu2  ;;  %v6009_v1 = vpop.f32.mrf.mxu3 }
 0x767   : > { %v11476_v19 = vadd.f32 %v5960_v36, %v11321_v7  ;;  %v6010_v21 = vadd.f32 %v6009_v1, %v11324_v25  ;;  %v8418_v7 = vld [vmem:[%s11592_s3 + $0x1b8] sm:$0xf0]  ;;  %v5926_v25 = vadd.f32 %v11347_v40, %v11141_v48  ;;  %v5931_v48 = vadd.f32 %v11371_v44, %v11169_v27 }
 0x768   : > { %v8421_v41 = vor.u32 %v8973_v3, %v8418_v7  ;;  %v8450_v27 = vld [vmem:[%s11592_s3 + $0x1f8] sm:$0xf0]  ;;  %v5936_v44 = vadd.f32 %v11395_v13, %v11194_v49 }
 0x769   : > { %v6079_v18 = vmax.f32 %v6010_v21, 0.0  ;;  %v8453_v21 = vor.u32 %v8981_v59, %v8450_v27 }
 0x76b   : > { %6051 = vmatmul.bf16.gmra.mxu3 %v8405_v10  ;;  %v6123_v39 = vpack.c.bf16 %v6079_v18, %v6078_v12 }
 0x76e   : > { %v5963_v37 = vpop.f32.mrf.mxu2  ;;  %v6012_v55 = vpop.f32.mrf.mxu3 }
 0x76f   : > { %v11480_v32 = vadd.f32 %v5963_v37, %v11328_v38  ;;  %v6013_v24 = vadd.f32 %v6012_v55, %v11331_v15  ;;  %v5929_v15 = vadd.f32 %v11353_v9, %v11149_v30  ;;  %v5934_v9 = vadd.f32 %v11377_v63, %v11175_v5 }
 0x770   : > { %v5939_v63 = vadd.f32 %v11401_v52, %v11202_v31  ;;  %v5941_v37 = vadd.f32 %v11413_v35, %v11222_v4 }
 0x771   : > { %v6080_v14 = vmax.f32 %v6013_v24, 0.0 }
 0x776   : > { %v6014_v47 = vpop.f32.mrf.mxu3 }
 0x777   : > { %v6015_v29 = vadd.f32 %v6014_v47, %v5926_v25 }
 0x779   : > { %v6081_v42 = vmax.f32 %v6015_v29, 0.0 }
 0x77b   : > { %v6124_v38 = vpack.c.bf16 %v6081_v42, %v6080_v14  ;;  %6056 = vmatmul.bf16.gmra.mxu3 %v8421_v41  ;;  %v8456_v42 = vld [vmem:[#allocation4] sm:$0xf] }
 0x77e   : > { %v6017_v43 = vpop.f32.mrf.mxu3 }
 0x77f   : > { %v6018_v40 = vadd.f32 %v6017_v43, %v5929_v15 }
 0x781   : > { %v6082_v2 = vmax.f32 %v6018_v40, 0.0 }
 0x786   : > { %v6019_v33 = vpop.f32.mrf.mxu3 }
 0x787   : > { %v6020_v58 = vadd.f32 %v6019_v33, %v5931_v48  ;;  %v8464_v48 = vld [vmem:[#allocation4 + $0x10] sm:$0xf] }
 0x789   : > { %v6083_v6 = vmax.f32 %v6020_v58, 0.0 }
 0x78b   : > { %v6125_v23 = vpack.c.bf16 %v6083_v6, %v6082_v2  ;;  %6061 = vmatmul.bf16.gmra.mxu3 %v8437_v45  ;;  %v8472_v6 = vld [vmem:[#allocation4 + $0x20] sm:$0xf] }
 0x78e   : > { %v6022_v30 = vpop.f32.mrf.mxu3 }
 0x78f   : > { %v6023_v16 = vadd.f32 %v6022_v30, %v5934_v9  ;;  %v5965_v30 = vpop.f32.mrf.mxu2 }
 0x791   : > { %v6084_v10 = vmax.f32 %v6023_v16, 0.0 }
 0x796   : > { %v6024_v36 = vpop.f32.mrf.mxu3 }
 0x797   : > { %v6025_v1 = vadd.f32 %v6024_v36, %v5936_v44 }
 0x799   : > { %v6085_v12 = vmax.f32 %v6025_v1, 0.0  ;;  %v5968_v1 = vpop.f32.mrf.mxu2 }
 0x79b   : > { %v6126_v18 = vpack.c.bf16 %v6085_v12, %v6084_v10  ;;  %6066 = vmatmul.bf16.gmra.mxu3 %v8453_v21  ;;  %v5966_v21 = vadd.f32 %v5965_v30, %v11349_v34  ;;  %v8480_v10 = vld [vmem:[#allocation4 + $0x30] sm:$0xf] }
 0x79e   : > { %v6027_v5 = vpop.f32.mrf.mxu3 }
 0x79f   : > { %v6028_v55 = vadd.f32 %v6027_v5, %v5939_v63 }
 0x7a1   : > { %v6086_v7 = vmax.f32 %v6028_v55, 0.0 }
 0x7a6   : > { %v6029_v24 = vpop.f32.mrf.mxu3 }
 0x7a7   : > { %v6030_v3 = vadd.f32 %v6029_v24, %v5941_v37 }
 0x7a9   : > { %v6087_v49 = vmax.f32 %v6030_v3, 0.0  ;;  %v5969_v3 = vadd.f32 %v5968_v1, %v11355_v11  ;;  %v8988_v1 = vld [vmem:[#allocation4 + $0x24] sm:$0xf] }
 0x7ab   : > { %v6127_v13 = vpack.c.bf16 %v6087_v49, %v6086_v7 }
 0x7ad   : > { %6312 = vmatpush.bf16.msrb.mxu0 %v6127_v13  ;;  %v8488_v13 = vld [vmem:[#allocation4 + $0x40] sm:$0xf] }
 0x7ae   : > { %v6032_v25 = vpop.f32.mrf.mxu3 }
 0x7af   : > { %v6033_v47 = vadd.f32 %v6032_v25, %v11418_v0  ;;  %v8985_v0 = vld [vmem:[#allocation4 + $0x4] sm:$0xf0] }
 0x7b0   : > { %v8457_v62 = vor.u32 %v8985_v0, %v8456_v42  ;;  %v8993_v25 = vld [vmem:[#allocation4 + $0x44] sm:$0xf0] }
 0x7b1   : > { %6313 = vmatpush.bf16.msrb.mxu0 %v6126_v18  ;;  %v6088_v14 = vmax.f32 %v6033_v47, 0.0 }
 0x7b5   : > { %6314 = vmatpush.bf16.msrb.mxu0 %v6125_v23  ;;  %v8989_v23 = vld [vmem:[#allocation4 + $0x24] sm:$0xf0] }
 0x7b6   : > { %v6034_v29 = vpop.f32.mrf.mxu3  ;;  %v8473_v59 = vor.u32 %v8989_v23, %v8472_v6 }
 0x7b7   : > { %v6035_v41 = vadd.f32 %v6034_v29, %v11428_v17  ;;  %v8489_v29 = vor.u32 %v8993_v25, %v8488_v13 }
 0x7b9   : > { %v6089_v31 = vmax.f32 %v6035_v41, 0.0  ;;  %6315 = vmatpush.bf16.msrb.mxu0 %v6124_v38 }
 0x7bb   : > { %v11517_v52 = vpack.c.bf16 %v6089_v31, %v6088_v14 }
 0x7bd   : > { %6316 = vmatpush.bf16.msrb.mxu0 %v6123_v39 }
 0x7be   : > { %v6037_v4 = vpop.f32.mrf.mxu3 }
 0x7bf   : > { %v6038_v35 = vadd.f32 %v6037_v4, %v11434_v20 }
 0x7c1   : > { %6317 = vmatpush.bf16.msrb.mxu0 %v11463_v46  ;;  %v6090_v17 = vmax.f32 %v6038_v35, 0.0  ;;  %v8987_v46 = vld [vmem:[#allocation4 + $0x14] sm:$0xf0] }
 0x7c2   : > { %v8465_v33 = vor.u32 %v8987_v46, %v8464_v48 }
 0x7c5   : > { %6318 = vmatpush.bf16.msrb.mxu0 %v11447_v8 }
 0x7c6   : > { %v6039_v43 = vpop.f32.mrf.mxu3 }
 0x7c7   : > { %v6040_v15 = vadd.f32 %v6039_v43, %v11444_v61  ;;  %v8496_v43 = vld [vmem:[#allocation4 + $0x50] sm:$0xf] }
 0x7c9   : > { %v6091_v54 = vmax.f32 %v6040_v15, 0.0  ;;  %6319 = vmatpush.bf16.msrb.mxu0 %v11431_v60  ;;  %v8995_v15 = vld [vmem:[#allocation4 + $0x54] sm:$0xf0] }
 0x7cb   : > { %v11524_v38 = vpack.c.bf16 %v6091_v54, %v6090_v17  ;;  %v8497_v54 = vor.u32 %v8995_v15, %v8496_v43 }
 0x7cc   : > { %6320 = vmatmul.bf16.vlgmr.msrb.gmra.mxu0 %v8457_v62 }
 0x7ce   : > { %v6042_v39 = vpop.f32.mrf.mxu3 }
 0x7cf   : > { %v6043_v20 = vadd.f32 %v6042_v39, %v11450_v57 }
 0x7d1   : > { %v6092_v58 = vmax.f32 %v6043_v20, 0.0 }
 0x7d6   : > { %v6044_v40 = vpop.f32.mrf.mxu3 }
 0x7d7   : > { %v6045_v8 = vadd.f32 %v6044_v40, %v11460_v50 }
 0x7d9   : > { %v6093_v45 = vmax.f32 %v6045_v8, 0.0 }
 0x7db   : > { %v11528_v61 = vpack.c.bf16 %v6093_v45, %v6092_v58  ;;  %v8504_v58 = vld [vmem:[#allocation4 + $0x60] sm:$0xf] }
 0x7dc   : > { %6325 = vmatmul.bf16.gmra.mxu0 %v8465_v33 }
 0x7de   : > { %v6047_v2 = vpop.f32.mrf.mxu3 }
 0x7df   : > { %v6048_v60 = vadd.f32 %v6047_v2, %v11466_v26  ;;  %v8991_v26 = vld [vmem:[#allocation4 + $0x34] sm:$0xf0] }
 0x7e0   : > { %v8481_v5 = vor.u32 %v8991_v26, %v8480_v10  ;;  %v8990_v26 = vld [vmem:[#allocation4 + $0x34] sm:$0xf] }
 0x7e1   : > { %v6094_v27 = vmax.f32 %v6048_v60, 0.0 }
 0x7e6   : > { %v6049_v9 = vpop.f32.mrf.mxu3 }
 0x7e7   : > { %v6050_v57 = vadd.f32 %v6049_v9, %v11476_v19  ;;  %v5970_v19 = vpop.f32.mrf.mxu2  ;;  %v8512_v9 = vld [vmem:[#allocation4 + $0x70] sm:$0xf] }
 0x7e8   : > { %v5971_v49 = vadd.f32 %v5970_v19, %v11373_v22  ;;  %v11548_v19 = vpop.permute.xlu2 %6214 }
 0x7e9   : > { %v6095_v44 = vmax.f32 %v6050_v57, 0.0  ;;  %v8999_v57 = vld [vmem:[#allocation4 + $0x74] sm:$0xf0] }
 0x7eb   : > { %v11532_v16 = vpack.c.bf16 %v6095_v44, %v6094_v27  ;;  %v8986_v44 = vld [vmem:[#allocation4 + $0x14] sm:$0xf] }
 0x7ec   : > { %6330 = vmatmul.bf16.gmra.mxu0 %v8473_v59  ;;  %v8513_v59 = vor.u32 %v8999_v57, %v8512_v9 }
 0x7ee   : > { %v6052_v50 = vpop.f32.mrf.mxu3 }
 0x7ef   : > { %v6053_v36 = vadd.f32 %v6052_v50, %v11480_v32  ;;  %v5973_v7 = vpop.f32.mrf.mxu2  ;;  %v8466_v50 = vld [vmem:[#allocation4 + $0x18] sm:$0xf0] }
 0x7f0   : > { %v5974_v42 = vadd.f32 %v5973_v7, %v11379_v51 }
 0x7f1   : > { %v6096_v63 = vmax.f32 %v6053_v36, 0.0  ;;  %v8469_v36 = vor.u32 %v8986_v44, %v8466_v50 }
 0x7f6   : > { %v6054_v12 = vpop.f32.mrf.mxu3 }
 0x7f7   : > { %v6055_v18 = vadd.f32 %v6054_v12, %v5966_v21  ;;  %v5975_v4 = vpop.f32.mrf.mxu2  ;;  %v8474_v21 = vld [vmem:[#allocation4 + $0x28] sm:$0xf0] }
 0x7f8   : > { %v5976_v0 = vadd.f32 %v5975_v4, %v11397_v28  ;;  %v8997_v28 = vld [vmem:[#allocation4 + $0x64] sm:$0xf0]  ;;  %v8477_v10 = vor.u32 %v8988_v1, %v8474_v21 }
 0x7f9   : > { %v6097_v37 = vmax.f32 %v6055_v18, 0.0  ;;  %v8505_v60 = vor.u32 %v8997_v28, %v8504_v58 }
 0x7fb   : > { %v6132_v55 = vpack.c.bf16 %v6097_v37, %v6096_v63  ;;  %v8498_v63 = vld [vmem:[#allocation4 + $0x58] sm:$0xf0]  ;;  %v11546_v37 = vpop.permute.xlu0 %6224 }
 0x7fc   : > { %6335 = vmatmul.bf16.gmra.mxu0 %v8481_v5  ;;  %v8994_v5 = vld [vmem:[#allocation4 + $0x54] sm:$0xf] }
 0x7fe   : > { %v6057_v24 = vpop.f32.mrf.mxu3 }
 0x7ff   : > { %v6058_v32 = vadd.f32 %v6057_v24, %v5969_v3  ;;  %v5978_v17 = vpop.f32.mrf.mxu2  ;;  %v8506_v24 = vld [vmem:[#allocation4 + $0x68] sm:$0xf0] }
 0x800   : > { %v5979_v8 = vadd.f32 %v5978_v17, %v11403_v56  ;;  %v8984_v56 = vld [vmem:[#allocation4 + $0x4] sm:$0xf] }
 0x801   : > { %v6098_v41 = vmax.f32 %v6058_v32, 0.0  ;;  %v11552_v32 = vpop.permute.xlu2 %6209 }
 0x803   : > { %v11550_v3 = vpop.permute.xlu0 %6219 }
 0x806   : > { %v6059_v34 = vpop.f32.mrf.mxu3 }
 0x807   : > { %v6060_v47 = vadd.f32 %v6059_v34, %v5971_v49  ;;  %v5980_v40 = vpop.f32.mrf.mxu2 }
 0x808   : > { %v5981_v33 = vadd.f32 %v5980_v40, %v11415_v53  ;;  %v8458_v53 = vld [vmem:[#allocation4 + $0x8] sm:$0xf0] }
 0x809   : > { %v6099_v14 = vmax.f32 %v6060_v47, 0.0  ;;  %v8461_v27 = vor.u32 %v8984_v56, %v8458_v53  ;;  %v6185_v34 = vpop.permute.xlu2 %6184  ;;  %v8998_v47 = vld [vmem:[#allocation4 + $0x74] sm:$0xf] }
 0x80b   : > { %v6133_v31 = vpack.c.bf16 %v6099_v14, %v6098_v41  ;;  %v6195_v13 = vpop.permute.xlu0 %6194  ;;  %v11554_v41 = vpop.permute.xlu1 %6229 }
 0x80c   : > { %6340 = vmatmul.bf16.gmra.mxu0 %v8489_v29  ;;  %v8514_v29 = vld [vmem:[#allocation4 + $0x78] sm:$0xf0] }
 0x80d   : > { %v8517_v14 = vor.u32 %v8998_v47, %v8514_v29 }
 0x80e   : > { %v6062_v35 = vpop.f32.mrf.mxu3 }
 0x80f   : > { %v6063_v11 = vadd.f32 %v6062_v35, %v5974_v42 }
 0x811   : > { %v6100_v39 = vmax.f32 %v6063_v11, 0.0  ;;  %v6180_v35 = vpop.permute.xlu2 %6179 }
 0x813   : > { %v11556_v42 = vpop.permute.xlu1 %6204 }
 0x816   : > { %v6064_v22 = vpop.f32.mrf.mxu3 }
 0x817   : > { %v6065_v62 = vadd.f32 %v6064_v22, %v5976_v0 }
 0x819   : > { %v6101_v20 = vmax.f32 %v6065_v62, 0.0  ;;  %v6155_v43 = vpop.permute.xlu2 %6154 }
 0x81b   : > { %v6134_v48 = vpack.c.bf16 %v6101_v20, %v6100_v39  ;;  %v11558_v17 = vpop.permute.xlu1 %6199 }
 0x81c   : > { %6345 = vmatmul.bf16.gmra.mxu0 %v8497_v54 }
 0x81e   : > { %v6067_v46 = vpop.f32.mrf.mxu3 }
 0x81f   : > { %v6068_v51 = vadd.f32 %v6067_v46, %v5979_v8 }
 0x821   : > { %v6102_v6 = vmax.f32 %v6068_v51, 0.0 }
 0x826   : > { %v6069_v45 = vpop.f32.mrf.mxu3 }
 0x827   : > { %v6070_v2 = vadd.f32 %v6069_v45, %v5981_v33  ;;  %v6175_v33 = vpop.permute.xlu1 %6174 }
 0x829   : > { %v6103_v23 = vmax.f32 %v6070_v2, 0.0 }
 0x82b   : > { %v6135_v30 = vpack.c.bf16 %v6103_v23, %v6102_v6 }
 0x82c   : > { %6350 = vmatmul.bf16.gmra.mxu0 %v8505_v60 }
 0x82d   : > { %6361 = vmatpush.bf16.msrb.mxu1 %v6135_v30 }
 0x82f   : > { %v6170_v60 = vpop.permute.xlu1 %6169 }
 0x831   : > { %6362 = vmatpush.bf16.msrb.mxu1 %v6134_v48 }
 0x835   : > { %6363 = vmatpush.bf16.msrb.mxu1 %v6133_v31  ;;  %v6190_v31 = vpop.permute.xlu0 %6189 }
 0x839   : > { %6364 = vmatpush.bf16.msrb.mxu1 %v6132_v55  ;;  %v8996_v55 = vld [vmem:[#allocation4 + $0x64] sm:$0xf] }
 0x83a   : > { %v8509_v49 = vor.u32 %v8996_v55, %v8506_v24 }
 0x83c   : > { %6355 = vmatmul.bf16.gmra.mxu0 %v8513_v59 }
 0x83d   : > { %6365 = vmatpush.bf16.msrb.mxu1 %v11532_v16  ;;  %v8482_v16 = vld [vmem:[#allocation4 + $0x38] sm:$0xf0]  ;;  %v6165_v0 = vpop.permute.xlu0 %6164 }
 0x83e   : > { %v8485_v12 = vor.u32 %v8990_v26, %v8482_v16 }
 0x841   : > { %6366 = vmatpush.bf16.msrb.mxu1 %v11528_v61  ;;  %v8992_v61 = vld [vmem:[#allocation4 + $0x44] sm:$0xf] }
 0x845   : > { %6367 = vmatpush.bf16.msrb.mxu1 %v11524_v38  ;;  %v8490_v38 = vld [vmem:[#allocation4 + $0x48] sm:$0xf0]  ;;  %v6160_v54 = vpop.permute.xlu0 %6159 }
 0x846   : > { %v8493_v18 = vor.u32 %v8992_v61, %v8490_v38 }
 0x849   : > { %6368 = vmatpush.bf16.msrb.mxu1 %v11517_v52  ;;  %v8501_v52 = vor.u32 %v8994_v5, %v8498_v63  ;;  %v6321_v7 = vpop.f32.mrf.mxu0 }
 0x84a   : > { %v6322_v15 = vadd.f32 %v6321_v7, %v6155_v43 }
 0x84c   : > { %6369 = vmatmul.bf16.vlgmr.msrb.gmra.mxu1 %v8461_v27 }
 0x851   : > { %v6323_v25 = vpop.f32.mrf.mxu0 }
 0x852   : > { %v6324_v20 = vadd.f32 %v6323_v25, %v6160_v54 }
 0x859   : > { %v6326_v4 = vpop.f32.mrf.mxu0 }
 0x85a   : > { %v6327_v58 = vadd.f32 %v6326_v4, %v6165_v0 }
 0x85c   : > { %6374 = vmatmul.bf16.gmra.mxu1 %v8469_v36 }
 0x861   : > { %v6328_v11 = vpop.f32.mrf.mxu0 }
 0x862   : > { %v6329_v6 = vadd.f32 %v6328_v11, %v6170_v60 }
 0x869   : > { %v6331_v39 = vpop.f32.mrf.mxu0 }
 0x86a   : > { %v6332_v53 = vadd.f32 %v6331_v39, %v6175_v33 }
 0x86c   : > { %6379 = vmatmul.bf16.gmra.mxu1 %v8477_v10 }
 0x871   : > { %v6333_v28 = vpop.f32.mrf.mxu0 }
 0x872   : > { %v6334_v36 = vadd.f32 %v6333_v28, %v6180_v35 }
 0x879   : > { %v6336_v9 = vpop.f32.mrf.mxu0 }
 0x87a   : > { %v6337_v61 = vadd.f32 %v6336_v9, %v6185_v34 }
 0x87c   : > { %6384 = vmatmul.bf16.gmra.mxu1 %v8485_v12 }
 0x881   : > { %v6338_v50 = vpop.f32.mrf.mxu0 }
 0x882   : > { %v6339_v5 = vadd.f32 %v6338_v50, %v6190_v31 }
 0x889   : > { %v6341_v12 = vpop.f32.mrf.mxu0 }
 0x88a   : > { %v6342_v25 = vadd.f32 %v6341_v12, %v6195_v13 }
 0x88c   : > { %6389 = vmatmul.bf16.gmra.mxu1 %v8493_v18 }
 0x891   : > { %v6343_v63 = vpop.f32.mrf.mxu0 }
 0x89c   : > { %6394 = vmatmul.bf16.gmra.mxu1 %v8501_v52 }
 0x8ac   : > { %6399 = vmatmul.bf16.gmra.mxu1 %v8509_v49 }
 0x8bc   : > { %6404 = vmatmul.bf16.gmra.mxu1 %v8517_v14  ;;  %v6346_v14 = vpop.f32.mrf.mxu0 }
 0x8bd   : > { %v6347_v60 = vadd.f32 %v6346_v14, %v11556_v42  ;;  %v6426_v42 = vld [vmem:[#allocation6] sm:$0xf] }
 0x8c4   : > { %v6348_v35 = vpop.f32.mrf.mxu0 }
 0x8c9   : > { %v6370_v22 = vpop.f32.mrf.mxu1 }
 0x8ca   : > { %v6371_v62 = vadd.f32 %v6370_v22, %v6322_v15 }
 0x8cc   : > { %v6410_v40 = vmax.f32 %v6371_v62, 0.0  ;;  %v6351_v11 = vpop.f32.mrf.mxu0 }
 0x8d1   : > { %v6372_v48 = vpop.f32.mrf.mxu1 }
 0x8d2   : > { %v6373_v46 = vadd.f32 %v6372_v48, %v6324_v20 }
 0x8d4   : > { %v6411_v8 = vmax.f32 %v6373_v46, 0.0  ;;  %v6353_v15 = vpop.f32.mrf.mxu0 }
 0x8d5   : > { %v6354_v20 = vadd.f32 %v6353_v15, %v11550_v3  ;;  %v6344_v3 = vadd.f32 %v6343_v63, %v11558_v17  ;;  %v6439_v17 = vpop.permute.xlu1 %6438 }
 0x8d6   : > { %v11560_v51 = vpack.c.bf16 %v6411_v8, %v6410_v40  ;;  %v6352_v40 = vadd.f32 %v6351_v11, %v11548_v19 }
 0x8d9   : > { %v6375_v45 = vpop.f32.mrf.mxu1 }
 0x8da   : > { %v6376_v2 = vadd.f32 %v6375_v45, %v6327_v58  ;;  %v6349_v58 = vadd.f32 %v6348_v35, %v11552_v32 }
 0x8dc   : > { %v6412_v57 = vmax.f32 %v6376_v2, 0.0  ;;  %v6356_v62 = vpop.f32.mrf.mxu0 }
 0x8dd   : > { %v6357_v39 = vadd.f32 %v6356_v62, %v11546_v37 }
 0x8e1   : > { %v6377_v23 = vpop.f32.mrf.mxu1 }
 0x8e2   : > { %v6378_v30 = vadd.f32 %v6377_v23, %v6329_v6 }
 0x8e4   : > { %v6413_v59 = vmax.f32 %v6378_v30, 0.0  ;;  %v6358_v54 = vpop.f32.mrf.mxu0 }
 0x8e5   : > { %v6359_v13 = vadd.f32 %v6358_v54, %v11554_v41 }
 0x8e6   : > { %v11562_v56 = vpack.c.bf16 %v6413_v59, %v6412_v57 }
 0x8e9   : > { %v6380_v27 = vpop.f32.mrf.mxu1 }
 0x8ea   : > { %v6381_v44 = vadd.f32 %v6380_v27, %v6332_v53 }
 0x8ec   : > { %v6414_v10 = vmax.f32 %v6381_v44, 0.0 }
 0x8f1   : > { %v6382_v1 = vpop.f32.mrf.mxu1 }
 0x8f2   : > { %v6383_v21 = vadd.f32 %v6382_v1, %v6334_v36 }
 0x8f4   : > { %v6415_v26 = vmax.f32 %v6383_v21, 0.0 }
 0x8f6   : > { %v6429_v16 = vpack.c.bf16 %v6415_v26, %v6414_v10 }
 0x8f9   : > { %v6385_v38 = vpop.f32.mrf.mxu1 }
 0x8fa   : > { %v6386_v18 = vadd.f32 %v6385_v38, %v6337_v61 }
 0x8fc   : > { %v6416_v24 = vmax.f32 %v6386_v18, 0.0 }
 0x901   : > { %v6387_v52 = vpop.f32.mrf.mxu1 }
 0x902   : > { %v6388_v55 = vadd.f32 %v6387_v52, %v6339_v5 }
 0x904   : > { %v6417_v7 = vmax.f32 %v6388_v55, 0.0 }
 0x906   : > { %v6430_v49 = vpack.c.bf16 %v6417_v7, %v6416_v24 }
 0x909   : > { %v6390_v47 = vpop.f32.mrf.mxu1 }
 0x90a   : > { %v6391_v29 = vadd.f32 %v6390_v47, %v6342_v25 }
 0x90c   : > { %v6418_v27 = vmax.f32 %v6391_v29, 0.0 }
 0x911   : > { %v6392_v4 = vpop.f32.mrf.mxu1 }
 0x912   : > { %v6393_v9 = vadd.f32 %v6392_v4, %v6344_v3 }
 0x914   : > { %v6419_v53 = vmax.f32 %v6393_v9, 0.0 }
 0x916   : > { %v6431_v44 = vpack.c.bf16 %v6419_v53, %v6418_v27 }
 0x919   : > { %v6395_v0 = vpop.f32.mrf.mxu1 }
 0x91a   : > { %v6396_v30 = vadd.f32 %v6395_v0, %v6347_v60 }
 0x91c   : > { %v6420_v59 = vmax.f32 %v6396_v30, 0.0 }
 0x921   : > { %v6397_v43 = vpop.f32.mrf.mxu1 }
 0x922   : > { %v6398_v6 = vadd.f32 %v6397_v43, %v6349_v58 }
 0x924   : > { %v6421_v57 = vmax.f32 %v6398_v6, 0.0 }
 0x926   : > { %v6432_v32 = vpack.c.bf16 %v6421_v57, %v6420_v59 }
 0x929   : > { %v6400_v34 = vpop.f32.mrf.mxu1 }
 0x92a   : > { %v6401_v28 = vadd.f32 %v6400_v34, %v6352_v40 }
 0x92c   : > { %v6422_v41 = vmax.f32 %v6401_v28, 0.0 }
 0x931   : > { %v6402_v22 = vpop.f32.mrf.mxu1 }
 0x932   : > { %v6403_v8 = vadd.f32 %v6402_v22, %v6354_v20 }
 0x934   : > { %v6423_v23 = vmax.f32 %v6403_v8, 0.0 }
 0x936   : > { %v6433_v19 = vpack.c.bf16 %v6423_v23, %v6422_v41 }
 0x939   : > { %v6405_v31 = vpop.f32.mrf.mxu1 }
 0x93a   : > { %v6406_v48 = vadd.f32 %v6405_v31, %v6357_v39 }
 0x93c   : > { %v6424_v45 = vmax.f32 %v6406_v48, 0.0 }
 0x941   : > { %v6407_v46 = vpop.f32.mrf.mxu1 }
 0x942   : > { %v6408_v33 = vadd.f32 %v6407_v46, %v6359_v13 }
 0x944   : > { %v6425_v2 = vmax.f32 %v6408_v33, 0.0 }
 0x946   : > { %v6434_v37 = vpack.c.bf16 %v6425_v2, %v6424_v45 }
 0x948   : > { %6441 = vmatpush.bf16.msrb.mxu2 %v6434_v37 }
 0x94c   : > { %6442 = vmatpush.bf16.msrb.mxu2 %v6433_v19 }
 0x950   : > { %6443 = vmatpush.bf16.msrb.mxu2 %v6432_v32 }
 0x954   : > { %6444 = vmatpush.bf16.msrb.mxu2 %v6431_v44 }
 0x958   : > { %6445 = vmatpush.bf16.msrb.mxu2 %v6430_v49 }
 0x95c   : > { %6446 = vmatpush.bf16.msrb.mxu2 %v6429_v16 }
 0x960   : > { %6447 = vmatpush.bf16.msrb.mxu2 %v11562_v56 }
 0x964   : > { %6448 = vmatpush.bf16.msrb.mxu2 %v11560_v51 }
 0x967   : > { %6449 = vmatmul.bf16.vlgmr.msrb.gmra.mxu2 %v6426_v42 }
 0x9ea   : > { %v6450_v50 = vpop.f32.mrf.mxu2 }
 0x9eb   : > { %v6451_v36 = vadd.f32 %v6450_v50, %v6439_v17 }
 0x9ed   : > { %v6455_v1 = vsel %vm6454_vm0, %v6451_v36, -inf }
 0x9ee   : > { %v6456_v21 = vrot.slane %v6455_v1, 4 }
 0x9f0   : > { %v6457_v10 = vmax.f32 %v6455_v1, %v6456_v21 }
 0x9f2   : > { %v6458_v26 = vrot.slane %v6457_v10, 2  ;;  %v6452_v12 = vpop.f32.mrf.mxu2 }
 0x9f4   : > { %v6459_v61 = vmax.f32 %v6457_v10, %v6458_v26 }
 0x9f6   : > { %v6460_v38 = vrot.slane %v6459_v61, 1 }
 0x9f8   : > { %v6461_v16 = vmax.f32 %v6459_v61, %v6460_v38 }
 0x9fa   : > { %v6462_v18 = vsub.f32 %v6451_v36, %v6461_v16 }
 0x9fc   : > { %v6463_v56 = vmul.f32 1.442695, %v6462_v18 }
 0x9fe   : > { %9080 = vpow2.f32 %v6463_v56 }
 0xa04   : > { %v9081_v51 = vpop.eup %9080 }
 0xa05   : > { %v6465_v5 = vsel %vm6454_vm0, %v9081_v51, 0.0 }
 0xa06   : > { %v6466_v63 = vrot.slane %v6465_v5, 4 }
 0xa08   : > { %v6467_v52 = vadd.f32 %v6466_v63, %v6465_v5 }
 0xa0a   : > { %v6468_v55 = vrot.slane %v6467_v52, 2 }
 0xa0c   : > { %v6469_v24 = vadd.f32 %v6468_v55, %v6467_v52 }
 0xa0e   : > { %v6470_v7 = vrot.slane %v6469_v24, 1 }
 0xa10   : > { %v6471_v49 = vadd.f32 %v6470_v7, %v6469_v24 }
 0xa12   : > { %9082 = vlog2.f32 %v6471_v49 }
 0xa18   : > { %v9083_v25 = vpop.eup %9082 }
 0xa19   : > { %v6473_v47 = vmul.f32 0.6931472, %v9083_v25 }
 0xa1b   : > { %v6474_v29 = vsub.f32 %v6462_v18, %v6473_v47 }
 0xa1d   : > { %6475 = vst.msk [vmem:[%s409_s23] sm:$0xff] %vm6454_vm0, %v6474_v29 }
 0xa1e PF: > { %s21_s11 = sadd.s32 1, %s9204_s11   ;;  %s11800_s30 = smov %s9200_s10 }
 0xa1f   : > { %p18_p8 = scmp.ge.s32.totalorder %s21_s11, 4   ;;  %s11801_s10 = smov %s11803_s21 }
 0xa21   :  { %20 = sbr.rel (!%p18_p8) target bundleno = 3 (0x3), region = 99 }
 0xa26   :  { %6501 = vsyncpa [#allocation3], 1 }
 0xa27   :  { %6503 = vsyncpa [#allocation3 + $0x1], 1 }
 0xa28   :  { %6504 = vsyncpa [#allocation5], 1 }

</bundles_post_ra>
